<compile_context>
chip_gen: v7x
topology: tpu7x:2x2x1
jax: 0.10.0
libtpu: 0.0.40
codegen_flags: <defaults>
</compile_context>

<pallas_src>
import functools

import jax
import jax.numpy as jnp
from jax import lax
from jax.experimental import pallas as pl
from jax.experimental.pallas import tpu as pltpu


def _round_up(v, m):
    return ((v + m - 1) // m) * m


def _dwconv_kernel(x_ref, w_ref, b_ref, r_ref, o_ref, xb_ref,
                   *, gs, wpad, out_rows, ct):
    """Grouped 3x3 conv on one (batch, 128-channel-tile) block.

    x_ref : (pad_rows, CT) f32   zero-padded input, flattened spatial rows x channels
    w_ref : (9*gs, CT)    f32   row (tap*gs + ci) holds weight[c, ci, ki, kj] per lane c
    b_ref : (1, CT)       f32   bias
    r_ref : (gs*CT, CT)   f32   one-hot within-group broadcast matrices (per ci)
    o_ref : (out_rows, CT) f32  output rows (valid cols sliced out in the wrapper)
    xb_ref: (pad_rows, CT) f32  VMEM scratch for the group-broadcast input
    """
    xp = x_ref[...]                                              # (pad_rows, CT)
    o_ref[...] = jnp.broadcast_to(b_ref[...], o_ref.shape)       # bias init
    for ci in range(gs):
        # Within-group broadcast: xb[:, g*gs + co] = xp[:, g*gs + ci] for every co.
        # Exact one-hot matmul on the otherwise-idle MXU; stays in VMEM.
        xb_ref[...] = jnp.dot(xp, r_ref[ci * ct:(ci + 1) * ct, :],
                              preferred_element_type=jnp.float32)
        acc = None
        for t in range(9):                                       # 3x3 taps, unrolled
            ki, kj = t // 3, t % 3
            off = ki * wpad + kj                                 # flat (dh,dw) shift
            term = (w_ref[t * gs + ci:t * gs + ci + 1, :]
                    * xb_ref[off:off + out_rows, :])             # VPU FMA, lane-dense
            acc = term if acc is None else acc + term
        o_ref[...] += acc


def dwconv(x, weight, bias, groups):
    """x: (B, C, H, W) f32; weight: (C, C//groups, 3, 3); bias: (C,).  NCHW out."""
    B, C, H, W = x.shape
    gs = C // groups                       # channels per group (4 for group_num=4)
    assert C % groups == 0 and weight.shape == (C, gs, 3, 3)
    CT = 128
    assert CT % gs == 0, "group size must divide the 128-lane channel tile"
    Cp = _round_up(C, CT)
    wpad = W + 2
    pad_rows_raw = (H + 3) * wpad          # pad H by (1,2), W by (1,1) -> flat rows
    pad_rows = _round_up(pad_rows_raw, 8)
    out_rows = H * wpad

    # ---- layout plumbing (XLA, once): NCHW -> lane-dense (rows, Cp) slab -----------
    xh = jnp.transpose(x, (0, 2, 3, 1)).astype(jnp.float32)           # (B, H, W, C)
    xh = jnp.pad(xh, ((0, 0), (1, 2), (1, 1), (0, Cp - C)))           # (B, H+3, W+2, Cp)
    xh = xh.reshape(B, pad_rows_raw, Cp)
    xh = jnp.pad(xh, ((0, 0), (0, pad_rows - pad_rows_raw), (0, 0)))  # (B, pad_rows, Cp)

    # weights -> (9*gs, Cp): row (ki*3+kj)*gs + ci holds weight[c, ci, ki, kj] at lane c
    w36 = jnp.transpose(weight, (2, 3, 1, 0)).reshape(9 * gs, C).astype(jnp.float32)
    w36 = jnp.pad(w36, ((0, 0), (0, Cp - C)))
    b2 = jnp.pad(bias.astype(jnp.float32), (0, Cp - C)).reshape(1, Cp)

    # one-hot within-group broadcast matrices, identical for every 128-channel tile
    lane = jnp.arange(CT)
    r_blocks = []
    for ci in range(gs):
        tgt = gs * (lane // gs) + ci                                   # (CT,)
        r_blocks.append((lane[:, None] == tgt[None, :]).astype(jnp.float32))
    rmat = jnp.concatenate(r_blocks, axis=0)                           # (gs*CT, CT)

    kern = functools.partial(_dwconv_kernel, gs=gs, wpad=wpad,
                             out_rows=out_rows, ct=CT)
    out = pl.pallas_call(
        kern,
        out_shape=jax.ShapeDtypeStruct((B, out_rows, Cp), jnp.float32),
        grid=(B, Cp // CT),
        in_specs=[
            pl.BlockSpec((None, pad_rows, CT), lambda b, c: (b, 0, c)),
            pl.BlockSpec((9 * gs, CT), lambda b, c: (0, c)),
            pl.BlockSpec((1, CT), lambda b, c: (0, c)),
            pl.BlockSpec((gs * CT, CT), lambda b, c: (0, 0)),
        ],
        out_specs=pl.BlockSpec((None, out_rows, CT), lambda b, c: (b, 0, c)),
        scratch_shapes=[pltpu.VMEM((pad_rows, CT), jnp.float32)],
        compiler_params=pltpu.CompilerParams(
            dimension_semantics=("parallel", "parallel")),
    )(xh, w36, b2, rmat)

    y = out.reshape(B, H, wpad, Cp)[:, :, :W, :C]                      # drop pad cols/chans
    return jnp.transpose(y, (0, 3, 1, 2)).astype(x.dtype)              # back to NCHW


if __name__ == "__main__":
    # DWConv(dim, group_num=4): groups = dim // 4, i.e. 4 channels per group.
    B, dim, H, W = 2, 128, 16, 16
    group_num = 4
    groups = dim // group_num

    key = jax.random.PRNGKey(0)
    kx, kw, kb = jax.random.split(key, 3)
    x = jax.random.normal(kx, (B, dim, H, W), jnp.float32)
    weight = 0.1 * jax.random.normal(kw, (dim, dim // groups, 3, 3), jnp.float32)
    bias = 0.1 * jax.random.normal(kb, (dim,), jnp.float32)

    fn = jax.jit(functools.partial(dwconv, groups=groups))
    y = jax.block_until_ready(fn(x, weight, bias))

    assert y.shape == (B, dim, H, W), y.shape
    assert bool(jnp.all(jnp.isfinite(y)))

    # Reference: XLA grouped conv (PyTorch nn.Conv2d semantics), full f32 precision.
    y_ref = lax.conv_general_dilated(
        x, weight, window_strides=(1, 1), padding=((1, 1), (1, 1)),
        dimension_numbers=("NCHW", "OIHW", "NCHW"),
        feature_group_count=groups,
        precision=lax.Precision.HIGHEST) + bias[None, :, None, None]
    err = float(jnp.max(jnp.abs(y - y_ref)))
    assert jnp.allclose(y, y_ref, atol=1e-4, rtol=1e-4), err

    print("KERNEL_OK")
</pallas_src>

<mosaic_0001>
module attributes {stable_mosaic.version = 11 : i64} {
  func.func @_dwconv_kernel(%arg0: i32, %arg1: i32, %arg2: memref<1x344x128xf32, #tpu.memory_space<vmem>>, %arg3: memref<36x128xf32, #tpu.memory_space<vmem>>, %arg4: memref<1x128xf32, #tpu.memory_space<vmem>>, %arg5: memref<512x128xf32, #tpu.memory_space<vmem>>, %arg6: memref<1x288x128xf32, #tpu.memory_space<vmem>>, %arg7: memref<344x128xf32, #tpu.memory_space<vmem>>) attributes {dimension_semantics = [#tpu.dimension_semantics<parallel>, #tpu.dimension_semantics<parallel>], iteration_bounds = array<i64: 2, 1>, scalar_prefetch = 0 : i64, scratch_operands = 1 : i64, tpu.core_type = #tpu.core_type<tc>, window_params = [{transform_indices = @transform_0, window_bounds = array<i64: 1, 344, 128>}, {transform_indices = @transform_1, window_bounds = array<i64: 36, 128>}, {transform_indices = @transform_2, window_bounds = array<i64: 1, 128>}, {pipeline_mode = #tpu.pipeline_mode<synchronous>, transform_indices = @transform_3, window_bounds = array<i64: 512, 128>}, {transform_indices = @transform_4, window_bounds = array<i64: 1, 288, 128>}]} {
    %c0 = arith.constant 0 : index
    %c0_0 = arith.constant 0 : index
    %c0_1 = arith.constant 0 : index
    %0 = vector.load %arg2[%c0, %c0_0, %c0_1] : memref<1x344x128xf32, #tpu.memory_space<vmem>>, vector<1x344x128xf32>
    %1 = vector.shape_cast %0 : vector<1x344x128xf32> to vector<344x128xf32>
    %c0_2 = arith.constant 0 : index
    %c0_3 = arith.constant 0 : index
    %2 = vector.load %arg4[%c0_2, %c0_3] : memref<1x128xf32, #tpu.memory_space<vmem>>, vector<1x128xf32>
    %3 = vector.shape_cast %2 : vector<1x128xf32> to vector<1x128xf32>
    %4 = vector.broadcast %3 : vector<1x128xf32> to vector<288x128xf32>
    %c0_4 = arith.constant 0 : index
    %c0_5 = arith.constant 0 : index
    %c0_6 = arith.constant 0 : index
    %5 = vector.load %arg6[%c0_4, %c0_5, %c0_6] : memref<1x288x128xf32, #tpu.memory_space<vmem>>, vector<1x288x128xf32>
    %6 = vector.shape_cast %5 : vector<1x288x128xf32> to vector<288x128xf32>
    %7 = vector.shape_cast %4 : vector<288x128xf32> to vector<1x288x128xf32>
    tpu.vector_store %arg6[%c0_4, %c0_5, %c0_6], %7 {strides = array<i32>} : memref<1x288x128xf32, #tpu.memory_space<vmem>>, vector<1x288x128xf32>,
    %c0_7 = arith.constant 0 : index
    %c0_8 = arith.constant 0 : index
    %8 = vector.load %arg5[%c0_7, %c0_8] : memref<512x128xf32, #tpu.memory_space<vmem>>, vector<128x128xf32>
    %cst = arith.constant dense<0.000000e+00> : vector<344x128xf32>
    %9 = tpu.matmul %1, %8, %cst {dimension_numbers = #tpu.dot_dimension_numbers<[1], [0], [0], [1], [0, 0, 1, 1], [], []>} : vector<344x128xf32>, vector<128x128xf32>, vector<344x128xf32> -> vector<344x128xf32>
    %c0_9 = arith.constant 0 : index
    %c0_10 = arith.constant 0 : index
    %10 = vector.load %arg7[%c0_9, %c0_10] : memref<344x128xf32, #tpu.memory_space<vmem>>, vector<344x128xf32>
    tpu.vector_store %arg7[%c0_9, %c0_10], %9 {strides = array<i32>} : memref<344x128xf32, #tpu.memory_space<vmem>>, vector<344x128xf32>,
    %c0_11 = arith.constant 0 : index
    %c0_12 = arith.constant 0 : index
    %11 = vector.load %arg3[%c0_11, %c0_12] : memref<36x128xf32, #tpu.memory_space<vmem>>, vector<1x128xf32>
    %c0_13 = arith.constant 0 : index
    %c0_14 = arith.constant 0 : index
    %12 = vector.load %arg7[%c0_13, %c0_14] : memref<344x128xf32, #tpu.memory_space<vmem>>, vector<288x128xf32>
    %13 = vector.broadcast %11 : vector<1x128xf32> to vector<288x128xf32>
    %14 = arith.mulf %13, %12 : vector<288x128xf32>
    %c4 = arith.constant 4 : index
    %c0_15 = arith.constant 0 : index
    %15 = vector.load %arg3[%c4, %c0_15] : memref<36x128xf32, #tpu.memory_space<vmem>>, vector<1x128xf32>
    %c1 = arith.constant 1 : index
    %c0_16 = arith.constant 0 : index
    %16 = vector.load %arg7[%c1, %c0_16] : memref<344x128xf32, #tpu.memory_space<vmem>>, vector<288x128xf32>
    %17 = vector.broadcast %15 : vector<1x128xf32> to vector<288x128xf32>
    %18 = arith.mulf %17, %16 : vector<288x128xf32>
    %19 = arith.addf %14, %18 : vector<288x128xf32>
    %c8 = arith.constant 8 : index
    %c0_17 = arith.constant 0 : index
    %20 = vector.load %arg3[%c8, %c0_17] : memref<36x128xf32, #tpu.memory_space<vmem>>, vector<1x128xf32>
    %c2 = arith.constant 2 : index
    %c0_18 = arith.constant 0 : index
    %21 = vector.load %arg7[%c2, %c0_18] : memref<344x128xf32, #tpu.memory_space<vmem>>, vector<288x128xf32>
    %22 = vector.broadcast %20 : vector<1x128xf32> to vector<288x128xf32>
    %23 = arith.mulf %22, %21 : vector<288x128xf32>
    %24 = arith.addf %19, %23 : vector<288x128xf32>
    %c12 = arith.constant 12 : index
    %c0_19 = arith.constant 0 : index
    %25 = vector.load %arg3[%c12, %c0_19] : memref<36x128xf32, #tpu.memory_space<vmem>>, vector<1x128xf32>
    %c18 = arith.constant 18 : index
    %c0_20 = arith.constant 0 : index
    %26 = vector.load %arg7[%c18, %c0_20] : memref<344x128xf32, #tpu.memory_space<vmem>>, vector<288x128xf32>
    %27 = vector.broadcast %25 : vector<1x128xf32> to vector<288x128xf32>
    %28 = arith.mulf %27, %26 : vector<288x128xf32>
    %29 = arith.addf %24, %28 : vector<288x128xf32>
    %c16 = arith.constant 16 : index
    %c0_21 = arith.constant 0 : index
    %30 = vector.load %arg3[%c16, %c0_21] : memref<36x128xf32, #tpu.memory_space<vmem>>, vector<1x128xf32>
    %c19 = arith.constant 19 : index
    %c0_22 = arith.constant 0 : index
    %31 = vector.load %arg7[%c19, %c0_22] : memref<344x128xf32, #tpu.memory_space<vmem>>, vector<288x128xf32>
    %32 = vector.broadcast %30 : vector<1x128xf32> to vector<288x128xf32>
    %33 = arith.mulf %32, %31 : vector<288x128xf32>
    %34 = arith.addf %29, %33 : vector<288x128xf32>
    %c20 = arith.constant 20 : index
    %c0_23 = arith.constant 0 : index
    %35 = vector.load %arg3[%c20, %c0_23] : memref<36x128xf32, #tpu.memory_space<vmem>>, vector<1x128xf32>
    %c20_24 = arith.constant 20 : index
    %c0_25 = arith.constant 0 : index
    %36 = vector.load %arg7[%c20_24, %c0_25] : memref<344x128xf32, #tpu.memory_space<vmem>>, vector<288x128xf32>
    %37 = vector.broadcast %35 : vector<1x128xf32> to vector<288x128xf32>
    %38 = arith.mulf %37, %36 : vector<288x128xf32>
    %39 = arith.addf %34, %38 : vector<288x128xf32>
    %c24 = arith.constant 24 : index
    %c0_26 = arith.constant 0 : index
    %40 = vector.load %arg3[%c24, %c0_26] : memref<36x128xf32, #tpu.memory_space<vmem>>, vector<1x128xf32>
    %c36 = arith.constant 36 : index
    %c0_27 = arith.constant 0 : index
    %41 = vector.load %arg7[%c36, %c0_27] : memref<344x128xf32, #tpu.memory_space<vmem>>, vector<288x128xf32>
    %42 = vector.broadcast %40 : vector<1x128xf32> to vector<288x128xf32>
    %43 = arith.mulf %42, %41 : vector<288x128xf32>
    %44 = arith.addf %39, %43 : vector<288x128xf32>
    %c28 = arith.constant 28 : index
    %c0_28 = arith.constant 0 : index
    %45 = vector.load %arg3[%c28, %c0_28] : memref<36x128xf32, #tpu.memory_space<vmem>>, vector<1x128xf32>
    %c37 = arith.constant 37 : index
    %c0_29 = arith.constant 0 : index
    %46 = vector.load %arg7[%c37, %c0_29] : memref<344x128xf32, #tpu.memory_space<vmem>>, vector<288x128xf32>
    %47 = vector.broadcast %45 : vector<1x128xf32> to vector<288x128xf32>
    %48 = arith.mulf %47, %46 : vector<288x128xf32>
    %49 = arith.addf %44, %48 : vector<288x128xf32>
    %c32 = arith.constant 32 : index
    %c0_30 = arith.constant 0 : index
    %50 = vector.load %arg3[%c32, %c0_30] : memref<36x128xf32, #tpu.memory_space<vmem>>, vector<1x128xf32>
    %c38 = arith.constant 38 : index
    %c0_31 = arith.constant 0 : index
    %51 = vector.load %arg7[%c38, %c0_31] : memref<344x128xf32, #tpu.memory_space<vmem>>, vector<288x128xf32>
    %52 = vector.broadcast %50 : vector<1x128xf32> to vector<288x128xf32>
    %53 = arith.mulf %52, %51 : vector<288x128xf32>
    %54 = arith.addf %49, %53 : vector<288x128xf32>
    %c0_32 = arith.constant 0 : index
    %c0_33 = arith.constant 0 : index
    %c0_34 = arith.constant 0 : index
    %55 = vector.load %arg6[%c0_32, %c0_33, %c0_34] : memref<1x288x128xf32, #tpu.memory_space<vmem>>, vector<1x288x128xf32>
    %56 = vector.shape_cast %55 : vector<1x288x128xf32> to vector<288x128xf32>
    %57 = arith.addf %56, %54 : vector<288x128xf32>
    %c0_35 = arith.constant 0 : index
    %c0_36 = arith.constant 0 : index
    %c0_37 = arith.constant 0 : index
    %58 = vector.load %arg6[%c0_35, %c0_36, %c0_37] : memref<1x288x128xf32, #tpu.memory_space<vmem>>, vector<1x288x128xf32>
    %59 = vector.shape_cast %58 : vector<1x288x128xf32> to vector<288x128xf32>
    %60 = vector.shape_cast %57 : vector<288x128xf32> to vector<1x288x128xf32>
    tpu.vector_store %arg6[%c0_35, %c0_36, %c0_37], %60 {strides = array<i32>} : memref<1x288x128xf32, #tpu.memory_space<vmem>>, vector<1x288x128xf32>,
    %c128 = arith.constant 128 : index
    %c0_38 = arith.constant 0 : index
    %61 = vector.load %arg5[%c128, %c0_38] : memref<512x128xf32, #tpu.memory_space<vmem>>, vector<128x128xf32>
    %cst_39 = arith.constant dense<0.000000e+00> : vector<344x128xf32>
    %62 = tpu.matmul %1, %61, %cst_39 {dimension_numbers = #tpu.dot_dimension_numbers<[1], [0], [0], [1], [0, 0, 1, 1], [], []>} : vector<344x128xf32>, vector<128x128xf32>, vector<344x128xf32> -> vector<344x128xf32>
    %c0_40 = arith.constant 0 : index
    %c0_41 = arith.constant 0 : index
    %63 = vector.load %arg7[%c0_40, %c0_41] : memref<344x128xf32, #tpu.memory_space<vmem>>, vector<344x128xf32>
    tpu.vector_store %arg7[%c0_40, %c0_41], %62 {strides = array<i32>} : memref<344x128xf32, #tpu.memory_space<vmem>>, vector<344x128xf32>,
    %c1_42 = arith.constant 1 : index
    %c0_43 = arith.constant 0 : index
    %64 = vector.load %arg3[%c1_42, %c0_43] : memref<36x128xf32, #tpu.memory_space<vmem>>, vector<1x128xf32>
    %c0_44 = arith.constant 0 : index
    %c0_45 = arith.constant 0 : index
    %65 = vector.load %arg7[%c0_44, %c0_45] : memref<344x128xf32, #tpu.memory_space<vmem>>, vector<288x128xf32>
    %66 = vector.broadcast %64 : vector<1x128xf32> to vector<288x128xf32>
    %67 = arith.mulf %66, %65 : vector<288x128xf32>
    %c5 = arith.constant 5 : index
    %c0_46 = arith.constant 0 : index
    %68 = vector.load %arg3[%c5, %c0_46] : memref<36x128xf32, #tpu.memory_space<vmem>>, vector<1x128xf32>
    %c1_47 = arith.constant 1 : index
    %c0_48 = arith.constant 0 : index
    %69 = vector.load %arg7[%c1_47, %c0_48] : memref<344x128xf32, #tpu.memory_space<vmem>>, vector<288x128xf32>
    %70 = vector.broadcast %68 : vector<1x128xf32> to vector<288x128xf32>
    %71 = arith.mulf %70, %69 : vector<288x128xf32>
    %72 = arith.addf %67, %71 : vector<288x128xf32>
    %c9 = arith.constant 9 : index
    %c0_49 = arith.constant 0 : index
    %73 = vector.load %arg3[%c9, %c0_49] : memref<36x128xf32, #tpu.memory_space<vmem>>, vector<1x128xf32>
    %c2_50 = arith.constant 2 : index
    %c0_51 = arith.constant 0 : index
    %74 = vector.load %arg7[%c2_50, %c0_51] : memref<344x128xf32, #tpu.memory_space<vmem>>, vector<288x128xf32>
    %75 = vector.broadcast %73 : vector<1x128xf32> to vector<288x128xf32>
    %76 = arith.mulf %75, %74 : vector<288x128xf32>
    %77 = arith.addf %72, %76 : vector<288x128xf32>
    %c13 = arith.constant 13 : index
    %c0_52 = arith.constant 0 : index
    %78 = vector.load %arg3[%c13, %c0_52] : memref<36x128xf32, #tpu.memory_space<vmem>>, vector<1x128xf32>
    %c18_53 = arith.constant 18 : index
    %c0_54 = arith.constant 0 : index
    %79 = vector.load %arg7[%c18_53, %c0_54] : memref<344x128xf32, #tpu.memory_space<vmem>>, vector<288x128xf32>
    %80 = vector.broadcast %78 : vector<1x128xf32> to vector<288x128xf32>
    %81 = arith.mulf %80, %79 : vector<288x128xf32>
    %82 = arith.addf %77, %81 : vector<288x128xf32>
    %c17 = arith.constant 17 : index
    %c0_55 = arith.constant 0 : index
    %83 = vector.load %arg3[%c17, %c0_55] : memref<36x128xf32, #tpu.memory_space<vmem>>, vector<1x128xf32>
    %c19_56 = arith.constant 19 : index
    %c0_57 = arith.constant 0 : index
    %84 = vector.load %arg7[%c19_56, %c0_57] : memref<344x128xf32, #tpu.memory_space<vmem>>, vector<288x128xf32>
    %85 = vector.broadcast %83 : vector<1x128xf32> to vector<288x128xf32>
    %86 = arith.mulf %85, %84 : vector<288x128xf32>
    %87 = arith.addf %82, %86 : vector<288x128xf32>
    %c21 = arith.constant 21 : index
    %c0_58 = arith.constant 0 : index
    %88 = vector.load %arg3[%c21, %c0_58] : memref<36x128xf32, #tpu.memory_space<vmem>>, vector<1x128xf32>
    %c20_59 = arith.constant 20 : index
    %c0_60 = arith.constant 0 : index
    %89 = vector.load %arg7[%c20_59, %c0_60] : memref<344x128xf32, #tpu.memory_space<vmem>>, vector<288x128xf32>
    %90 = vector.broadcast %88 : vector<1x128xf32> to vector<288x128xf32>
    %91 = arith.mulf %90, %89 : vector<288x128xf32>
    %92 = arith.addf %87, %91 : vector<288x128xf32>
    %c25 = arith.constant 25 : index
    %c0_61 = arith.constant 0 : index
    %93 = vector.load %arg3[%c25, %c0_61] : memref<36x128xf32, #tpu.memory_space<vmem>>, vector<1x128xf32>
    %c36_62 = arith.constant 36 : index
    %c0_63 = arith.constant 0 : index
    %94 = vector.load %arg7[%c36_62, %c0_63] : memref<344x128xf32, #tpu.memory_space<vmem>>, vector<288x128xf32>
    %95 = vector.broadcast %93 : vector<1x128xf32> to vector<288x128xf32>
    %96 = arith.mulf %95, %94 : vector<288x128xf32>
    %97 = arith.addf %92, %96 : vector<288x128xf32>
    %c29 = arith.constant 29 : index
    %c0_64 = arith.constant 0 : index
    %98 = vector.load %arg3[%c29, %c0_64] : memref<36x128xf32, #tpu.memory_space<vmem>>, vector<1x128xf32>
    %c37_65 = arith.constant 37 : index
    %c0_66 = arith.constant 0 : index
    %99 = vector.load %arg7[%c37_65, %c0_66] : memref<344x128xf32, #tpu.memory_space<vmem>>, vector<288x128xf32>
    %100 = vector.broadcast %98 : vector<1x128xf32> to vector<288x128xf32>
    %101 = arith.mulf %100, %99 : vector<288x128xf32>
    %102 = arith.addf %97, %101 : vector<288x128xf32>
    %c33 = arith.constant 33 : index
    %c0_67 = arith.constant 0 : index
    %103 = vector.load %arg3[%c33, %c0_67] : memref<36x128xf32, #tpu.memory_space<vmem>>, vector<1x128xf32>
    %c38_68 = arith.constant 38 : index
    %c0_69 = arith.constant 0 : index
    %104 = vector.load %arg7[%c38_68, %c0_69] : memref<344x128xf32, #tpu.memory_space<vmem>>, vector<288x128xf32>
    %105 = vector.broadcast %103 : vector<1x128xf32> to vector<288x128xf32>
    %106 = arith.mulf %105, %104 : vector<288x128xf32>
    %107 = arith.addf %102, %106 : vector<288x128xf32>
    %c0_70 = arith.constant 0 : index
    %c0_71 = arith.constant 0 : index
    %c0_72 = arith.constant 0 : index
    %108 = vector.load %arg6[%c0_70, %c0_71, %c0_72] : memref<1x288x128xf32, #tpu.memory_space<vmem>>, vector<1x288x128xf32>
    %109 = vector.shape_cast %108 : vector<1x288x128xf32> to vector<288x128xf32>
    %110 = arith.addf %109, %107 : vector<288x128xf32>
    %c0_73 = arith.constant 0 : index
    %c0_74 = arith.constant 0 : index
    %c0_75 = arith.constant 0 : index
    %111 = vector.load %arg6[%c0_73, %c0_74, %c0_75] : memref<1x288x128xf32, #tpu.memory_space<vmem>>, vector<1x288x128xf32>
    %112 = vector.shape_cast %111 : vector<1x288x128xf32> to vector<288x128xf32>
    %113 = vector.shape_cast %110 : vector<288x128xf32> to vector<1x288x128xf32>
    tpu.vector_store %arg6[%c0_73, %c0_74, %c0_75], %113 {strides = array<i32>} : memref<1x288x128xf32, #tpu.memory_space<vmem>>, vector<1x288x128xf32>,
    %c256 = arith.constant 256 : index
    %c0_76 = arith.constant 0 : index
    %114 = vector.load %arg5[%c256, %c0_76] : memref<512x128xf32, #tpu.memory_space<vmem>>, vector<128x128xf32>
    %cst_77 = arith.constant dense<0.000000e+00> : vector<344x128xf32>
    %115 = tpu.matmul %1, %114, %cst_77 {dimension_numbers = #tpu.dot_dimension_numbers<[1], [0], [0], [1], [0, 0, 1, 1], [], []>} : vector<344x128xf32>, vector<128x128xf32>, vector<344x128xf32> -> vector<344x128xf32>
    %c0_78 = arith.constant 0 : index
    %c0_79 = arith.constant 0 : index
    %116 = vector.load %arg7[%c0_78, %c0_79] : memref<344x128xf32, #tpu.memory_space<vmem>>, vector<344x128xf32>
    tpu.vector_store %arg7[%c0_78, %c0_79], %115 {strides = array<i32>} : memref<344x128xf32, #tpu.memory_space<vmem>>, vector<344x128xf32>,
    %c2_80 = arith.constant 2 : index
    %c0_81 = arith.constant 0 : index
    %117 = vector.load %arg3[%c2_80, %c0_81] : memref<36x128xf32, #tpu.memory_space<vmem>>, vector<1x128xf32>
    %c0_82 = arith.constant 0 : index
    %c0_83 = arith.constant 0 : index
    %118 = vector.load %arg7[%c0_82, %c0_83] : memref<344x128xf32, #tpu.memory_space<vmem>>, vector<288x128xf32>
    %119 = vector.broadcast %117 : vector<1x128xf32> to vector<288x128xf32>
    %120 = arith.mulf %119, %118 : vector<288x128xf32>
    %c6 = arith.constant 6 : index
    %c0_84 = arith.constant 0 : index
    %121 = vector.load %arg3[%c6, %c0_84] : memref<36x128xf32, #tpu.memory_space<vmem>>, vector<1x128xf32>
    %c1_85 = arith.constant 1 : index
    %c0_86 = arith.constant 0 : index
    %122 = vector.load %arg7[%c1_85, %c0_86] : memref<344x128xf32, #tpu.memory_space<vmem>>, vector<288x128xf32>
    %123 = vector.broadcast %121 : vector<1x128xf32> to vector<288x128xf32>
    %124 = arith.mulf %123, %122 : vector<288x128xf32>
    %125 = arith.addf %120, %124 : vector<288x128xf32>
    %c10 = arith.constant 10 : index
    %c0_87 = arith.constant 0 : index
    %126 = vector.load %arg3[%c10, %c0_87] : memref<36x128xf32, #tpu.memory_space<vmem>>, vector<1x128xf32>
    %c2_88 = arith.constant 2 : index
    %c0_89 = arith.constant 0 : index
    %127 = vector.load %arg7[%c2_88, %c0_89] : memref<344x128xf32, #tpu.memory_space<vmem>>, vector<288x128xf32>
    %128 = vector.broadcast %126 : vector<1x128xf32> to vector<288x128xf32>
    %129 = arith.mulf %128, %127 : vector<288x128xf32>
    %130 = arith.addf %125, %129 : vector<288x128xf32>
    %c14 = arith.constant 14 : index
    %c0_90 = arith.constant 0 : index
    %131 = vector.load %arg3[%c14, %c0_90] : memref<36x128xf32, #tpu.memory_space<vmem>>, vector<1x128xf32>
    %c18_91 = arith.constant 18 : index
    %c0_92 = arith.constant 0 : index
    %132 = vector.load %arg7[%c18_91, %c0_92] : memref<344x128xf32, #tpu.memory_space<vmem>>, vector<288x128xf32>
    %133 = vector.broadcast %131 : vector<1x128xf32> to vector<288x128xf32>
    %134 = arith.mulf %133, %132 : vector<288x128xf32>
    %135 = arith.addf %130, %134 : vector<288x128xf32>
    %c18_93 = arith.constant 18 : index
    %c0_94 = arith.constant 0 : index
    %136 = vector.load %arg3[%c18_93, %c0_94] : memref<36x128xf32, #tpu.memory_space<vmem>>, vector<1x128xf32>
    %c19_95 = arith.constant 19 : index
    %c0_96 = arith.constant 0 : index
    %137 = vector.load %arg7[%c19_95, %c0_96] : memref<344x128xf32, #tpu.memory_space<vmem>>, vector<288x128xf32>
    %138 = vector.broadcast %136 : vector<1x128xf32> to vector<288x128xf32>
    %139 = arith.mulf %138, %137 : vector<288x128xf32>
    %140 = arith.addf %135, %139 : vector<288x128xf32>
    %c22 = arith.constant 22 : index
    %c0_97 = arith.constant 0 : index
    %141 = vector.load %arg3[%c22, %c0_97] : memref<36x128xf32, #tpu.memory_space<vmem>>, vector<1x128xf32>
    %c20_98 = arith.constant 20 : index
    %c0_99 = arith.constant 0 : index
    %142 = vector.load %arg7[%c20_98, %c0_99] : memref<344x128xf32, #tpu.memory_space<vmem>>, vector<288x128xf32>
    %143 = vector.broadcast %141 : vector<1x128xf32> to vector<288x128xf32>
    %144 = arith.mulf %143, %142 : vector<288x128xf32>
    %145 = arith.addf %140, %144 : vector<288x128xf32>
    %c26 = arith.constant 26 : index
    %c0_100 = arith.constant 0 : index
    %146 = vector.load %arg3[%c26, %c0_100] : memref<36x128xf32, #tpu.memory_space<vmem>>, vector<1x128xf32>
    %c36_101 = arith.constant 36 : index
    %c0_102 = arith.constant 0 : index
    %147 = vector.load %arg7[%c36_101, %c0_102] : memref<344x128xf32, #tpu.memory_space<vmem>>, vector<288x128xf32>
    %148 = vector.broadcast %146 : vector<1x128xf32> to vector<288x128xf32>
    %149 = arith.mulf %148, %147 : vector<288x128xf32>
    %150 = arith.addf %145, %149 : vector<288x128xf32>
    %c30 = arith.constant 30 : index
    %c0_103 = arith.constant 0 : index
    %151 = vector.load %arg3[%c30, %c0_103] : memref<36x128xf32, #tpu.memory_space<vmem>>, vector<1x128xf32>
    %c37_104 = arith.constant 37 : index
    %c0_105 = arith.constant 0 : index
    %152 = vector.load %arg7[%c37_104, %c0_105] : memref<344x128xf32, #tpu.memory_space<vmem>>, vector<288x128xf32>
    %153 = vector.broadcast %151 : vector<1x128xf32> to vector<288x128xf32>
    %154 = arith.mulf %153, %152 : vector<288x128xf32>
    %155 = arith.addf %150, %154 : vector<288x128xf32>
    %c34 = arith.constant 34 : index
    %c0_106 = arith.constant 0 : index
    %156 = vector.load %arg3[%c34, %c0_106] : memref<36x128xf32, #tpu.memory_space<vmem>>, vector<1x128xf32>
    %c38_107 = arith.constant 38 : index
    %c0_108 = arith.constant 0 : index
    %157 = vector.load %arg7[%c38_107, %c0_108] : memref<344x128xf32, #tpu.memory_space<vmem>>, vector<288x128xf32>
    %158 = vector.broadcast %156 : vector<1x128xf32> to vector<288x128xf32>
    %159 = arith.mulf %158, %157 : vector<288x128xf32>
    %160 = arith.addf %155, %159 : vector<288x128xf32>
    %c0_109 = arith.constant 0 : index
    %c0_110 = arith.constant 0 : index
    %c0_111 = arith.constant 0 : index
    %161 = vector.load %arg6[%c0_109, %c0_110, %c0_111] : memref<1x288x128xf32, #tpu.memory_space<vmem>>, vector<1x288x128xf32>
    %162 = vector.shape_cast %161 : vector<1x288x128xf32> to vector<288x128xf32>
    %163 = arith.addf %162, %160 : vector<288x128xf32>
    %c0_112 = arith.constant 0 : index
    %c0_113 = arith.constant 0 : index
    %c0_114 = arith.constant 0 : index
    %164 = vector.load %arg6[%c0_112, %c0_113, %c0_114] : memref<1x288x128xf32, #tpu.memory_space<vmem>>, vector<1x288x128xf32>
    %165 = vector.shape_cast %164 : vector<1x288x128xf32> to vector<288x128xf32>
    %166 = vector.shape_cast %163 : vector<288x128xf32> to vector<1x288x128xf32>
    tpu.vector_store %arg6[%c0_112, %c0_113, %c0_114], %166 {strides = array<i32>} : memref<1x288x128xf32, #tpu.memory_space<vmem>>, vector<1x288x128xf32>,
    %c384 = arith.constant 384 : index
    %c0_115 = arith.constant 0 : index
    %167 = vector.load %arg5[%c384, %c0_115] : memref<512x128xf32, #tpu.memory_space<vmem>>, vector<128x128xf32>
    %cst_116 = arith.constant dense<0.000000e+00> : vector<344x128xf32>
    %168 = tpu.matmul %1, %167, %cst_116 {dimension_numbers = #tpu.dot_dimension_numbers<[1], [0], [0], [1], [0, 0, 1, 1], [], []>} : vector<344x128xf32>, vector<128x128xf32>, vector<344x128xf32> -> vector<344x128xf32>
    %c0_117 = arith.constant 0 : index
    %c0_118 = arith.constant 0 : index
    %169 = vector.load %arg7[%c0_117, %c0_118] : memref<344x128xf32, #tpu.memory_space<vmem>>, vector<344x128xf32>
    tpu.vector_store %arg7[%c0_117, %c0_118], %168 {strides = array<i32>} : memref<344x128xf32, #tpu.memory_space<vmem>>, vector<344x128xf32>,
    %c3 = arith.constant 3 : index
    %c0_119 = arith.constant 0 : index
    %170 = vector.load %arg3[%c3, %c0_119] : memref<36x128xf32, #tpu.memory_space<vmem>>, vector<1x128xf32>
    %c0_120 = arith.constant 0 : index
    %c0_121 = arith.constant 0 : index
    %171 = vector.load %arg7[%c0_120, %c0_121] : memref<344x128xf32, #tpu.memory_space<vmem>>, vector<288x128xf32>
    %172 = vector.broadcast %170 : vector<1x128xf32> to vector<288x128xf32>
    %173 = arith.mulf %172, %171 : vector<288x128xf32>
    %c7 = arith.constant 7 : index
    %c0_122 = arith.constant 0 : index
    %174 = vector.load %arg3[%c7, %c0_122] : memref<36x128xf32, #tpu.memory_space<vmem>>, vector<1x128xf32>
    %c1_123 = arith.constant 1 : index
    %c0_124 = arith.constant 0 : index
    %175 = vector.load %arg7[%c1_123, %c0_124] : memref<344x128xf32, #tpu.memory_space<vmem>>, vector<288x128xf32>
    %176 = vector.broadcast %174 : vector<1x128xf32> to vector<288x128xf32>
    %177 = arith.mulf %176, %175 : vector<288x128xf32>
    %178 = arith.addf %173, %177 : vector<288x128xf32>
    %c11 = arith.constant 11 : index
    %c0_125 = arith.constant 0 : index
    %179 = vector.load %arg3[%c11, %c0_125] : memref<36x128xf32, #tpu.memory_space<vmem>>, vector<1x128xf32>
    %c2_126 = arith.constant 2 : index
    %c0_127 = arith.constant 0 : index
    %180 = vector.load %arg7[%c2_126, %c0_127] : memref<344x128xf32, #tpu.memory_space<vmem>>, vector<288x128xf32>
    %181 = vector.broadcast %179 : vector<1x128xf32> to vector<288x128xf32>
    %182 = arith.mulf %181, %180 : vector<288x128xf32>
    %183 = arith.addf %178, %182 : vector<288x128xf32>
    %c15 = arith.constant 15 : index
    %c0_128 = arith.constant 0 : index
    %184 = vector.load %arg3[%c15, %c0_128] : memref<36x128xf32, #tpu.memory_space<vmem>>, vector<1x128xf32>
    %c18_129 = arith.constant 18 : index
    %c0_130 = arith.constant 0 : index
    %185 = vector.load %arg7[%c18_129, %c0_130] : memref<344x128xf32, #tpu.memory_space<vmem>>, vector<288x128xf32>
    %186 = vector.broadcast %184 : vector<1x128xf32> to vector<288x128xf32>
    %187 = arith.mulf %186, %185 : vector<288x128xf32>
    %188 = arith.addf %183, %187 : vector<288x128xf32>
    %c19_131 = arith.constant 19 : index
    %c0_132 = arith.constant 0 : index
    %189 = vector.load %arg3[%c19_131, %c0_132] : memref<36x128xf32, #tpu.memory_space<vmem>>, vector<1x128xf32>
    %c19_133 = arith.constant 19 : index
    %c0_134 = arith.constant 0 : index
    %190 = vector.load %arg7[%c19_133, %c0_134] : memref<344x128xf32, #tpu.memory_space<vmem>>, vector<288x128xf32>
    %191 = vector.broadcast %189 : vector<1x128xf32> to vector<288x128xf32>
    %192 = arith.mulf %191, %190 : vector<288x128xf32>
    %193 = arith.addf %188, %192 : vector<288x128xf32>
    %c23 = arith.constant 23 : index
    %c0_135 = arith.constant 0 : index
    %194 = vector.load %arg3[%c23, %c0_135] : memref<36x128xf32, #tpu.memory_space<vmem>>, vector<1x128xf32>
    %c20_136 = arith.constant 20 : index
    %c0_137 = arith.constant 0 : index
    %195 = vector.load %arg7[%c20_136, %c0_137] : memref<344x128xf32, #tpu.memory_space<vmem>>, vector<288x128xf32>
    %196 = vector.broadcast %194 : vector<1x128xf32> to vector<288x128xf32>
    %197 = arith.mulf %196, %195 : vector<288x128xf32>
    %198 = arith.addf %193, %197 : vector<288x128xf32>
    %c27 = arith.constant 27 : index
    %c0_138 = arith.constant 0 : index
    %199 = vector.load %arg3[%c27, %c0_138] : memref<36x128xf32, #tpu.memory_space<vmem>>, vector<1x128xf32>
    %c36_139 = arith.constant 36 : index
    %c0_140 = arith.constant 0 : index
    %200 = vector.load %arg7[%c36_139, %c0_140] : memref<344x128xf32, #tpu.memory_space<vmem>>, vector<288x128xf32>
    %201 = vector.broadcast %199 : vector<1x128xf32> to vector<288x128xf32>
    %202 = arith.mulf %201, %200 : vector<288x128xf32>
    %203 = arith.addf %198, %202 : vector<288x128xf32>
    %c31 = arith.constant 31 : index
    %c0_141 = arith.constant 0 : index
    %204 = vector.load %arg3[%c31, %c0_141] : memref<36x128xf32, #tpu.memory_space<vmem>>, vector<1x128xf32>
    %c37_142 = arith.constant 37 : index
    %c0_143 = arith.constant 0 : index
    %205 = vector.load %arg7[%c37_142, %c0_143] : memref<344x128xf32, #tpu.memory_space<vmem>>, vector<288x128xf32>
    %206 = vector.broadcast %204 : vector<1x128xf32> to vector<288x128xf32>
    %207 = arith.mulf %206, %205 : vector<288x128xf32>
    %208 = arith.addf %203, %207 : vector<288x128xf32>
    %c35 = arith.constant 35 : index
    %c0_144 = arith.constant 0 : index
    %209 = vector.load %arg3[%c35, %c0_144] : memref<36x128xf32, #tpu.memory_space<vmem>>, vector<1x128xf32>
    %c38_145 = arith.constant 38 : index
    %c0_146 = arith.constant 0 : index
    %210 = vector.load %arg7[%c38_145, %c0_146] : memref<344x128xf32, #tpu.memory_space<vmem>>, vector<288x128xf32>
    %211 = vector.broadcast %209 : vector<1x128xf32> to vector<288x128xf32>
    %212 = arith.mulf %211, %210 : vector<288x128xf32>
    %213 = arith.addf %208, %212 : vector<288x128xf32>
    %c0_147 = arith.constant 0 : index
    %c0_148 = arith.constant 0 : index
    %c0_149 = arith.constant 0 : index
    %214 = vector.load %arg6[%c0_147, %c0_148, %c0_149] : memref<1x288x128xf32, #tpu.memory_space<vmem>>, vector<1x288x128xf32>
    %215 = vector.shape_cast %214 : vector<1x288x128xf32> to vector<288x128xf32>
    %216 = arith.addf %215, %213 : vector<288x128xf32>
    %c0_150 = arith.constant 0 : index
    %c0_151 = arith.constant 0 : index
    %c0_152 = arith.constant 0 : index
    %217 = vector.load %arg6[%c0_150, %c0_151, %c0_152] : memref<1x288x128xf32, #tpu.memory_space<vmem>>, vector<1x288x128xf32>
    %218 = vector.shape_cast %217 : vector<1x288x128xf32> to vector<288x128xf32>
    %219 = vector.shape_cast %216 : vector<288x128xf32> to vector<1x288x128xf32>
    tpu.vector_store %arg6[%c0_150, %c0_151, %c0_152], %219 {strides = array<i32>} : memref<1x288x128xf32, #tpu.memory_space<vmem>>, vector<1x288x128xf32>,
    return
  }
  func.func @transform_0(%arg0: i32, %arg1: i32) -> (i32, i32, i32) {
    %c0_i32 = arith.constant 0 : i32
    %c0_i32_0 = arith.constant 0 : i32
    return %arg0, %c0_i32, %arg1 : i32, i32, i32
  }
  func.func @transform_1(%arg0: i32, %arg1: i32) -> (i32, i32) {
    %c0_i32 = arith.constant 0 : i32
    %c0_i32_0 = arith.constant 0 : i32
    return %c0_i32, %arg1 : i32, i32
  }
  func.func @transform_2(%arg0: i32, %arg1: i32) -> (i32, i32) {
    %c0_i32 = arith.constant 0 : i32
    %c0_i32_0 = arith.constant 0 : i32
    return %c0_i32, %arg1 : i32, i32
  }
  func.func @transform_3(%arg0: i32, %arg1: i32) -> (i32, i32) {
    %c0_i32 = arith.constant 0 : i32
    %c0_i32_0 = arith.constant 0 : i32
    %c0_i32_1 = arith.constant 0 : i32
    return %c0_i32, %c0_i32_0 : i32, i32
  }
  func.func @transform_4(%arg0: i32, %arg1: i32) -> (i32, i32, i32) {
    %c0_i32 = arith.constant 0 : i32
    %c0_i32_0 = arith.constant 0 : i32
    return %arg0, %c0_i32, %arg1 : i32, i32, i32
  }
}

</mosaic_0001>

<bundles_post_ra>
// kernel: dwconv.1
= control target key start
LH: loop header
LB: loop body
LE: loop exit
PB: predicated region body
PF: predicated region fallthrough
CT: control target
= control target key end

     0   :  { %s7146_s15 = smov 0   ;;  %s7148_s16 = smov 0   ;;  %s12396_s0 = inlined_call_operand.vmem [shape: f32[2,344,128], index: 0, kind: input, shape index: {}]   ;;  %s12397_s1 = inlined_call_operand.vmem [shape: f32[36,128], index: 1, kind: input, shape index: {}]   ;;  %s12398_s2 = inlined_call_operand.vmem [shape: f32[1,128], index: 2, kind: input, shape index: {}]   ;;  %s12399_s3 = inlined_call_operand.vmem [shape: f32[512,128], index: 3, kind: input, shape index: {}]   ;;  %s12400_s4 = inlined_call_operand.vmem [shape: f32[2,288,128], index: 4, kind: output, shape index: {}]  }
   0x1   :  { %s7150_s17 = smov 0  }
   0x2 LB: > { %s26_s18 = sadd.s32 1, %s7112_s16  ;;  %p5903_p0 = scmp.ge.s32.totalorder %s7116_s17, 1  ;;  %s7116_s17 = sphi %s7150_s17, %s14_s17   ;;  %s7112_s16 = sphi %s7148_s16, %s13712_s16   ;;  %s7108_s15 = sphi %s7146_s15, %s13711_s15  }
   0x3   : > { %p28_p1 = scmp.ge.s32.totalorder %s26_s18, 2  ;;  %p198_p2 = scmp.lt.s32.totalorder %s7116_s17, 3 }
   0x5   : > { %s13714_s18 = smov (%p28_p1, %s26_s18), 0  ;;  %p199_p3 = pnand %p5903_p0, %p198_p2 }
   0x7   : > { %202 = sbr.rel (%p199_p3) target bundleno = 1142 (0x476), region = 36 }
   0xe   : > { %v346_v0 = vld [vmem:[%s12399_s3] sm:$0xff]  ;;  %v347_v1 = vld [vmem:[%s12399_s3 + $0x8] sm:$0xff]  ;;  %v348_v2 = vld [vmem:[%s12399_s3 + $0x10] sm:$0xff]  ;;  %v7118_v3 = vmov 0.0|0.0   ;;  %vm7119_vm0 = vmmov 0   ;;  %v12401_v8 = vmov 0.0  }
   0xf   : > { %6825 = vmatprep.subr.bf16.mxu0 %v7118_v3  ;;  %v6826_v4 = vpack.c.bf16 %v347_v1, %v346_v0  ;;  %v349_v5 = vld [vmem:[%s12399_s3 + $0x18] sm:$0xff]  ;;  %6849 = vmatprep.subr.bf16.mxu1 %v7118_v3  ;;  %v1706_v6 = vld [vmem:[%s12399_s3 + $0x80] sm:$0xff]  ;;  %v1707_v7 = vld [vmem:[%s12399_s3 + $0x88] sm:$0xff]  ;;  %p237_p4 = scmp.lt.s32.totalorder %s7108_s15, 1 }
  0x10   : > { %6213 = vmatprep.mubr.msk.f32.mxu0 %vm7119_vm0, %v12401_v8  ;;  %6374 = vmatprep.mubr.msk.f32.mxu1 %vm7119_vm0, %v12401_v8  ;;  %v6829_v9 = vpack.c.bf16 %v349_v5, %v348_v2  ;;  %v6850_v10 = vpack.c.bf16 %v1707_v7, %v1706_v6  ;;  %v1708_v11 = vld [vmem:[%s12399_s3 + $0x90] sm:$0xff]  ;;  %v1709_v12 = vld [vmem:[%s12399_s3 + $0x98] sm:$0xff]  ;;  %v350_v13 = vld [vmem:[%s12399_s3 + $0x20] sm:$0xff] }
  0x11   : > { %6827 = vmatpush3.bf16.msra.mxu0 %v6826_v4  ;;  %v351_v14 = vld [vmem:[%s12399_s3 + $0x28] sm:$0xff]  ;;  %v6853_v15 = vpack.c.bf16 %v1709_v12, %v1708_v11  ;;  %v1710_v16 = vld [vmem:[%s12399_s3 + $0xa0] sm:$0xff]  ;;  %v352_v19 = vld [vmem:[%s12399_s3 + $0x30] sm:$0xff]  ;;  %s13716_s15 = smov (!%p237_p4, %s7108_s15), 1 }
  0x12   : > { %6828 = vmatprep.subr.bf16.mxu0 %v7118_v3  ;;  %6851 = vmatpush3.bf16.msra.mxu1 %v6850_v10  ;;  %v1711_v17 = vld [vmem:[%s12399_s3 + $0xa8] sm:$0xff]  ;;  %v6832_v18 = vpack.c.bf16 %v351_v14, %v350_v13  ;;  %v353_v20 = vld [vmem:[%s12399_s3 + $0x38] sm:$0xff]  ;;  %v1712_v22 = vld [vmem:[%s12399_s3 + $0xb0] sm:$0xff]  ;;  %s6921_s9 = smul.u32 344, %s13716_s15 }
  0x13   : > { %6852 = vmatprep.subr.bf16.mxu1 %v7118_v3  ;;  %v6856_v21 = vpack.c.bf16 %v1711_v17, %v1710_v16  ;;  %v1713_v23 = vld [vmem:[%s12399_s3 + $0xb8] sm:$0xff]  ;;  %v6835_v24 = vpack.c.bf16 %v353_v20, %v352_v19  ;;  %v354_v25 = vld [vmem:[%s12399_s3 + $0x40] sm:$0xff]  ;;  %v355_v26 = vld [vmem:[%s12399_s3 + $0x48] sm:$0xff]  ;;  %s6922_s22 = smul.u32 288, %s13716_s15 }
  0x14   : > { %v6859_v27 = vpack.c.bf16 %v1713_v23, %v1712_v22  ;;  %v1714_v28 = vld [vmem:[%s12399_s3 + $0xc0] sm:$0xff]  ;;  %v1715_v29 = vld [vmem:[%s12399_s3 + $0xc8] sm:$0xff]  ;;  %v6838_v30 = vpack.c.bf16 %v355_v26, %v354_v25  ;;  %v356_v31 = vld [vmem:[%s12399_s3 + $0x50] sm:$0xff]  ;;  %s7289_s20 = scalar_lea.vmem %s12396_s0, %s6921_s9 }
  0x15   : > { %6830 = vmatpush3.bf16.msra.mxu0 %v6829_v9  ;;  %v357_v32 = vld [vmem:[%s12399_s3 + $0x58] sm:$0xff]  ;;  %v6862_v33 = vpack.c.bf16 %v1715_v29, %v1714_v28  ;;  %v1716_v34 = vld [vmem:[%s12399_s3 + $0xd0] sm:$0xff]  ;;  %v358_v37 = vld [vmem:[%s12399_s3 + $0x60] sm:$0xff]  ;;  %s7646_s25 = scalar_lea.vmem %s12400_s4, %s6922_s22 }
  0x16   : > { %6831 = vmatprep.subr.bf16.mxu0 %v7118_v3  ;;  %6854 = vmatpush3.bf16.msra.mxu1 %v6853_v15  ;;  %v1717_v35 = vld [vmem:[%s12399_s3 + $0xd8] sm:$0xff]  ;;  %v6841_v36 = vpack.c.bf16 %v357_v32, %v356_v31  ;;  %v359_v38 = vld [vmem:[%s12399_s3 + $0x68] sm:$0xff]  ;;  %v1718_v40 = vld [vmem:[%s12399_s3 + $0xe0] sm:$0xff] }
  0x17   : > { %6855 = vmatprep.subr.bf16.mxu1 %v7118_v3  ;;  %v6865_v39 = vpack.c.bf16 %v1717_v35, %v1716_v34  ;;  %v1719_v41 = vld [vmem:[%s12399_s3 + $0xe8] sm:$0xff]  ;;  %v6844_v42 = vpack.c.bf16 %v359_v38, %v358_v37  ;;  %v360_v43 = vld [vmem:[%s12399_s3 + $0x70] sm:$0xff]  ;;  %v361_v44 = vld [vmem:[%s12399_s3 + $0x78] sm:$0xff] }
  0x18   : > { %v6868_v45 = vpack.c.bf16 %v1719_v41, %v1718_v40  ;;  %v1720_v46 = vld [vmem:[%s12399_s3 + $0xf0] sm:$0xff]  ;;  %v1721_v47 = vld [vmem:[%s12399_s3 + $0xf8] sm:$0xff]  ;;  %v6847_v48 = vpack.c.bf16 %v361_v44, %v360_v43  ;;  %v3066_v49 = vld [vmem:[%s12399_s3 + $0x100] sm:$0xff] }
  0x19   : > { %6833 = vmatpush3.bf16.msra.mxu0 %v6832_v18  ;;  %v3067_v50 = vld [vmem:[%s12399_s3 + $0x108] sm:$0xff]  ;;  %v6871_v51 = vpack.c.bf16 %v1721_v47, %v1720_v46  ;;  %v4426_v52 = vld [vmem:[%s12399_s3 + $0x180] sm:$0xff]  ;;  %v3068_v56 = vld [vmem:[%s12399_s3 + $0x110] sm:$0xff] }
  0x1a   : > { %6834 = vmatprep.subr.bf16.mxu0 %v7118_v3  ;;  %6857 = vmatpush3.bf16.msra.mxu1 %v6856_v21  ;;  %v4427_v53 = vld [vmem:[%s12399_s3 + $0x188] sm:$0xff]  ;;  %v7305_v54 = vld [vmem:[%s7289_s20] sm:$0xff]  ;;  %v6874_v55 = vpack.c.bf16 %v3067_v50, %v3066_v49  ;;  %v3069_v57 = vld [vmem:[%s12399_s3 + $0x118] sm:$0xff] }
  0x1b   : > { %6858 = vmatprep.subr.bf16.mxu1 %v7118_v3  ;;  %v6898_v58 = vpack.c.bf16 %v4427_v53, %v4426_v52  ;;  %v4428_v59 = vld [vmem:[%s12399_s3 + $0x190] sm:$0xff]  ;;  %v4429_v60 = vld [vmem:[%s12399_s3 + $0x198] sm:$0xff]  ;;  %v7325_v61 = vld [vmem:[%s7289_s20 + $0x8] sm:$0xff]  ;;  %v6877_v62 = vpack.c.bf16 %v3069_v57, %v3068_v56 }
  0x1c   : > { %v3070_v63 = vld [vmem:[%s12399_s3 + $0x120] sm:$0xff]  ;;  %v3071_v0 = vld [vmem:[%s12399_s3 + $0x128] sm:$0xff]  ;;  %v6901_v1 = vpack.c.bf16 %v4429_v60, %v4428_v59  ;;  %v7348_v5 = vld [vmem:[%s7289_s20 + $0x10] sm:$0xff] }
  0x1d   : > { %6836 = vmatpush3.bf16.msra.mxu0 %v6835_v24  ;;  %v4430_v2 = vld [vmem:[%s12399_s3 + $0x1a0] sm:$0xff]  ;;  %v4431_v4 = vld [vmem:[%s12399_s3 + $0x1a8] sm:$0xff]  ;;  %v6880_v6 = vpack.c.bf16 %v3071_v0, %v3070_v63  ;;  %v3072_v7 = vld [vmem:[%s12399_s3 + $0x130] sm:$0xff] }
  0x1e   : > { %6837 = vmatprep.subr.bf16.mxu0 %v7118_v3  ;;  %6860 = vmatpush3.bf16.msra.mxu1 %v6859_v27  ;;  %v3073_v9 = vld [vmem:[%s12399_s3 + $0x138] sm:$0xff]  ;;  %v6904_v10 = vpack.c.bf16 %v4431_v4, %v4430_v2  ;;  %v4432_v11 = vld [vmem:[%s12399_s3 + $0x1b0] sm:$0xff]  ;;  %v3074_v15 = vld [vmem:[%s12399_s3 + $0x140] sm:$0xff] }
  0x1f   : > { %6861 = vmatprep.subr.bf16.mxu1 %v7118_v3  ;;  %v4433_v12 = vld [vmem:[%s12399_s3 + $0x1b8] sm:$0xff]  ;;  %v6883_v14 = vpack.c.bf16 %v3073_v9, %v3072_v7  ;;  %v3075_v16 = vld [vmem:[%s12399_s3 + $0x148] sm:$0xff]  ;;  %v4434_v18 = vld [vmem:[%s12399_s3 + $0x1c0] sm:$0xff] }
  0x20   : > { %v7371_v13 = vld [vmem:[%s7289_s20 + $0x18] sm:$0xff]  ;;  %v6907_v17 = vpack.c.bf16 %v4433_v12, %v4432_v11  ;;  %v4435_v19 = vld [vmem:[%s12399_s3 + $0x1c8] sm:$0xff]  ;;  %v7394_v20 = vld [vmem:[%s7289_s20 + $0x20] sm:$0xff]  ;;  %v6886_v21 = vpack.c.bf16 %v3075_v16, %v3074_v15 }
  0x21   : > { %6839 = vmatpush3.bf16.msra.mxu0 %v6838_v30  ;;  %v3076_v22 = vld [vmem:[%s12399_s3 + $0x150] sm:$0xff]  ;;  %v3077_v23 = vld [vmem:[%s12399_s3 + $0x158] sm:$0xff]  ;;  %v6910_v24 = vpack.c.bf16 %v4435_v19, %v4434_v18  ;;  %v7417_v27 = vld [vmem:[%s7289_s20 + $0x28] sm:$0xff] }
  0x22   : > { %6840 = vmatprep.subr.bf16.mxu0 %v7118_v3  ;;  %6863 = vmatpush3.bf16.msra.mxu1 %v6862_v33  ;;  %v4436_v25 = vld [vmem:[%s12399_s3 + $0x1d0] sm:$0xff]  ;;  %v4437_v26 = vld [vmem:[%s12399_s3 + $0x1d8] sm:$0xff]  ;;  %v6889_v28 = vpack.c.bf16 %v3077_v23, %v3076_v22  ;;  %v3078_v29 = vld [vmem:[%s12399_s3 + $0x160] sm:$0xff] }
  0x23   : > { %6864 = vmatprep.subr.bf16.mxu1 %v7118_v3  ;;  %v3079_v30 = vld [vmem:[%s12399_s3 + $0x168] sm:$0xff]  ;;  %v6913_v31 = vpack.c.bf16 %v4437_v26, %v4436_v25  ;;  %v4438_v32 = vld [vmem:[%s12399_s3 + $0x1e0] sm:$0xff]  ;;  %v7440_v34 = vld [vmem:[%s7289_s20 + $0x30] sm:$0xff] }
  0x24   : > { %v4439_v33 = vld [vmem:[%s12399_s3 + $0x1e8] sm:$0xff]  ;;  %v6892_v35 = vpack.c.bf16 %v3079_v30, %v3078_v29  ;;  %v3080_v37 = vld [vmem:[%s12399_s3 + $0x170] sm:$0xff]  ;;  %v3081_v38 = vld [vmem:[%s12399_s3 + $0x178] sm:$0xff] }
  0x25   : > { %6842 = vmatpush3.bf16.msra.mxu0 %v6841_v36  ;;  %v6916_v36 = vpack.c.bf16 %v4439_v33, %v4438_v32  ;;  %v6895_v40 = vpack.c.bf16 %v3081_v38, %v3080_v37  ;;  %v7468_v41 = vld [vmem:[%s7289_s20 + $0x40] sm:$0xff]  ;;  %v7483_v43 = vld [vmem:[%s7289_s20 + $0x48] sm:$0xff]  ;;  %v7501_v46 = vld [vmem:[%s7289_s20 + $0x58] sm:$0xff] }
  0x26   : > { %6843 = vmatprep.subr.bf16.mxu0 %v7118_v3  ;;  %6866 = vmatpush3.bf16.msra.mxu1 %v6865_v39  ;;  %v7457_v39 = vld [vmem:[%s7289_s20 + $0x38] sm:$0xff]  ;;  %v7510_v47 = vld [vmem:[%s7289_s20 + $0x60] sm:$0xff]  ;;  %v7528_v49 = vld [vmem:[%s7289_s20 + $0x70] sm:$0xff] }
  0x27   : > { %6867 = vmatprep.subr.bf16.mxu1 %v7118_v3  ;;  %v7537_v50 = vld [vmem:[%s7289_s20 + $0x78] sm:$0xff]  ;;  %v7555_v52 = vld [vmem:[%s7289_s20 + $0x88] sm:$0xff]  ;;  %v7564_v53 = vld [vmem:[%s7289_s20 + $0x90] sm:$0xff] }
  0x28   : > { %v7582_v56 = vld [vmem:[%s7289_s20 + $0xa0] sm:$0xff]  ;;  %v7591_v57 = vld [vmem:[%s7289_s20 + $0xa8] sm:$0xff]  ;;  %v283_v59 = vld [vmem:[%s7289_s20 + $0xb8] sm:$0xff] }
  0x29   : > { %6845 = vmatpush3.bf16.msra.mxu0 %v6844_v42  ;;  %v4440_v42 = vld [vmem:[%s12399_s3 + $0x1f0] sm:$0xff]  ;;  %v284_v60 = vld [vmem:[%s7289_s20 + $0xc0] sm:$0xff]  ;;  %v287_v0 = vld [vmem:[%s7289_s20 + $0xd8] sm:$0xff] }
  0x2a   : > { %6846 = vmatprep.subr.bf16.mxu0 %v7118_v3  ;;  %6869 = vmatpush3.bf16.msra.mxu1 %v6868_v45  ;;  %v7492_v45 = vld [vmem:[%s7289_s20 + $0x50] sm:$0xff]  ;;  %v289_v2 = vld [vmem:[%s7289_s20 + $0xe8] sm:$0xff]  ;;  %v291_v7 = vld [vmem:[%s7289_s20 + $0xf8] sm:$0xff] }
  0x2b   : > { %6870 = vmatprep.subr.bf16.mxu1 %v7118_v3  ;;  %v286_v63 = vld [vmem:[%s7289_s20 + $0xd0] sm:$0xff]  ;;  %v292_v9 = vld [vmem:[%s7289_s20 + $0x100] sm:$0xff]  ;;  %v295_v12 = vld [vmem:[%s7289_s20 + $0x118] sm:$0xff] }
  0x2c   : > { %v290_v4 = vld [vmem:[%s7289_s20 + $0xf0] sm:$0xff]  ;;  %v297_v15 = vld [vmem:[%s7289_s20 + $0x128] sm:$0xff]  ;;  %v300_v18 = vld [vmem:[%s7289_s20 + $0x140] sm:$0xff] }
  0x2d   : > { %6848 = vmatpush3.bf16.msra.mxu0 %v6847_v48  ;;  %v7519_v48 = vld [vmem:[%s7289_s20 + $0x68] sm:$0xff]  ;;  %v294_v11 = vld [vmem:[%s7289_s20 + $0x110] sm:$0xff]  ;;  %v7862_v30 = vld [vmem:[%s12397_s1] ss:$0 sm:$0xff] }
  0x2e   : > { %6873 = vmatprep.subr.bf16.mxu0 %v7118_v3  ;;  %6872 = vmatpush3.bf16.msra.mxu1 %v6871_v51  ;;  %v7546_v51 = vld [vmem:[%s7289_s20 + $0x80] sm:$0xff]  ;;  %v298_v16 = vld [vmem:[%s7289_s20 + $0x130] sm:$0xff]  ;;  %v301_v19 = vld [vmem:[%s7289_s20 + $0x148] sm:$0xff] }
  0x2f   : > { %6897 = vmatprep.subr.bf16.mxu1 %v7118_v3 }
  0x30   : > { %6214 = vmatmul.mubr.f32.vlgmr.msra.gmra.mrb[0].mxu0 %v7305_v54 }
  0x31   : > { %6875 = vmatpush3.bf16.msra.mxu0 %v6874_v55  ;;  %6216 = vmatprep.mubr.msk.f32.mxu0 %vm7119_vm0, %v12401_v8  ;;  %v7573_v55 = vld [vmem:[%s7289_s20 + $0x98] sm:$0xff] }
  0x32   : > { %6375 = vmatmul.mubr.f32.vlgmr.msra.gmra.mrb[0].mxu1 %v7305_v54  ;;  %6876 = vmatprep.subr.bf16.mxu0 %v7118_v3 }
  0x33   : > { %6377 = vmatprep.mubr.msk.f32.mxu1 %vm7119_vm0, %v12401_v8  ;;  %6899 = vmatpush3.bf16.msra.mxu1 %v6898_v58  ;;  %v7600_v58 = vld [vmem:[%s7289_s20 + $0xb0] sm:$0xff] }
  0x34   : > { %6217 = vmatmul.mubr.f32.gmra.mrb[2].mxu0 %v7325_v61  ;;  %6900 = vmatprep.subr.bf16.mxu1 %v7118_v3 }
  0x35   : > { %6219 = vmatprep.mubr.msk.f32.mxu0 %vm7119_vm0, %v12401_v8  ;;  %6878 = vmatpush3.bf16.msra.mxu0 %v6877_v62  ;;  %v285_v62 = vld [vmem:[%s7289_s20 + $0xc8] sm:$0xff] }
  0x36   : > { %6378 = vmatmul.mubr.f32.gmra.mrb[2].mxu1 %v7325_v61  ;;  %6879 = vmatprep.subr.bf16.mxu0 %v7118_v3 }
  0x37   : > { %6380 = vmatprep.mubr.msk.f32.mxu1 %vm7119_vm0, %v12401_v8  ;;  %6902 = vmatpush3.bf16.msra.mxu1 %v6901_v1  ;;  %v288_v1 = vld [vmem:[%s7289_s20 + $0xe0] sm:$0xff] }
  0x38   : > { %6220 = vmatmul.mubr.f32.gmra.mrb[4].mxu0 %v7348_v5  ;;  %6903 = vmatprep.subr.bf16.mxu1 %v7118_v3 }
  0x39   : > { %6222 = vmatprep.mubr.msk.f32.mxu0 %vm7119_vm0, %v12401_v8  ;;  %6881 = vmatpush3.bf16.msra.mxu0 %v6880_v6  ;;  %v7654_v6 = vld [vmem:[%s12398_s2] ss:$0 sm:$0xff] }
  0x3a   : > { %6381 = vmatmul.mubr.f32.gmra.mrb[4].mxu1 %v7348_v5  ;;  %6882 = vmatprep.subr.bf16.mxu0 %v7118_v3  ;;  %319 = vst [vmem:[%s7646_s25 + $0x48] sm:$0xff] %v7654_v6  ;;  %320 = vst [vmem:[%s7646_s25 + $0x50] sm:$0xff] %v7654_v6 }
  0x3b   : > { %6383 = vmatprep.mubr.msk.f32.mxu1 %vm7119_vm0, %v12401_v8  ;;  %6905 = vmatpush3.bf16.msra.mxu1 %v6904_v10  ;;  %321 = vst [vmem:[%s7646_s25 + $0x58] sm:$0xff] %v7654_v6  ;;  %322 = vst [vmem:[%s7646_s25 + $0x60] sm:$0xff] %v7654_v6  ;;  %v293_v10 = vld [vmem:[%s7289_s20 + $0x108] sm:$0xff] }
  0x3c   : > { %6223 = vmatmul.mubr.f32.gmra.mrb[6].mxu0 %v7371_v13  ;;  %6906 = vmatprep.subr.bf16.mxu1 %v7118_v3  ;;  %323 = vst [vmem:[%s7646_s25 + $0x68] sm:$0xff] %v7654_v6  ;;  %324 = vst [vmem:[%s7646_s25 + $0x70] sm:$0xff] %v7654_v6 }
  0x3d   : > { %6225 = vmatprep.mubr.msk.f32.mxu0 %vm7119_vm0, %v12401_v8  ;;  %6884 = vmatpush3.bf16.msra.mxu0 %v6883_v14  ;;  %325 = vst [vmem:[%s7646_s25 + $0x78] sm:$0xff] %v7654_v6  ;;  %326 = vst [vmem:[%s7646_s25 + $0x80] sm:$0xff] %v7654_v6  ;;  %v296_v14 = vld [vmem:[%s7289_s20 + $0x120] sm:$0xff] }
  0x3e   : > { %6384 = vmatmul.mubr.f32.gmra.mrb[6].mxu1 %v7371_v13  ;;  %6885 = vmatprep.subr.bf16.mxu0 %v7118_v3  ;;  %327 = vst [vmem:[%s7646_s25 + $0x88] sm:$0xff] %v7654_v6  ;;  %328 = vst [vmem:[%s7646_s25 + $0x90] sm:$0xff] %v7654_v6 }
  0x3f   : > { %6386 = vmatprep.mubr.msk.f32.mxu1 %vm7119_vm0, %v12401_v8  ;;  %6908 = vmatpush3.bf16.msra.mxu1 %v6907_v17  ;;  %329 = vst [vmem:[%s7646_s25 + $0x98] sm:$0xff] %v7654_v6  ;;  %330 = vst [vmem:[%s7646_s25 + $0xa0] sm:$0xff] %v7654_v6  ;;  %v299_v17 = vld [vmem:[%s7289_s20 + $0x138] sm:$0xff] }
  0x40   : > { %6226 = vmatmul.mubr.f32.gmra.mrb[8].mxu0 %v7394_v20  ;;  %6909 = vmatprep.subr.bf16.mxu1 %v7118_v3  ;;  %331 = vst [vmem:[%s7646_s25 + $0xa8] sm:$0xff] %v7654_v6  ;;  %332 = vst [vmem:[%s7646_s25 + $0xb0] sm:$0xff] %v7654_v6 }
  0x41   : > { %6228 = vmatprep.mubr.msk.f32.mxu0 %vm7119_vm0, %v12401_v8  ;;  %6887 = vmatpush3.bf16.msra.mxu0 %v6886_v21  ;;  %333 = vst [vmem:[%s7646_s25 + $0xb8] sm:$0xff] %v7654_v6  ;;  %334 = vst [vmem:[%s7646_s25 + $0xc0] sm:$0xff] %v7654_v6  ;;  %v302_v21 = vld [vmem:[%s7289_s20 + $0x150] sm:$0xff] }
  0x42   : > { %6387 = vmatmul.mubr.f32.gmra.mrb[8].mxu1 %v7394_v20  ;;  %6888 = vmatprep.subr.bf16.mxu0 %v7118_v3  ;;  %335 = vst [vmem:[%s7646_s25 + $0xc8] sm:$0xff] %v7654_v6  ;;  %336 = vst [vmem:[%s7646_s25 + $0xd0] sm:$0xff] %v7654_v6 }
  0x43   : > { %6389 = vmatprep.mubr.msk.f32.mxu1 %vm7119_vm0, %v12401_v8  ;;  %6911 = vmatpush3.bf16.msra.mxu1 %v6910_v24  ;;  %337 = vst [vmem:[%s7646_s25 + $0xd8] sm:$0xff] %v7654_v6  ;;  %338 = vst [vmem:[%s7646_s25 + $0xe0] sm:$0xff] %v7654_v6 }
  0x44   : > { %6229 = vmatmul.mubr.f32.gmra.mrb[10].mxu0 %v7417_v27  ;;  %6912 = vmatprep.subr.bf16.mxu1 %v7118_v3  ;;  %339 = vst [vmem:[%s7646_s25 + $0xe8] sm:$0xff] %v7654_v6  ;;  %340 = vst [vmem:[%s7646_s25 + $0xf0] sm:$0xff] %v7654_v6 }
  0x45   : > { %6231 = vmatprep.mubr.msk.f32.mxu0 %vm7119_vm0, %v12401_v8  ;;  %6890 = vmatpush3.bf16.msra.mxu0 %v6889_v28  ;;  %341 = vst [vmem:[%s7646_s25 + $0xf8] sm:$0xff] %v7654_v6  ;;  %342 = vst [vmem:[%s7646_s25 + $0x100] sm:$0xff] %v7654_v6 }
  0x46   : > { %6390 = vmatmul.mubr.f32.gmra.mrb[10].mxu1 %v7417_v27  ;;  %6891 = vmatprep.subr.bf16.mxu0 %v7118_v3  ;;  %343 = vst [vmem:[%s7646_s25 + $0x108] sm:$0xff] %v7654_v6  ;;  %344 = vst [vmem:[%s7646_s25 + $0x110] sm:$0xff] %v7654_v6 }
  0x47   : > { %6392 = vmatprep.mubr.msk.f32.mxu1 %vm7119_vm0, %v12401_v8  ;;  %6914 = vmatpush3.bf16.msra.mxu1 %v6913_v31  ;;  %345 = vst [vmem:[%s7646_s25 + $0x118] sm:$0xff] %v7654_v6 }
  0x48   : > { %6232 = vmatmul.mubr.f32.gmra.mrb[12].mxu0 %v7440_v34  ;;  %6915 = vmatprep.subr.bf16.mxu1 %v7118_v3 }
  0x49   : > { %6234 = vmatprep.mubr.msk.f32.mxu0 %vm7119_vm0, %v12401_v8  ;;  %6893 = vmatpush3.bf16.msra.mxu0 %v6892_v35 }
  0x4a   : > { %6393 = vmatmul.mubr.f32.gmra.mrb[12].mxu1 %v7440_v34  ;;  %6894 = vmatprep.subr.bf16.mxu0 %v7118_v3 }
  0x4b   : > { %6395 = vmatprep.mubr.msk.f32.mxu1 %vm7119_vm0, %v12401_v8  ;;  %6917 = vmatpush3.bf16.msra.mxu1 %v6916_v36 }
  0x4c   : > { %6235 = vmatmul.mubr.f32.gmra.mrb[14].mxu0 %v7457_v39  ;;  %6918 = vmatprep.subr.bf16.mxu1 %v7118_v3  ;;  %v4441_v3 = vld [vmem:[%s12399_s3 + $0x1f8] sm:$0xff] }
  0x4d   : > { %6237 = vmatprep.mubr.msk.f32.mxu0 %vm7119_vm0, %v12401_v8  ;;  %6896 = vmatpush3.bf16.msra.mxu0 %v6895_v40  ;;  %v6919_v44 = vpack.c.bf16 %v4441_v3, %v4440_v42 }
  0x4e   : > { %6396 = vmatmul.mubr.f32.gmra.mrb[14].mxu1 %v7457_v39 }
  0x4f   : > { %6398 = vmatprep.mubr.msk.f32.mxu1 %vm7119_vm0, %v12401_v8  ;;  %6920 = vmatpush3.bf16.msra.mxu1 %v6919_v44 }
  0x50   : > { %6238 = vmatmul.mubr.f32.gmra.mrb[16].mxu0 %v7468_v41 }
  0x51   : > { %6240 = vmatprep.mubr.msk.f32.mxu0 %vm7119_vm0, %v12401_v8 }
  0x52   : > { %6399 = vmatmul.mubr.f32.gmra.mrb[16].mxu1 %v7468_v41 }
  0x53   : > { %6401 = vmatprep.mubr.msk.f32.mxu1 %vm7119_vm0, %v12401_v8 }
  0x54   : > { %6241 = vmatmul.mubr.f32.gmra.mrb[18].mxu0 %v7483_v43 }
  0x55   : > { %6243 = vmatprep.mubr.msk.f32.mxu0 %vm7119_vm0, %v12401_v8 }
  0x56   : > { %6402 = vmatmul.mubr.f32.gmra.mrb[18].mxu1 %v7483_v43 }
  0x57   : > { %6404 = vmatprep.mubr.msk.f32.mxu1 %vm7119_vm0, %v12401_v8 }
  0x58   : > { %6244 = vmatmul.mubr.f32.gmra.mrb[20].mxu0 %v7492_v45 }
  0x59   : > { %6246 = vmatprep.mubr.msk.f32.mxu0 %vm7119_vm0, %v12401_v8 }
  0x5a   : > { %6405 = vmatmul.mubr.f32.gmra.mrb[20].mxu1 %v7492_v45 }
  0x5b   : > { %6407 = vmatprep.mubr.msk.f32.mxu1 %vm7119_vm0, %v12401_v8 }
  0x5c   : > { %6247 = vmatmul.mubr.f32.gmra.mrb[22].mxu0 %v7501_v46 }
  0x5d   : > { %6249 = vmatprep.mubr.msk.f32.mxu0 %vm7119_vm0, %v12401_v8 }
  0x5e   : > { %6408 = vmatmul.mubr.f32.gmra.mrb[22].mxu1 %v7501_v46 }
  0x5f   : > { %6410 = vmatprep.mubr.msk.f32.mxu1 %vm7119_vm0, %v12401_v8 }
  0x60   : > { %6250 = vmatmul.mubr.f32.gmra.mrb[24].mxu0 %v7510_v47 }
  0x61   : > { %6252 = vmatprep.mubr.msk.f32.mxu0 %vm7119_vm0, %v12401_v8 }
  0x62   : > { %6411 = vmatmul.mubr.f32.gmra.mrb[24].mxu1 %v7510_v47 }
  0x63   : > { %6413 = vmatprep.mubr.msk.f32.mxu1 %vm7119_vm0, %v12401_v8 }
  0x64   : > { %6253 = vmatmul.mubr.f32.gmra.mrb[26].mxu0 %v7519_v48 }
  0x65   : > { %6255 = vmatprep.mubr.msk.f32.mxu0 %vm7119_vm0, %v12401_v8 }
  0x66   : > { %6414 = vmatmul.mubr.f32.gmra.mrb[26].mxu1 %v7519_v48 }
  0x67   : > { %6416 = vmatprep.mubr.msk.f32.mxu1 %vm7119_vm0, %v12401_v8 }
  0x68   : > { %6256 = vmatmul.mubr.f32.gmra.mrb[28].mxu0 %v7528_v49 }
  0x69   : > { %6258 = vmatprep.mubr.msk.f32.mxu0 %vm7119_vm0, %v12401_v8 }
  0x6a   : > { %6417 = vmatmul.mubr.f32.gmra.mrb[28].mxu1 %v7528_v49 }
  0x6b   : > { %6419 = vmatprep.mubr.msk.f32.mxu1 %vm7119_vm0, %v12401_v8 }
  0x6c   : > { %6259 = vmatmul.mubr.f32.gmra.mrb[30].mxu0 %v7537_v50 }
  0x6d   : > { %6261 = vmatprep.mubr.msk.f32.mxu0 %vm7119_vm0, %v12401_v8 }
  0x6e   : > { %6420 = vmatmul.mubr.f32.gmra.mrb[30].mxu1 %v7537_v50 }
  0x6f   : > { %6422 = vmatprep.mubr.msk.f32.mxu1 %vm7119_vm0, %v12401_v8 }
  0x70   : > { %6262 = vmatmul.mubr.f32.gmra.mrb[32].mxu0 %v7546_v51 }
  0x71   : > { %6264 = vmatprep.mubr.msk.f32.mxu0 %vm7119_vm0, %v12401_v8 }
  0x72   : > { %6423 = vmatmul.mubr.f32.gmra.mrb[32].mxu1 %v7546_v51 }
  0x73   : > { %6425 = vmatprep.mubr.msk.f32.mxu1 %vm7119_vm0, %v12401_v8 }
  0x74   : > { %6265 = vmatmul.mubr.f32.gmra.mrb[34].mxu0 %v7555_v52 }
  0x75   : > { %6267 = vmatprep.mubr.msk.f32.mxu0 %vm7119_vm0, %v12401_v8 }
  0x76   : > { %6426 = vmatmul.mubr.f32.gmra.mrb[34].mxu1 %v7555_v52 }
  0x77   : > { %6428 = vmatprep.mubr.msk.f32.mxu1 %vm7119_vm0, %v12401_v8 }
  0x78   : > { %6268 = vmatmul.mubr.f32.gmra.mrb[36].mxu0 %v7564_v53 }
  0x79   : > { %6270 = vmatprep.mubr.msk.f32.mxu0 %vm7119_vm0, %v12401_v8 }
  0x7a   : > { %6429 = vmatmul.mubr.f32.gmra.mrb[36].mxu1 %v7564_v53 }
  0x7b   : > { %6431 = vmatprep.mubr.msk.f32.mxu1 %vm7119_vm0, %v12401_v8 }
  0x7c   : > { %6271 = vmatmul.mubr.f32.gmra.mrb[38].mxu0 %v7573_v55 }
  0x7d   : > { %6273 = vmatprep.mubr.msk.f32.mxu0 %vm7119_vm0, %v12401_v8 }
  0x7e   : > { %6432 = vmatmul.mubr.f32.gmra.mrb[38].mxu1 %v7573_v55 }
  0x7f   : > { %6434 = vmatprep.mubr.msk.f32.mxu1 %vm7119_vm0, %v12401_v8 }
  0x80   : > { %6274 = vmatmul.mubr.f32.gmra.mrb[40].mxu0 %v7582_v56 }
  0x81   : > { %6276 = vmatprep.mubr.msk.f32.mxu0 %vm7119_vm0, %v12401_v8 }
  0x82   : > { %6435 = vmatmul.mubr.f32.gmra.mrb[40].mxu1 %v7582_v56 }
  0x83   : > { %6437 = vmatprep.mubr.msk.f32.mxu1 %vm7119_vm0, %v12401_v8 }
  0x84   : > { %6277 = vmatmul.mubr.f32.gmra.mrb[42].mxu0 %v7591_v57 }
  0x85   : > { %6279 = vmatprep.mubr.msk.f32.mxu0 %vm7119_vm0, %v12401_v8 }
  0x86   : > { %6438 = vmatmul.mubr.f32.gmra.mrb[42].mxu1 %v7591_v57 }
  0x87   : > { %6440 = vmatprep.mubr.msk.f32.mxu1 %vm7119_vm0, %v12401_v8 }
  0x88   : > { %6280 = vmatmul.mubr.f32.gmra.mrb[44].mxu0 %v7600_v58 }
  0x89   : > { %6282 = vmatprep.mubr.msk.f32.mxu0 %vm7119_vm0, %v12401_v8 }
  0x8a   : > { %6441 = vmatmul.mubr.f32.gmra.mrb[44].mxu1 %v7600_v58 }
  0x8b   : > { %6443 = vmatprep.mubr.msk.f32.mxu1 %vm7119_vm0, %v12401_v8 }
  0x8c   : > { %6283 = vmatmul.mubr.f32.gmra.mrb[46].mxu0 %v283_v59 }
  0x8d   : > { %6285 = vmatprep.mubr.msk.f32.mxu0 %vm7119_vm0, %v12401_v8 }
  0x8e   : > { %6444 = vmatmul.mubr.f32.gmra.mrb[46].mxu1 %v283_v59 }
  0x8f   : > { %6446 = vmatprep.mubr.msk.f32.mxu1 %vm7119_vm0, %v12401_v8 }
  0x90   : > { %6286 = vmatmul.mubr.f32.gmra.mrb[48].mxu0 %v284_v60 }
  0x91   : > { %6288 = vmatprep.mubr.msk.f32.mxu0 %vm7119_vm0, %v12401_v8 }
  0x92   : > { %6447 = vmatmul.mubr.f32.gmra.mrb[48].mxu1 %v284_v60  ;;  %v7903_v60 = vld [vmem:[%s12397_s1 + $0x1] ss:$0 sm:$0xff] }
  0x93   : > { %6449 = vmatprep.mubr.msk.f32.mxu1 %vm7119_vm0, %v12401_v8 }
  0x94   : > { %6289 = vmatmul.mubr.f32.gmra.mrb[50].mxu0 %v285_v62 }
  0x95   : > { %6291 = vmatprep.mubr.msk.f32.mxu0 %vm7119_vm0, %v12401_v8 }
  0x96   : > { %6450 = vmatmul.mubr.f32.gmra.mrb[50].mxu1 %v285_v62 }
  0x97   : > { %6452 = vmatprep.mubr.msk.f32.mxu1 %vm7119_vm0, %v12401_v8 }
  0x98   : > { %6292 = vmatmul.mubr.f32.gmra.mrb[52].mxu0 %v286_v63 }
  0x99   : > { %6294 = vmatprep.mubr.msk.f32.mxu0 %vm7119_vm0, %v12401_v8 }
  0x9a   : > { %6453 = vmatmul.mubr.f32.gmra.mrb[52].mxu1 %v286_v63 }
  0x9b   : > { %6455 = vmatprep.mubr.msk.f32.mxu1 %vm7119_vm0, %v12401_v8 }
  0x9c   : > { %6295 = vmatmul.mubr.f32.gmra.mrb[54].mxu0 %v287_v0 }
  0x9d   : > { %6297 = vmatprep.mubr.msk.f32.mxu0 %vm7119_vm0, %v12401_v8 }
  0x9e   : > { %6456 = vmatmul.mubr.f32.gmra.mrb[54].mxu1 %v287_v0 }
  0x9f   : > { %6458 = vmatprep.mubr.msk.f32.mxu1 %vm7119_vm0, %v12401_v8 }
  0xa0   : > { %6298 = vmatmul.mubr.f32.gmra.mrb[56].mxu0 %v288_v1 }
  0xa1   : > { %6300 = vmatprep.mubr.msk.f32.mxu0 %vm7119_vm0, %v12401_v8 }
  0xa2   : > { %6459 = vmatmul.mubr.f32.gmra.mrb[56].mxu1 %v288_v1 }
  0xa3   : > { %6461 = vmatprep.mubr.msk.f32.mxu1 %vm7119_vm0, %v12401_v8 }
  0xa4   : > { %6301 = vmatmul.mubr.f32.gmra.mrb[58].mxu0 %v289_v2 }
  0xa5   : > { %6303 = vmatprep.mubr.msk.f32.mxu0 %vm7119_vm0, %v12401_v8 }
  0xa6   : > { %6462 = vmatmul.mubr.f32.gmra.mrb[58].mxu1 %v289_v2 }
  0xa7   : > { %6464 = vmatprep.mubr.msk.f32.mxu1 %vm7119_vm0, %v12401_v8 }
  0xa8   : > { %6304 = vmatmul.mubr.f32.gmra.mrb[60].mxu0 %v290_v4 }
  0xa9   : > { %6306 = vmatprep.mubr.msk.f32.mxu0 %vm7119_vm0, %v12401_v8 }
  0xaa   : > { %6465 = vmatmul.mubr.f32.gmra.mrb[60].mxu1 %v290_v4 }
  0xab   : > { %6467 = vmatprep.mubr.msk.f32.mxu1 %vm7119_vm0, %v12401_v8 }
  0xac   : > { %6307 = vmatmul.mubr.f32.gmra.mrb[62].mxu0 %v291_v7 }
  0xad   : > { %6309 = vmatprep.mubr.msk.f32.mxu0 %vm7119_vm0, %v12401_v8 }
  0xae   : > { %6468 = vmatmul.mubr.f32.gmra.mrb[62].mxu1 %v291_v7 }
  0xaf   : > { %6470 = vmatprep.mubr.msk.f32.mxu1 %vm7119_vm0, %v12401_v8 }
  0xb0   : > { %6310 = vmatmul.mubr.f32.gmra.mrb[64].mxu0 %v292_v9 }
  0xb1   : > { %6312 = vmatprep.mubr.msk.f32.mxu0 %vm7119_vm0, %v12401_v8 }
  0xb2   : > { %6471 = vmatmul.mubr.f32.gmra.mrb[64].mxu1 %v292_v9 }
  0xb3   : > { %6473 = vmatprep.mubr.msk.f32.mxu1 %vm7119_vm0, %v12401_v8 }
  0xb4   : > { %6313 = vmatmul.mubr.f32.gmra.mrb[66].mxu0 %v293_v10 }
  0xb5   : > { %6315 = vmatprep.mubr.msk.f32.mxu0 %vm7119_vm0, %v12401_v8 }
  0xb6   : > { %6474 = vmatmul.mubr.f32.gmra.mrb[66].mxu1 %v293_v10 }
  0xb7   : > { %6476 = vmatprep.mubr.msk.f32.mxu1 %vm7119_vm0, %v12401_v8 }
  0xb8   : > { %6316 = vmatmul.mubr.f32.gmra.mrb[68].mxu0 %v294_v11 }
  0xb9   : > { %6318 = vmatprep.mubr.msk.f32.mxu0 %vm7119_vm0, %v12401_v8 }
  0xba   : > { %6477 = vmatmul.mubr.f32.gmra.mrb[68].mxu1 %v294_v11 }
  0xbb   : > { %6479 = vmatprep.mubr.msk.f32.mxu1 %vm7119_vm0, %v12401_v8 }
  0xbc   : > { %6319 = vmatmul.mubr.f32.gmra.mrb[70].mxu0 %v295_v12 }
  0xbd   : > { %6321 = vmatprep.mubr.msk.f32.mxu0 %vm7119_vm0, %v12401_v8 }
  0xbe   : > { %6480 = vmatmul.mubr.f32.gmra.mrb[70].mxu1 %v295_v12 }
  0xbf   : > { %6482 = vmatprep.mubr.msk.f32.mxu1 %vm7119_vm0, %v12401_v8 }
  0xc0   : > { %6322 = vmatmul.mubr.f32.gmra.mrb[72].mxu0 %v296_v14 }
  0xc1   : > { %6324 = vmatprep.mubr.msk.f32.mxu0 %vm7119_vm0, %v12401_v8 }
  0xc2   : > { %6483 = vmatmul.mubr.f32.gmra.mrb[72].mxu1 %v296_v14 }
  0xc3   : > { %6485 = vmatprep.mubr.msk.f32.mxu1 %vm7119_vm0, %v12401_v8 }
  0xc4   : > { %6325 = vmatmul.mubr.f32.gmra.mrb[74].mxu0 %v297_v15 }
  0xc5   : > { %6327 = vmatprep.mubr.msk.f32.mxu0 %vm7119_vm0, %v12401_v8 }
  0xc6   : > { %6486 = vmatmul.mubr.f32.gmra.mrb[74].mxu1 %v297_v15  ;;  %v7916_v15 = vld [vmem:[%s12397_s1 + $0x14] ss:$0 sm:$0xff] }
  0xc7   : > { %6488 = vmatprep.mubr.msk.f32.mxu1 %vm7119_vm0, %v12401_v8 }
  0xc8   : > { %6328 = vmatmul.mubr.f32.gmra.mrb[76].mxu0 %v298_v16 }
  0xc9   : > { %6330 = vmatprep.mubr.msk.f32.mxu0 %vm7119_vm0, %v12401_v8 }
  0xca   : > { %6489 = vmatmul.mubr.f32.gmra.mrb[76].mxu1 %v298_v16 }
  0xcb   : > { %6491 = vmatprep.mubr.msk.f32.mxu1 %vm7119_vm0, %v12401_v8 }
  0xcc   : > { %6331 = vmatmul.mubr.f32.gmra.mrb[78].mxu0 %v299_v17 }
  0xcd   : > { %6333 = vmatprep.mubr.msk.f32.mxu0 %vm7119_vm0, %v12401_v8 }
  0xce   : > { %6492 = vmatmul.mubr.f32.gmra.mrb[78].mxu1 %v299_v17 }
  0xcf   : > { %6494 = vmatprep.mubr.msk.f32.mxu1 %vm7119_vm0, %v12401_v8 }
  0xd0   : > { %6334 = vmatmul.mubr.f32.gmra.mrb[80].mxu0 %v300_v18 }
  0xd1   : > { %6336 = vmatprep.mubr.msk.f32.mxu0 %vm7119_vm0, %v12401_v8 }
  0xd2   : > { %6495 = vmatmul.mubr.f32.gmra.mrb[80].mxu1 %v300_v18 }
  0xd3   : > { %6497 = vmatprep.mubr.msk.f32.mxu1 %vm7119_vm0, %v12401_v8 }
  0xd4   : > { %6337 = vmatmul.mubr.f32.gmra.mrb[82].mxu0 %v301_v19 }
  0xd5   : > { %6339 = vmatprep.mubr.msk.f32.mxu0 %vm7119_vm0, %v12401_v8 }
  0xd6   : > { %6498 = vmatmul.mubr.f32.gmra.mrb[82].mxu1 %v301_v19 }
  0xd7   : > { %6500 = vmatprep.mubr.msk.f32.mxu1 %vm7119_vm0, %v12401_v8 }
  0xd8   : > { %6340 = vmatmul.mubr.f32.gmra.mrb[84].mxu0 %v302_v21 }
  0xd9   : > { %6535 = vmatprep.mubr.msk.f32.mxu0 %vm7119_vm0, %v12401_v8 }
  0xda   : > { %6501 = vmatmul.mubr.f32.gmra.mrb[84].mxu1 %v302_v21 }
  0xdb   : > { %6696 = vmatprep.mubr.msk.f32.mxu1 %vm7119_vm0, %v12401_v8 }
  0xdc   : > { %6536 = vmatmul.mubr.f32.vlgmr.msra.gmra.mrb[86].mxu0 %v7305_v54 }
  0xdd   : > { %6538 = vmatprep.mubr.msk.f32.mxu0 %vm7119_vm0, %v12401_v8 }
  0xde   : > { %6697 = vmatmul.mubr.f32.vlgmr.msra.gmra.mrb[86].mxu1 %v7305_v54 }
  0xdf   : > { %6699 = vmatprep.mubr.msk.f32.mxu1 %vm7119_vm0, %v12401_v8 }
  0xe0   : > { %6539 = vmatmul.mubr.f32.gmra.mrb[88].mxu0 %v7325_v61 }
  0xe1   : > { %6541 = vmatprep.mubr.msk.f32.mxu0 %vm7119_vm0, %v12401_v8 }
  0xe2   : > { %6700 = vmatmul.mubr.f32.gmra.mrb[88].mxu1 %v7325_v61 }
  0xe3   : > { %6702 = vmatprep.mubr.msk.f32.mxu1 %vm7119_vm0, %v12401_v8 }
  0xe4   : > { %6542 = vmatmul.mubr.f32.gmra.mrb[90].mxu0 %v7348_v5 }
  0xe5   : > { %6544 = vmatprep.mubr.msk.f32.mxu0 %vm7119_vm0, %v12401_v8 }
  0xe6   : > { %6703 = vmatmul.mubr.f32.gmra.mrb[90].mxu1 %v7348_v5 }
  0xe7   : > { %6705 = vmatprep.mubr.msk.f32.mxu1 %vm7119_vm0, %v12401_v8 }
  0xe8   : > { %6545 = vmatmul.mubr.f32.gmra.mrb[92].mxu0 %v7371_v13 }
  0xe9   : > { %6547 = vmatprep.mubr.msk.f32.mxu0 %vm7119_vm0, %v12401_v8 }
  0xea   : > { %6706 = vmatmul.mubr.f32.gmra.mrb[92].mxu1 %v7371_v13 }
  0xeb   : > { %6708 = vmatprep.mubr.msk.f32.mxu1 %vm7119_vm0, %v12401_v8 }
  0xec   : > { %6548 = vmatmul.mubr.f32.gmra.mrb[94].mxu0 %v7394_v20 }
  0xed   : > { %6550 = vmatprep.mubr.msk.f32.mxu0 %vm7119_vm0, %v12401_v8 }
  0xee   : > { %6709 = vmatmul.mubr.f32.gmra.mrb[94].mxu1 %v7394_v20 }
  0xef   : > { %6711 = vmatprep.mubr.msk.f32.mxu1 %vm7119_vm0, %v12401_v8 }
  0xf0   : > { %6551 = vmatmul.mubr.f32.gmra.mrb[96].mxu0 %v7417_v27 }
  0xf1   : > { %6553 = vmatprep.mubr.msk.f32.mxu0 %vm7119_vm0, %v12401_v8 }
  0xf2   : > { %6712 = vmatmul.mubr.f32.gmra.mrb[96].mxu1 %v7417_v27  ;;  %v7854_v27 = vld [vmem:[%s12397_s1 + $0x4] ss:$0 sm:$0xff] }
  0xf3   : > { %6714 = vmatprep.mubr.msk.f32.mxu1 %vm7119_vm0, %v12401_v8 }
  0xf4   : > { %6554 = vmatmul.mubr.f32.gmra.mrb[98].mxu0 %v7440_v34 }
  0xf5   : > { %6556 = vmatprep.mubr.msk.f32.mxu0 %vm7119_vm0, %v12401_v8 }
  0xf6   : > { %6715 = vmatmul.mubr.f32.gmra.mrb[98].mxu1 %v7440_v34 }
  0xf7   : > { %6717 = vmatprep.mubr.msk.f32.mxu1 %vm7119_vm0, %v12401_v8 }
  0xf8   : > { %6557 = vmatmul.mubr.f32.gmra.mrb[100].mxu0 %v7457_v39 }
  0xf9   : > { %6559 = vmatprep.mubr.msk.f32.mxu0 %vm7119_vm0, %v12401_v8 }
  0xfa   : > { %6718 = vmatmul.mubr.f32.gmra.mrb[100].mxu1 %v7457_v39  ;;  %v7877_v39 = vld [vmem:[%s12397_s1 + $0x8] ss:$0 sm:$0xff] }
  0xfb   : > { %6720 = vmatprep.mubr.msk.f32.mxu1 %vm7119_vm0, %v12401_v8 }
  0xfc   : > { %6560 = vmatmul.mubr.f32.gmra.mrb[102].mxu0 %v7468_v41 }
  0xfd   : > { %6562 = vmatprep.mubr.msk.f32.mxu0 %vm7119_vm0, %v12401_v8 }
  0xfe   : > { %6721 = vmatmul.mubr.f32.gmra.mrb[102].mxu1 %v7468_v41 }
  0xff   : > { %6723 = vmatprep.mubr.msk.f32.mxu1 %vm7119_vm0, %v12401_v8 }
 0x100   : > { %6563 = vmatmul.mubr.f32.gmra.mrb[104].mxu0 %v7483_v43 }
 0x101   : > { %6565 = vmatprep.mubr.msk.f32.mxu0 %vm7119_vm0, %v12401_v8 }
 0x102   : > { %6724 = vmatmul.mubr.f32.gmra.mrb[104].mxu1 %v7483_v43 }
 0x103   : > { %v428_v54 = vpop.f32.mrb[0].mxu0  ;;  %6726 = vmatprep.mubr.msk.f32.mxu1 %vm7119_vm0, %v12401_v8 }
 0x104   : > { %642 = vst [vmem:[#allocation2] sm:$0xff] %v428_v54  ;;  %v6215_v61 = vpop.f32.mrb[1].mxu0  ;;  %6566 = vmatmul.mubr.f32.gmra.mrb[106].mxu0 %v7492_v45  ;;  %v726_v37 = vmul.f32 %v7862_v30, %v428_v54 }
 0x105   : > { %6568 = vmatprep.mubr.msk.f32.mxu0 %vm7119_vm0, %v12401_v8  ;;  %v1788_v5 = vpop.f32.mrb[0].mxu1 }
 0x106   : > { %6727 = vmatmul.mubr.f32.gmra.mrb[106].mxu1 %v7492_v45  ;;  %v6376_v13 = vpop.f32.mrb[1].mxu1  ;;  %v7887_v45 = vld [vmem:[%s12397_s1 + $0xc] ss:$0 sm:$0xff] }
 0x107   : > { %v433_v20 = vpop.f32.mrb[2].mxu0  ;;  %6729 = vmatprep.mubr.msk.f32.mxu1 %vm7119_vm0, %v12401_v8 }
 0x108   : > { %643 = vst [vmem:[#allocation2 + $0x8] sm:$0xff] %v433_v20  ;;  %v6218_v22 = vpop.f32.mrb[3].mxu0  ;;  %6569 = vmatmul.mubr.f32.gmra.mrb[108].mxu0 %v7501_v46  ;;  %v727_v59 = vmul.f32 %v7862_v30, %v433_v20 }
 0x109   : > { %6571 = vmatprep.mubr.msk.f32.mxu0 %vm7119_vm0, %v12401_v8  ;;  %v7845_v23 = vpop.f32.mrb[2].mxu1 }
 0x10a   : > { %6730 = vmatmul.mubr.f32.gmra.mrb[108].mxu1 %v7501_v46  ;;  %v6379_v24 = vpop.f32.mrb[3].mxu1  ;;  %v7920_v16 = vmul.f32 %v7903_v60, %v7845_v23 }
 0x10b   : > { %v438_v25 = vpop.f32.mrb[4].mxu0  ;;  %6732 = vmatprep.mubr.msk.f32.mxu1 %vm7119_vm0, %v12401_v8 }
 0x10c   : > { %644 = vst [vmem:[#allocation2 + $0x10] sm:$0xff] %v438_v25  ;;  %v6221_v26 = vpop.f32.mrb[5].mxu0  ;;  %6572 = vmatmul.mubr.f32.gmra.mrb[110].mxu0 %v7510_v47  ;;  %v728_v63 = vmul.f32 %v7862_v30, %v438_v25 }
 0x10d   : > { %6574 = vmatprep.mubr.msk.f32.mxu0 %vm7119_vm0, %v12401_v8  ;;  %v1798_v28 = vpop.f32.mrb[4].mxu1 }
 0x10e   : > { %6733 = vmatmul.mubr.f32.gmra.mrb[110].mxu1 %v7510_v47  ;;  %v6382_v29 = vpop.f32.mrb[5].mxu1  ;;  %v7923_v17 = vmul.f32 %v7903_v60, %v1798_v28 }
 0x10f   : > { %v763_v31 = vld [vmem:[#allocation2 + $0x1] sm:$0xff]  ;;  %v443_v33 = vpop.f32.mrb[6].mxu0  ;;  %6735 = vmatprep.mubr.msk.f32.mxu1 %vm7119_vm0, %v12401_v8 }
 0x110   : > { %v876_v32 = vld [vmem:[#allocation2 + $0x2] sm:$0xff]  ;;  %v803_v34 = vmul.f32 %v7854_v27, %v763_v31  ;;  %645 = vst [vmem:[#allocation2 + $0x18] sm:$0xff] %v443_v33  ;;  %v6224_v35 = vpop.f32.mrb[7].mxu0  ;;  %6575 = vmatmul.mubr.f32.gmra.mrb[112].mxu0 %v7519_v48  ;;  %12608 = vst [vmem:[#allocation3_spill] sm:$0xff] %v7923_v17 }
 0x111   : > { %2002 = vst [vmem:[#allocation2] sm:$0xff] %v1788_v5  ;;  %6577 = vmatprep.mubr.msk.f32.mxu0 %vm7119_vm0, %v12401_v8  ;;  %v7870_v36 = vpop.f32.mrb[6].mxu1  ;;  %v916_v47 = vmul.f32 %v7877_v39, %v876_v32 }
 0x112   : > { %6736 = vmatmul.mubr.f32.gmra.mrb[112].mxu1 %v7519_v48  ;;  %v6385_v38 = vpop.f32.mrb[7].mxu1  ;;  %v839_v3 = vadd.f32 %v803_v34, %v726_v37  ;;  %v7897_v48 = vld [vmem:[%s12397_s1 + $0x10] ss:$0 sm:$0xff]  ;;  %v7936_v25 = vmul.f32 %v7903_v60, %v7870_v36 }
 0x113   : > { %v764_v40 = vld [vmem:[#allocation2 + $0x9] sm:$0xff]  ;;  %v448_v42 = vpop.f32.mrb[8].mxu0  ;;  %6738 = vmatprep.mubr.msk.f32.mxu1 %vm7119_vm0, %v12401_v8 }
 0x114   : > { %v877_v41 = vld [vmem:[#allocation2 + $0xa] sm:$0xff]  ;;  %v804_v43 = vmul.f32 %v7854_v27, %v764_v40  ;;  %646 = vst [vmem:[#allocation2 + $0x20] sm:$0xff] %v448_v42  ;;  %v6227_v44 = vpop.f32.mrb[9].mxu0  ;;  %6578 = vmatmul.mubr.f32.gmra.mrb[114].mxu0 %v7528_v49  ;;  %v952_v7 = vadd.f32 %v916_v47, %v839_v3  ;;  %v730_v20 = vmul.f32 %v7862_v30, %v448_v42  ;;  %v7954_v40 = vld [vmem:[%s12397_s1 + $0x18] ss:$0 sm:$0xff] }
 0x115   : > { %2003 = vst [vmem:[#allocation2 + $0x8] sm:$0xff] %v7845_v23  ;;  %6580 = vmatprep.mubr.msk.f32.mxu0 %vm7119_vm0, %v12401_v8  ;;  %v7891_v46 = vpop.f32.mrb[8].mxu1  ;;  %v917_v61 = vmul.f32 %v7877_v39, %v877_v41 }
 0x116   : > { %6739 = vmatmul.mubr.f32.gmra.mrb[114].mxu1 %v7528_v49  ;;  %v6388_v62 = vpop.f32.mrb[9].mxu1  ;;  %v840_v12 = vadd.f32 %v804_v43, %v727_v59  ;;  %v729_v49 = vmul.f32 %v7862_v30, %v443_v33  ;;  %v7976_v59 = vld [vmem:[%s12397_s1 + $0x9] ss:$0 sm:$0xff] }
 0x117   : > { %v765_v0 = vld [vmem:[#allocation2 + $0x11] sm:$0xff]  ;;  %v453_v4 = vpop.f32.mrb[10].mxu0  ;;  %6741 = vmatprep.mubr.msk.f32.mxu1 %vm7119_vm0, %v12401_v8  ;;  %v7981_v62 = vld [vmem:[%s12397_s1 + $0x1c] ss:$0 sm:$0xff] }
 0x118   : > { %v878_v1 = vld [vmem:[#allocation2 + $0x12] sm:$0xff]  ;;  %v805_v9 = vmul.f32 %v7854_v27, %v765_v0  ;;  %647 = vst [vmem:[#allocation2 + $0x28] sm:$0xff] %v453_v4  ;;  %v6230_v14 = vpop.f32.mrb[11].mxu0  ;;  %6581 = vmatmul.mubr.f32.gmra.mrb[116].mxu0 %v7537_v50  ;;  %v953_v31 = vadd.f32 %v917_v61, %v840_v12  ;;  %v7949_v38 = vmul.f32 %v7862_v30, %v453_v4 }
 0x119   : > { %v1068_v2 = vld [vmem:[#allocation2 + $0x13] sm:$0xff]  ;;  %v995_v10 = vmul.f32 %v7887_v45, %v878_v1  ;;  %6583 = vmatprep.mubr.msk.f32.mxu0 %vm7119_vm0, %v12401_v8  ;;  %v7927_v18 = vpop.f32.mrb[10].mxu1  ;;  %v918_v13 = vmul.f32 %v7877_v39, %v878_v1 }
 0x11a   : > { %v1181_v11 = vld [vmem:[#allocation2 + $0x14] sm:$0xff]  ;;  %v841_v19 = vadd.f32 %v805_v9, %v728_v63  ;;  %v1108_v54 = vmul.f32 %v7897_v48, %v1068_v2  ;;  %6742 = vmatmul.mubr.f32.gmra.mrb[116].mxu1 %v7537_v50  ;;  %v6391_v5 = vpop.f32.mrb[11].mxu1  ;;  %v7961_v41 = vmul.f32 %v7903_v60, %v7927_v18  ;;  %v7986_v63 = vld [vmem:[%s12397_s1 + $0x20] ss:$0 sm:$0xff] }
 0x11b   : > { %2004 = vst [vmem:[#allocation2 + $0x10] sm:$0xff] %v1798_v28  ;;  %v1031_v21 = vadd.f32 %v995_v10, %v952_v7  ;;  %v766_v22 = vld [vmem:[#allocation2 + $0x19] sm:$0xff]  ;;  %v458_v26 = vpop.f32.mrb[12].mxu0  ;;  %v7940_v28 = vmul.f32 %v7903_v60, %v7891_v46  ;;  %6744 = vmatprep.mubr.msk.f32.mxu1 %vm7119_vm0, %v12401_v8  ;;  %v1221_v29 = vmul.f32 %v7916_v15, %v1181_v11 }
 0x11c   : > { %v879_v23 = vld [vmem:[#allocation2 + $0x1a] sm:$0xff]  ;;  %v806_v32 = vmul.f32 %v7854_v27, %v766_v22  ;;  %648 = vst [vmem:[#allocation2 + $0x30] sm:$0xff] %v458_v26  ;;  %v6233_v34 = vpop.f32.mrb[13].mxu0  ;;  %6584 = vmatmul.mubr.f32.gmra.mrb[118].mxu0 %v7546_v51  ;;  %v954_v35 = vadd.f32 %v918_v13, %v841_v19  ;;  %v7990_v10 = vmul.f32 %v7862_v30, %v458_v26 }
 0x11d   : > { %v1069_v24 = vld [vmem:[#allocation2 + $0x1b] sm:$0xff]  ;;  %12609 = vst [vmem:[#allocation4_spill] sm:$0xff] %v7940_v28  ;;  %v1144_v50 = vadd.f32 %v1108_v54, %v1031_v21  ;;  %v996_v37 = vmul.f32 %v7887_v45, %v879_v23  ;;  %6586 = vmatprep.mubr.msk.f32.mxu0 %vm7119_vm0, %v12401_v8  ;;  %v7963_v42 = vpop.f32.mrb[12].mxu1  ;;  %v919_v43 = vmul.f32 %v7877_v39, %v879_v23 }
 0x11e   : > { %v1182_v33 = vld [vmem:[#allocation2 + $0x1c] sm:$0xff]  ;;  %v842_v3 = vadd.f32 %v806_v32, %v729_v49  ;;  %v1109_v44 = vmul.f32 %v7897_v48, %v1069_v24  ;;  %6745 = vmatmul.mubr.f32.gmra.mrb[118].mxu1 %v7546_v51  ;;  %v6394_v0 = vpop.f32.mrb[13].mxu1  ;;  %v7996_v12 = vmul.f32 %v7903_v60, %v7963_v42 }
 0x11f   : > { %2005 = vst [vmem:[#allocation2 + $0x18] sm:$0xff] %v7870_v36  ;;  %v1222_v47 = vmul.f32 %v7916_v15, %v1182_v33  ;;  %v7971_v36 = vld [vmem:[%s12397_s1 + $0x5] ss:$0 sm:$0xff]  ;;  %v1257_v1 = vadd.f32 %v1221_v29, %v1144_v50  ;;  %v1032_v2 = vadd.f32 %v996_v37, %v953_v31  ;;  %v7992_v11 = vpop.f32.mrb[14].mxu0  ;;  %6747 = vmatprep.mubr.msk.f32.mxu1 %vm7119_vm0, %v12401_v8  ;;  %v1486_v50 = vld [vmem:[#allocation2 + $0x26] sm:$0xff] }
 0x120   : > { %v767_v4 = vld [vmem:[#allocation2 + $0x21] sm:$0xff]  ;;  %v955_v14 = vadd.f32 %v919_v43, %v842_v3  ;;  %649 = vst [vmem:[#allocation2 + $0x38] sm:$0xff] %v7992_v11  ;;  %v6236_v5 = vpop.f32.mrb[15].mxu0  ;;  %6587 = vmatmul.mubr.f32.gmra.mrb[120].mxu0 %v7555_v52  ;;  %v1526_v0 = vmul.f32 %v7986_v63, %v1486_v50 }
 0x121   : > { %v880_v7 = vld [vmem:[#allocation2 + $0x22] sm:$0xff]  ;;  %v807_v19 = vmul.f32 %v7854_v27, %v767_v4  ;;  %v1145_v13 = vadd.f32 %v1109_v44, %v1032_v2  ;;  %6589 = vmatprep.mubr.msk.f32.mxu0 %vm7119_vm0, %v12401_v8  ;;  %v8010_v29 = vpop.f32.mrb[14].mxu1 }
 0x122   : > { %v1070_v9 = vld [vmem:[#allocation2 + $0x23] sm:$0xff]  ;;  %v920_v21 = vmul.f32 %v7877_v39, %v880_v7  ;;  %v997_v54 = vmul.f32 %v7887_v45, %v880_v7  ;;  %6748 = vmatmul.mubr.f32.gmra.mrb[120].mxu1 %v7555_v52  ;;  %v6397_v37 = vpop.f32.mrb[15].mxu1 }
 0x123   : > { %v2124_v51 = vld [vmem:[#allocation2 + $0x9] sm:$0xff]  ;;  %v1110_v24 = vmul.f32 %v7897_v48, %v1070_v9  ;;  %v843_v31 = vadd.f32 %v807_v19, %v730_v20  ;;  %v1258_v3 = vadd.f32 %v1222_v47, %v1145_v13  ;;  %6750 = vmatprep.mubr.msk.f32.mxu1 %vm7119_vm0, %v12401_v8 }
 0x124   : > { %v2237_v49 = vld [vmem:[#allocation2 + $0xa] sm:$0xff]  ;;  %v2164_v22 = vmul.f32 %v7971_v36, %v2124_v51  ;;  %v1033_v32 = vadd.f32 %v997_v54, %v954_v35  ;;  %v8019_v35 = vpop.f32.mrb[16].mxu0  ;;  %6590 = vmatmul.mubr.f32.gmra.mrb[122].mxu0 %v7564_v53 }
 0x125   : > { %v1183_v61 = vld [vmem:[#allocation2 + $0x24] sm:$0xff]  ;;  %v2277_v23 = vmul.f32 %v7976_v59, %v2237_v49  ;;  %v8023_v7 = vadd.f32 %v920_v21, %v843_v31  ;;  %v1184_v9 = vld [vmem:[#allocation2 + $0x2c] sm:$0xff]  ;;  %650 = vst [vmem:[#allocation2 + $0x40] sm:$0xff] %v8019_v35  ;;  %v6239_v51 = vpop.f32.mrb[17].mxu0  ;;  %6592 = vmatprep.mubr.msk.f32.mxu0 %vm7119_vm0, %v12401_v8 }
 0x126   : > { %v1373_v26 = vld [vmem:[#allocation2 + $0x25] sm:$0xff]  ;;  %v1223_v33 = vmul.f32 %v7916_v15, %v1183_v61  ;;  %v1300_v34 = vmul.f32 %v7954_v40, %v1183_v61  ;;  %v2200_v43 = vadd.f32 %v2164_v22, %v7920_v16  ;;  %v1374_v16 = vld [vmem:[#allocation2 + $0x2d] sm:$0xff]  ;;  %6751 = vmatmul.mubr.f32.gmra.mrb[122].mxu1 %v7564_v53  ;;  %v1301_v50 = vmul.f32 %v7954_v40, %v1184_v9 }
 0x127   : > { %2006 = vst [vmem:[#allocation2 + $0x20] sm:$0xff] %v7891_v46  ;;  %v1413_v44 = vmul.f32 %v7981_v62, %v1373_v26  ;;  %v768_v2 = vld [vmem:[#allocation2 + $0x29] sm:$0xff]  ;;  %v1146_v46 = vadd.f32 %v1110_v24, %v1033_v32  ;;  %v1414_v31 = vmul.f32 %v7981_v62, %v1374_v16  ;;  %v1072_v37 = vld [vmem:[#allocation2 + $0x33] sm:$0xff]  ;;  %6753 = vmatprep.mubr.msk.f32.mxu1 %vm7119_vm0, %v12401_v8 }
 0x128   : > { %v881_v4 = vld [vmem:[#allocation2 + $0x2a] sm:$0xff]  ;;  %v1336_v52 = vadd.f32 %v1300_v34, %v1257_v1  ;;  %v808_v47 = vmul.f32 %v7854_v27, %v768_v2  ;;  %v8028_v49 = vadd.f32 %v2277_v23, %v2200_v43  ;;  %v8035_v1 = vpop.f32.mrb[16].mxu1  ;;  %v1224_v23 = vmul.f32 %v7916_v15, %v1184_v9  ;;  %v882_v34 = vld [vmem:[#allocation2 + $0x32] sm:$0xff]  ;;  %v8051_v43 = vpop.f32.mrb[18].mxu0  ;;  %6593 = vmatmul.mubr.f32.gmra.mrb[124].mxu0 %v7573_v55 }
 0x129   : > { %v1071_v20 = vld [vmem:[#allocation2 + $0x2b] sm:$0xff]  ;;  %v921_v19 = vmul.f32 %v7877_v39, %v881_v4  ;;  %v998_v54 = vmul.f32 %v7887_v45, %v881_v4  ;;  %12610 = vst [vmem:[#allocation5_spill] sm:$0xff] %v8035_v1  ;;  %v8037_v5 = vadd.f32 %v1223_v33, %v1146_v46  ;;  %v6400_v24 = vpop.f32.mrb[17].mxu1  ;;  %v1185_v2 = vld [vmem:[#allocation2 + $0x34] sm:$0xff]  ;;  %651 = vst [vmem:[#allocation2 + $0x48] sm:$0xff] %v8051_v43  ;;  %v6242_v46 = vpop.f32.mrb[19].mxu0  ;;  %6595 = vmatprep.mubr.msk.f32.mxu0 %vm7119_vm0, %v12401_v8 }
 0x12a   : > { %v1111_v21 = vmul.f32 %v7897_v48, %v1071_v20  ;;  %v1487_v61 = vld [vmem:[#allocation2 + $0x2e] sm:$0xff]  ;;  %v1449_v13 = vadd.f32 %v1413_v44, %v1336_v52  ;;  %v844_v22 = vadd.f32 %v808_v47, %v7949_v38  ;;  %v8049_v33 = vld [vmem:[%s12397_s1 + $0xd] ss:$0 sm:$0xff]  ;;  %v1488_v20 = vld [vmem:[#allocation2 + $0x36] sm:$0xff]  ;;  %v1337_v47 = vadd.f32 %v1301_v50, %v1258_v3  ;;  %6754 = vmatmul.mubr.f32.gmra.mrb[124].mxu1 %v7573_v55 }
 0x12b   : > { %2007 = vst [vmem:[#allocation2 + $0x28] sm:$0xff] %v7927_v18  ;;  %v1034_v26 = vadd.f32 %v998_v54, %v955_v14  ;;  %v1527_v32 = vmul.f32 %v7986_v63, %v1487_v61  ;;  %12611 = vst [vmem:[#allocation6_spill] sm:$0xff] %v8049_v33  ;;  %v769_v38 = vld [vmem:[#allocation2 + $0x31] sm:$0xff]  ;;  %v8059_v14 = vmul.f32 %v7862_v30, %v7992_v11  ;;  %6756 = vmatprep.mubr.msk.f32.mxu1 %vm7119_vm0, %v12401_v8 }
 0x12c   : > { %v1562_v53 = vadd.f32 %v1526_v0, %v1449_v13  ;;  %v8055_v18 = vadd.f32 %v921_v19, %v844_v22  ;;  %v809_v44 = vmul.f32 %v7854_v27, %v769_v38  ;;  %v1375_v4 = vld [vmem:[#allocation2 + $0x35] sm:$0xff]  ;;  %v922_v51 = vmul.f32 %v7877_v39, %v882_v34  ;;  %v8069_v19 = vpop.f32.mrb[18].mxu1  ;;  %v8078_v13 = vld [vmem:[%s12397_s1 + $0x11] ss:$0 sm:$0xff]  ;;  %6596 = vmatmul.mubr.f32.gmra.mrb[126].mxu0 %v7582_v56 }
 0x12d   : > { %v1147_v52 = vadd.f32 %v1111_v21, %v1034_v26  ;;  %v999_v11 = vmul.f32 %v7887_v45, %v882_v34  ;;  %2008 = vst [vmem:[#allocation2 + $0x30] sm:$0xff] %v7963_v42  ;;  %12612 = vst [vmem:[#allocation7_spill] sm:$0xff] %v8069_v19  ;;  %v8083_v42 = vld [vmem:[%s12397_s1 + $0x15] ss:$0 sm:$0xff]  ;;  %v6403_v24 = vpop.f32.mrb[19].mxu1  ;;  %v1450_v50 = vadd.f32 %v1414_v31, %v1337_v47  ;;  %v883_v46 = vld [vmem:[#allocation2 + $0x3a] sm:$0xff] }
 0x12e   : > { %v2126_v9 = vld [vmem:[#allocation2 + $0x19] sm:$0xff]  ;;  %v1634_v54 = vadd.f32 %v7654_v6, %v1562_v53  ;;  %v1112_v8 = vmul.f32 %v7897_v48, %v1072_v37  ;;  %6757 = vmatmul.mubr.f32.gmra.mrb[126].mxu1 %v7582_v56  ;;  %v8130_v56 = vmul.f32 %v7862_v30, %v8019_v35  ;;  %v1000_v35 = vmul.f32 %v7887_v45, %v883_v46 }
 0x12f   : > { %v2239_v0 = vld [vmem:[#allocation2 + $0x1a] sm:$0xff]  ;;  %v2166_v61 = vmul.f32 %v7971_v36, %v2126_v9  ;;  %v8086_v26 = vadd.f32 %v1224_v23, %v1147_v52  ;;  %v845_v23 = vadd.f32 %v809_v44, %v7990_v10  ;;  %v1035_v31 = vadd.f32 %v999_v11, %v8023_v7  ;;  %v8107_v7 = vpop.f32.mrb[20].mxu1 }
 0x130   : > { %v2429_v16 = vld [vmem:[#allocation2 + $0x1b] sm:$0xff]  ;;  %v2279_v3 = vmul.f32 %v7976_v59, %v2239_v0  ;;  %v2356_v21 = vmul.f32 %v8049_v33, %v2239_v0  ;;  %v8090_v0 = vpop.f32.mrb[20].mxu0  ;;  %1670 = vst [vmem:[%s7646_s25] sm:$0xff] %v1634_v54  ;;  %v1563_v24 = vadd.f32 %v1527_v32, %v1450_v50  ;;  %v1225_v54 = vmul.f32 %v7916_v15, %v1185_v2  ;;  %v6406_v37 = vpop.f32.mrb[21].mxu1 }
 0x131   : > { %v2542_v22 = vld [vmem:[#allocation2 + $0x1c] sm:$0xff]  ;;  %v2469_v38 = vmul.f32 %v8078_v13, %v2429_v16  ;;  %v2202_v28 = vadd.f32 %v2166_v61, %v7936_v25  ;;  %652 = vst [vmem:[#allocation2 + $0x50] sm:$0xff] %v8090_v0  ;;  %v1302_v25 = vmul.f32 %v7954_v40, %v1185_v2  ;;  %v12613_v10 = vmov 0.0   ;;  %12614 = vst [vmem:[#allocation8_spill] sm:$0xff] %v8107_v7 }
 0x132   : > { %v2582_v34 = vmul.f32 %v8083_v42, %v2542_v22  ;;  %v770_v53 = vld [vmem:[#allocation2 + $0x39] sm:$0xff]  ;;  %v2392_v55 = vadd.f32 %v2356_v21, %v8028_v49  ;;  %v6245_v22 = vpop.f32.mrb[21].mxu0  ;;  %6598 = vmatprep.mubr.msk.f32.mxu0 %vm7119_vm0, %v12613_v10  ;;  %v8111_v11 = vadd.f32 %v922_v51, %v845_v23  ;;  %v1415_v32 = vmul.f32 %v7981_v62, %v1375_v4 }
 0x133   : > { %v1073_v9 = vld [vmem:[#allocation2 + $0x3b] sm:$0xff]  ;;  %v8109_v49 = vadd.f32 %v2279_v3, %v2202_v28  ;;  %v8116_v61 = vadd.f32 %v7654_v6, %v1563_v24  ;;  %v1148_v2 = vadd.f32 %v1112_v8, %v1035_v31  ;;  %v1338_v21 = vadd.f32 %v1302_v25, %v8037_v5  ;;  %v8122_v28 = vpop.f32.mrb[22].mxu0  ;;  %6759 = vmatprep.mubr.msk.f32.mxu1 %vm7119_vm0, %v12613_v10  ;;  %v8146_v25 = vpop.f32.mrb[22].mxu1 }
 0x134   : > { %v1186_v52 = vld [vmem:[#allocation2 + $0x3c] sm:$0xff]  ;;  %v2505_v44 = vadd.f32 %v2469_v38, %v2392_v55  ;;  %v1528_v50 = vmul.f32 %v7986_v63, %v1488_v20  ;;  %12615 = vst [vmem:[#allocation9_spill] sm:$0xff] %v8122_v28  ;;  %v810_v4 = vmul.f32 %v7854_v27, %v770_v53  ;;  %v923_v8 = vmul.f32 %v7877_v39, %v883_v46  ;;  %v2128_v5 = vld [vmem:[#allocation2 + $0x29] sm:$0xff]  ;;  %v6248_v38 = vpop.f32.mrb[23].mxu0 }
 0x135   : > { %v1376_v47 = vld [vmem:[#allocation2 + $0x3d] sm:$0xff]  ;;  %653 = vst [vmem:[#allocation2 + $0x58] sm:$0xff] %v8122_v28  ;;  %6599 = vmatmul.mubr.f32.gmra.mrb[128].mxu0 %v7591_v57  ;;  %v1451_v55 = vadd.f32 %v1415_v32, %v1338_v21  ;;  %v1113_v23 = vmul.f32 %v7897_v48, %v1073_v9  ;;  %v2241_v53 = vld [vmem:[#allocation2 + $0x2a] sm:$0xff]  ;;  %12616 = vst [vmem:[#allocation10_spill] sm:$0xff] %v8146_v25  ;;  %v1226_v37 = vmul.f32 %v7916_v15, %v1186_v52  ;;  %v6409_v21 = vpop.f32.mrb[23].mxu1  ;;  %v8169_v25 = vpop.f32.mrb[24].mxu0 }
 0x136   : > { %v1489_v16 = vld [vmem:[#allocation2 + $0x3e] sm:$0xff]  ;;  %v8126_v51 = vadd.f32 %v2582_v34, %v2505_v44  ;;  %v8140_v34 = vadd.f32 %v1225_v54, %v1148_v2  ;;  %v2431_v31 = vld [vmem:[#allocation2 + $0x2b] sm:$0xff]  ;;  %6601 = vmatprep.mubr.msk.f32.mxu0 %vm7119_vm0, %v12613_v10  ;;  %v846_v44 = vadd.f32 %v810_v4, %v8059_v14  ;;  %v1303_v54 = vmul.f32 %v7954_v40, %v1186_v52  ;;  %v6251_v21 = vpop.f32.mrb[25].mxu0 }
 0x137   : > { %2009 = vst [vmem:[#allocation2 + $0x38] sm:$0xff] %v8010_v29  ;;  %v8120_v22 = vld [vmem:[#allocation2 + $0x41] sm:$0xff]  ;;  %v2544_v24 = vld [vmem:[#allocation2 + $0x2c] sm:$0xff]  ;;  %v1416_v32 = vmul.f32 %v7981_v62, %v1376_v47  ;;  %6760 = vmatmul.mubr.f32.gmra.mrb[128].mxu1 %v7591_v57  ;;  %v1564_v38 = vadd.f32 %v1528_v50, %v1451_v55  ;;  %v1036_v17 = vadd.f32 %v1000_v35, %v8055_v18  ;;  %12617 = vst [vmem:[#allocation11_spill] sm:$0xff] %v8169_v25  ;;  %v8196_v21 = vpop.f32.mrb[24].mxu1 }
 0x138   : > { %v8134_v3 = vld [vmem:[#allocation2 + $0x42] sm:$0xff]  ;;  %v1529_v14 = vmul.f32 %v7986_v63, %v1489_v16  ;;  %v2168_v4 = vmul.f32 %v7971_v36, %v2128_v5  ;;  %v8164_v52 = vld [vmem:[#allocation2 + $0x4a] sm:$0xff]  ;;  %6762 = vmatprep.mubr.msk.f32.mxu1 %vm7119_vm0, %v12613_v10  ;;  %v8173_v57 = vadd.f32 %v923_v8, %v846_v44  ;;  %v1339_v18 = vadd.f32 %v1303_v54, %v8086_v26  ;;  %v8181_v5 = vld [vmem:[%s12397_s1 + $0x19] ss:$0 sm:$0xff] }
 0x139   : > { %v8136_v20 = vld [vmem:[#allocation2 + $0x43] sm:$0xff]  ;;  %v8166_v47 = vld [vmem:[#allocation2 + $0x4b] sm:$0xff]  ;;  %v2281_v16 = vmul.f32 %v7976_v59, %v2241_v53  ;;  %v2358_v50 = vmul.f32 %v8049_v33, %v2241_v53  ;;  %12618 = vst [vmem:[#allocation12_spill] sm:$0xff] %v8181_v5  ;;  %654 = vst [vmem:[#allocation2 + $0x60] sm:$0xff] %v8169_v25  ;;  %6602 = vmatmul.mubr.f32.gmra.mrb[130].mxu0 %v7600_v58  ;;  %v1636_v8 = vadd.f32 %v7654_v6, %v1564_v38 }
 0x13a   : > { %v8152_v2 = vld [vmem:[#allocation2 + $0x44] sm:$0xff]  ;;  %v2734_v55 = vld [vmem:[#allocation2 + $0x2d] sm:$0xff]  ;;  %v1149_v44 = vadd.f32 %v1113_v23, %v1036_v17  ;;  %v2204_v26 = vadd.f32 %v2168_v4, %v7961_v41  ;;  %v2471_v53 = vmul.f32 %v8078_v13, %v2431_v31  ;;  %6604 = vmatprep.mubr.msk.f32.mxu0 %vm7119_vm0, %v12613_v10  ;;  %12619 = vst [vmem:[#allocation13_spill] sm:$0xff] %v8196_v21  ;;  %v8204_v23 = vld [vmem:[%s12397_s1 + $0x1d] ss:$0 sm:$0xff] }
 0x13b   : > { %v8154_v46 = vld [vmem:[#allocation2 + $0x45] sm:$0xff]  ;;  %v2847_v35 = vld [vmem:[#allocation2 + $0x2e] sm:$0xff]  ;;  %v1452_v25 = vadd.f32 %v1416_v32, %v1339_v18  ;;  %v2394_v38 = vadd.f32 %v2358_v50, %v8109_v49  ;;  %v2584_v17 = vmul.f32 %v8083_v42, %v2544_v24  ;;  %v2661_v41 = vmul.f32 %v8181_v5, %v2544_v24  ;;  %v8209_v31 = vld [vmem:[%s12397_s1 + $0x21] ss:$0 sm:$0xff]  ;;  %6763 = vmatmul.mubr.f32.gmra.mrb[130].mxu1 %v7600_v58  ;;  %v6412_v32 = vpop.f32.mrb[25].mxu1 }
 0x13c   : > { %v8156_v9 = vld [vmem:[#allocation2 + $0x46] sm:$0xff]  ;;  %1672 = vst [vmem:[%s7646_s25 + $0x10] sm:$0xff] %v1636_v8  ;;  %v8214_v49 = vadd.f32 %v1226_v37, %v1149_v44  ;;  %v8216_v4 = vadd.f32 %v2281_v16, %v2204_v26  ;;  %v2774_v24 = vmul.f32 %v8204_v23, %v2734_v55  ;;  %v2887_v18 = vmul.f32 %v8209_v31, %v2847_v35  ;;  %v8220_v50 = vld [vmem:[#allocation2 + $0x51] sm:$0xff] }
 0x13d   : > { %v8162_v28 = vld [vmem:[#allocation2 + $0x49] sm:$0xff]  ;;  %2010 = vst [vmem:[#allocation2 + $0x40] sm:$0xff] %v8035_v1  ;;  %v8222_v5 = vld [vmem:[#allocation2 + $0x52] sm:$0xff]  ;;  %6765 = vmatprep.mubr.msk.f32.mxu1 %vm7119_vm0, %v12613_v10  ;;  %v1565_v58 = vadd.f32 %v1529_v14, %v1452_v25  ;;  %v2507_v37 = vadd.f32 %v2471_v53, %v2394_v38  ;;  %v2697_v16 = vadd.f32 %v2661_v41, %v8126_v51  ;;  %v8254_v38 = vpop.f32.mrb[26].mxu1 }
 0x13e   : > { %v8188_v54 = vld [vmem:[#allocation2 + $0x4c] sm:$0xff]  ;;  %v8233_v55 = vmul.f32 %v7862_v30, %v8051_v43  ;;  %v8235_v35 = vld [vmem:[#allocation2 + $0x54] sm:$0xff]  ;;  %v811_v25 = vmul.f32 %v7854_v27, %v8120_v22  ;;  %v924_v51 = vmul.f32 %v7877_v39, %v8134_v3  ;;  %v1001_v43 = vmul.f32 %v7887_v45, %v8134_v3  ;;  %12623 = vst [vmem:[#allocation17_spill] sm:$0xff] %v8254_v38 }
 0x13f   : > { %v8190_v33 = vld [vmem:[#allocation2 + $0x4d] sm:$0xff]  ;;  %v8237_v8 = vld [vmem:[#allocation2 + $0x55] sm:$0xff]  ;;  %v1114_v14 = vmul.f32 %v7897_v48, %v8136_v20  ;;  %v8257_v41 = vadd.f32 %v7654_v6, %v1565_v58  ;;  %v8259_v22 = vadd.f32 %v2584_v17, %v2507_v37  ;;  %v1227_v3 = vmul.f32 %v7916_v15, %v8152_v2  ;;  %v6415_v20 = vpop.f32.mrb[27].mxu1  ;;  %v6951_v37 = vld [vmem:[%s7289_s20 + $0xc0] sm:$0xff] }
 0x140   : > { %v8192_v1 = vld [vmem:[#allocation2 + $0x4e] sm:$0xff]  ;;  %12621 = vst [vmem:[#allocation15_spill] sm:$0xff] %v8237_v8  ;;  %v8239_v44 = vld [vmem:[#allocation2 + $0x56] sm:$0xff]  ;;  %v1304_v8 = vmul.f32 %v7954_v40, %v8152_v2  ;;  %v1417_v6 = vmul.f32 %v7981_v62, %v8154_v46  ;;  %v1530_v58 = vmul.f32 %v7986_v63, %v8156_v9  ;;  %v925_v20 = vmul.f32 %v7877_v39, %v8164_v52 }
 0x141   : > { %2011 = vst [vmem:[#allocation2 + $0x48] sm:$0xff] %v8069_v19  ;;  %v8224_v21 = vld [vmem:[#allocation2 + $0x53] sm:$0xff]  ;;  %v8226_v19 = vpop.f32.mrb[26].mxu0  ;;  %12622 = vst [vmem:[#allocation16_spill] sm:$0xff] %v8239_v44  ;;  %v1037_v44 = vadd.f32 %v1001_v43, %v8111_v11  ;;  %v8297_v43 = vpop.f32.mrb[28].mxu1 }
 0x142   : > { %12620 = vst [vmem:[#allocation14_spill] sm:$0xff] %v8226_v19  ;;  %655 = vst [vmem:[#allocation2 + $0x68] sm:$0xff] %v8226_v19  ;;  %v6254_v26 = vpop.f32.mrb[27].mxu0  ;;  %v6950_v32 = vld [vmem:[%s7289_s20 + $0xb8] sm:$0xff] }
 0x143   : > { %6605 = vmatmul.mubr.f32.gmra.mrb[132].mxu0 %v6950_v32  ;;  %v2129_v53 = vld [vmem:[#allocation2 + $0x31] sm:$0xff]  ;;  %2012 = vst [vmem:[#allocation2 + $0x50] sm:$0xff] %v8107_v7  ;;  %v2810_v26 = vadd.f32 %v2774_v24, %v2697_v16  ;;  %6766 = vmatmul.mubr.f32.gmra.mrb[132].mxu1 %v6950_v32  ;;  %v847_v7 = vadd.f32 %v811_v25, %v8130_v56  ;;  %v8271_v17 = vpop.f32.mrb[28].mxu0  ;;  %v8289_v9 = vld [vmem:[#allocation2 + $0x59] sm:$0xff]  ;;  %12626 = vst [vmem:[#allocation20_spill] sm:$0xff] %v8297_v43 }
 0x144   : > { %6607 = vmatprep.mubr.msk.f32.mxu0 %vm7119_vm0, %v12613_v10  ;;  %v8263_v19 = vld [vmem:[#allocation2 + $0x32] sm:$0xff]  ;;  %12625 = vst [vmem:[#allocation19_spill] sm:$0xff] %v8271_v17  ;;  %6768 = vmatprep.mubr.msk.f32.mxu1 %vm7119_vm0, %v12613_v10  ;;  %v8279_v56 = vmul.f32 %v7903_v60, %v8010_v29  ;;  %v2169_v11 = vmul.f32 %v7971_v36, %v2129_v53  ;;  %656 = vst [vmem:[#allocation2 + $0x70] sm:$0xff] %v8271_v17  ;;  %v6257_v2 = vpop.f32.mrb[29].mxu0  ;;  %v8291_v25 = vld [vmem:[#allocation2 + $0x5a] sm:$0xff] }
 0x145   : > { %12624 = vst [vmem:[#allocation18_spill] sm:$0xff] %v8263_v19  ;;  %v2923_v24 = vadd.f32 %v2887_v18, %v2810_v26  ;;  %v8284_v46 = vadd.f32 %v924_v51, %v847_v7  ;;  %v1150_v16 = vadd.f32 %v1114_v14, %v1037_v44  ;;  %v1340_v32 = vadd.f32 %v1304_v8, %v8140_v34  ;;  %v8293_v29 = vld [vmem:[#allocation2 + $0x5b] sm:$0xff]  ;;  %v6418_v14 = vpop.f32.mrb[29].mxu1 }
 0x146   : > { %v2282_v18 = vmul.f32 %v7976_v59, %v8263_v19  ;;  %v2205_v44 = vadd.f32 %v2169_v11, %v7996_v12  ;;  %v8305_v34 = vmul.f32 %v7862_v30, %v8090_v0  ;;  %v812_v8 = vmul.f32 %v7854_v27, %v8162_v28  ;;  %v2130_v51 = vld [vmem:[#allocation2 + $0x39] sm:$0xff]  ;;  %v8321_v28 = vpop.f32.mrb[30].mxu0  ;;  %v6952_v14 = vld [vmem:[%s7289_s20 + $0xc8] sm:$0xff] }
 0x147   : > { %6608 = vmatmul.mubr.f32.gmra.mrb[134].mxu0 %v6951_v37  ;;  %v8300_v7 = vadd.f32 %v2923_v24, %v8116_v61  ;;  %6769 = vmatmul.mubr.f32.gmra.mrb[134].mxu1 %v6951_v37  ;;  %v8309_v53 = vadd.f32 %v1227_v3, %v1150_v16  ;;  %v1453_v26 = vadd.f32 %v1417_v6, %v1340_v32  ;;  %v8315_v61 = vld [vmem:[#allocation2 + $0x5c] sm:$0xff]  ;;  %v12631_v16 = vld [vmem:[#allocation10_spill] sm:$0xff]  ;;  %v6260_v32 = vpop.f32.mrb[31].mxu0 }
 0x148   : > { %6610 = vmatprep.mubr.msk.f32.mxu0 %vm7119_vm0, %v12613_v10  ;;  %v1002_v12 = vmul.f32 %v7887_v45, %v8164_v52  ;;  %v8317_v0 = vld [vmem:[#allocation2 + $0x5d] sm:$0xff]  ;;  %12630 = vst [vmem:[#allocation24_spill] sm:$0xff] %v8321_v28  ;;  %6771 = vmatprep.mubr.msk.f32.mxu1 %vm7119_vm0, %v12613_v10  ;;  %v8325_v3 = vadd.f32 %v2282_v18, %v2205_v44  ;;  %657 = vst [vmem:[#allocation2 + $0x78] sm:$0xff] %v8321_v28  ;;  %v8342_v28 = vpop.f32.mrb[30].mxu1 }
 0x149   : > { %12627 = vst [vmem:[#allocation21_spill] sm:$0xff] %v8300_v7  ;;  %12628 = vst [vmem:[#allocation22_spill] sm:$0xff] %v8317_v0  ;;  %v8319_v24 = vld [vmem:[#allocation2 + $0x5e] sm:$0xff]  ;;  %v848_v6 = vadd.f32 %v812_v8, %v8233_v55  ;;  %v1115_v11 = vmul.f32 %v7897_v48, %v8166_v47  ;;  %v1228_v52 = vmul.f32 %v7916_v15, %v8188_v54 }
 0x14a   : > { %12629 = vst [vmem:[#allocation23_spill] sm:$0xff] %v8319_v24  ;;  %v2243_v2 = vld [vmem:[#allocation2 + $0x3a] sm:$0xff]  ;;  %2013 = vst [vmem:[#allocation2 + $0x58] sm:$0xff] %v12631_v16  ;;  %v1566_v7 = vadd.f32 %v1530_v58, %v1453_v26  ;;  %v1038_v18 = vadd.f32 %v1002_v12, %v8173_v57  ;;  %v1305_v55 = vmul.f32 %v7954_v40, %v8188_v54  ;;  %v12633_v58 = vld [vmem:[#allocation5_spill] sm:$0xff]  ;;  %v6421_v16 = vpop.f32.mrb[31].mxu1 }
 0x14b   : > { %v2433_v37 = vld [vmem:[#allocation2 + $0x3b] sm:$0xff]  ;;  %6611 = vmatmul.mubr.f32.gmra.mrb[136].mxu0 %v6952_v14  ;;  %v1418_v47 = vmul.f32 %v7981_v62, %v8190_v33  ;;  %12632 = vst [vmem:[#allocation25_spill] sm:$0xff] %v8342_v28  ;;  %v8344_v32 = vadd.f32 %v925_v20, %v848_v6  ;;  %v1531_v57 = vmul.f32 %v7986_v63, %v8192_v1  ;;  %v8357_v17 = vld [vmem:[#allocation2 + $0x63] sm:$0xff]  ;;  %v12642_v16 = vld [vmem:[#allocation6_spill] sm:$0xff] }
 0x14c   : > { %v2546_v44 = vld [vmem:[#allocation2 + $0x3c] sm:$0xff]  ;;  %6613 = vmatprep.mubr.msk.f32.mxu0 %vm7119_vm0, %v12613_v10  ;;  %v8350_v54 = vmul.f32 %v7903_v60, %v12633_v58  ;;  %v2170_v26 = vmul.f32 %v7971_v36, %v2130_v51  ;;  %12636 = vst [vmem:[#allocation27_spill] sm:$0xff] %v8357_v17  ;;  %6772 = vmatmul.mubr.f32.gmra.mrb[136].mxu1 %v6952_v14  ;;  %v8360_v24 = vld [vmem:[%s7646_s25 + $0x48] sm:$0xff]  ;;  %v8373_v17 = vpop.f32.mrb[32].mxu0 }
 0x14d   : > { %v2736_v8 = vld [vmem:[#allocation2 + $0x3d] sm:$0xff]  ;;  %v8363_v20 = vadd.f32 %v8360_v24, %v1566_v7  ;;  %v1151_v1 = vadd.f32 %v1115_v11, %v1038_v18  ;;  %v1341_v6 = vadd.f32 %v1305_v55, %v8214_v49  ;;  %v2283_v58 = vmul.f32 %v7976_v59, %v2243_v2  ;;  %12641 = vst [vmem:[#allocation32_spill] sm:$0xff] %v8373_v17  ;;  %v8381_v18 = vld [vmem:[#allocation2 + $0x69] sm:$0xff] }
 0x14e   : > { %v2849_v19 = vld [vmem:[#allocation2 + $0x3e] sm:$0xff]  ;;  %6774 = vmatprep.mubr.msk.f32.mxu1 %vm7119_vm0, %v12613_v10  ;;  %v2206_v7 = vadd.f32 %v2170_v26, %v8279_v56  ;;  %v2360_v11 = vmul.f32 %v12642_v16, %v2243_v2  ;;  %v2473_v49 = vmul.f32 %v8078_v13, %v2433_v37  ;;  %v2586_v14 = vmul.f32 %v8083_v42, %v2546_v44  ;;  %v8383_v55 = vld [vmem:[#allocation2 + $0x6a] sm:$0xff] }
 0x14f   : > { %v8353_v33 = vld [vmem:[#allocation2 + $0x61] sm:$0xff]  ;;  %12637 = vst [vmem:[#allocation28_spill] sm:$0xff] %v8363_v20  ;;  %12643 = vst [vmem:[#allocation6_spill] sm:$0xff] %v8381_v18  ;;  %v8385_v20 = vld [vmem:[#allocation2 + $0x6b] sm:$0xff]  ;;  %v8390_v56 = vadd.f32 %v1228_v52, %v1151_v1  ;;  %v1454_v2 = vadd.f32 %v1418_v47, %v1341_v6  ;;  %v2776_v0 = vmul.f32 %v8204_v23, %v2736_v8 }
 0x150   : > { %12634 = vst [vmem:[#allocation5_spill] sm:$0xff] %v8353_v33  ;;  %v8355_v12 = vld [vmem:[#allocation2 + $0x62] sm:$0xff]  ;;  %12644 = vst [vmem:[#allocation33_spill] sm:$0xff] %v8383_v55  ;;  %v8394_v28 = vld [vmem:[#allocation2 + $0x6c] sm:$0xff]  ;;  %v2396_v52 = vadd.f32 %v2360_v11, %v8216_v4  ;;  %v2889_v47 = vmul.f32 %v8209_v31, %v2849_v19  ;;  %v926_v4 = vmul.f32 %v7877_v39, %v8222_v5 }
 0x151   : > { %12635 = vst [vmem:[#allocation26_spill] sm:$0xff] %v8355_v12  ;;  %v8367_v51 = vld [vmem:[#allocation2 + $0x64] sm:$0xff]  ;;  %658 = vst [vmem:[#allocation2 + $0x80] sm:$0xff] %v8373_v17  ;;  %v8396_v18 = vld [vmem:[#allocation2 + $0x6d] sm:$0xff]  ;;  %v8402_v17 = vpop.f32.mrb[32].mxu1  ;;  %v1567_v6 = vadd.f32 %v1531_v57, %v1454_v2  ;;  %v1116_v57 = vmul.f32 %v7897_v48, %v8224_v21  ;;  %v1306_v21 = vmul.f32 %v7954_v40, %v8235_v35 }
 0x152   : > { %12638 = vst [vmem:[#allocation29_spill] sm:$0xff] %v8367_v51  ;;  %v8369_v33 = vld [vmem:[#allocation2 + $0x65] sm:$0xff]  ;;  %v6954_v51 = vld [vmem:[%s7289_s20 + $0xd0] sm:$0xff]  ;;  %12649 = vst [vmem:[#allocation35_spill] sm:$0xff] %v8402_v17  ;;  %v6424_v1 = vpop.f32.mrb[33].mxu1  ;;  %v2509_v11 = vadd.f32 %v2473_v49, %v2396_v52 }
 0x153   : > { %12639 = vst [vmem:[#allocation30_spill] sm:$0xff] %v8369_v33  ;;  %v8371_v12 = vld [vmem:[#allocation2 + $0x66] sm:$0xff]  ;;  %v6263_v33 = vpop.f32.mrb[33].mxu0  ;;  %6614 = vmatmul.mubr.f32.gmra.mrb[138].mxu0 %v6954_v51  ;;  %v8398_v55 = vld [vmem:[#allocation2 + $0x6e] sm:$0xff]  ;;  %6775 = vmatmul.mubr.f32.gmra.mrb[138].mxu1 %v6954_v51  ;;  %v1003_v51 = vmul.f32 %v7887_v45, %v8222_v5  ;;  %v8433_v49 = vadd.f32 %v8360_v24, %v1567_v6 }
 0x154   : > { %12640 = vst [vmem:[#allocation31_spill] sm:$0xff] %v8371_v12  ;;  %v12645_v12 = vld [vmem:[#allocation13_spill] sm:$0xff]  ;;  %v12646_v26 = vld [vmem:[#allocation12_spill] sm:$0xff]  ;;  %12648 = vst [vmem:[#allocation34_spill] sm:$0xff] %v8398_v55  ;;  %6616 = vmatprep.mubr.msk.f32.mxu0 %vm7119_vm0, %v12613_v10  ;;  %v8404_v33 = vadd.f32 %v2283_v58, %v2206_v7  ;;  %v813_v58 = vmul.f32 %v7854_v27, %v8220_v50  ;;  %v8418_v19 = vpop.f32.mrb[34].mxu0  ;;  %6777 = vmatprep.mubr.msk.f32.mxu1 %vm7119_vm0, %v12613_v10 }
 0x155   : > { %2014 = vst [vmem:[#allocation2 + $0x60] sm:$0xff] %v12645_v12  ;;  %v2663_v37 = vmul.f32 %v12646_v26, %v2546_v44  ;;  %12647 = vst [vmem:[#allocation12_spill] sm:$0xff] %v8396_v18  ;;  %v12650_v44 = vld [vmem:[#allocation9_spill] sm:$0xff]  ;;  %v8438_v1 = vld [vmem:[#allocation2 + $0x71] sm:$0xff] }
 0x156   : > { %v8410_v8 = vmul.f32 %v7862_v30, %v12650_v44  ;;  %2015 = vst [vmem:[#allocation2 + $0x68] sm:$0xff] %v8254_v38  ;;  %v2131_v7 = vld [vmem:[#allocation2 + $0x41] sm:$0xff]  ;;  %12651 = vst [vmem:[#allocation9_spill] sm:$0xff] %v8418_v19  ;;  %v6955_v44 = vld [vmem:[%s7289_s20 + $0xd8] sm:$0xff]  ;;  %v849_v5 = vadd.f32 %v813_v58, %v8305_v34 }
 0x157   : > { %v2699_v12 = vadd.f32 %v2663_v37, %v8259_v22  ;;  %v1229_v22 = vmul.f32 %v7916_v15, %v8235_v35  ;;  %v2244_v27 = vld [vmem:[#allocation2 + $0x42] sm:$0xff]  ;;  %659 = vst [vmem:[#allocation2 + $0x88] sm:$0xff] %v8418_v19  ;;  %v6266_v37 = vpop.f32.mrb[35].mxu0  ;;  %6617 = vmatmul.mubr.f32.gmra.mrb[140].mxu0 %v6955_v44  ;;  %12653 = vst [vmem:[#allocation37_spill] sm:$0xff] %v8438_v1  ;;  %v8440_v38 = vld [vmem:[#allocation2 + $0x72] sm:$0xff]  ;;  %v8448_v19 = vadd.f32 %v2586_v14, %v2509_v11 }
 0x158   : > { %v2434_v50 = vld [vmem:[#allocation2 + $0x43] sm:$0xff]  ;;  %12654 = vst [vmem:[#allocation38_spill] sm:$0xff] %v8440_v38  ;;  %v8442_v55 = vld [vmem:[#allocation2 + $0x73] sm:$0xff]  ;;  %6619 = vmatprep.mubr.msk.f32.mxu0 %vm7119_vm0, %v12613_v10  ;;  %v8446_v37 = vpop.f32.mrb[34].mxu1  ;;  %6778 = vmatmul.mubr.f32.gmra.mrb[140].mxu1 %v6955_v44  ;;  %v8461_v14 = vadd.f32 %v926_v4, %v849_v5  ;;  %v2171_v44 = vmul.f32 %v7971_v36, %v2131_v7 }
 0x159   : > { %v8428_v2 = vld [vmem:[#allocation2 + $0x44] sm:$0xff]  ;;  %v2812_v52 = vadd.f32 %v2776_v0, %v2699_v12  ;;  %12655 = vst [vmem:[#allocation39_spill] sm:$0xff] %v8442_v55  ;;  %12656 = vst [vmem:[#allocation40_spill] sm:$0xff] %v8446_v37  ;;  %v1039_v0 = vadd.f32 %v1003_v51, %v8284_v46  ;;  %v12657_v12 = vld [vmem:[#allocation15_spill] sm:$0xff]  ;;  %v6427_v1 = vpop.f32.mrb[35].mxu1  ;;  %v1342_v46 = vadd.f32 %v1306_v21, %v8309_v53  ;;  %6780 = vmatprep.mubr.msk.f32.mxu1 %vm7119_vm0, %v12613_v10 }
 0x15a   : > { %12652 = vst [vmem:[#allocation36_spill] sm:$0xff] %v8428_v2  ;;  %v1419_v34 = vmul.f32 %v7981_v62, %v12657_v12  ;;  %v12658_v6 = vld [vmem:[#allocation16_spill] sm:$0xff]  ;;  %v8455_v58 = vld [vmem:[#allocation2 + $0x74] sm:$0xff]  ;;  %v8469_v12 = vpop.f32.mrb[36].mxu0  ;;  %v2361_v4 = vmul.f32 %v12642_v16, %v2244_v27  ;;  %v2474_v1 = vmul.f32 %v8078_v13, %v2434_v50  ;;  %v8486_v7 = vpop.f32.mrb[36].mxu1 }
 0x15b   : > { %v1532_v35 = vmul.f32 %v7986_v63, %v12658_v6  ;;  %v8457_v38 = vld [vmem:[#allocation2 + $0x75] sm:$0xff]  ;;  %v2925_v18 = vadd.f32 %v2889_v47, %v2812_v52  ;;  %12660 = vst [vmem:[#allocation15_spill] sm:$0xff] %v8469_v12  ;;  %v1152_v6 = vadd.f32 %v1116_v57, %v1039_v0  ;;  %v2284_v47 = vmul.f32 %v7976_v59, %v2244_v27  ;;  %v6269_v53 = vpop.f32.mrb[37].mxu0  ;;  %v6956_v52 = vld [vmem:[%s7289_s20 + $0xe0] sm:$0xff]  ;;  %v6430_v50 = vpop.f32.mrb[37].mxu1 }
 0x15c   : > { %v8459_v55 = vld [vmem:[#allocation2 + $0x76] sm:$0xff]  ;;  %660 = vst [vmem:[#allocation2 + $0x90] sm:$0xff] %v8469_v12  ;;  %6620 = vmatmul.mubr.f32.gmra.mrb[142].mxu0 %v6956_v52  ;;  %v1455_v21 = vadd.f32 %v1419_v34, %v1342_v46  ;;  %v2587_v57 = vmul.f32 %v8083_v42, %v8428_v2  ;;  %v2207_v0 = vadd.f32 %v2171_v44, %v8350_v54  ;;  %v8499_v46 = vld [vmem:[%s12397_s1 + $0x4] ss:$0 sm:$0xff]  ;;  %v8513_v44 = vpop.f32.mrb[38].mxu0  ;;  %v6958_v50 = vld [vmem:[%s7289_s20 + $0xe8] sm:$0xff] }
 0x15d   : > { %v12659_v11 = vld [vmem:[#allocation7_spill] sm:$0xff]  ;;  %2016 = vst [vmem:[#allocation2 + $0x70] sm:$0xff] %v8297_v43  ;;  %v8479_v5 = vadd.f32 %v2925_v18, %v8257_v41  ;;  %6622 = vmatprep.mubr.msk.f32.mxu0 %vm7119_vm0, %v12613_v10  ;;  %v8488_v27 = vadd.f32 %v1229_v22, %v1152_v6  ;;  %v2132_v18 = vld [vmem:[#allocation2 + $0x49] sm:$0xff]  ;;  %6781 = vmatmul.mubr.f32.gmra.mrb[142].mxu1 %v6956_v52  ;;  %12667 = vst [vmem:[#allocation43_spill] sm:$0xff] %v8513_v44 }
 0x15e   : > { %v8466_v51 = vmul.f32 %v7903_v60, %v12659_v11  ;;  %12662 = vst [vmem:[#allocation7_spill] sm:$0xff] %v8486_v7  ;;  %v2397_v11 = vadd.f32 %v2361_v4, %v8325_v3  ;;  %v12663_v53 = vld [vmem:[#allocation11_spill] sm:$0xff]  ;;  %v1568_v34 = vadd.f32 %v1532_v35, %v1455_v21  ;;  %v814_v22 = vmul.f32 %v8499_v46, %v8289_v9  ;;  %v8557_v12 = vld [vmem:[#allocation2 + $0x83] sm:$0xff] }
 0x15f   : > { %12661 = vst [vmem:[#allocation16_spill] sm:$0xff] %v8479_v5  ;;  %v8494_v41 = vmul.f32 %v7862_v30, %v12663_v53  ;;  %v927_v54 = vmul.f32 %v7877_v39, %v8291_v25  ;;  %v1004_v30 = vmul.f32 %v7887_v45, %v8291_v25  ;;  %v8507_v3 = vld [vmem:[#allocation2 + $0x79] sm:$0xff]  ;;  %6783 = vmatprep.mubr.msk.f32.mxu1 %vm7119_vm0, %v12613_v10  ;;  %661 = vst [vmem:[#allocation2 + $0x98] sm:$0xff] %v8513_v44  ;;  %v6272_v53 = vpop.f32.mrb[39].mxu0  ;;  %v12671_v5 = vld [vmem:[#allocation25_spill] sm:$0xff] }
 0x160   : > { %12664 = vst [vmem:[#allocation11_spill] sm:$0xff] %v8507_v3  ;;  %v8509_v6 = vld [vmem:[#allocation2 + $0x7a] sm:$0xff]  ;;  %v8517_v4 = vadd.f32 %v2284_v47, %v2207_v0  ;;  %v2510_v9 = vadd.f32 %v2474_v1, %v2397_v11  ;;  %v1117_v39 = vmul.f32 %v7897_v48, %v8293_v29  ;;  %v1230_v45 = vmul.f32 %v7916_v15, %v8315_v61  ;;  %v2245_v29 = vld [vmem:[#allocation2 + $0x4a] sm:$0xff]  ;;  %v8541_v53 = vpop.f32.mrb[38].mxu1  ;;  %v8555_v44 = vld [vmem:[#allocation2 + $0x82] sm:$0xff] }
 0x161   : > { %12665 = vst [vmem:[#allocation41_spill] sm:$0xff] %v8509_v6  ;;  %v8511_v35 = vld [vmem:[#allocation2 + $0x7b] sm:$0xff]  ;;  %6623 = vmatmul.mubr.f32.gmra.mrb[144].mxu0 %v6958_v50  ;;  %v8532_v47 = vadd.f32 %v8360_v24, %v1568_v34  ;;  %v850_v1 = vadd.f32 %v814_v22, %v8410_v8  ;;  %v1040_v48 = vadd.f32 %v1004_v30, %v8344_v32  ;;  %v2435_v0 = vld [vmem:[#allocation2 + $0x4b] sm:$0xff] }
 0x162   : > { %12666 = vst [vmem:[#allocation42_spill] sm:$0xff] %v8511_v35  ;;  %v8523_v25 = vld [vmem:[#allocation2 + $0x7c] sm:$0xff]  ;;  %v1307_v15 = vmul.f32 %v7954_v40, %v8315_v61  ;;  %v2548_v11 = vld [vmem:[#allocation2 + $0x4c] sm:$0xff]  ;;  %6625 = vmatprep.mubr.msk.f32.mxu0 %vm7119_vm0, %v12613_v10  ;;  %v8543_v2 = vadd.f32 %v2587_v57, %v2510_v9  ;;  %6784 = vmatmul.mubr.f32.gmra.mrb[144].mxu1 %v6958_v50 }
 0x163   : > { %12668 = vst [vmem:[#allocation44_spill] sm:$0xff] %v8523_v25  ;;  %v8525_v52 = vld [vmem:[#allocation2 + $0x7d] sm:$0xff]  ;;  %v12672_v34 = vld [vmem:[#allocation22_spill] sm:$0xff]  ;;  %v8559_v57 = vadd.f32 %v927_v54, %v850_v1  ;;  %v1153_v9 = vadd.f32 %v1117_v39, %v1040_v48  ;;  %6786 = vmatprep.mubr.msk.f32.mxu1 %vm7119_vm0, %v12613_v10  ;;  %v2362_v50 = vmul.f32 %v12642_v16, %v2245_v29 }
 0x164   : > { %12669 = vst [vmem:[#allocation45_spill] sm:$0xff] %v8525_v52  ;;  %v8527_v21 = vld [vmem:[#allocation2 + $0x7e] sm:$0xff]  ;;  %v1420_v8 = vmul.f32 %v7981_v62, %v12672_v34  ;;  %v1343_v62 = vadd.f32 %v1307_v15, %v8390_v56  ;;  %v2738_v34 = vld [vmem:[#allocation2 + $0x4d] sm:$0xff]  ;;  %v2588_v54 = vmul.f32 %v8083_v42, %v2548_v11 }
 0x165   : > { %12670 = vst [vmem:[#allocation46_spill] sm:$0xff] %v8527_v21  ;;  %2017 = vst [vmem:[#allocation2 + $0x78] sm:$0xff] %v12671_v5  ;;  %v12673_v22 = vld [vmem:[#allocation23_spill] sm:$0xff]  ;;  %v12674_v30 = vld [vmem:[#allocation8_spill] sm:$0xff]  ;;  %v6433_v5 = vpop.f32.mrb[39].mxu1  ;;  %v8579_v48 = vadd.f32 %v1230_v45, %v1153_v9  ;;  %v2398_v45 = vadd.f32 %v2362_v50, %v8404_v33 }
 0x166   : > { %v1533_v32 = vmul.f32 %v7986_v63, %v12673_v22  ;;  %v8551_v40 = vmul.f32 %v7903_v60, %v12674_v30  ;;  %v8553_v61 = vld [vmem:[#allocation2 + $0x81] sm:$0xff]  ;;  %12676 = vst [vmem:[#allocation23_spill] sm:$0xff] %v8555_v44  ;;  %12677 = vst [vmem:[#allocation8_spill] sm:$0xff] %v8557_v12  ;;  %v2172_v63 = vmul.f32 %v7971_v36, %v2132_v18  ;;  %v2851_v22 = vld [vmem:[#allocation2 + $0x4e] sm:$0xff]  ;;  %v8563_v60 = vpop.f32.mrb[40].mxu0 }
 0x167   : > { %12675 = vst [vmem:[#allocation22_spill] sm:$0xff] %v8553_v61  ;;  %12678 = vst [vmem:[#allocation47_spill] sm:$0xff] %v8563_v60  ;;  %v2285_v30 = vmul.f32 %v7976_v59, %v2245_v29  ;;  %v2475_v5 = vmul.f32 %v8078_v13, %v2435_v0  ;;  %v8571_v39 = vld [vmem:[#allocation2 + $0x84] sm:$0xff]  ;;  %v6275_v18 = vpop.f32.mrb[41].mxu0  ;;  %v6959_v1 = vld [vmem:[%s7289_s20 + $0xf0] sm:$0xff]  ;;  %v1456_v59 = vadd.f32 %v1420_v8, %v1343_v62 }
 0x168   : > { %12679 = vst [vmem:[#allocation48_spill] sm:$0xff] %v8571_v39  ;;  %v8573_v56 = vld [vmem:[#allocation2 + $0x85] sm:$0xff]  ;;  %662 = vst [vmem:[#allocation2 + $0xa0] sm:$0xff] %v8563_v60  ;;  %6626 = vmatmul.mubr.f32.gmra.mrb[146].mxu0 %v6959_v1  ;;  %v2208_v15 = vadd.f32 %v2172_v63, %v8466_v51  ;;  %v2665_v29 = vmul.f32 %v12646_v26, %v2548_v11  ;;  %v8592_v18 = vpop.f32.mrb[40].mxu1  ;;  %v2778_v8 = vmul.f32 %v8204_v23, %v2738_v34  ;;  %v8600_v11 = vld [vmem:[%s12397_s1] ss:$0 sm:$0xff] }
 0x169   : > { %12680 = vst [vmem:[#allocation49_spill] sm:$0xff] %v8573_v56  ;;  %v8575_v36 = vld [vmem:[#allocation2 + $0x86] sm:$0xff]  ;;  %6628 = vmatprep.mubr.msk.f32.mxu0 %vm7119_vm0, %v12613_v10  ;;  %v2891_v51 = vmul.f32 %v8209_v31, %v2851_v22  ;;  %v12685_v9 = vld [vmem:[#allocation14_spill] sm:$0xff]  ;;  %6787 = vmatmul.mubr.f32.gmra.mrb[146].mxu1 %v6959_v1  ;;  %v6436_v33 = vpop.f32.mrb[41].mxu1  ;;  %v1569_v34 = vadd.f32 %v1533_v32, %v1456_v59  ;;  %v12692_v59 = vld [vmem:[#allocation27_spill] sm:$0xff] }
 0x16a   : > { %12681 = vst [vmem:[#allocation50_spill] sm:$0xff] %v8575_v36  ;;  %v8583_v0 = vld [vmem:[#allocation2 + $0x89] sm:$0xff]  ;;  %2018 = vst [vmem:[#allocation2 + $0x80] sm:$0xff] %v8402_v17  ;;  %v8604_v62 = vmul.f32 %v8600_v11, %v12685_v9  ;;  %v8612_v50 = vadd.f32 %v2285_v30, %v2208_v15  ;;  %v2701_v22 = vadd.f32 %v2665_v29, %v8448_v19  ;;  %v8618_v9 = vpop.f32.mrb[42].mxu0  ;;  %6789 = vmatprep.mubr.msk.f32.mxu1 %vm7119_vm0, %v12613_v10  ;;  %v8625_v32 = vld [vmem:[%s12397_s1 + $0x8] ss:$0 sm:$0xff] }
 0x16b   : > { %12682 = vst [vmem:[#allocation51_spill] sm:$0xff] %v8583_v0  ;;  %v8585_v12 = vld [vmem:[#allocation2 + $0x8a] sm:$0xff]  ;;  %v8647_v33 = vld [vmem:[#allocation2 + $0x93] sm:$0xff]  ;;  %663 = vst [vmem:[#allocation2 + $0xa8] sm:$0xff] %v8618_v9 }
 0x16c   : > { %12683 = vst [vmem:[#allocation52_spill] sm:$0xff] %v8585_v12  ;;  %v8587_v39 = vld [vmem:[#allocation2 + $0x8b] sm:$0xff]  ;;  %12695 = vst [vmem:[#allocation56_spill] sm:$0xff] %v8647_v33  ;;  %v2436_v56 = vld [vmem:[#allocation2 + $0x53] sm:$0xff] }
 0x16d   : > { %12684 = vst [vmem:[#allocation53_spill] sm:$0xff] %v8587_v39  ;;  %v8606_v63 = vld [vmem:[#allocation2 + $0x8c] sm:$0xff]  ;;  %v12701_v52 = vld [vmem:[#allocation31_spill] sm:$0xff] }
 0x16e   : > { %12686 = vst [vmem:[#allocation14_spill] sm:$0xff] %v8606_v63  ;;  %v8608_v60 = vld [vmem:[#allocation2 + $0x8d] sm:$0xff]  ;;  %v2814_v63 = vadd.f32 %v2778_v8, %v2701_v22  ;;  %v8679_v22 = vld [vmem:[%s12397_s1 + $0x1c] ss:$0 sm:$0xff] }
 0x16f   : > { %12687 = vst [vmem:[#allocation54_spill] sm:$0xff] %v8608_v60  ;;  %v8610_v17 = vld [vmem:[#allocation2 + $0x8e] sm:$0xff]  ;;  %v6964_v60 = vld [vmem:[%s7289_s20 + $0xf8] sm:$0xff] }
 0x170   : > { %12688 = vst [vmem:[#allocation55_spill] sm:$0xff] %v8610_v17  ;;  %v12689_v39 = vld [vmem:[#allocation5_spill] sm:$0xff]  ;;  %v2133_v0 = vld [vmem:[#allocation2 + $0x51] sm:$0xff]  ;;  %2019 = vst [vmem:[#allocation2 + $0x88] sm:$0xff] %v8446_v37  ;;  %v2511_v17 = vadd.f32 %v2475_v5, %v2398_v45  ;;  %v6278_v37 = vpop.f32.mrb[43].mxu0  ;;  %6629 = vmatmul.mubr.f32.gmra.mrb[148].mxu0 %v6964_v60  ;;  %6790 = vmatmul.mubr.f32.gmra.mrb[148].mxu1 %v6964_v60  ;;  %v2927_v43 = vadd.f32 %v2891_v51, %v2814_v63 }
 0x171   : > { %v815_v12 = vmul.f32 %v8499_v46, %v12689_v39  ;;  %12690 = vst [vmem:[#allocation5_spill] sm:$0xff] %v8618_v9  ;;  %v12691_v30 = vld [vmem:[#allocation26_spill] sm:$0xff]  ;;  %v8632_v39 = vld [vmem:[%s12397_s1 + $0xc] ss:$0 sm:$0xff]  ;;  %6631 = vmatprep.mubr.msk.f32.mxu0 %vm7119_vm0, %v12613_v10  ;;  %v8664_v37 = vpop.f32.mrb[42].mxu1  ;;  %6792 = vmatprep.mubr.msk.f32.mxu1 %vm7119_vm0, %v12613_v10 }
 0x172   : > { %v928_v19 = vmul.f32 %v8625_v32, %v12691_v30  ;;  %v1005_v1 = vmul.f32 %v8632_v39, %v12691_v30  ;;  %v8639_v5 = vld [vmem:[%s12397_s1 + $0x10] ss:$0 sm:$0xff]  ;;  %v8643_v29 = vld [vmem:[#allocation2 + $0x91] sm:$0xff]  ;;  %v8652_v30 = vadd.f32 %v8360_v24, %v1569_v34  ;;  %v8666_v34 = vadd.f32 %v2588_v54, %v2511_v17  ;;  %v8716_v63 = vld [vmem:[%s12397_s1 + $0x5] ss:$0 sm:$0xff] }
 0x173   : > { %v1118_v15 = vmul.f32 %v8639_v5, %v12692_v59  ;;  %12693 = vst [vmem:[#allocation26_spill] sm:$0xff] %v8643_v29  ;;  %v8645_v45 = vld [vmem:[#allocation2 + $0x92] sm:$0xff]  ;;  %v851_v36 = vadd.f32 %v815_v12, %v8494_v41  ;;  %v12696_v29 = vld [vmem:[#allocation29_spill] sm:$0xff] }
 0x174   : > { %12694 = vst [vmem:[#allocation27_spill] sm:$0xff] %v8645_v45  ;;  %v8658_v59 = vld [vmem:[%s12397_s1 + $0x14] ss:$0 sm:$0xff]  ;;  %v1041_v12 = vadd.f32 %v1005_v1, %v8461_v14  ;;  %v8672_v41 = vld [vmem:[%s12397_s1 + $0x18] ss:$0 sm:$0xff]  ;;  %v6439_v1 = vpop.f32.mrb[43].mxu1 }
 0x175   : > { %v1231_v45 = vmul.f32 %v8658_v59, %v12696_v29  ;;  %v2246_v33 = vld [vmem:[#allocation2 + $0x52] sm:$0xff]  ;;  %v1308_v8 = vmul.f32 %v8672_v41, %v12696_v29  ;;  %v8689_v21 = vadd.f32 %v928_v19, %v851_v36  ;;  %v8694_v29 = vld [vmem:[%s12397_s1 + $0x20] ss:$0 sm:$0xff]  ;;  %v8708_v36 = vpop.f32.mrb[44].mxu0  ;;  %v2173_v19 = vmul.f32 %v8716_v63, %v2133_v0  ;;  %v8735_v35 = vpop.f32.mrb[44].mxu1 }
 0x176   : > { %v2549_v9 = vld [vmem:[#allocation2 + $0x54] sm:$0xff]  ;;  %v1534_v25 = vmul.f32 %v8694_v29, %v12701_v52  ;;  %12703 = vst [vmem:[#allocation31_spill] sm:$0xff] %v8708_v36  ;;  %v1154_v51 = vadd.f32 %v1118_v15, %v1041_v12  ;;  %664 = vst [vmem:[#allocation2 + $0xb0] sm:$0xff] %v8708_v36  ;;  %v6281_v15 = vpop.f32.mrb[45].mxu0  ;;  %v8728_v12 = vadd.f32 %v2927_v43, %v8433_v49 }
 0x177   : > { %v12697_v44 = vld [vmem:[#allocation30_spill] sm:$0xff]  ;;  %v1344_v52 = vadd.f32 %v1308_v8, %v8488_v27  ;;  %v6972_v27 = vld [vmem:[%s7289_s20 + $0x100] sm:$0xff]  ;;  %v2363_v8 = vmul.f32 %v12642_v16, %v2246_v33  ;;  %v2476_v0 = vmul.f32 %v8078_v13, %v2436_v56  ;;  %v2209_v15 = vadd.f32 %v2173_v19, %v8551_v40  ;;  %v6442_v13 = vpop.f32.mrb[45].mxu1 }
 0x178   : > { %v1421_v61 = vmul.f32 %v8679_v22, %v12697_v44  ;;  %v8683_v17 = vld [vmem:[#allocation2 + $0x94] sm:$0xff]  ;;  %v8701_v44 = vld [vmem:[%s12397_s1 + $0x1] ss:$0 sm:$0xff]  ;;  %6632 = vmatmul.mubr.f32.gmra.mrb[150].mxu0 %v6972_v27  ;;  %v8737_v6 = vadd.f32 %v1231_v45, %v1154_v51  ;;  %v2666_v3 = vmul.f32 %v12646_v26, %v2549_v9  ;;  %6793 = vmatmul.mubr.f32.gmra.mrb[150].mxu1 %v6972_v27  ;;  %v6973_v13 = vld [vmem:[%s7289_s20 + $0x108] sm:$0xff] }
 0x179   : > { %12698 = vst [vmem:[#allocation29_spill] sm:$0xff] %v8683_v17  ;;  %v8685_v54 = vld [vmem:[#allocation2 + $0x95] sm:$0xff]  ;;  %v2589_v17 = vmul.f32 %v8083_v42, %v2549_v9  ;;  %6634 = vmatprep.mubr.msk.f32.mxu0 %vm7119_vm0, %v12613_v10  ;;  %v2399_v42 = vadd.f32 %v2363_v8, %v8517_v4  ;;  %v8754_v9 = vpop.f32.mrb[46].mxu0  ;;  %6795 = vmatprep.mubr.msk.f32.mxu1 %vm7119_vm0, %v12613_v10  ;;  %v8767_v27 = vld [vmem:[#allocation2 + $0x9e] sm:$0xff] }
 0x17a   : > { %12699 = vst [vmem:[#allocation30_spill] sm:$0xff] %v8685_v54  ;;  %v8687_v14 = vld [vmem:[#allocation2 + $0x96] sm:$0xff]  ;;  %v1457_v36 = vadd.f32 %v1421_v61, %v1344_v52  ;;  %v2702_v52 = vadd.f32 %v2666_v3, %v8543_v2  ;;  %12711 = vst [vmem:[#allocation60_spill] sm:$0xff] %v8767_v27  ;;  %v6284_v8 = vpop.f32.mrb[47].mxu0  ;;  %v1119_v3 = vmul.f32 %v8639_v5, %v8385_v20  ;;  %v8788_v20 = vld [vmem:[#allocation2 + $0xa1] sm:$0xff] }
 0x17b   : > { %12700 = vst [vmem:[#allocation57_spill] sm:$0xff] %v8687_v14  ;;  %v12702_v14 = vld [vmem:[#allocation10_spill] sm:$0xff]  ;;  %2020 = vst [vmem:[#allocation2 + $0x90] sm:$0xff] %v8486_v7  ;;  %v8741_v43 = vld [vmem:[#allocation2 + $0x99] sm:$0xff]  ;;  %v8780_v8 = vpop.f32.mrb[46].mxu1 }
 0x17c   : > { %v8705_v60 = vmul.f32 %v8701_v44, %v12702_v14  ;;  %v8722_v14 = vld [vmem:[%s12397_s1 + $0x9] ss:$0 sm:$0xff]  ;;  %v2739_v7 = vld [vmem:[#allocation2 + $0x55] sm:$0xff]  ;;  %12704 = vst [vmem:[#allocation10_spill] sm:$0xff] %v8728_v12  ;;  %665 = vst [vmem:[#allocation2 + $0xb8] sm:$0xff] %v8754_v9  ;;  %6635 = vmatmul.mubr.f32.gmra.mrb[152].mxu0 %v6973_v13  ;;  %6796 = vmatmul.mubr.f32.gmra.mrb[152].mxu1 %v6973_v13 }
 0x17d   : > { %v2286_v1 = vmul.f32 %v8722_v14, %v2246_v33  ;;  %v2852_v54 = vld [vmem:[#allocation2 + $0x56] sm:$0xff]  ;;  %v2779_v56 = vmul.f32 %v8204_v23, %v2739_v7  ;;  %v1570_v33 = vadd.f32 %v1534_v25, %v1457_v36  ;;  %v12712_v25 = vld [vmem:[#allocation33_spill] sm:$0xff]  ;;  %6637 = vmatprep.mubr.msk.f32.mxu0 %vm7119_vm0, %v12613_v10  ;;  %6798 = vmatprep.mubr.msk.f32.mxu1 %vm7119_vm0, %v12613_v10 }
 0x17e   : > { %v8743_v49 = vld [vmem:[#allocation2 + $0x9a] sm:$0xff]  ;;  %v2892_v45 = vmul.f32 %v8209_v31, %v2852_v54  ;;  %v12708_v19 = vld [vmem:[#allocation6_spill] sm:$0xff]  ;;  %v929_v36 = vmul.f32 %v8625_v32, %v12712_v25  ;;  %v1006_v2 = vmul.f32 %v8632_v39, %v12712_v25  ;;  %v1232_v25 = vmul.f32 %v8658_v59, %v8394_v28  ;;  %12713 = vst [vmem:[#allocation33_spill] sm:$0xff] %v8788_v20  ;;  %v8792_v27 = vld [vmem:[#allocation2 + $0xa3] sm:$0xff]  ;;  %v8801_v20 = vpop.f32.mrb[48].mxu0 }
 0x17f   : > { %v8745_v16 = vld [vmem:[#allocation2 + $0x9b] sm:$0xff]  ;;  %v8758_v51 = vadd.f32 %v2286_v1, %v2209_v15  ;;  %v816_v4 = vmul.f32 %v8499_v46, %v12708_v19  ;;  %12715 = vst [vmem:[#allocation62_spill] sm:$0xff] %v8792_v27  ;;  %v8817_v27 = vld [vmem:[#allocation2 + $0xa6] sm:$0xff]  ;;  %666 = vst [vmem:[#allocation2 + $0xc0] sm:$0xff] %v8801_v20 }
 0x180   : > { %12705 = vst [vmem:[#allocation58_spill] sm:$0xff] %v8745_v16  ;;  %v12706_v61 = vld [vmem:[#allocation19_spill] sm:$0xff]  ;;  %12722 = vst [vmem:[#allocation63_spill] sm:$0xff] %v8817_v27  ;;  %v6974_v16 = vld [vmem:[%s7289_s20 + $0x110] sm:$0xff] }
 0x181   : > { %v8752_v40 = vmul.f32 %v8600_v11, %v12706_v61  ;;  %12707 = vst [vmem:[#allocation19_spill] sm:$0xff] %v8754_v9  ;;  %v8763_v7 = vld [vmem:[#allocation2 + $0x9c] sm:$0xff]  ;;  %v2512_v61 = vadd.f32 %v2476_v0, %v2399_v42  ;;  %v8783_v0 = vadd.f32 %v8360_v24, %v1570_v33  ;;  %v2815_v42 = vadd.f32 %v2779_v56, %v2702_v52 }
 0x182   : > { %12709 = vst [vmem:[#allocation6_spill] sm:$0xff] %v8763_v7  ;;  %v8765_v54 = vld [vmem:[#allocation2 + $0x9d] sm:$0xff]  ;;  %v852_v12 = vadd.f32 %v816_v4, %v8604_v62  ;;  %v1042_v7 = vadd.f32 %v1006_v2, %v8559_v57  ;;  %v1309_v24 = vmul.f32 %v8672_v41, %v8394_v28  ;;  %v12719_v2 = vld [vmem:[#allocation13_spill] sm:$0xff]  ;;  %6638 = vmatmul.mubr.f32.gmra.mrb[154].mxu0 %v6974_v16 }
 0x183   : > { %12710 = vst [vmem:[#allocation59_spill] sm:$0xff] %v8765_v54  ;;  %v2134_v1 = vld [vmem:[#allocation2 + $0x59] sm:$0xff]  ;;  %2021 = vst [vmem:[#allocation2 + $0x98] sm:$0xff] %v8541_v53  ;;  %v8790_v9 = vld [vmem:[#allocation2 + $0xa2] sm:$0xff]  ;;  %v6445_v53 = vpop.f32.mrb[47].mxu1  ;;  %v8794_v54 = vadd.f32 %v2589_v17, %v2512_v61  ;;  %v2928_v13 = vadd.f32 %v2892_v45, %v2815_v42  ;;  %v8811_v28 = vmul.f32 %v8701_v44, %v12719_v2  ;;  %6640 = vmatprep.mubr.msk.f32.mxu0 %vm7119_vm0, %v12613_v10 }
 0x184   : > { %v2247_v15 = vld [vmem:[#allocation2 + $0x5a] sm:$0xff]  ;;  %12714 = vst [vmem:[#allocation61_spill] sm:$0xff] %v8790_v9  ;;  %v8805_v17 = vadd.f32 %v929_v36, %v852_v12  ;;  %v12718_v61 = vld [vmem:[#allocation34_spill] sm:$0xff]  ;;  %v8813_v53 = vld [vmem:[#allocation2 + $0xa4] sm:$0xff]  ;;  %v6287_v9 = vpop.f32.mrb[49].mxu0  ;;  %v1155_v12 = vadd.f32 %v1119_v3, %v1042_v7  ;;  %v1345_v45 = vadd.f32 %v1309_v24, %v8579_v48  ;;  %v2174_v36 = vmul.f32 %v8716_v63, %v2134_v1 }
 0x185   : > { %v2437_v19 = vld [vmem:[#allocation2 + $0x5b] sm:$0xff]  ;;  %v1535_v57 = vmul.f32 %v8694_v29, %v12718_v61  ;;  %12720 = vst [vmem:[#allocation34_spill] sm:$0xff] %v8813_v53  ;;  %v2287_v42 = vmul.f32 %v8722_v14, %v2247_v15  ;;  %v8824_v61 = vld [vmem:[#allocation2 + $0xa9] sm:$0xff]  ;;  %v8833_v9 = vpop.f32.mrb[48].mxu1  ;;  %v8836_v48 = vadd.f32 %v2928_v13, %v8532_v47  ;;  %v8853_v24 = vld [vmem:[%s12397_s1 + $0x15] ss:$0 sm:$0xff]  ;;  %6799 = vmatmul.mubr.f32.gmra.mrb[154].mxu1 %v6974_v16 }
 0x186   : > { %v12716_v56 = vld [vmem:[#allocation12_spill] sm:$0xff]  ;;  %12723 = vst [vmem:[#allocation64_spill] sm:$0xff] %v8824_v61  ;;  %v8826_v2 = vld [vmem:[#allocation2 + $0xaa] sm:$0xff]  ;;  %v2210_v61 = vadd.f32 %v2174_v36, %v8705_v60  ;;  %6801 = vmatprep.mubr.msk.f32.mxu1 %vm7119_vm0, %v12613_v10 }
 0x187   : > { %v1422_v62 = vmul.f32 %v8679_v22, %v12716_v56  ;;  %v2550_v33 = vld [vmem:[#allocation2 + $0x5c] sm:$0xff]  ;;  %12717 = vst [vmem:[#allocation12_spill] sm:$0xff] %v8801_v20  ;;  %v8815_v56 = vld [vmem:[#allocation2 + $0xa5] sm:$0xff]  ;;  %12724 = vst [vmem:[#allocation65_spill] sm:$0xff] %v8826_v2 }
 0x188   : > { %v2740_v52 = vld [vmem:[#allocation2 + $0x5d] sm:$0xff]  ;;  %12721 = vst [vmem:[#allocation13_spill] sm:$0xff] %v8815_v56  ;;  %v8828_v53 = vld [vmem:[#allocation2 + $0xab] sm:$0xff]  ;;  %2022 = vst [vmem:[#allocation2 + $0xa0] sm:$0xff] %v8592_v18  ;;  %v2590_v47 = vmul.f32 %v8853_v24, %v2550_v33  ;;  %v2667_v27 = vmul.f32 %v12646_v26, %v2550_v33  ;;  %v8868_v56 = vpop.f32.mrb[50].mxu0  ;;  %v8887_v36 = vadd.f32 %v2287_v42, %v2210_v61 }
 0x189   : > { %v2853_v4 = vld [vmem:[#allocation2 + $0x5e] sm:$0xff]  ;;  %12725 = vst [vmem:[#allocation66_spill] sm:$0xff] %v8828_v53  ;;  %12726 = vst [vmem:[#allocation67_spill] sm:$0xff] %v8836_v48  ;;  %v8841_v7 = vld [vmem:[%s12397_s1 + $0xd] ss:$0 sm:$0xff]  ;;  %v8862_v53 = vadd.f32 %v1232_v25, %v1155_v12  ;;  %v1458_v2 = vadd.f32 %v1422_v62, %v1345_v45  ;;  %v2780_v16 = vmul.f32 %v8204_v23, %v2740_v52  ;;  %v6290_v33 = vpop.f32.mrb[51].mxu0 }
 0x18a   : > { %v2364_v3 = vmul.f32 %v8841_v7, %v2247_v15  ;;  %v8847_v18 = vld [vmem:[%s12397_s1 + $0x11] ss:$0 sm:$0xff]  ;;  %v6448_v15 = vpop.f32.mrb[49].mxu1  ;;  %12728 = vst [vmem:[#allocation69_spill] sm:$0xff] %v8868_v56  ;;  %v2893_v25 = vmul.f32 %v8209_v31, %v2853_v4  ;;  %v12729_v62 = vld [vmem:[#allocation24_spill] sm:$0xff]  ;;  %v8881_v26 = vld [vmem:[#allocation2 + $0xb2] sm:$0xff]  ;;  %v2703_v52 = vadd.f32 %v2667_v27, %v8666_v34 }
 0x18b   : > { %v2477_v1 = vmul.f32 %v8847_v18, %v2437_v19  ;;  %v8856_v13 = vld [vmem:[#allocation2 + $0xac] sm:$0xff]  ;;  %v8877_v12 = vmul.f32 %v8600_v11, %v12729_v62  ;;  %12731 = vst [vmem:[#allocation70_spill] sm:$0xff] %v8881_v26  ;;  %667 = vst [vmem:[#allocation2 + $0xc8] sm:$0xff] %v8868_v56  ;;  %v6978_v45 = vld [vmem:[%s7289_s20 + $0x118] sm:$0xff]  ;;  %v8894_v15 = vpop.f32.mrb[50].mxu1 }
 0x18c   : > { %v8858_v48 = vld [vmem:[#allocation2 + $0xad] sm:$0xff]  ;;  %6641 = vmatmul.mubr.f32.gmra.mrb[156].mxu0 %v6978_v45  ;;  %v8904_v34 = vld [vmem:[#allocation2 + $0xb5] sm:$0xff]  ;;  %6802 = vmatmul.mubr.f32.gmra.mrb[156].mxu1 %v6978_v45  ;;  %v2135_v26 = vld [vmem:[#allocation2 + $0x61] sm:$0xff] }
 0x18d   : > { %v8860_v20 = vld [vmem:[#allocation2 + $0xae] sm:$0xff]  ;;  %6643 = vmatprep.mubr.msk.f32.mxu0 %vm7119_vm0, %v12613_v10  ;;  %v8906_v27 = vld [vmem:[#allocation2 + $0xb6] sm:$0xff]  ;;  %6804 = vmatprep.mubr.msk.f32.mxu1 %vm7119_vm0, %v12613_v10 }
 0x18e   : > { %12727 = vst [vmem:[#allocation68_spill] sm:$0xff] %v8860_v20  ;;  %v1607_v19 = vld [vmem:[%s7646_s25 + $0x48] sm:$0xff]  ;;  %2023 = vst [vmem:[#allocation2 + $0xa8] sm:$0xff] %v8664_v37  ;;  %v2400_v20 = vadd.f32 %v2364_v3, %v8612_v50  ;;  %v8879_v60 = vld [vmem:[#allocation2 + $0xb1] sm:$0xff]  ;;  %v1571_v50 = vadd.f32 %v1535_v57, %v1458_v2  ;;  %v6451_v2 = vpop.f32.mrb[51].mxu1 }
 0x18f   : > { %12730 = vst [vmem:[#allocation24_spill] sm:$0xff] %v8879_v60  ;;  %v8883_v37 = vld [vmem:[#allocation2 + $0xb3] sm:$0xff]  ;;  %v12733_v4 = vld [vmem:[#allocation37_spill] sm:$0xff] }
 0x190   : > { %12732 = vst [vmem:[#allocation71_spill] sm:$0xff] %v8883_v37  ;;  %v817_v3 = vmul.f32 %v8499_v46, %v12733_v4  ;;  %v2513_v62 = vadd.f32 %v2477_v1, %v2400_v20  ;;  %v12734_v37 = vld [vmem:[#allocation38_spill] sm:$0xff]  ;;  %v12735_v57 = vld [vmem:[#allocation39_spill] sm:$0xff]  ;;  %12736 = vst [vmem:[#allocation37_spill] sm:$0xff] %v8904_v34  ;;  %v8908_v4 = vadd.f32 %v1607_v19, %v1571_v50 }
 0x191   : > { %v930_v56 = vmul.f32 %v8625_v32, %v12734_v37  ;;  %v1007_v33 = vmul.f32 %v8632_v39, %v12734_v37  ;;  %v1120_v42 = vmul.f32 %v8639_v5, %v12735_v57  ;;  %v8902_v61 = vld [vmem:[#allocation2 + $0xb4] sm:$0xff]  ;;  %12737 = vst [vmem:[#allocation38_spill] sm:$0xff] %v8906_v27  ;;  %v2816_v20 = vadd.f32 %v2780_v16, %v2703_v52  ;;  %v2248_v60 = vld [vmem:[#allocation2 + $0x62] sm:$0xff]  ;;  %v8914_v57 = vpop.f32.mrb[52].mxu0 }
 0x192   : > { %v853_v1 = vadd.f32 %v817_v3, %v8752_v40  ;;  %v1233_v37 = vmul.f32 %v8658_v59, %v8455_v58  ;;  %2024 = vst [vmem:[#allocation2 + $0xb0] sm:$0xff] %v8735_v35  ;;  %12738 = vst [vmem:[#allocation39_spill] sm:$0xff] %v8914_v57  ;;  %v8918_v45 = vadd.f32 %v2590_v47, %v2513_v62  ;;  %v2438_v50 = vld [vmem:[#allocation2 + $0x63] sm:$0xff]  ;;  %v6293_v35 = vpop.f32.mrb[53].mxu0 }
 0x193   : > { %v1043_v19 = vadd.f32 %v1007_v33, %v8689_v21  ;;  %v1310_v16 = vmul.f32 %v8672_v41, %v8455_v58  ;;  %v1423_v40 = vmul.f32 %v8679_v22, %v8457_v38  ;;  %v2551_v52 = vld [vmem:[#allocation2 + $0x64] sm:$0xff]  ;;  %668 = vst [vmem:[#allocation2 + $0xd0] sm:$0xff] %v8914_v57  ;;  %v2929_v2 = vadd.f32 %v2893_v25, %v2816_v20  ;;  %v8937_v38 = vpop.f32.mrb[52].mxu1  ;;  %v8942_v20 = vld [vmem:[#allocation2 + $0xb9] sm:$0xff] }
 0x194   : > { %v6979_v3 = vld [vmem:[%s7289_s20 + $0x120] sm:$0xff]  ;;  %v8927_v27 = vadd.f32 %v930_v56, %v853_v1  ;;  %v1536_v47 = vmul.f32 %v8694_v29, %v8459_v55  ;;  %v12739_v21 = vld [vmem:[#allocation17_spill] sm:$0xff]  ;;  %v2175_v56 = vmul.f32 %v8716_v63, %v2135_v26  ;;  %v2288_v25 = vmul.f32 %v8722_v14, %v2248_v60 }
 0x195   : > { %6644 = vmatmul.mubr.f32.gmra.mrb[158].mxu0 %v6979_v3  ;;  %v8933_v62 = vmul.f32 %v8701_v44, %v12739_v21  ;;  %v2741_v58 = vld [vmem:[#allocation2 + $0x65] sm:$0xff]  ;;  %v1156_v35 = vadd.f32 %v1120_v42, %v1043_v19  ;;  %v1346_v57 = vadd.f32 %v1310_v16, %v8737_v6  ;;  %12740 = vst [vmem:[#allocation17_spill] sm:$0xff] %v8942_v20  ;;  %v8944_v55 = vld [vmem:[#allocation2 + $0xba] sm:$0xff]  ;;  %v6454_v21 = vpop.f32.mrb[53].mxu1  ;;  %v8954_v19 = vpop.f32.mrb[54].mxu0 }
 0x196   : > { %v2854_v33 = vld [vmem:[#allocation2 + $0x66] sm:$0xff]  ;;  %6646 = vmatprep.mubr.msk.f32.mxu0 %vm7119_vm0, %v12613_v10  ;;  %12741 = vst [vmem:[#allocation72_spill] sm:$0xff] %v8944_v55  ;;  %v8946_v1 = vld [vmem:[#allocation2 + $0xbb] sm:$0xff]  ;;  %6805 = vmatmul.mubr.f32.gmra.mrb[158].mxu1 %v6979_v3  ;;  %v8949_v34 = vadd.f32 %v2929_v2, %v8652_v30  ;;  %v2365_v42 = vmul.f32 %v8841_v7, %v2248_v60  ;;  %12744 = vst [vmem:[#allocation75_spill] sm:$0xff] %v8954_v19 }
 0x197   : > { %12742 = vst [vmem:[#allocation73_spill] sm:$0xff] %v8946_v1  ;;  %v2478_v6 = vmul.f32 %v8847_v18, %v2438_v50  ;;  %v2591_v26 = vmul.f32 %v8853_v24, %v2551_v52  ;;  %6807 = vmatprep.mubr.msk.f32.mxu1 %vm7119_vm0, %v12613_v10  ;;  %v8958_v16 = vadd.f32 %v1233_v37, %v1156_v35  ;;  %v8964_v30 = vld [vmem:[%s12397_s1 + $0x19] ss:$0 sm:$0xff]  ;;  %v8967_v50 = vld [vmem:[#allocation2 + $0xbc] sm:$0xff]  ;;  %669 = vst [vmem:[#allocation2 + $0xd8] sm:$0xff] %v8954_v19  ;;  %v6296_v37 = vpop.f32.mrb[55].mxu0 }
 0x198   : > { %12743 = vst [vmem:[#allocation74_spill] sm:$0xff] %v8949_v34  ;;  %v1459_v3 = vadd.f32 %v1423_v40, %v1346_v57  ;;  %v2211_v21 = vadd.f32 %v2175_v56, %v8811_v28  ;;  %v2668_v60 = vmul.f32 %v8964_v30, %v2551_v52  ;;  %12745 = vst [vmem:[#allocation76_spill] sm:$0xff] %v8967_v50  ;;  %v8969_v2 = vld [vmem:[#allocation2 + $0xbd] sm:$0xff]  ;;  %v6981_v35 = vld [vmem:[%s7289_s20 + $0x128] sm:$0xff]  ;;  %v8986_v19 = vpop.f32.mrb[54].mxu1 }
 0x199   : > { %12746 = vst [vmem:[#allocation77_spill] sm:$0xff] %v8969_v2  ;;  %v8971_v34 = vld [vmem:[#allocation2 + $0xbe] sm:$0xff]  ;;  %6647 = vmatmul.mubr.f32.gmra.mrb[160].mxu0 %v6981_v35  ;;  %v1608_v57 = vld [vmem:[%s7646_s25 + $0x50] sm:$0xff]  ;;  %v2401_v28 = vadd.f32 %v2365_v42, %v8758_v51  ;;  %v2781_v40 = vmul.f32 %v8204_v23, %v2741_v58  ;;  %v2894_v56 = vmul.f32 %v8209_v31, %v2854_v33  ;;  %v12753_v2 = vld [vmem:[#allocation41_spill] sm:$0xff] }
 0x19a   : > { %12747 = vst [vmem:[#allocation78_spill] sm:$0xff] %v8971_v34  ;;  %v12748_v1 = vld [vmem:[#allocation32_spill] sm:$0xff]  ;;  %2025 = vst [vmem:[#allocation2 + $0xb8] sm:$0xff] %v8780_v8  ;;  %6649 = vmatprep.mubr.msk.f32.mxu0 %vm7119_vm0, %v12613_v10  ;;  %v1572_v37 = vadd.f32 %v1536_v47, %v1459_v3  ;;  %v8988_v34 = vadd.f32 %v2288_v25, %v2211_v21  ;;  %v2704_v51 = vadd.f32 %v2668_v60, %v8794_v54  ;;  %v12749_v42 = vld [vmem:[#allocation11_spill] sm:$0xff]  ;;  %v6457_v8 = vpop.f32.mrb[55].mxu1 }
 0x19b   : > { %v8981_v52 = vmul.f32 %v8600_v11, %v12748_v1  ;;  %v818_v23 = vmul.f32 %v8499_v46, %v12749_v42  ;;  %v8993_v31 = vld [vmem:[#allocation2 + $0xc1] sm:$0xff]  ;;  %6808 = vmatmul.mubr.f32.gmra.mrb[160].mxu1 %v6981_v35  ;;  %v2514_v1 = vadd.f32 %v2478_v6, %v2401_v28  ;;  %v931_v50 = vmul.f32 %v8625_v32, %v12753_v2  ;;  %v12754_v25 = vld [vmem:[#allocation42_spill] sm:$0xff]  ;;  %v9005_v42 = vpop.f32.mrb[56].mxu0 }
 0x19c   : > { %12750 = vst [vmem:[#allocation32_spill] sm:$0xff] %v8993_v31  ;;  %v8995_v58 = vld [vmem:[#allocation2 + $0xc2] sm:$0xff]  ;;  %v1008_v47 = vmul.f32 %v8632_v39, %v12753_v2  ;;  %v1121_v54 = vmul.f32 %v8639_v5, %v12754_v25  ;;  %v2249_v21 = vld [vmem:[#allocation2 + $0x6a] sm:$0xff]  ;;  %12755 = vst [vmem:[#allocation41_spill] sm:$0xff] %v9005_v42  ;;  %6810 = vmatprep.mubr.msk.f32.mxu1 %vm7119_vm0, %v12613_v10  ;;  %v9009_v35 = vadd.f32 %v1608_v57, %v1572_v37  ;;  %v6299_v31 = vpop.f32.mrb[57].mxu0 }
 0x19d   : > { %12751 = vst [vmem:[#allocation11_spill] sm:$0xff] %v8995_v58  ;;  %v8997_v33 = vld [vmem:[#allocation2 + $0xc3] sm:$0xff]  ;;  %v2439_v60 = vld [vmem:[#allocation2 + $0x6b] sm:$0xff]  ;;  %v2817_v6 = vadd.f32 %v2781_v40, %v2704_v51  ;;  %v854_v28 = vadd.f32 %v818_v23, %v8877_v12  ;;  %670 = vst [vmem:[#allocation2 + $0xe0] sm:$0xff] %v9005_v42  ;;  %v9022_v20 = vadd.f32 %v2591_v26, %v2514_v1  ;;  %v9036_v26 = vpop.f32.mrb[56].mxu1 }
 0x19e   : > { %12752 = vst [vmem:[#allocation79_spill] sm:$0xff] %v8997_v33  ;;  %v2136_v3 = vld [vmem:[#allocation2 + $0x69] sm:$0xff]  ;;  %v12756_v8 = vld [vmem:[#allocation44_spill] sm:$0xff]  ;;  %v1044_v57 = vadd.f32 %v1008_v47, %v8805_v17 }
 0x19f   : > { %v1234_v2 = vmul.f32 %v8658_v59, %v12756_v8  ;;  %v9014_v33 = vld [vmem:[#allocation2 + $0xc4] sm:$0xff]  ;;  %v6982_v55 = vld [vmem:[%s7289_s20 + $0x130] sm:$0xff]  ;;  %v1311_v12 = vmul.f32 %v8672_v41, %v12756_v8  ;;  %v2930_v31 = vadd.f32 %v2894_v56, %v2817_v6  ;;  %v9038_v17 = vadd.f32 %v931_v50, %v854_v28 }
 0x1a0   : > { %12757 = vst [vmem:[#allocation42_spill] sm:$0xff] %v9014_v33  ;;  %v9016_v58 = vld [vmem:[#allocation2 + $0xc5] sm:$0xff]  ;;  %6650 = vmatmul.mubr.f32.gmra.mrb[162].mxu0 %v6982_v55  ;;  %v12763_v1 = vld [vmem:[#allocation46_spill] sm:$0xff]  ;;  %6811 = vmatmul.mubr.f32.gmra.mrb[162].mxu1 %v6982_v55  ;;  %v2176_v56 = vmul.f32 %v8716_v63, %v2136_v3  ;;  %v2289_v6 = vmul.f32 %v8722_v14, %v2249_v21  ;;  %v12794_v33 = vld [vmem:[#allocation15_spill] sm:$0xff] }
 0x1a1   : > { %12758 = vst [vmem:[#allocation44_spill] sm:$0xff] %v9016_v58  ;;  %v9018_v25 = vld [vmem:[#allocation2 + $0xc6] sm:$0xff]  ;;  %6652 = vmatprep.mubr.msk.f32.mxu0 %vm7119_vm0, %v12613_v10  ;;  %v1537_v47 = vmul.f32 %v8694_v29, %v12763_v1  ;;  %v1347_v50 = vadd.f32 %v1311_v12, %v8862_v53  ;;  %v2855_v1 = vld [vmem:[#allocation2 + $0x6e] sm:$0xff]  ;;  %6813 = vmatprep.mubr.msk.f32.mxu1 %vm7119_vm0, %v12613_v10  ;;  %v6983_v12 = vld [vmem:[%s7289_s20 + $0x138] sm:$0xff] }
 0x1a2   : > { %12759 = vst [vmem:[#allocation80_spill] sm:$0xff] %v9018_v25  ;;  %v12760_v40 = vld [vmem:[#allocation45_spill] sm:$0xff]  ;;  %2026 = vst [vmem:[#allocation2 + $0xc0] sm:$0xff] %v8833_v9  ;;  %v12764_v8 = vld [vmem:[#allocation20_spill] sm:$0xff]  ;;  %v1157_v25 = vadd.f32 %v1121_v54, %v1044_v57  ;;  %v9062_v55 = vadd.f32 %v2930_v31, %v8783_v0  ;;  %v2366_v54 = vmul.f32 %v8841_v7, %v2249_v21 }
 0x1a3   : > { %v1424_v37 = vmul.f32 %v8679_v22, %v12760_v40  ;;  %v2552_v51 = vld [vmem:[#allocation2 + $0x6c] sm:$0xff]  ;;  %v9044_v40 = vmul.f32 %v8701_v44, %v12764_v8  ;;  %v2479_v53 = vmul.f32 %v8847_v18, %v2439_v60  ;;  %v2212_v0 = vadd.f32 %v2176_v56, %v8933_v62  ;;  %v9091_v62 = vld [vmem:[%s12397_s1 + $0x21] ss:$0 sm:$0xff] }
 0x1a4   : > { %v9029_v23 = vld [vmem:[#allocation2 + $0xc9] sm:$0xff]  ;;  %12770 = vst [vmem:[#allocation85_spill] sm:$0xff] %v9062_v55  ;;  %v2592_v3 = vmul.f32 %v8853_v24, %v2552_v51  ;;  %6653 = vmatmul.mubr.f32.gmra.mrb[164].mxu0 %v6983_v12  ;;  %v2669_v31 = vmul.f32 %v8964_v30, %v2552_v51  ;;  %v9075_v21 = vld [vmem:[#allocation2 + $0xd1] sm:$0xff]  ;;  %6814 = vmatmul.mubr.f32.gmra.mrb[164].mxu1 %v6983_v12 }
 0x1a5   : > { %12761 = vst [vmem:[#allocation45_spill] sm:$0xff] %v9029_v23  ;;  %v9031_v58 = vld [vmem:[#allocation2 + $0xca] sm:$0xff]  ;;  %v6460_v23 = vpop.f32.mrb[57].mxu1  ;;  %12771 = vst [vmem:[#allocation86_spill] sm:$0xff] %v9075_v21  ;;  %6655 = vmatprep.mubr.msk.f32.mxu0 %vm7119_vm0, %v12613_v10  ;;  %v9098_v56 = vld [vmem:[#allocation2 + $0xd2] sm:$0xff]  ;;  %v9104_v55 = vadd.f32 %v2289_v6, %v2212_v0  ;;  %6816 = vmatprep.mubr.msk.f32.mxu1 %vm7119_vm0, %v12613_v10 }
 0x1a6   : > { %12762 = vst [vmem:[#allocation81_spill] sm:$0xff] %v9031_v58  ;;  %v9046_v42 = vld [vmem:[#allocation2 + $0xcb] sm:$0xff]  ;;  %v9070_v23 = vadd.f32 %v1234_v2, %v1157_v25  ;;  %v9079_v60 = vpop.f32.mrb[58].mxu1  ;;  %v9085_v2 = vld [vmem:[%s12397_s1 + $0x1d] ss:$0 sm:$0xff] }
 0x1a7   : > { %12765 = vst [vmem:[#allocation46_spill] sm:$0xff] %v9046_v42  ;;  %v9048_v58 = vld [vmem:[#allocation2 + $0xcc] sm:$0xff]  ;;  %v9057_v42 = vpop.f32.mrb[58].mxu0 }
 0x1a8   : > { %12766 = vst [vmem:[#allocation20_spill] sm:$0xff] %v9048_v58  ;;  %v9050_v9 = vld [vmem:[#allocation2 + $0xcd] sm:$0xff]  ;;  %12769 = vst [vmem:[#allocation84_spill] sm:$0xff] %v9057_v42  ;;  %v6302_v57 = vpop.f32.mrb[59].mxu0  ;;  %v9109_v58 = vld [vmem:[#allocation2 + $0xd5] sm:$0xff] }
 0x1a9   : > { %12767 = vst [vmem:[#allocation82_spill] sm:$0xff] %v9050_v9  ;;  %v2742_v28 = vld [vmem:[#allocation2 + $0x6d] sm:$0xff]  ;;  %671 = vst [vmem:[#allocation2 + $0xe8] sm:$0xff] %v9057_v42  ;;  %v1609_v9 = vld [vmem:[%s7646_s25 + $0x58] sm:$0xff]  ;;  %v6463_v57 = vpop.f32.mrb[59].mxu1  ;;  %v2705_v42 = vadd.f32 %v2669_v31, %v8918_v45 }
 0x1aa   : > { %v9055_v8 = vld [vmem:[#allocation2 + $0xce] sm:$0xff]  ;;  %v2782_v25 = vmul.f32 %v9085_v2, %v2742_v28  ;;  %v12780_v57 = vld [vmem:[#allocation23_spill] sm:$0xff]  ;;  %v12781_v45 = vld [vmem:[#allocation8_spill] sm:$0xff] }
 0x1ab   : > { %12768 = vst [vmem:[#allocation83_spill] sm:$0xff] %v9055_v8  ;;  %2027 = vst [vmem:[#allocation2 + $0xc8] sm:$0xff] %v8894_v15  ;;  %v1460_v8 = vadd.f32 %v1424_v37, %v1347_v50  ;;  %v2402_v15 = vadd.f32 %v2366_v54, %v8887_v36  ;;  %v2895_v37 = vmul.f32 %v9091_v62, %v2855_v1  ;;  %v12772_v51 = vld [vmem:[#allocation9_spill] sm:$0xff]  ;;  %v9100_v36 = vld [vmem:[#allocation2 + $0xd3] sm:$0xff] }
 0x1ac   : > { %v9096_v50 = vmul.f32 %v8600_v11, %v12772_v51  ;;  %12773 = vst [vmem:[#allocation9_spill] sm:$0xff] %v9098_v56  ;;  %12774 = vst [vmem:[#allocation87_spill] sm:$0xff] %v9100_v36  ;;  %v9102_v54 = vld [vmem:[#allocation2 + $0xd4] sm:$0xff]  ;;  %v9113_v56 = vpop.f32.mrb[60].mxu0  ;;  %v1009_v6 = vmul.f32 %v8632_v39, %v12780_v57  ;;  %v6986_v31 = vld [vmem:[%s7289_s20 + $0x140] sm:$0xff] }
 0x1ad   : > { %12775 = vst [vmem:[#allocation88_spill] sm:$0xff] %v9102_v54  ;;  %v1573_v28 = vadd.f32 %v1537_v47, %v1460_v8  ;;  %v12776_v21 = vld [vmem:[#allocation22_spill] sm:$0xff]  ;;  %12779 = vst [vmem:[#allocation90_spill] sm:$0xff] %v9113_v56  ;;  %v2515_v12 = vadd.f32 %v2479_v53, %v2402_v15  ;;  %v932_v47 = vmul.f32 %v8625_v32, %v12780_v57  ;;  %v6305_v0 = vpop.f32.mrb[61].mxu0  ;;  %6656 = vmatmul.mubr.f32.gmra.mrb[166].mxu0 %v6986_v31  ;;  %v12782_v15 = vld [vmem:[#allocation48_spill] sm:$0xff] }
 0x1ae   : > { %v819_v1 = vmul.f32 %v8499_v46, %v12776_v21  ;;  %12777 = vst [vmem:[#allocation22_spill] sm:$0xff] %v9109_v58  ;;  %v9111_v51 = vld [vmem:[#allocation2 + $0xd6] sm:$0xff]  ;;  %v1122_v8 = vmul.f32 %v8639_v5, %v12781_v45  ;;  %672 = vst [vmem:[#allocation2 + $0xf0] sm:$0xff] %v9113_v56  ;;  %v1235_v58 = vmul.f32 %v8658_v59, %v12782_v15  ;;  %6658 = vmatprep.mubr.msk.f32.mxu0 %vm7119_vm0, %v12613_v10 }
 0x1af   : > { %12778 = vst [vmem:[#allocation89_spill] sm:$0xff] %v9111_v51  ;;  %2028 = vst [vmem:[#allocation2 + $0xd0] sm:$0xff] %v8937_v38  ;;  %v9126_v21 = vadd.f32 %v1609_v9, %v1573_v28  ;;  %v2818_v51 = vadd.f32 %v2782_v25, %v2705_v42  ;;  %v2137_v54 = vld [vmem:[#allocation2 + $0x71] sm:$0xff]  ;;  %v9133_v45 = vadd.f32 %v2592_v3, %v2515_v12  ;;  %v12783_v9 = vld [vmem:[#allocation49_spill] sm:$0xff]  ;;  %6817 = vmatmul.mubr.f32.gmra.mrb[166].mxu1 %v6986_v31 }
 0x1b0   : > { %v855_v53 = vadd.f32 %v819_v1, %v8981_v52  ;;  %v2250_v57 = vld [vmem:[#allocation2 + $0x72] sm:$0xff]  ;;  %v1045_v38 = vadd.f32 %v1009_v6, %v8927_v27  ;;  %v1312_v0 = vmul.f32 %v8672_v41, %v12782_v15  ;;  %v1425_v42 = vmul.f32 %v8679_v22, %v12783_v9  ;;  %v12785_v3 = vld [vmem:[#allocation25_spill] sm:$0xff]  ;;  %v9150_v6 = vld [vmem:[#allocation2 + $0xda] sm:$0xff]  ;;  %v9154_v9 = vpop.f32.mrb[62].mxu0  ;;  %6819 = vmatprep.mubr.msk.f32.mxu1 %vm7119_vm0, %v12613_v10 }
 0x1b1   : > { %v2440_v25 = vld [vmem:[#allocation2 + $0x73] sm:$0xff]  ;;  %v2931_v28 = vadd.f32 %v2895_v37, %v2818_v51  ;;  %v9146_v12 = vmul.f32 %v8701_v44, %v12785_v3  ;;  %12787 = vst [vmem:[#allocation8_spill] sm:$0xff] %v9150_v6  ;;  %v9152_v15 = vld [vmem:[#allocation2 + $0xdb] sm:$0xff]  ;;  %12789 = vst [vmem:[#allocation49_spill] sm:$0xff] %v9154_v9  ;;  %v6308_v3 = vpop.f32.mrb[63].mxu0 }
 0x1b2   : > { %v2553_v52 = vld [vmem:[#allocation2 + $0x74] sm:$0xff]  ;;  %v9140_v1 = vadd.f32 %v932_v47, %v855_v53  ;;  %12788 = vst [vmem:[#allocation48_spill] sm:$0xff] %v9152_v15  ;;  %v1158_v37 = vadd.f32 %v1122_v8, %v1045_v38  ;;  %v1348_v51 = vadd.f32 %v1312_v0, %v8958_v16  ;;  %v2290_v47 = vmul.f32 %v8722_v14, %v2250_v57  ;;  %v6987_v6 = vld [vmem:[%s7289_s20 + $0x148] sm:$0xff]  ;;  %v9171_v38 = vld [vmem:[#allocation2 + $0xdd] sm:$0xff] }
 0x1b3   : > { %v12784_v56 = vld [vmem:[#allocation50_spill] sm:$0xff]  ;;  %v9148_v27 = vld [vmem:[#allocation2 + $0xd9] sm:$0xff]  ;;  %673 = vst [vmem:[#allocation2 + $0xf8] sm:$0xff] %v9154_v9  ;;  %6659 = vmatmul.mubr.f32.gmra.mrb[168].mxu0 %v6987_v6  ;;  %v9164_v15 = vadd.f32 %v2931_v28, %v8908_v4  ;;  %v2480_v8 = vmul.f32 %v8847_v18, %v2440_v25  ;;  %v2593_v16 = vmul.f32 %v8853_v24, %v2553_v52  ;;  %12792 = vst [vmem:[#allocation91_spill] sm:$0xff] %v9171_v38  ;;  %v9175_v9 = vpop.f32.mrb[60].mxu1 }
 0x1b4   : > { %v1538_v36 = vmul.f32 %v8694_v29, %v12784_v56  ;;  %12786 = vst [vmem:[#allocation23_spill] sm:$0xff] %v9148_v27  ;;  %v2177_v56 = vmul.f32 %v8716_v63, %v2137_v54  ;;  %v2743_v31 = vld [vmem:[#allocation2 + $0x75] sm:$0xff]  ;;  %v2367_v27 = vmul.f32 %v8841_v7, %v2250_v57  ;;  %v9173_v0 = vld [vmem:[#allocation2 + $0xde] sm:$0xff]  ;;  %6661 = vmatprep.mubr.msk.f32.mxu0 %vm7119_vm0, %v12613_v10  ;;  %v6466_v3 = vpop.f32.mrb[61].mxu1 }
 0x1b5   : > { %v2856_v53 = vld [vmem:[#allocation2 + $0x76] sm:$0xff]  ;;  %12790 = vst [vmem:[#allocation50_spill] sm:$0xff] %v9164_v15  ;;  %12793 = vst [vmem:[#allocation92_spill] sm:$0xff] %v9173_v0  ;;  %v9179_v4 = vadd.f32 %v1235_v58, %v1158_v37  ;;  %v1461_v28 = vadd.f32 %v1425_v42, %v1348_v51  ;;  %v2670_v25 = vmul.f32 %v8964_v30, %v2553_v52  ;;  %6820 = vmatmul.mubr.f32.gmra.mrb[168].mxu1 %v6987_v6  ;;  %v1610_v15 = vld [vmem:[%s7646_s25 + $0x60] sm:$0xff]  ;;  %v9192_v42 = vpop.f32.mrb[64].mxu0 }
 0x1b6   : > { %v9169_v54 = vld [vmem:[#allocation2 + $0xdc] sm:$0xff]  ;;  %v2213_v57 = vadd.f32 %v2177_v56, %v9044_v40  ;;  %v2403_v38 = vadd.f32 %v2367_v27, %v8988_v34  ;;  %v2783_v0 = vmul.f32 %v9085_v2, %v2743_v31  ;;  %v9190_v58 = vmul.f32 %v8600_v11, %v12794_v33  ;;  %12795 = vst [vmem:[#allocation15_spill] sm:$0xff] %v9192_v42  ;;  %v6311_v33 = vpop.f32.mrb[65].mxu0  ;;  %v6988_v31 = vld [vmem:[%s7289_s20 + $0x150] sm:$0xff]  ;;  %v9217_v3 = vld [vmem:[#allocation2 + $0xe5] sm:$0xff] }
 0x1b7   : > { %12791 = vst [vmem:[#allocation25_spill] sm:$0xff] %v9169_v54  ;;  %2029 = vst [vmem:[#allocation2 + $0xd8] sm:$0xff] %v8986_v19  ;;  %v2896_v54 = vmul.f32 %v9091_v62, %v2856_v53  ;;  %6822 = vmatprep.mubr.msk.f32.mxu1 %vm7119_vm0, %v12613_v10  ;;  %v1574_v19 = vadd.f32 %v1538_v36, %v1461_v28  ;;  %v2706_v52 = vadd.f32 %v2670_v25, %v9022_v20  ;;  %v12796_v34 = vld [vmem:[#allocation51_spill] sm:$0xff]  ;;  %v9201_v51 = vld [vmem:[#allocation2 + $0xe1] sm:$0xff] }
 0x1b8   : > { %v9196_v40 = vadd.f32 %v2290_v47, %v2213_v57  ;;  %v820_v27 = vmul.f32 %v8499_v46, %v12796_v34  ;;  %v2138_v6 = vld [vmem:[#allocation2 + $0x79] sm:$0xff]  ;;  %12797 = vst [vmem:[#allocation51_spill] sm:$0xff] %v9201_v51  ;;  %v9203_v56 = vld [vmem:[#allocation2 + $0xe2] sm:$0xff]  ;;  %674 = vst [vmem:[#allocation2 + $0x100] sm:$0xff] %v9192_v42  ;;  %6662 = vmatmul.mubr.f32.gmra.mrb[170].mxu0 %v6988_v31  ;;  %v2516_v10 = vadd.f32 %v2480_v8, %v2403_v38 }
 0x1b9   : > { %v2251_v37 = vld [vmem:[#allocation2 + $0x7a] sm:$0xff]  ;;  %12798 = vst [vmem:[#allocation93_spill] sm:$0xff] %v9203_v56  ;;  %v12800_v53 = vld [vmem:[#allocation53_spill] sm:$0xff]  ;;  %v9219_v34 = vadd.f32 %v1610_v15, %v1574_v19  ;;  %v2819_v33 = vadd.f32 %v2783_v0, %v2706_v52  ;;  %v12802_v38 = vld [vmem:[#allocation14_spill] sm:$0xff]  ;;  %6823 = vmatmul.mubr.f32.gmra.mrb[170].mxu1 %v6988_v31 }
 0x1ba   : > { %v12799_v36 = vld [vmem:[#allocation52_spill] sm:$0xff]  ;;  %v1123_v46 = vmul.f32 %v8639_v5, %v12800_v53  ;;  %v856_v8 = vadd.f32 %v820_v27, %v9096_v50  ;;  %v1236_v42 = vmul.f32 %v8658_v59, %v12802_v38  ;;  %v9226_v51 = vld [vmem:[#allocation2 + $0xe9] sm:$0xff]  ;;  %v9228_v53 = vadd.f32 %v2593_v16, %v2516_v10 }
 0x1bb   : > { %v933_v47 = vmul.f32 %v8625_v32, %v12799_v36  ;;  %v1010_v20 = vmul.f32 %v8632_v39, %v12799_v36  ;;  %v2441_v28 = vld [vmem:[#allocation2 + $0x7b] sm:$0xff]  ;;  %v9213_v57 = vld [vmem:[#allocation2 + $0xe3] sm:$0xff]  ;;  %12803 = vst [vmem:[#allocation53_spill] sm:$0xff] %v9226_v51  ;;  %v1313_v15 = vmul.f32 %v8672_v41, %v12802_v38  ;;  %v12804_v19 = vld [vmem:[#allocation54_spill] sm:$0xff]  ;;  %v9242_v51 = vpop.f32.mrb[66].mxu0  ;;  %v2932_v16 = vadd.f32 %v2896_v54, %v2819_v33 }
 0x1bc   : > { %v9215_v25 = vld [vmem:[#allocation2 + $0xe4] sm:$0xff]  ;;  %v2554_v56 = vld [vmem:[#allocation2 + $0x7c] sm:$0xff]  ;;  %v1426_v0 = vmul.f32 %v8679_v22, %v12804_v19  ;;  %v9239_v27 = vld [vmem:[#allocation2 + $0xec] sm:$0xff]  ;;  %12808 = vst [vmem:[#allocation95_spill] sm:$0xff] %v9242_v51  ;;  %v2291_v33 = vmul.f32 %v8722_v14, %v2251_v37 }
 0x1bd   : > { %12801 = vst [vmem:[#allocation52_spill] sm:$0xff] %v9215_v25  ;;  %v9224_v36 = vld [vmem:[#allocation2 + $0xe6] sm:$0xff]  ;;  %v1046_v25 = vadd.f32 %v1010_v20, %v9038_v17  ;;  %12807 = vst [vmem:[#allocation94_spill] sm:$0xff] %v9239_v27  ;;  %v9244_v31 = vadd.f32 %v933_v47, %v856_v8  ;;  %v12809_v17 = vld [vmem:[#allocation55_spill] sm:$0xff]  ;;  %v1349_v54 = vadd.f32 %v1313_v15, %v9070_v23 }
 0x1be   : > { %v9235_v50 = vld [vmem:[#allocation2 + $0xea] sm:$0xff]  ;;  %2030 = vst [vmem:[#allocation2 + $0xe0] sm:$0xff] %v9036_v26  ;;  %v1539_v10 = vmul.f32 %v8694_v29, %v12809_v17  ;;  %v12810_v20 = vld [vmem:[#allocation35_spill] sm:$0xff]  ;;  %675 = vst [vmem:[#allocation2 + $0x108] sm:$0xff] %v9242_v51  ;;  %v6314_v26 = vpop.f32.mrb[67].mxu0  ;;  %v2178_v47 = vmul.f32 %v8716_v63, %v2138_v6  ;;  %v2481_v51 = vmul.f32 %v8847_v18, %v2441_v28 }
 0x1bf   : > { %12805 = vst [vmem:[#allocation14_spill] sm:$0xff] %v9235_v50  ;;  %v9237_v52 = vld [vmem:[#allocation2 + $0xeb] sm:$0xff]  ;;  %v9250_v38 = vmul.f32 %v8701_v44, %v12810_v20  ;;  %v1159_v27 = vadd.f32 %v1123_v46, %v1046_v25  ;;  %v2744_v8 = vld [vmem:[#allocation2 + $0x7d] sm:$0xff]  ;;  %v9262_v20 = vadd.f32 %v2932_v16, %v9009_v35  ;;  %v2594_v46 = vmul.f32 %v8853_v24, %v2554_v56  ;;  %v9268_v25 = vpop.f32.mrb[62].mxu1  ;;  %v9278_v16 = vld [vmem:[#allocation2 + $0xf3] sm:$0xff] }
 0x1c0   : > { %12806 = vst [vmem:[#allocation54_spill] sm:$0xff] %v9237_v52  ;;  %v9252_v19 = vld [vmem:[#allocation2 + $0xed] sm:$0xff]  ;;  %v2857_v17 = vld [vmem:[#allocation2 + $0x7e] sm:$0xff]  ;;  %v1462_v6 = vadd.f32 %v1426_v0, %v1349_v54  ;;  %v2214_v15 = vadd.f32 %v2178_v47, %v9146_v12  ;;  %v2671_v26 = vmul.f32 %v8964_v30, %v2554_v56  ;;  %12814 = vst [vmem:[#allocation97_spill] sm:$0xff] %v9278_v16 }
 0x1c1   : > { %12811 = vst [vmem:[#allocation55_spill] sm:$0xff] %v9252_v19  ;;  %v9254_v52 = vld [vmem:[#allocation2 + $0xee] sm:$0xff]  ;;  %12813 = vst [vmem:[#allocation96_spill] sm:$0xff] %v9262_v20  ;;  %v9270_v23 = vadd.f32 %v1236_v42, %v1159_v27  ;;  %v2784_v20 = vmul.f32 %v9085_v2, %v2744_v8  ;;  %v2897_v50 = vmul.f32 %v9091_v62, %v2857_v17  ;;  %v12815_v42 = vld [vmem:[#allocation43_spill] sm:$0xff] }
 0x1c2   : > { %12812 = vst [vmem:[#allocation35_spill] sm:$0xff] %v9254_v52  ;;  %2031 = vst [vmem:[#allocation2 + $0xe8] sm:$0xff] %v9079_v60  ;;  %v1611_v19 = vld [vmem:[%s7646_s25 + $0x68] sm:$0xff]  ;;  %v2368_v52 = vmul.f32 %v8841_v7, %v2251_v37  ;;  %v9274_v60 = vld [vmem:[#allocation2 + $0xf1] sm:$0xff]  ;;  %v6469_v37 = vpop.f32.mrb[63].mxu1  ;;  %v9285_v0 = vmul.f32 %v8600_v11, %v12815_v42  ;;  %v1575_v54 = vadd.f32 %v1539_v10, %v1462_v6 }
 0x1c3   : > { %v9276_v35 = vld [vmem:[#allocation2 + $0xf2] sm:$0xff]  ;;  %v9293_v47 = vadd.f32 %v2291_v33, %v2214_v15  ;;  %v2707_v37 = vadd.f32 %v2671_v26, %v9133_v45  ;;  %v12821_v33 = vld [vmem:[#allocation56_spill] sm:$0xff] }
 0x1c4   : > { %v2404_v28 = vadd.f32 %v2368_v52, %v9104_v55  ;;  %v9287_v12 = vld [vmem:[#allocation2 + $0xf4] sm:$0xff]  ;;  %v9299_v55 = vld [vmem:[%s12397_s1 + $0x4] ss:$0 sm:$0xff]  ;;  %v1124_v45 = vmul.f32 %v8639_v5, %v12821_v33  ;;  %v9310_v6 = vadd.f32 %v1611_v19, %v1575_v54 }
 0x1c5   : > { %12816 = vst [vmem:[#allocation43_spill] sm:$0xff] %v9287_v12  ;;  %v9289_v56 = vld [vmem:[#allocation2 + $0xf5] sm:$0xff]  ;;  %v2820_v15 = vadd.f32 %v2784_v20, %v2707_v37  ;;  %v2442_v19 = vld [vmem:[#allocation2 + $0x83] sm:$0xff]  ;;  %v9322_v37 = vpop.f32.mrb[68].mxu0 }
 0x1c6   : > { %12817 = vst [vmem:[#allocation98_spill] sm:$0xff] %v9289_v56  ;;  %v9291_v27 = vld [vmem:[#allocation2 + $0xf6] sm:$0xff]  ;;  %v2517_v8 = vadd.f32 %v2481_v51, %v2404_v28  ;;  %v2139_v56 = vld [vmem:[#allocation2 + $0x81] sm:$0xff]  ;;  %676 = vst [vmem:[#allocation2 + $0x110] sm:$0xff] %v9322_v37 }
 0x1c7   : > { %12818 = vst [vmem:[#allocation99_spill] sm:$0xff] %v9291_v27  ;;  %v12819_v52 = vld [vmem:[#allocation26_spill] sm:$0xff]  ;;  %2032 = vst [vmem:[#allocation2 + $0xf0] sm:$0xff] %v9175_v9  ;;  %v12820_v17 = vld [vmem:[#allocation27_spill] sm:$0xff] }
 0x1c8   : > { %v821_v11 = vmul.f32 %v9299_v55, %v12819_v52  ;;  %v934_v42 = vmul.f32 %v8625_v32, %v12820_v17  ;;  %v1011_v10 = vmul.f32 %v8632_v39, %v12820_v17  ;;  %v12822_v27 = vld [vmem:[#allocation29_spill] sm:$0xff]  ;;  %v9315_v51 = vadd.f32 %v2594_v46, %v2517_v8  ;;  %v12823_v28 = vld [vmem:[#allocation30_spill] sm:$0xff]  ;;  %12824 = vst [vmem:[#allocation26_spill] sm:$0xff] %v9322_v37  ;;  %v12826_v8 = vld [vmem:[#allocation40_spill] sm:$0xff] }
 0x1c9   : > { %v1237_v52 = vmul.f32 %v8658_v59, %v12822_v27  ;;  %v2252_v9 = vld [vmem:[#allocation2 + $0x82] sm:$0xff]  ;;  %v1314_v39 = vmul.f32 %v8672_v41, %v12822_v27  ;;  %v1427_v5 = vmul.f32 %v8679_v22, %v12823_v28  ;;  %v9332_v27 = vld [vmem:[#allocation2 + $0xf9] sm:$0xff]  ;;  %v6317_v28 = vpop.f32.mrb[69].mxu0 }
 0x1ca   : > { %v857_v26 = vadd.f32 %v821_v11, %v9190_v58  ;;  %v1047_v32 = vadd.f32 %v1011_v10, %v9140_v1  ;;  %v2555_v54 = vld [vmem:[#allocation2 + $0x84] sm:$0xff]  ;;  %v2933_v58 = vadd.f32 %v2897_v50, %v2820_v15  ;;  %v9330_v1 = vmul.f32 %v8701_v44, %v12826_v8  ;;  %12827 = vst [vmem:[#allocation27_spill] sm:$0xff] %v9332_v27  ;;  %v9334_v33 = vld [vmem:[#allocation2 + $0xfa] sm:$0xff] }
 0x1cb   : > { %v2745_v20 = vld [vmem:[#allocation2 + $0x85] sm:$0xff]  ;;  %12828 = vst [vmem:[#allocation56_spill] sm:$0xff] %v9334_v33  ;;  %v1350_v50 = vadd.f32 %v1314_v39, %v9179_v4  ;;  %v2292_v15 = vmul.f32 %v8722_v14, %v2252_v9  ;;  %v9344_v8 = vld [vmem:[#allocation2 + $0xfd] sm:$0xff]  ;;  %v2369_v37 = vmul.f32 %v8841_v7, %v2252_v9  ;;  %v2595_v4 = vmul.f32 %v8853_v24, %v2555_v54 }
 0x1cc   : > { %v9324_v11 = vadd.f32 %v934_v42, %v857_v26  ;;  %v12825_v17 = vld [vmem:[#allocation57_spill] sm:$0xff]  ;;  %v1160_v12 = vadd.f32 %v1124_v45, %v1047_v32  ;;  %v2179_v42 = vmul.f32 %v8716_v63, %v2139_v56  ;;  %v9340_v26 = vld [vmem:[#allocation2 + $0xfb] sm:$0xff]  ;;  %v9347_v27 = vadd.f32 %v2933_v58, %v9126_v21  ;;  %v1948_v56 = vpop.f32.mrb[64].mxu1  ;;  %v1612_v58 = vld [vmem:[%s7646_s25 + $0x70] sm:$0xff] }
 0x1cd   : > { %v1540_v46 = vmul.f32 %v8694_v29, %v12825_v17  ;;  %v2858_v10 = vld [vmem:[#allocation2 + $0x86] sm:$0xff]  ;;  %12829 = vst [vmem:[#allocation29_spill] sm:$0xff] %v9340_v26  ;;  %v9342_v17 = vld [vmem:[#allocation2 + $0xfc] sm:$0xff]  ;;  %12831 = vst [vmem:[#allocation57_spill] sm:$0xff] %v9344_v8  ;;  %v2482_v45 = vmul.f32 %v8847_v18, %v2442_v19  ;;  %v1463_v28 = vadd.f32 %v1427_v5, %v1350_v50  ;;  %v6472_v21 = vpop.f32.mrb[65].mxu1 }
 0x1ce   : > { %12830 = vst [vmem:[#allocation30_spill] sm:$0xff] %v9342_v17  ;;  %12832 = vst [vmem:[#allocation40_spill] sm:$0xff] %v9347_v27  ;;  %v9352_v32 = vld [vmem:[#allocation2 + $0xfe] sm:$0xff]  ;;  %v9354_v39 = vadd.f32 %v1237_v52, %v1160_v12  ;;  %v2215_v26 = vadd.f32 %v2179_v42, %v9250_v38  ;;  %v2672_v17 = vmul.f32 %v8964_v30, %v2555_v54  ;;  %v9388_v21 = vld [vmem:[%s12397_s1 + $0x8] ss:$0 sm:$0xff] }
 0x1cf   : > { %12833 = vst [vmem:[#allocation100_spill] sm:$0xff] %v9352_v32  ;;  %2033 = vst [vmem:[#allocation2 + $0xf8] sm:$0xff] %v9268_v25  ;;  %v2405_v9 = vadd.f32 %v2369_v37, %v9196_v40  ;;  %v2785_v19 = vmul.f32 %v9085_v2, %v2745_v20  ;;  %v2898_v27 = vmul.f32 %v9091_v62, %v2858_v10  ;;  %v9366_v12 = vld [vmem:[%s12397_s1] ss:$0 sm:$0xff]  ;;  %v12834_v52 = vld [vmem:[#allocation47_spill] sm:$0xff] }
 0x1d0   : > { %v9370_v38 = vmul.f32 %v9366_v12, %v12834_v52  ;;  %v9372_v5 = vld [vmem:[#allocation2 + $0x101] sm:$0xff]  ;;  %v1576_v25 = vadd.f32 %v1540_v46, %v1463_v28  ;;  %v9374_v54 = vadd.f32 %v2292_v15, %v2215_v26  ;;  %v2708_v40 = vadd.f32 %v2672_v17, %v9228_v53  ;;  %v9395_v53 = vld [vmem:[%s12397_s1 + $0xc] ss:$0 sm:$0xff]  ;;  %v9402_v15 = vld [vmem:[%s12397_s1 + $0x10] ss:$0 sm:$0xff] }
 0x1d1   : > { %12835 = vst [vmem:[#allocation47_spill] sm:$0xff] %v9372_v5  ;;  %v822_v20 = vmul.f32 %v9299_v55, %v8741_v43  ;;  %v9379_v37 = vld [vmem:[#allocation2 + $0x102] sm:$0xff]  ;;  %v2518_v42 = vadd.f32 %v2482_v45, %v2405_v9  ;;  %v935_v46 = vmul.f32 %v9388_v21, %v8743_v49  ;;  %v1012_v43 = vmul.f32 %v9395_v53, %v8743_v49  ;;  %v12839_v26 = vld [vmem:[#allocation58_spill] sm:$0xff] }
 0x1d2   : > { %12836 = vst [vmem:[#allocation101_spill] sm:$0xff] %v9379_v37  ;;  %v9381_v10 = vld [vmem:[#allocation2 + $0x103] sm:$0xff]  ;;  %v1125_v17 = vmul.f32 %v9402_v15, %v12839_v26  ;;  %v9410_v9 = vadd.f32 %v1612_v58, %v1576_v25  ;;  %v2821_v52 = vadd.f32 %v2785_v19, %v2708_v40  ;;  %v2443_v25 = vld [vmem:[#allocation2 + $0x8b] sm:$0xff]  ;;  %v9422_v40 = vpop.f32.mrb[70].mxu0 }
 0x1d3   : > { %12837 = vst [vmem:[#allocation102_spill] sm:$0xff] %v9381_v10  ;;  %v9383_v50 = vld [vmem:[#allocation2 + $0x104] sm:$0xff]  ;;  %v12842_v10 = vld [vmem:[#allocation6_spill] sm:$0xff]  ;;  %v9415_v32 = vadd.f32 %v2595_v4, %v2518_v42  ;;  %v1048_v8 = vadd.f32 %v1012_v43, %v9244_v31  ;;  %v12846_v4 = vld [vmem:[#allocation7_spill] sm:$0xff] }
 0x1d4   : > { %12838 = vst [vmem:[#allocation103_spill] sm:$0xff] %v9383_v50  ;;  %v9406_v45 = vld [vmem:[#allocation2 + $0x105] sm:$0xff]  ;;  %v858_v50 = vadd.f32 %v822_v20, %v9285_v0  ;;  %v1238_v49 = vmul.f32 %v8658_v59, %v12842_v10  ;;  %v1315_v26 = vmul.f32 %v8672_v41, %v12842_v10  ;;  %12844 = vst [vmem:[#allocation6_spill] sm:$0xff] %v9422_v40  ;;  %v2746_v31 = vld [vmem:[#allocation2 + $0x8d] sm:$0xff]  ;;  %v6320_v41 = vpop.f32.mrb[71].mxu0 }
 0x1d5   : > { %12840 = vst [vmem:[#allocation58_spill] sm:$0xff] %v9406_v45  ;;  %v9408_v28 = vld [vmem:[#allocation2 + $0x106] sm:$0xff]  ;;  %v12843_v45 = vld [vmem:[#allocation59_spill] sm:$0xff]  ;;  %v2934_v0 = vadd.f32 %v2898_v27, %v2821_v52  ;;  %v9430_v42 = vmul.f32 %v8701_v44, %v12846_v4  ;;  %v2859_v43 = vld [vmem:[#allocation2 + $0x8e] sm:$0xff]  ;;  %v2786_v41 = vmul.f32 %v9085_v2, %v2746_v31 }
 0x1d6   : > { %12841 = vst [vmem:[#allocation104_spill] sm:$0xff] %v9408_v28  ;;  %v2140_v37 = vld [vmem:[#allocation2 + $0x89] sm:$0xff]  ;;  %2034 = vst [vmem:[#allocation2 + $0x100] sm:$0xff] %v1948_v56  ;;  %v1428_v58 = vmul.f32 %v8679_v22, %v12843_v45  ;;  %v9424_v20 = vadd.f32 %v935_v46, %v858_v50  ;;  %v12845_v59 = vld [vmem:[#allocation60_spill] sm:$0xff]  ;;  %v1161_v22 = vadd.f32 %v1125_v17, %v1048_v8  ;;  %v1953_v17 = vpop.f32.mrb[66].mxu1 }
 0x1d7   : > { %v2253_v5 = vld [vmem:[#allocation2 + $0x8a] sm:$0xff]  ;;  %v1541_v56 = vmul.f32 %v8694_v29, %v12845_v59  ;;  %677 = vst [vmem:[#allocation2 + $0x118] sm:$0xff] %v9422_v40  ;;  %v1351_v10 = vadd.f32 %v1315_v26, %v9270_v23  ;;  %v2180_v45 = vmul.f32 %v8716_v63, %v2140_v37  ;;  %v9443_v44 = vadd.f32 %v2934_v0, %v9219_v34  ;;  %v6475_v0 = vpop.f32.mrb[67].mxu1 }
 0x1d8   : > { %v2556_v19 = vld [vmem:[#allocation2 + $0x8c] sm:$0xff]  ;;  %v2293_v27 = vmul.f32 %v8722_v14, %v2253_v5  ;;  %v2370_v52 = vmul.f32 %v8841_v7, %v2253_v5  ;;  %v2483_v8 = vmul.f32 %v8847_v18, %v2443_v25  ;;  %v9448_v63 = vadd.f32 %v1238_v49, %v1161_v22  ;;  %v1613_v5 = vld [vmem:[%s7646_s25 + $0x78] sm:$0xff] }
 0x1d9   : > { %v9436_v50 = vld [vmem:[#allocation2 + $0x109] sm:$0xff]  ;;  %12850 = vst [vmem:[#allocation105_spill] sm:$0xff] %v9443_v44  ;;  %v2596_v23 = vmul.f32 %v8853_v24, %v2556_v19  ;;  %v1464_v14 = vadd.f32 %v1428_v58, %v1351_v10  ;;  %v2216_v37 = vadd.f32 %v2180_v45, %v9330_v1  ;;  %v2673_v26 = vmul.f32 %v8964_v30, %v2556_v19  ;;  %v608_v44 = vpop.f32.mrb[72].mxu0 }
 0x1da   : > { %12847 = vst [vmem:[#allocation59_spill] sm:$0xff] %v9436_v50  ;;  %v9438_v29 = vld [vmem:[#allocation2 + $0x10a] sm:$0xff]  ;;  %v2406_v25 = vadd.f32 %v2370_v52, %v9293_v47  ;;  %v2899_v49 = vmul.f32 %v9091_v62, %v2859_v43  ;;  %678 = vst [vmem:[#allocation2 + $0x120] sm:$0xff] %v608_v44 }
 0x1db   : > { %12848 = vst [vmem:[#allocation60_spill] sm:$0xff] %v9438_v29  ;;  %v9440_v46 = vld [vmem:[#allocation2 + $0x10b] sm:$0xff]  ;;  %v1577_v1 = vadd.f32 %v1541_v56, %v1464_v14  ;;  %v9466_v19 = vadd.f32 %v2293_v27, %v2216_v37  ;;  %v2709_v10 = vadd.f32 %v2673_v26, %v9315_v51  ;;  %v6323_v56 = vpop.f32.mrb[73].mxu0  ;;  %v9477_v27 = vpop.f32.mrb[68].mxu1 }
 0x1dc   : > { %12849 = vst [vmem:[#allocation7_spill] sm:$0xff] %v9440_v46  ;;  %v9452_v59 = vld [vmem:[#allocation2 + $0x10c] sm:$0xff]  ;;  %v2519_v40 = vadd.f32 %v2483_v8, %v2406_v25  ;;  %v9485_v8 = vld [vmem:[%s12397_s1 + $0x14] ss:$0 sm:$0xff]  ;;  %v6478_v44 = vpop.f32.mrb[69].mxu1  ;;  %v2860_v56 = vld [vmem:[#allocation2 + $0x96] sm:$0xff] }
 0x1dd   : > { %12851 = vst [vmem:[#allocation106_spill] sm:$0xff] %v9452_v59  ;;  %v9454_v4 = vld [vmem:[#allocation2 + $0x10d] sm:$0xff]  ;;  %v2822_v51 = vadd.f32 %v2786_v41, %v2709_v10  ;;  %v9511_v44 = vld [vmem:[%s12397_s1 + $0x20] ss:$0 sm:$0xff]  ;;  %v1963_v33 = vpop.f32.mrb[70].mxu1 }
 0x1de   : > { %12852 = vst [vmem:[#allocation107_spill] sm:$0xff] %v9454_v4  ;;  %v9456_v34 = vld [vmem:[#allocation2 + $0x10e] sm:$0xff]  ;;  %v9518_v4 = vld [vmem:[%s12397_s1 + $0x1] ss:$0 sm:$0xff] }
 0x1df   : > { %12853 = vst [vmem:[#allocation108_spill] sm:$0xff] %v9456_v34  ;;  %v12854_v22 = vld [vmem:[#allocation5_spill] sm:$0xff]  ;;  %2035 = vst [vmem:[#allocation2 + $0x108] sm:$0xff] %v1953_v17  ;;  %v12857_v52 = vld [vmem:[#allocation62_spill] sm:$0xff]  ;;  %v9479_v17 = vadd.f32 %v1613_v5, %v1577_v1 }
 0x1e0   : > { %v9464_v58 = vmul.f32 %v9366_v12, %v12854_v22  ;;  %v12855_v45 = vld [vmem:[#allocation33_spill] sm:$0xff]  ;;  %v1126_v22 = vmul.f32 %v9402_v15, %v12857_v52  ;;  %12858 = vst [vmem:[#allocation5_spill] sm:$0xff] %v9477_v27  ;;  %v12859_v37 = vld [vmem:[#allocation34_spill] sm:$0xff]  ;;  %v9489_v52 = vadd.f32 %v2596_v23, %v2519_v40  ;;  %v9502_v1 = vld [vmem:[%s12397_s1 + $0x1c] ss:$0 sm:$0xff] }
 0x1e1   : > { %v823_v0 = vmul.f32 %v9299_v55, %v12855_v45  ;;  %v12856_v47 = vld [vmem:[#allocation61_spill] sm:$0xff]  ;;  %v1239_v26 = vmul.f32 %v9485_v8, %v12859_v37  ;;  %v2141_v25 = vld [vmem:[#allocation2 + $0x91] sm:$0xff] }
 0x1e2   : > { %v936_v31 = vmul.f32 %v9388_v21, %v12856_v47  ;;  %v1013_v43 = vmul.f32 %v9395_v53, %v12856_v47  ;;  %v2254_v45 = vld [vmem:[#allocation2 + $0x92] sm:$0xff]  ;;  %v12860_v10 = vld [vmem:[#allocation13_spill] sm:$0xff] }
 0x1e3   : > { %v859_v14 = vadd.f32 %v823_v0, %v9370_v38  ;;  %v2444_v47 = vld [vmem:[#allocation2 + $0x93] sm:$0xff]  ;;  %v1429_v0 = vmul.f32 %v9502_v1, %v12860_v10 }
 0x1e4   : > { %v1049_v5 = vadd.f32 %v1013_v43, %v9324_v11  ;;  %v9495_v38 = vld [vmem:[%s12397_s1 + $0x18] ss:$0 sm:$0xff]  ;;  %v2935_v11 = vadd.f32 %v2899_v49, %v2822_v51 }
 0x1e5   : > { %v1316_v41 = vmul.f32 %v9495_v38, %v12859_v37  ;;  %v2557_v40 = vld [vmem:[#allocation2 + $0x94] sm:$0xff]  ;;  %v9506_v43 = vadd.f32 %v936_v31, %v859_v14  ;;  %v613_v14 = vpop.f32.mrb[74].mxu0 }
 0x1e6   : > { %v2747_v23 = vld [vmem:[#allocation2 + $0x95] sm:$0xff]  ;;  %v1162_v46 = vadd.f32 %v1126_v22, %v1049_v5  ;;  %679 = vst [vmem:[#allocation2 + $0x128] sm:$0xff] %v613_v14  ;;  %v6326_v5 = vpop.f32.mrb[75].mxu0  ;;  %v2597_v28 = vmul.f32 %v8853_v24, %v2557_v40  ;;  %v2674_v14 = vmul.f32 %v8964_v30, %v2557_v40 }
 0x1e7   : > { %v12861_v37 = vld [vmem:[#allocation63_spill] sm:$0xff]  ;;  %v1352_v29 = vadd.f32 %v1316_v41, %v9354_v39  ;;  %v9549_v41 = vadd.f32 %v2935_v11, %v9310_v6  ;;  %v6481_v5 = vpop.f32.mrb[71].mxu1  ;;  %v618_v40 = vpop.f32.mrb[76].mxu0  ;;  %v12871_v11 = vld [vmem:[#allocation65_spill] sm:$0xff] }
 0x1e8   : > { %v1542_v34 = vmul.f32 %v9511_v44, %v12861_v37  ;;  %v6999_v10 = vld [vmem:[#allocation2 + $0x98] sm:$0xff]  ;;  %v9533_v37 = vld [vmem:[%s12397_s1 + $0x5] ss:$0 sm:$0xff]  ;;  %680 = vst [vmem:[#allocation2 + $0x130] sm:$0xff] %v618_v40 }
 0x1e9   : > { %v9521_v59 = vmul.f32 %v6999_v10, %v9518_v4  ;;  %v9523_v49 = vld [vmem:[#allocation2 + $0x111] sm:$0xff]  ;;  %v2181_v50 = vmul.f32 %v9533_v37, %v2141_v25  ;;  %v9539_v10 = vld [vmem:[%s12397_s1 + $0x9] ss:$0 sm:$0xff]  ;;  %12868 = vst [vmem:[#allocation109_spill] sm:$0xff] %v9549_v41  ;;  %v2371_v25 = vmul.f32 %v8841_v7, %v2254_v45  ;;  %v1465_v16 = vadd.f32 %v1429_v0, %v1352_v29  ;;  %v2255_v0 = vld [vmem:[#allocation2 + $0x9a] sm:$0xff] }
 0x1ea   : > { %12862 = vst [vmem:[#allocation33_spill] sm:$0xff] %v9523_v49  ;;  %v9525_v31 = vld [vmem:[#allocation2 + $0x112] sm:$0xff]  ;;  %v2787_v7 = vmul.f32 %v9085_v2, %v2747_v23  ;;  %v2710_v29 = vadd.f32 %v2674_v14, %v9415_v32  ;;  %v937_v23 = vmul.f32 %v9388_v21, %v12871_v11  ;;  %v9582_v32 = vld [vmem:[#allocation2 + $0x11b] sm:$0xff] }
 0x1eb   : > { %12863 = vst [vmem:[#allocation61_spill] sm:$0xff] %v9525_v31  ;;  %v9527_v51 = vld [vmem:[#allocation2 + $0x113] sm:$0xff]  ;;  %v2294_v31 = vmul.f32 %v9539_v10, %v2254_v45  ;;  %v2407_v6 = vadd.f32 %v2371_v25, %v9374_v54 }
 0x1ec   : > { %12864 = vst [vmem:[#allocation62_spill] sm:$0xff] %v9527_v51  ;;  %v9542_v49 = vld [vmem:[#allocation2 + $0x114] sm:$0xff]  ;;  %v2484_v51 = vmul.f32 %v8847_v18, %v2444_v47  ;;  %v2900_v18 = vmul.f32 %v9091_v62, %v2860_v56  ;;  %v1578_v47 = vadd.f32 %v1542_v34, %v1465_v16  ;;  %v1014_v56 = vmul.f32 %v9395_v53, %v12871_v11  ;;  %v9593_v11 = vld [vmem:[#allocation2 + $0x11e] sm:$0xff] }
 0x1ed   : > { %12865 = vst [vmem:[#allocation34_spill] sm:$0xff] %v9542_v49  ;;  %v9544_v22 = vld [vmem:[#allocation2 + $0x115] sm:$0xff]  ;;  %v9555_v49 = vadd.f32 %v1239_v26, %v1162_v46 }
 0x1ee   : > { %12866 = vst [vmem:[#allocation13_spill] sm:$0xff] %v9544_v22  ;;  %v9546_v39 = vld [vmem:[#allocation2 + $0x116] sm:$0xff]  ;;  %v2217_v22 = vadd.f32 %v2181_v50, %v9430_v42  ;;  %v12870_v42 = vld [vmem:[#allocation64_spill] sm:$0xff]  ;;  %v2520_v54 = vadd.f32 %v2484_v51, %v2407_v6  ;;  %v2823_v51 = vadd.f32 %v2787_v7, %v2710_v29  ;;  %v1240_v6 = vmul.f32 %v9485_v8, %v8856_v13 }
 0x1ef   : > { %12867 = vst [vmem:[#allocation63_spill] sm:$0xff] %v9546_v39  ;;  %2036 = vst [vmem:[#allocation2 + $0x110] sm:$0xff] %v9477_v27  ;;  %v1614_v39 = vld [vmem:[%s7646_s25 + $0x80] sm:$0xff]  ;;  %v12869_v45 = vld [vmem:[#allocation31_spill] sm:$0xff]  ;;  %v824_v50 = vmul.f32 %v9299_v55, %v12870_v42  ;;  %v1050_v40 = vadd.f32 %v1014_v56, %v9424_v20 }
 0x1f0   : > { %v9565_v24 = vmul.f32 %v9366_v12, %v12869_v45  ;;  %v9567_v46 = vadd.f32 %v2294_v31, %v2217_v22  ;;  %v2142_v26 = vld [vmem:[#allocation2 + $0x99] sm:$0xff]  ;;  %v12872_v25 = vld [vmem:[#allocation66_spill] sm:$0xff]  ;;  %12873 = vst [vmem:[#allocation31_spill] sm:$0xff] %v9582_v32  ;;  %v6329_v22 = vpop.f32.mrb[77].mxu0  ;;  %v9584_v14 = vadd.f32 %v1614_v39, %v1578_v47  ;;  %v9595_v41 = vadd.f32 %v2597_v28, %v2520_v54 }
 0x1f1   : > { %v1127_v16 = vmul.f32 %v9402_v15, %v12872_v25  ;;  %v9578_v34 = vld [vmem:[#allocation2 + $0x119] sm:$0xff]  ;;  %v860_v5 = vadd.f32 %v824_v50, %v9464_v58  ;;  %12876 = vst [vmem:[#allocation66_spill] sm:$0xff] %v9593_v11  ;;  %v1968_v25 = vpop.f32.mrb[72].mxu1  ;;  %v1317_v39 = vmul.f32 %v9495_v38, %v8856_v13  ;;  %v1430_v58 = vmul.f32 %v9502_v1, %v8858_v48 }
 0x1f2   : > { %v9580_v31 = vld [vmem:[#allocation2 + $0x11a] sm:$0xff]  ;;  %v6484_v29 = vpop.f32.mrb[73].mxu1  ;;  %v2936_v50 = vadd.f32 %v2900_v18, %v2823_v51  ;;  %v2182_v56 = vmul.f32 %v9533_v37, %v2142_v26  ;;  %v2295_v48 = vmul.f32 %v9539_v10, %v2255_v0  ;;  %v9633_v51 = vld [vmem:[#allocation2 + $0x122] sm:$0xff] }
 0x1f3   : > { %v9589_v45 = vld [vmem:[#allocation2 + $0x11c] sm:$0xff]  ;;  %v9602_v22 = vadd.f32 %v937_v23, %v860_v5  ;;  %v1163_v20 = vadd.f32 %v1127_v16, %v1050_v40  ;;  %v1353_v13 = vadd.f32 %v1317_v39, %v9448_v63  ;;  %v9624_v63 = vld [vmem:[%s12397_s1 + $0x11] ss:$0 sm:$0xff]  ;;  %12879 = vst [vmem:[#allocation110_spill] sm:$0xff] %v9633_v51  ;;  %v9637_v40 = vld [vmem:[#allocation2 + $0x124] sm:$0xff] }
 0x1f4   : > { %12874 = vst [vmem:[#allocation64_spill] sm:$0xff] %v9589_v45  ;;  %v9591_v42 = vld [vmem:[#allocation2 + $0x11d] sm:$0xff]  ;;  %v9613_v18 = vadd.f32 %v2936_v50, %v9410_v9  ;;  %v9630_v9 = vld [vmem:[%s12397_s1 + $0x15] ss:$0 sm:$0xff]  ;;  %12881 = vst [vmem:[#allocation112_spill] sm:$0xff] %v9637_v40  ;;  %v2218_v29 = vadd.f32 %v2182_v56, %v9521_v59 }
 0x1f5   : > { %12875 = vst [vmem:[#allocation65_spill] sm:$0xff] %v9591_v42  ;;  %v2445_v7 = vld [vmem:[#allocation2 + $0x9b] sm:$0xff]  ;;  %2037 = vst [vmem:[#allocation2 + $0x118] sm:$0xff] %v1963_v33  ;;  %v9635_v5 = vld [vmem:[#allocation2 + $0x123] sm:$0xff]  ;;  %v1466_v39 = vadd.f32 %v1430_v58, %v1353_v13 }
 0x1f6   : > { %v2558_v47 = vld [vmem:[#allocation2 + $0x9c] sm:$0xff]  ;;  %v2485_v26 = vmul.f32 %v9624_v63, %v2445_v7  ;;  %12880 = vst [vmem:[#allocation111_spill] sm:$0xff] %v9635_v5  ;;  %v9643_v50 = vld [vmem:[#allocation2 + $0x125] sm:$0xff]  ;;  %v9655_v59 = vadd.f32 %v2295_v48, %v2218_v29  ;;  %v12886_v56 = vld [vmem:[#allocation70_spill] sm:$0xff]  ;;  %v1318_v29 = vmul.f32 %v9495_v38, %v8902_v61 }
 0x1f7   : > { %v12877_v27 = vld [vmem:[#allocation68_spill] sm:$0xff]  ;;  %v2598_v16 = vmul.f32 %v9630_v9, %v2558_v47  ;;  %v2675_v7 = vmul.f32 %v8964_v30, %v2558_v47  ;;  %12882 = vst [vmem:[#allocation113_spill] sm:$0xff] %v9643_v50  ;;  %v12884_v32 = vld [vmem:[#allocation19_spill] sm:$0xff] }
 0x1f8   : > { %v1543_v11 = vmul.f32 %v9511_v44, %v12877_v27  ;;  %v7002_v28 = vld [vmem:[#allocation2 + $0xa0] sm:$0xff]  ;;  %12878 = vst [vmem:[#allocation68_spill] sm:$0xff] %v9613_v18  ;;  %v9618_v27 = vld [vmem:[%s12397_s1 + $0xd] ss:$0 sm:$0xff] }
 0x1f9   : > { %v9607_v54 = vmul.f32 %v7002_v28, %v9518_v4  ;;  %v2748_v42 = vld [vmem:[#allocation2 + $0x9d] sm:$0xff]  ;;  %v2372_v23 = vmul.f32 %v9618_v27, %v2255_v0  ;;  %v9639_v0 = vadd.f32 %v1240_v6, %v1163_v20  ;;  %v9645_v28 = vld [vmem:[#allocation2 + $0x126] sm:$0xff]  ;;  %v9653_v6 = vmul.f32 %v9366_v12, %v12884_v32 }
 0x1fa   : > { %v2861_v33 = vld [vmem:[#allocation2 + $0x9e] sm:$0xff]  ;;  %12883 = vst [vmem:[#allocation114_spill] sm:$0xff] %v9645_v28  ;;  %v1615_v18 = vld [vmem:[%s7646_s25 + $0x88] sm:$0xff]  ;;  %v2788_v51 = vmul.f32 %v9085_v2, %v2748_v42  ;;  %2038 = vst [vmem:[#allocation2 + $0x120] sm:$0xff] %v1968_v25  ;;  %v1579_v58 = vadd.f32 %v1543_v11, %v1466_v39  ;;  %v2711_v30 = vadd.f32 %v2675_v7, %v9489_v52 }
 0x1fb   : > { %v2408_v45 = vadd.f32 %v2372_v23, %v9466_v19  ;;  %v2901_v5 = vmul.f32 %v9091_v62, %v2861_v33  ;;  %v12885_v47 = vld [vmem:[#allocation24_spill] sm:$0xff]  ;;  %v938_v19 = vmul.f32 %v9388_v21, %v12886_v56  ;;  %v1015_v42 = vmul.f32 %v9395_v53, %v12886_v56  ;;  %v12887_v33 = vld [vmem:[#allocation71_spill] sm:$0xff]  ;;  %v12888_v7 = vld [vmem:[#allocation37_spill] sm:$0xff] }
 0x1fc   : > { %v825_v20 = vmul.f32 %v9299_v55, %v12885_v47  ;;  %v1128_v32 = vmul.f32 %v9402_v15, %v12887_v33  ;;  %v9666_v23 = vadd.f32 %v1615_v18, %v1579_v58  ;;  %v2824_v11 = vadd.f32 %v2788_v51, %v2711_v30  ;;  %v2143_v48 = vld [vmem:[#allocation2 + $0xa1] sm:$0xff]  ;;  %v7008_v28 = vld [vmem:[#allocation2 + $0xb0] sm:$0xff] }
 0x1fd   : > { %v2521_v13 = vadd.f32 %v2485_v26, %v2408_v45  ;;  %v1241_v52 = vmul.f32 %v9485_v8, %v8902_v61  ;;  %v2256_v39 = vld [vmem:[#allocation2 + $0xa2] sm:$0xff]  ;;  %v1051_v26 = vadd.f32 %v1015_v42, %v9506_v43  ;;  %v1431_v47 = vmul.f32 %v9502_v1, %v12888_v7 }
 0x1fe   : > { %v861_v25 = vadd.f32 %v825_v20, %v9565_v24  ;;  %v2446_v18 = vld [vmem:[#allocation2 + $0xa3] sm:$0xff]  ;;  %v2937_v51 = vadd.f32 %v2901_v5, %v2824_v11  ;;  %v12889_v24 = vld [vmem:[#allocation38_spill] sm:$0xff]  ;;  %v1354_v43 = vadd.f32 %v1318_v29, %v9555_v49  ;;  %v2183_v61 = vmul.f32 %v9533_v37, %v2143_v48 }
 0x1ff   : > { %v9671_v45 = vadd.f32 %v2598_v16, %v2521_v13  ;;  %v2559_v58 = vld [vmem:[#allocation2 + $0xa4] sm:$0xff]  ;;  %v1544_v20 = vmul.f32 %v9511_v44, %v12889_v24  ;;  %v1164_v13 = vadd.f32 %v1128_v32, %v1051_v26  ;;  %v2296_v42 = vmul.f32 %v9539_v10, %v2256_v39  ;;  %v9707_v29 = vld [vmem:[#allocation2 + $0x12c] sm:$0xff] }
 0x200   : > { %v9678_v30 = vadd.f32 %v938_v19, %v861_v25  ;;  %v7006_v56 = vld [vmem:[#allocation2 + $0xa8] sm:$0xff]  ;;  %v9689_v5 = vadd.f32 %v2937_v51, %v9479_v17  ;;  %v2373_v19 = vmul.f32 %v9618_v27, %v2256_v39  ;;  %v2486_v11 = vmul.f32 %v9624_v63, %v2446_v18  ;;  %v9704_v17 = vld [vmem:[%s12397_s1 + $0x19] ss:$0 sm:$0xff]  ;;  %12893 = vst [vmem:[#allocation71_spill] sm:$0xff] %v9707_v29 }
 0x201   : > { %v9683_v16 = vmul.f32 %v7006_v56, %v9518_v4  ;;  %v2749_v33 = vld [vmem:[#allocation2 + $0xa5] sm:$0xff]  ;;  %v2599_v25 = vmul.f32 %v9630_v9, %v2559_v58  ;;  %v9698_v49 = vadd.f32 %v1241_v52, %v1164_v13  ;;  %v1467_v48 = vadd.f32 %v1431_v47, %v1354_v43  ;;  %v9709_v18 = vld [vmem:[#allocation2 + $0x12d] sm:$0xff] }
 0x202   : > { %v2862_v7 = vld [vmem:[#allocation2 + $0xa6] sm:$0xff]  ;;  %12890 = vst [vmem:[#allocation19_spill] sm:$0xff] %v9689_v5  ;;  %v2219_v26 = vadd.f32 %v2183_v61, %v9607_v54  ;;  %v2676_v39 = vmul.f32 %v9704_v17, %v2559_v58  ;;  %12894 = vst [vmem:[#allocation37_spill] sm:$0xff] %v9709_v18  ;;  %v9711_v51 = vld [vmem:[#allocation2 + $0x12e] sm:$0xff]  ;;  %v2409_v52 = vadd.f32 %v2373_v19, %v9567_v46  ;;  %v623_v61 = vpop.f32.mrb[78].mxu0  ;;  %v1973_v46 = vpop.f32.mrb[74].mxu1 }
 0x203   : > { %v9694_v24 = vld [vmem:[#allocation2 + $0x12a] sm:$0xff]  ;;  %12895 = vst [vmem:[#allocation38_spill] sm:$0xff] %v9711_v51  ;;  %v2789_v47 = vmul.f32 %v9085_v2, %v2749_v33  ;;  %v2902_v54 = vmul.f32 %v9091_v62, %v2862_v7  ;;  %v12896_v13 = vld [vmem:[#allocation12_spill] sm:$0xff]  ;;  %v1580_v5 = vadd.f32 %v1544_v20, %v1467_v48  ;;  %681 = vst [vmem:[#allocation2 + $0x138] sm:$0xff] %v623_v61 }
 0x204   : > { %12891 = vst [vmem:[#allocation24_spill] sm:$0xff] %v9694_v24  ;;  %v9696_v32 = vld [vmem:[#allocation2 + $0x12b] sm:$0xff]  ;;  %v9719_v43 = vmul.f32 %v9366_v12, %v12896_v13  ;;  %v9721_v58 = vadd.f32 %v2296_v42, %v2219_v26  ;;  %v2712_v29 = vadd.f32 %v2676_v39, %v9595_v41  ;;  %v2522_v19 = vadd.f32 %v2486_v11, %v2409_v52  ;;  %v12898_v33 = vld [vmem:[#allocation72_spill] sm:$0xff]  ;;  %v6487_v42 = vpop.f32.mrb[75].mxu1 }
 0x205   : > { %12892 = vst [vmem:[#allocation70_spill] sm:$0xff] %v9696_v32  ;;  %v1616_v56 = vld [vmem:[%s7646_s25 + $0x90] sm:$0xff]  ;;  %v12897_v18 = vld [vmem:[#allocation17_spill] sm:$0xff]  ;;  %v6332_v32 = vpop.f32.mrb[79].mxu0  ;;  %v939_v7 = vmul.f32 %v9388_v21, %v12898_v33  ;;  %v1016_v13 = vmul.f32 %v9395_v53, %v12898_v33  ;;  %2039 = vst [vmem:[#allocation2 + $0x128] sm:$0xff] %v1973_v46 }
 0x206   : > { %v826_v51 = vmul.f32 %v9299_v55, %v12897_v18  ;;  %v12899_v24 = vld [vmem:[#allocation73_spill] sm:$0xff]  ;;  %v9732_v48 = vadd.f32 %v1616_v56, %v1580_v5  ;;  %v2825_v41 = vadd.f32 %v2789_v47, %v2712_v29  ;;  %v12900_v39 = vld [vmem:[#allocation76_spill] sm:$0xff]  ;;  %v9737_v52 = vadd.f32 %v2599_v25, %v2522_v19  ;;  %v628_v29 = vpop.f32.mrb[80].mxu0  ;;  %v1978_v19 = vpop.f32.mrb[76].mxu1 }
 0x207   : > { %v1129_v20 = vmul.f32 %v9402_v15, %v12899_v24  ;;  %v1242_v32 = vmul.f32 %v9485_v8, %v12900_v39  ;;  %v2144_v11 = vld [vmem:[#allocation2 + $0xa9] sm:$0xff]  ;;  %v1052_v61 = vadd.f32 %v1016_v13, %v9602_v22  ;;  %v1319_v33 = vmul.f32 %v9495_v38, %v12900_v39  ;;  %682 = vst [vmem:[#allocation2 + $0x140] sm:$0xff] %v628_v29  ;;  %v6335_v22 = vpop.f32.mrb[81].mxu0 }
 0x208   : > { %v862_v26 = vadd.f32 %v826_v51, %v9653_v6  ;;  %v2257_v18 = vld [vmem:[#allocation2 + $0xaa] sm:$0xff]  ;;  %v2938_v47 = vadd.f32 %v2902_v54, %v2825_v41  ;;  %v9749_v25 = vmul.f32 %v7008_v28, %v9518_v4  ;;  %v6490_v41 = vpop.f32.mrb[77].mxu1 }
 0x209   : > { %v12901_v24 = vld [vmem:[#allocation77_spill] sm:$0xff]  ;;  %v12902_v51 = vld [vmem:[#allocation78_spill] sm:$0xff]  ;;  %v1165_v13 = vadd.f32 %v1129_v20, %v1052_v61  ;;  %v1355_v39 = vadd.f32 %v1319_v33, %v9639_v0  ;;  %v2297_v50 = vmul.f32 %v9539_v10, %v2257_v18  ;;  %v2374_v28 = vmul.f32 %v9618_v27, %v2257_v18  ;;  %v1617_v18 = vld [vmem:[%s7646_s25 + $0x98] sm:$0xff] }
 0x20a   : > { %v1432_v46 = vmul.f32 %v9502_v1, %v12901_v24  ;;  %v2447_v5 = vld [vmem:[#allocation2 + $0xab] sm:$0xff]  ;;  %v9744_v6 = vadd.f32 %v939_v7, %v862_v26  ;;  %v1545_v42 = vmul.f32 %v9511_v44, %v12902_v51  ;;  %v2184_v24 = vmul.f32 %v9533_v37, %v2144_v11  ;;  %v633_v26 = vpop.f32.mrb[82].mxu0  ;;  %v9764_v40 = vld [vmem:[#allocation2 + $0x134] sm:$0xff] }
 0x20b   : > { %v2560_v56 = vld [vmem:[#allocation2 + $0xac] sm:$0xff]  ;;  %v9755_v51 = vadd.f32 %v2938_v47, %v9584_v14  ;;  %v2487_v29 = vmul.f32 %v9624_v63, %v2447_v5  ;;  %v6338_v61 = vpop.f32.mrb[83].mxu0  ;;  %v9760_v0 = vadd.f32 %v1242_v32, %v1165_v13  ;;  %v9766_v41 = vld [vmem:[#allocation2 + $0x135] sm:$0xff]  ;;  %v2410_v5 = vadd.f32 %v2374_v28, %v9655_v59 }
 0x20c   : > { %v2750_v54 = vld [vmem:[#allocation2 + $0xad] sm:$0xff]  ;;  %v2600_v20 = vmul.f32 %v9630_v9, %v2560_v56  ;;  %v1468_v11 = vadd.f32 %v1432_v46, %v1355_v39  ;;  %v2220_v33 = vadd.f32 %v2184_v24, %v9683_v16  ;;  %v2677_v22 = vmul.f32 %v9704_v17, %v2560_v56  ;;  %12904 = vst [vmem:[#allocation17_spill] sm:$0xff] %v9766_v41  ;;  %v9768_v14 = vld [vmem:[#allocation2 + $0x136] sm:$0xff]  ;;  %v638_v47 = vpop.f32.mrb[84].mxu0  ;;  %v1983_v16 = vpop.f32.mrb[78].mxu1 }
 0x20d   : > { %v2863_v7 = vld [vmem:[#allocation2 + $0xae] sm:$0xff]  ;;  %12903 = vst [vmem:[#allocation12_spill] sm:$0xff] %v9755_v51  ;;  %12905 = vst [vmem:[#allocation72_spill] sm:$0xff] %v9768_v14  ;;  %v2790_v26 = vmul.f32 %v9085_v2, %v2750_v54  ;;  %v6341_v56 = vpop.f32.mrb[85].mxu0  ;;  %v12907_v47 = vld [vmem:[#allocation32_spill] sm:$0xff]  ;;  %v6493_v59 = vpop.f32.mrb[79].mxu1  ;;  %v2523_v28 = vadd.f32 %v2487_v29, %v2410_v5 }
 0x20e   : > { %v2903_v32 = vmul.f32 %v9091_v62, %v2863_v7  ;;  %v12906_v13 = vld [vmem:[#allocation69_spill] sm:$0xff]  ;;  %2040 = vst [vmem:[#allocation2 + $0x130] sm:$0xff] %v1978_v19  ;;  %v1581_v39 = vadd.f32 %v1545_v42, %v1468_v11  ;;  %v9778_v24 = vadd.f32 %v2297_v50, %v2220_v33  ;;  %v2713_v61 = vadd.f32 %v2677_v22, %v9671_v45  ;;  %v12908_v2 = vld [vmem:[#allocation11_spill] sm:$0xff]  ;;  %v12910_v11 = vld [vmem:[#allocation42_spill] sm:$0xff] }
 0x20f   : > { %v9776_v46 = vmul.f32 %v9366_v12, %v12906_v13  ;;  %v827_v51 = vmul.f32 %v9299_v55, %v12907_v47  ;;  %v940_v62 = vmul.f32 %v9388_v21, %v12908_v2  ;;  %v1017_v54 = vmul.f32 %v9395_v53, %v12908_v2  ;;  %v12909_v7 = vld [vmem:[#allocation79_spill] sm:$0xff]  ;;  %v12911_v2 = vld [vmem:[#allocation44_spill] sm:$0xff] }
 0x210   : > { %v1130_v19 = vmul.f32 %v9402_v15, %v12909_v7  ;;  %v2145_v13 = vld [vmem:[#allocation2 + $0xb1] sm:$0xff]  ;;  %v9789_v42 = vadd.f32 %v1617_v18, %v1581_v39  ;;  %v2826_v50 = vadd.f32 %v2790_v26, %v2713_v61  ;;  %v1243_v33 = vmul.f32 %v9485_v8, %v12910_v11  ;;  %v9801_v39 = vld [vmem:[#allocation2 + $0x13c] sm:$0xff] }
 0x211   : > { %v863_v45 = vadd.f32 %v827_v51, %v9719_v43  ;;  %v2258_v22 = vld [vmem:[#allocation2 + $0xb2] sm:$0xff]  ;;  %v9794_v56 = vadd.f32 %v2600_v20, %v2523_v28  ;;  %v1053_v47 = vadd.f32 %v1017_v54, %v9678_v30  ;;  %v1320_v59 = vmul.f32 %v9495_v38, %v12910_v11  ;;  %12912 = vst [vmem:[#allocation73_spill] sm:$0xff] %v9801_v39  ;;  %v9803_v26 = vld [vmem:[#allocation2 + $0x13d] sm:$0xff] }
 0x212   : > { %v2448_v29 = vld [vmem:[#allocation2 + $0xb3] sm:$0xff]  ;;  %v1433_v18 = vmul.f32 %v9502_v1, %v12911_v2  ;;  %12913 = vst [vmem:[#allocation76_spill] sm:$0xff] %v9803_v26  ;;  %v9805_v43 = vld [vmem:[#allocation2 + $0x13e] sm:$0xff]  ;;  %v2939_v51 = vadd.f32 %v2903_v32, %v2826_v50  ;;  %v2185_v2 = vmul.f32 %v9533_v37, %v2145_v13  ;;  %v2298_v26 = vmul.f32 %v9539_v10, %v2258_v22 }
 0x213   : > { %v2561_v5 = vld [vmem:[#allocation2 + $0xb4] sm:$0xff]  ;;  %12914 = vst [vmem:[#allocation77_spill] sm:$0xff] %v9805_v43  ;;  %v9807_v61 = vadd.f32 %v940_v62, %v863_v45  ;;  %v12915_v7 = vld [vmem:[#allocation80_spill] sm:$0xff]  ;;  %2041 = vst [vmem:[#allocation2 + $0x138] sm:$0xff] %v1983_v16  ;;  %v1166_v54 = vadd.f32 %v1130_v19, %v1053_v47  ;;  %v1356_v11 = vadd.f32 %v1320_v59, %v9698_v49 }
 0x214   : > { %v1546_v20 = vmul.f32 %v9511_v44, %v12915_v7  ;;  %v7009_v28 = vld [vmem:[#allocation2 + $0xb8] sm:$0xff]  ;;  %v9818_v62 = vadd.f32 %v2939_v51, %v9666_v23  ;;  %v2375_v50 = vmul.f32 %v9618_v27, %v2258_v22  ;;  %v2488_v45 = vmul.f32 %v9624_v63, %v2448_v29  ;;  %v1618_v13 = vld [vmem:[%s7646_s25 + $0xa0] sm:$0xff]  ;;  %v12918_v51 = vld [vmem:[#allocation45_spill] sm:$0xff] }
 0x215   : > { %v9812_v30 = vmul.f32 %v7009_v28, %v9518_v4  ;;  %v2751_v43 = vld [vmem:[#allocation2 + $0xb5] sm:$0xff]  ;;  %v2601_v7 = vmul.f32 %v9630_v9, %v2561_v5  ;;  %v9823_v28 = vadd.f32 %v1243_v33, %v1166_v54  ;;  %v1469_v16 = vadd.f32 %v1433_v18, %v1356_v11  ;;  %v9832_v23 = vld [vmem:[%s12397_s1 + $0x1d] ss:$0 sm:$0xff]  ;;  %v9838_v33 = vld [vmem:[%s12397_s1 + $0x21] ss:$0 sm:$0xff] }
 0x216   : > { %v2864_v32 = vld [vmem:[#allocation2 + $0xb6] sm:$0xff]  ;;  %12916 = vst [vmem:[#allocation78_spill] sm:$0xff] %v9818_v62  ;;  %v2221_v49 = vadd.f32 %v2185_v2, %v9749_v25  ;;  %v2678_v19 = vmul.f32 %v9704_v17, %v2561_v5  ;;  %v2411_v47 = vadd.f32 %v2375_v50, %v9721_v58  ;;  %v2791_v22 = vmul.f32 %v9832_v23, %v2751_v43  ;;  %v12919_v11 = vld [vmem:[#allocation81_spill] sm:$0xff] }
 0x217   : > { %v2904_v29 = vmul.f32 %v9838_v33, %v2864_v32  ;;  %v12917_v25 = vld [vmem:[#allocation39_spill] sm:$0xff]  ;;  %v1582_v59 = vadd.f32 %v1546_v20, %v1469_v16  ;;  %v828_v54 = vmul.f32 %v9299_v55, %v12918_v51  ;;  %v941_v2 = vmul.f32 %v9388_v21, %v12919_v11  ;;  %v12920_v32 = vld [vmem:[#allocation46_spill] sm:$0xff] }
 0x218   : > { %v9843_v5 = vmul.f32 %v9366_v12, %v12917_v25  ;;  %v9845_v58 = vadd.f32 %v2298_v26, %v2221_v49  ;;  %v2714_v18 = vadd.f32 %v2678_v19, %v9737_v52  ;;  %v2524_v43 = vadd.f32 %v2488_v45, %v2411_v47  ;;  %v1988_v25 = vpop.f32.mrb[80].mxu1  ;;  %v12921_v52 = vld [vmem:[#allocation20_spill] sm:$0xff]  ;;  %v12923_v14 = vld [vmem:[#allocation83_spill] sm:$0xff] }
 0x219   : > { %v1018_v50 = vmul.f32 %v9395_v53, %v12919_v11  ;;  %v1131_v62 = vmul.f32 %v9402_v15, %v12920_v32  ;;  %v9856_v39 = vadd.f32 %v1618_v13, %v1582_v59  ;;  %v864_v20 = vadd.f32 %v828_v54, %v9776_v46  ;;  %v2146_v49 = vld [vmem:[#allocation2 + $0xb9] sm:$0xff]  ;;  %2042 = vst [vmem:[#allocation2 + $0x140] sm:$0xff] %v1988_v25  ;;  %v6496_v19 = vpop.f32.mrb[81].mxu1  ;;  %v12922_v32 = vld [vmem:[#allocation82_spill] sm:$0xff] }
 0x21a   : > { %v2827_v26 = vadd.f32 %v2791_v22, %v2714_v18  ;;  %v1244_v16 = vmul.f32 %v9485_v8, %v12921_v52  ;;  %v2259_v45 = vld [vmem:[#allocation2 + $0xba] sm:$0xff]  ;;  %v9861_v47 = vadd.f32 %v2601_v7, %v2524_v43  ;;  %v1321_v11 = vmul.f32 %v9495_v38, %v12921_v52  ;;  %v1993_v46 = vpop.f32.mrb[82].mxu1 }
 0x21b   : > { %v1054_v51 = vadd.f32 %v1018_v50, %v9744_v6  ;;  %v1434_v13 = vmul.f32 %v9502_v1, %v12922_v32  ;;  %v2449_v22 = vld [vmem:[#allocation2 + $0xbb] sm:$0xff]  ;;  %v9868_v54 = vadd.f32 %v941_v2, %v864_v20  ;;  %v1547_v25 = vmul.f32 %v9511_v44, %v12923_v14  ;;  %v6499_v6 = vpop.f32.mrb[83].mxu1 }
 0x21c   : > { %v2562_v59 = vld [vmem:[#allocation2 + $0xbc] sm:$0xff]  ;;  %v2940_v18 = vadd.f32 %v2904_v29, %v2827_v26  ;;  %v1357_v50 = vadd.f32 %v1321_v11, %v9760_v0  ;;  %v2186_v52 = vmul.f32 %v9533_v37, %v2146_v49  ;;  %v2299_v32 = vmul.f32 %v9539_v10, %v2259_v45  ;;  %v1998_v2 = vpop.f32.mrb[84].mxu1  ;;  %v1619_v6 = vld [vmem:[%s7646_s25 + $0xa8] sm:$0xff] }
 0x21d   : > { %v7012_v19 = vld [vmem:[#allocation2 + $0xc0] sm:$0xff]  ;;  %v1167_v43 = vadd.f32 %v1131_v62, %v1054_v51  ;;  %v2376_v14 = vmul.f32 %v9618_v27, %v2259_v45  ;;  %v2489_v20 = vmul.f32 %v9624_v63, %v2449_v22  ;;  %v6502_v62 = vpop.f32.mrb[85].mxu1  ;;  %v2679_v11 = vmul.f32 %v9704_v17, %v2562_v59  ;;  %v12925_v45 = vld [vmem:[#allocation75_spill] sm:$0xff] }
 0x21e   : > { %v9873_v7 = vmul.f32 %v7012_v19, %v9518_v4  ;;  %v2752_v46 = vld [vmem:[#allocation2 + $0xbd] sm:$0xff]  ;;  %v9879_v26 = vadd.f32 %v2940_v18, %v9732_v48  ;;  %v2602_v19 = vmul.f32 %v9630_v9, %v2562_v59  ;;  %v1470_v0 = vadd.f32 %v1434_v13, %v1357_v50  ;;  %v12926_v13 = vld [vmem:[#allocation86_spill] sm:$0xff]  ;;  %v9907_v50 = vpop.f32.mrb[86].mxu0 }
 0x21f   : > { %v2865_v29 = vld [vmem:[#allocation2 + $0xbe] sm:$0xff]  ;;  %v9884_v51 = vadd.f32 %v1244_v16, %v1167_v43  ;;  %v2222_v49 = vadd.f32 %v2186_v52, %v9812_v30  ;;  %v2412_v2 = vadd.f32 %v2376_v14, %v9778_v24  ;;  %v2792_v48 = vmul.f32 %v9832_v23, %v2752_v46  ;;  %12930 = vst [vmem:[#allocation42_spill] sm:$0xff] %v9907_v50  ;;  %v9909_v52 = vpop.f32.mrb[86].mxu1  ;;  %v6537_v14 = vpop.f32.mrb[87].mxu0 }
 0x220   : > { %12924 = vst [vmem:[#allocation69_spill] sm:$0xff] %v9879_v26  ;;  %v2905_v18 = vmul.f32 %v9838_v33, %v2865_v29  ;;  %v9894_v22 = vmul.f32 %v9366_v12, %v12925_v45  ;;  %v1583_v26 = vadd.f32 %v1547_v25, %v1470_v0  ;;  %v2715_v16 = vadd.f32 %v2679_v11, %v9794_v56  ;;  %v9901_v59 = vld [vmem:[#allocation2] sm:$0xff]  ;;  %v12931_v29 = vld [vmem:[#allocation9_spill] sm:$0xff]  ;;  %v6698_v0 = vpop.f32.mrb[87].mxu1 }
 0x221   : > { %v9896_v62 = vadd.f32 %v2299_v32, %v2222_v49  ;;  %v829_v30 = vmul.f32 %v9299_v55, %v12926_v13  ;;  %12927 = vst [vmem:[#allocation32_spill] sm:$0xff] %v9901_v59  ;;  %v9903_v43 = vld [vmem:[#allocation2 + $0x1] sm:$0xff]  ;;  %v2525_v46 = vadd.f32 %v2489_v20, %v2412_v2  ;;  %v942_v25 = vmul.f32 %v9388_v21, %v12931_v29  ;;  %v12932_v32 = vld [vmem:[#allocation87_spill] sm:$0xff] }
 0x222   : > { %12928 = vst [vmem:[#allocation11_spill] sm:$0xff] %v9903_v43  ;;  %v9905_v24 = vld [vmem:[#allocation2 + $0x2] sm:$0xff]  ;;  %v1019_v56 = vmul.f32 %v9395_v53, %v12931_v29  ;;  %v1132_v55 = vmul.f32 %v9402_v15, %v12932_v32  ;;  %v9918_v49 = vadd.f32 %v1619_v6, %v1583_v26  ;;  %v2828_v11 = vadd.f32 %v2792_v48, %v2715_v16  ;;  %v9923_v43 = vpop.f32.mrb[88].mxu0  ;;  %v9925_v29 = vld [vmem:[#allocation2 + $0x11] sm:$0xff] }
 0x223   : > { %12929 = vst [vmem:[#allocation79_spill] sm:$0xff] %v9905_v24  ;;  %3362 = vst [vmem:[#allocation2] sm:$0xff] %v9907_v50  ;;  %v865_v45 = vadd.f32 %v829_v30, %v9843_v5  ;;  %v12933_v13 = vld [vmem:[#allocation88_spill] sm:$0xff]  ;;  %v9927_v59 = vadd.f32 %v2602_v19, %v2525_v46  ;;  %v12936_v6 = vld [vmem:[#allocation22_spill] sm:$0xff]  ;;  %v6540_v30 = vpop.f32.mrb[89].mxu0 }
 0x224   : > { %v1245_v20 = vmul.f32 %v9485_v8, %v12933_v13  ;;  %v2147_v2 = vld [vmem:[#allocation2 + $0xc1] sm:$0xff]  ;;  %12934 = vst [vmem:[#allocation44_spill] sm:$0xff] %v9923_v43  ;;  %12935 = vst [vmem:[#allocation80_spill] sm:$0xff] %v9925_v29  ;;  %v1055_v32 = vadd.f32 %v1019_v56, %v9807_v61  ;;  %v1322_v26 = vmul.f32 %v9495_v38, %v12933_v13  ;;  %v9942_v56 = vld [vmem:[#allocation2 + $0x12] sm:$0xff]  ;;  %v9948_v29 = vpop.f32.mrb[90].mxu0 }
 0x225   : > { %v2260_v24 = vld [vmem:[#allocation2 + $0xc2] sm:$0xff]  ;;  %v1435_v48 = vmul.f32 %v9502_v1, %v12936_v6  ;;  %3363 = vst [vmem:[#allocation2 + $0x8] sm:$0xff] %v9923_v43  ;;  %v2941_v14 = vadd.f32 %v2905_v18, %v2828_v11  ;;  %v9935_v0 = vadd.f32 %v942_v25, %v865_v45  ;;  %12938 = vst [vmem:[#allocation39_spill] sm:$0xff] %v9942_v56  ;;  %v9944_v13 = vld [vmem:[#allocation2 + $0x13] sm:$0xff] }
 0x226   : > { %v2450_v5 = vld [vmem:[#allocation2 + $0xc3] sm:$0xff]  ;;  %12939 = vst [vmem:[#allocation45_spill] sm:$0xff] %v9944_v13  ;;  %v9946_v6 = vld [vmem:[#allocation2 + $0x14] sm:$0xff]  ;;  %12941 = vst [vmem:[#allocation46_spill] sm:$0xff] %v9948_v29  ;;  %v1168_v30 = vadd.f32 %v1132_v55, %v1055_v32  ;;  %v1358_v18 = vadd.f32 %v1322_v26, %v9823_v28  ;;  %v2187_v25 = vmul.f32 %v9533_v37, %v2147_v2  ;;  %v4513_v2 = vpop.f32.mrb[88].mxu1 }
 0x227   : > { %v2563_v16 = vld [vmem:[#allocation2 + $0xc4] sm:$0xff]  ;;  %12940 = vst [vmem:[#allocation81_spill] sm:$0xff] %v9946_v6  ;;  %3364 = vst [vmem:[#allocation2 + $0x10] sm:$0xff] %v9948_v29  ;;  %v9955_v43 = vadd.f32 %v2941_v14, %v9789_v42  ;;  %v1620_v13 = vld [vmem:[%s7646_s25 + $0xb0] sm:$0xff]  ;;  %v2377_v6 = vmul.f32 %v9618_v27, %v2260_v24  ;;  %v2490_v56 = vmul.f32 %v9624_v63, %v2450_v5  ;;  %v6701_v5 = vpop.f32.mrb[89].mxu1 }
 0x228   : > { %v12937_v50 = vld [vmem:[#allocation89_spill] sm:$0xff]  ;;  %v2603_v55 = vmul.f32 %v9630_v9, %v2563_v16  ;;  %v9963_v32 = vadd.f32 %v1245_v20, %v1168_v30  ;;  %v1471_v26 = vadd.f32 %v1435_v48, %v1358_v18  ;;  %v2223_v41 = vadd.f32 %v2187_v25, %v9873_v7 }
 0x229   : > { %v1548_v19 = vmul.f32 %v9511_v44, %v12937_v50  ;;  %v7013_v46 = vld [vmem:[#allocation2 + $0xc8] sm:$0xff]  ;;  %v2300_v50 = vmul.f32 %v9539_v10, %v2260_v24  ;;  %12942 = vst [vmem:[#allocation20_spill] sm:$0xff] %v9955_v43  ;;  %v2413_v43 = vadd.f32 %v2377_v6, %v9845_v58  ;;  %v9995_v6 = vld [vmem:[%s12397_s1 + $0x4] ss:$0 sm:$0xff] }
 0x22a   : > { %v9940_v61 = vmul.f32 %v7013_v46, %v9518_v4  ;;  %v2753_v11 = vld [vmem:[#allocation2 + $0xc5] sm:$0xff]  ;;  %v6543_v46 = vpop.f32.mrb[91].mxu0 }
 0x22b   : > { %v2866_v45 = vld [vmem:[#allocation2 + $0xc6] sm:$0xff]  ;;  %v9961_v28 = vpop.f32.mrb[92].mxu0  ;;  %v2680_v46 = vmul.f32 %v9704_v17, %v2563_v16  ;;  %v2793_v20 = vmul.f32 %v9832_v23, %v2753_v11  ;;  %v9989_v5 = vadd.f32 %v2300_v50, %v2223_v41 }
 0x22c   : > { %12943 = vst [vmem:[#allocation82_spill] sm:$0xff] %v9961_v28  ;;  %v9967_v29 = vld [vmem:[#allocation2 + $0x21] sm:$0xff]  ;;  %3365 = vst [vmem:[#allocation2 + $0x18] sm:$0xff] %v9961_v28  ;;  %v6546_v24 = vpop.f32.mrb[93].mxu0  ;;  %v2906_v48 = vmul.f32 %v9838_v33, %v2866_v45  ;;  %v2526_v28 = vadd.f32 %v2490_v56, %v2413_v43 }
 0x22d   : > { %v9969_v42 = vld [vmem:[#allocation2 + $0x22] sm:$0xff]  ;;  %v1584_v24 = vadd.f32 %v1548_v19, %v1471_v26  ;;  %v2716_v58 = vadd.f32 %v2680_v46, %v9861_v47 }
 0x22e   : > { %v9971_v14 = vld [vmem:[#allocation2 + $0x23] sm:$0xff] }
 0x22f   : > { %12944 = vst [vmem:[#allocation83_spill] sm:$0xff] %v9971_v14  ;;  %v12945_v30 = vld [vmem:[#allocation41_spill] sm:$0xff]  ;;  %v9987_v14 = vpop.f32.mrb[94].mxu0  ;;  %v12952_v47 = vld [vmem:[#allocation48_spill] sm:$0xff] }
 0x230   : > { %v9979_v7 = vmul.f32 %v9366_v12, %v12945_v30  ;;  %v9981_v16 = vld [vmem:[#allocation2 + $0x24] sm:$0xff]  ;;  %12949 = vst [vmem:[#allocation87_spill] sm:$0xff] %v9987_v14  ;;  %v12950_v12 = vld [vmem:[#allocation23_spill] sm:$0xff]  ;;  %v6549_v45 = vpop.f32.mrb[95].mxu0  ;;  %v4518_v30 = vpop.f32.mrb[90].mxu1  ;;  %v1133_v50 = vmul.f32 %v9402_v15, %v12952_v47  ;;  %v10019_v47 = vadd.f32 %v2603_v55, %v2526_v28  ;;  %v7015_v28 = vld [vmem:[#allocation2 + $0xd0] sm:$0xff] }
 0x231   : > { %12946 = vst [vmem:[#allocation75_spill] sm:$0xff] %v9981_v16  ;;  %v9983_v18 = vld [vmem:[#allocation2 + $0x25] sm:$0xff]  ;;  %v830_v11 = vmul.f32 %v9995_v6, %v12950_v12  ;;  %v10010_v12 = vpop.f32.mrb[96].mxu0  ;;  %v2829_v45 = vadd.f32 %v2793_v20, %v2716_v58  ;;  %v12957_v20 = vld [vmem:[#allocation91_spill] sm:$0xff] }
 0x232   : > { %12947 = vst [vmem:[#allocation86_spill] sm:$0xff] %v9983_v18  ;;  %v9985_v25 = vld [vmem:[#allocation2 + $0x26] sm:$0xff]  ;;  %v6704_v18 = vpop.f32.mrb[91].mxu1  ;;  %12955 = vst [vmem:[#allocation89_spill] sm:$0xff] %v10010_v12  ;;  %v6552_v15 = vpop.f32.mrb[97].mxu0 }
 0x233   : > { %12948 = vst [vmem:[#allocation9_spill] sm:$0xff] %v9985_v25  ;;  %3366 = vst [vmem:[#allocation2 + $0x20] sm:$0xff] %v9987_v14  ;;  %v12951_v25 = vld [vmem:[#allocation8_spill] sm:$0xff]  ;;  %v10012_v14 = vadd.f32 %v1620_v13, %v1584_v24  ;;  %v866_v43 = vadd.f32 %v830_v11, %v9894_v22  ;;  %v12956_v56 = vld [vmem:[#allocation25_spill] sm:$0xff]  ;;  %v1436_v22 = vmul.f32 %v9502_v1, %v12957_v20 }
 0x234   : > { %v943_v19 = vmul.f32 %v9388_v21, %v12951_v25  ;;  %v1020_v41 = vmul.f32 %v9395_v53, %v12951_v25  ;;  %v10006_v26 = vld [vmem:[#allocation2 + $0x1] sm:$0xff]  ;;  %v1246_v21 = vmul.f32 %v9485_v8, %v12956_v56  ;;  %v2148_v16 = vld [vmem:[#allocation2 + $0xc9] sm:$0xff]  ;;  %3367 = vst [vmem:[#allocation2 + $0x28] sm:$0xff] %v10010_v12  ;;  %v1323_v13 = vmul.f32 %v9495_v38, %v12956_v56 }
 0x235   : > { %12953 = vst [vmem:[#allocation88_spill] sm:$0xff] %v10006_v26  ;;  %v10008_v46 = vld [vmem:[#allocation2 + $0x2] sm:$0xff]  ;;  %v2261_v53 = vld [vmem:[#allocation2 + $0xca] sm:$0xff]  ;;  %v2188_v26 = vmul.f32 %v9533_v37, %v2148_v16 }
 0x236   : > { %12954 = vst [vmem:[#allocation22_spill] sm:$0xff] %v10008_v46  ;;  %v2451_v25 = vld [vmem:[#allocation2 + $0xcb] sm:$0xff]  ;;  %4722 = vst [vmem:[#allocation2] sm:$0xff] %v9909_v52  ;;  %v1056_v18 = vadd.f32 %v1020_v41, %v9868_v54  ;;  %v2942_v46 = vadd.f32 %v2906_v48, %v2829_v45  ;;  %v10030_v52 = vadd.f32 %v943_v19, %v866_v43  ;;  %v12960_v12 = vld [vmem:[#allocation92_spill] sm:$0xff] }
 0x237   : > { %v2564_v24 = vld [vmem:[#allocation2 + $0xcc] sm:$0xff]  ;;  %v1549_v55 = vmul.f32 %v9511_v44, %v12960_v12  ;;  %v10035_v54 = vmul.f32 %v7015_v28, %v9518_v4  ;;  %v1359_v20 = vadd.f32 %v1323_v13, %v9884_v51  ;;  %v2378_v43 = vmul.f32 %v9618_v27, %v2261_v53 }
 0x238   : > { %v10026_v58 = vld [vmem:[#allocation2 + $0x9] sm:$0xff]  ;;  %v1169_v15 = vadd.f32 %v1133_v50, %v1056_v18  ;;  %v10040_v48 = vld [vmem:[#allocation2 + $0x11] sm:$0xff]  ;;  %v10047_v45 = vadd.f32 %v2942_v46, %v9856_v39  ;;  %v2604_v51 = vmul.f32 %v9630_v9, %v2564_v24  ;;  %v2224_v13 = vadd.f32 %v2188_v26, %v9940_v61  ;;  %v10073_v61 = vld [vmem:[%s12397_s1] ss:$0 sm:$0xff] }
 0x239   : > { %12958 = vst [vmem:[#allocation41_spill] sm:$0xff] %v10026_v58  ;;  %v10028_v11 = vld [vmem:[#allocation2 + $0xa] sm:$0xff]  ;;  %12961 = vst [vmem:[#allocation8_spill] sm:$0xff] %v10040_v48  ;;  %v10042_v19 = vld [vmem:[#allocation2 + $0x12] sm:$0xff]  ;;  %v1472_v18 = vadd.f32 %v1436_v22, %v1359_v20  ;;  %v2681_v28 = vmul.f32 %v9704_v17, %v2564_v24 }
 0x23a   : > { %12959 = vst [vmem:[#allocation23_spill] sm:$0xff] %v10028_v11  ;;  %v2754_v41 = vld [vmem:[#allocation2 + $0xcd] sm:$0xff]  ;;  %4723 = vst [vmem:[#allocation2 + $0x8] sm:$0xff] %v4513_v2  ;;  %v2301_v11 = vmul.f32 %v9539_v10, %v2261_v53  ;;  %v2491_v2 = vmul.f32 %v9624_v63, %v2451_v25  ;;  %v10054_v16 = vadd.f32 %v1246_v21, %v1169_v15  ;;  %v10062_v39 = vld [vmem:[#allocation2 + $0x1b] sm:$0xff] }
 0x23b   : > { %v2867_v56 = vld [vmem:[#allocation2 + $0xce] sm:$0xff]  ;;  %12962 = vst [vmem:[#allocation48_spill] sm:$0xff] %v10042_v19  ;;  %12964 = vst [vmem:[#allocation91_spill] sm:$0xff] %v10047_v45  ;;  %v10058_v19 = vld [vmem:[#allocation2 + $0x19] sm:$0xff]  ;;  %v2414_v25 = vadd.f32 %v2378_v43, %v9896_v62  ;;  %v2794_v21 = vmul.f32 %v9832_v23, %v2754_v41  ;;  %v1585_v20 = vadd.f32 %v1549_v55, %v1472_v18 }
 0x23c   : > { %v10044_v12 = vld [vmem:[#allocation2 + $0x13] sm:$0xff]  ;;  %12966 = vst [vmem:[#allocation115_spill] sm:$0xff] %v10058_v19  ;;  %12968 = vst [vmem:[#allocation117_spill] sm:$0xff] %v10062_v39  ;;  %v2907_v22 = vmul.f32 %v9838_v33, %v2867_v56  ;;  %v12969_v26 = vld [vmem:[#allocation84_spill] sm:$0xff]  ;;  %v10081_v45 = vadd.f32 %v2301_v11, %v2224_v13  ;;  %v2717_v62 = vadd.f32 %v2681_v28, %v9927_v59  ;;  %v10092_v19 = vpop.f32.mrb[98].mxu0 }
 0x23d   : > { %12963 = vst [vmem:[#allocation25_spill] sm:$0xff] %v10044_v12  ;;  %v10052_v50 = vld [vmem:[#allocation2 + $0x14] sm:$0xff]  ;;  %v10077_v24 = vmul.f32 %v10073_v61, %v12969_v26  ;;  %v10079_v15 = vld [vmem:[#allocation2 + $0x1c] sm:$0xff]  ;;  %12975 = vst [vmem:[#allocation120_spill] sm:$0xff] %v10092_v19 }
 0x23e   : > { %12965 = vst [vmem:[#allocation92_spill] sm:$0xff] %v10052_v50  ;;  %v10060_v12 = vld [vmem:[#allocation2 + $0x1a] sm:$0xff]  ;;  %4724 = vst [vmem:[#allocation2 + $0x10] sm:$0xff] %v4518_v30  ;;  %v4523_v30 = vpop.f32.mrb[92].mxu1  ;;  %v10097_v11 = vld [vmem:[%s12397_s1 + $0x8] ss:$0 sm:$0xff] }
 0x23f   : > { %12967 = vst [vmem:[#allocation116_spill] sm:$0xff] %v10060_v12  ;;  %v10064_v46 = vld [vmem:[#allocation2 + $0x33] sm:$0xff]  ;;  %12970 = vst [vmem:[#allocation84_spill] sm:$0xff] %v10079_v15  ;;  %v6707_v26 = vpop.f32.mrb[93].mxu1  ;;  %v2527_v15 = vadd.f32 %v2491_v2, %v2414_v25  ;;  %v12976_v59 = vld [vmem:[#allocation93_spill] sm:$0xff]  ;;  %v6555_v25 = vpop.f32.mrb[99].mxu0 }
 0x240   : > { %v1621_v53 = vld [vmem:[%s7646_s25 + $0xb8] sm:$0xff]  ;;  %4725 = vst [vmem:[#allocation2 + $0x18] sm:$0xff] %v4523_v30  ;;  %v944_v55 = vmul.f32 %v10097_v11, %v12976_v59  ;;  %v10104_v18 = vld [vmem:[%s12397_s1 + $0xc] ss:$0 sm:$0xff]  ;;  %v10111_v2 = vld [vmem:[%s12397_s1 + $0x10] ss:$0 sm:$0xff]  ;;  %v1437_v25 = vmul.f32 %v9502_v1, %v9217_v3 }
 0x241   : > { %v12971_v41 = vld [vmem:[#allocation51_spill] sm:$0xff]  ;;  %v1021_v13 = vmul.f32 %v10104_v18, %v12976_v59  ;;  %v1134_v28 = vmul.f32 %v10111_v2, %v9213_v57  ;;  %v10116_v30 = vadd.f32 %v1621_v53, %v1585_v20  ;;  %v12977_v50 = vld [vmem:[#allocation52_spill] sm:$0xff] }
 0x242   : > { %v831_v56 = vmul.f32 %v9995_v6, %v12971_v41  ;;  %v10086_v43 = vld [vmem:[#allocation2 + $0x34] sm:$0xff]  ;;  %v2830_v41 = vadd.f32 %v2794_v21, %v2717_v62  ;;  %v1247_v48 = vmul.f32 %v9485_v8, %v12977_v50  ;;  %v1324_v57 = vmul.f32 %v9495_v38, %v12977_v50  ;;  %v10138_v1 = vld [vmem:[#allocation2 + $0x21] sm:$0xff] }
 0x243   : > { %12972 = vst [vmem:[#allocation51_spill] sm:$0xff] %v10086_v43  ;;  %v10088_v39 = vld [vmem:[#allocation2 + $0x35] sm:$0xff]  ;;  %v1550_v8 = vmul.f32 %v9511_v44, %v9224_v36  ;;  %12978 = vst [vmem:[#allocation93_spill] sm:$0xff] %v10138_v1 }
 0x244   : > { %12973 = vst [vmem:[#allocation118_spill] sm:$0xff] %v10088_v39  ;;  %v10090_v12 = vld [vmem:[#allocation2 + $0x36] sm:$0xff]  ;;  %v867_v26 = vadd.f32 %v831_v56, %v9979_v7  ;;  %v1057_v39 = vadd.f32 %v1021_v13, %v9935_v0  ;;  %v2943_v21 = vadd.f32 %v2907_v22, %v2830_v41  ;;  %v1360_v38 = vadd.f32 %v1324_v57, %v9963_v32  ;;  %v10140_v22 = vld [vmem:[#allocation2 + $0x22] sm:$0xff] }
 0x245   : > { %12974 = vst [vmem:[#allocation119_spill] sm:$0xff] %v10090_v12  ;;  %3368 = vst [vmem:[#allocation2 + $0x30] sm:$0xff] %v10092_v19  ;;  %v2149_v59 = vld [vmem:[#allocation2 + $0xd1] sm:$0xff]  ;;  %v10121_v12 = vadd.f32 %v2604_v51, %v2527_v15 }
 0x246   : > { %v2262_v58 = vld [vmem:[#allocation2 + $0xd2] sm:$0xff]  ;;  %v10128_v62 = vadd.f32 %v944_v55, %v867_v26  ;;  %v1170_v56 = vadd.f32 %v1134_v28, %v1057_v39  ;;  %v2189_v50 = vmul.f32 %v9533_v37, %v2149_v59  ;;  %12979 = vst [vmem:[#allocation52_spill] sm:$0xff] %v10140_v22  ;;  %v10142_v55 = vld [vmem:[#allocation2 + $0x23] sm:$0xff]  ;;  %v10145_v36 = vadd.f32 %v2943_v21, %v9918_v49 }
 0x247   : > { %v2452_v53 = vld [vmem:[#allocation2 + $0xd3] sm:$0xff]  ;;  %v2302_v3 = vmul.f32 %v9539_v10, %v2262_v58  ;;  %12980 = vst [vmem:[#allocation121_spill] sm:$0xff] %v10142_v55  ;;  %v10150_v39 = vld [vmem:[#allocation2 + $0x24] sm:$0xff]  ;;  %v1473_v28 = vadd.f32 %v1437_v25, %v1360_v38  ;;  %v4528_v25 = vpop.f32.mrb[94].mxu1 }
 0x248   : > { %v2565_v20 = vld [vmem:[#allocation2 + $0xd4] sm:$0xff]  ;;  %12981 = vst [vmem:[#allocation122_spill] sm:$0xff] %v10145_v36  ;;  %v2492_v44 = vmul.f32 %v9624_v63, %v2452_v53  ;;  %12982 = vst [vmem:[#allocation123_spill] sm:$0xff] %v10150_v39  ;;  %v10152_v37 = vld [vmem:[#allocation2 + $0x25] sm:$0xff]  ;;  %v10156_v13 = vadd.f32 %v1247_v48, %v1170_v56  ;;  %v2225_v41 = vadd.f32 %v2189_v50, %v10035_v54  ;;  %v10172_v56 = vpop.f32.mrb[100].mxu0 }
 0x249   : > { %v7020_v7 = vld [vmem:[#allocation2 + $0xd8] sm:$0xff]  ;;  %v2605_v32 = vmul.f32 %v9630_v9, %v2565_v20  ;;  %12983 = vst [vmem:[#allocation124_spill] sm:$0xff] %v10152_v37  ;;  %v10154_v10 = vld [vmem:[#allocation2 + $0x26] sm:$0xff]  ;;  %v2682_v49 = vmul.f32 %v9704_v17, %v2565_v20  ;;  %v12985_v53 = vld [vmem:[#allocation90_spill] sm:$0xff]  ;;  %v1586_v54 = vadd.f32 %v1550_v8, %v1473_v28  ;;  %v6558_v36 = vpop.f32.mrb[101].mxu0 }
 0x24a   : > { %v10133_v51 = vmul.f32 %v7020_v7, %v9518_v4  ;;  %v2755_v15 = vld [vmem:[#allocation2 + $0xd5] sm:$0xff]  ;;  %v2379_v4 = vmul.f32 %v9618_v27, %v2262_v58  ;;  %12984 = vst [vmem:[#allocation125_spill] sm:$0xff] %v10154_v10  ;;  %v1622_v26 = vld [vmem:[%s7646_s25 + $0xc0] sm:$0xff]  ;;  %v10166_v21 = vmul.f32 %v10073_v61, %v12985_v53  ;;  %12988 = vst [vmem:[#allocation127_spill] sm:$0xff] %v10172_v56  ;;  %v6710_v53 = vpop.f32.mrb[95].mxu1 }
 0x24b   : > { %v2868_v0 = vld [vmem:[#allocation2 + $0xd6] sm:$0xff]  ;;  %v2795_v59 = vmul.f32 %v9832_v23, %v2755_v15  ;;  %v10174_v20 = vadd.f32 %v2302_v3, %v2225_v41  ;;  %v12989_v38 = vld [vmem:[#allocation53_spill] sm:$0xff]  ;;  %4726 = vst [vmem:[#allocation2 + $0x20] sm:$0xff] %v4528_v25  ;;  %3369 = vst [vmem:[#allocation2 + $0x38] sm:$0xff] %v10172_v56  ;;  %v4533_v25 = vpop.f32.mrb[96].mxu1  ;;  %v10198_v53 = vpop.f32.mrb[102].mxu0  ;;  %v10200_v36 = vadd.f32 %v1622_v26, %v1586_v54 }
 0x24c   : > { %v2415_v58 = vadd.f32 %v2379_v4, %v9989_v5  ;;  %v2908_v57 = vmul.f32 %v9838_v33, %v2868_v0  ;;  %v10168_v7 = vld [vmem:[#allocation2 + $0x29] sm:$0xff]  ;;  %v2718_v5 = vadd.f32 %v2682_v49, %v10019_v47  ;;  %v832_v15 = vmul.f32 %v9995_v6, %v12989_v38  ;;  %v7026_v10 = vld [vmem:[#allocation2 + $0xe0] sm:$0xff] }
 0x24d   : > { %12986 = vst [vmem:[#allocation90_spill] sm:$0xff] %v10168_v7  ;;  %v10170_v48 = vld [vmem:[#allocation2 + $0x2a] sm:$0xff]  ;;  %v6561_v7 = vpop.f32.mrb[103].mxu0  ;;  %v10255_v55 = vld [vmem:[%s12397_s1 + $0x9] ss:$0 sm:$0xff] }
 0x24e   : > { %12987 = vst [vmem:[#allocation126_spill] sm:$0xff] %v10170_v48  ;;  %v10179_v0 = vld [vmem:[#allocation2 + $0x2b] sm:$0xff]  ;;  %v2528_v3 = vadd.f32 %v2492_v44, %v2415_v58  ;;  %v2831_v56 = vadd.f32 %v2795_v59, %v2718_v5  ;;  %v10206_v44 = vld [vmem:[%s12397_s1 + $0x14] ss:$0 sm:$0xff]  ;;  %v10224_v5 = vld [vmem:[%s12397_s1 + $0x1c] ss:$0 sm:$0xff] }
 0x24f   : > { %12990 = vst [vmem:[#allocation53_spill] sm:$0xff] %v10179_v0  ;;  %v10181_v50 = vld [vmem:[#allocation2 + $0x2c] sm:$0xff]  ;;  %v2150_v0 = vld [vmem:[#allocation2 + $0xd9] sm:$0xff] }
 0x250   : > { %12991 = vst [vmem:[#allocation128_spill] sm:$0xff] %v10181_v50  ;;  %v10183_v4 = vld [vmem:[#allocation2 + $0x2d] sm:$0xff]  ;;  %v10186_v48 = vld [vmem:[#allocation2 + $0x45] sm:$0xff]  ;;  %v868_v50 = vadd.f32 %v832_v15, %v10077_v24  ;;  %v10211_v26 = vadd.f32 %v2605_v32, %v2528_v3  ;;  %v10217_v24 = vld [vmem:[%s12397_s1 + $0x18] ss:$0 sm:$0xff] }
 0x251   : > { %12992 = vst [vmem:[#allocation129_spill] sm:$0xff] %v10183_v4  ;;  %12993 = vst [vmem:[#allocation130_spill] sm:$0xff] %v10186_v48  ;;  %v10188_v8 = vld [vmem:[#allocation2 + $0x46] sm:$0xff]  ;;  %v12995_v47 = vld [vmem:[#allocation14_spill] sm:$0xff] }
 0x252   : > { %12994 = vst [vmem:[#allocation131_spill] sm:$0xff] %v10188_v8  ;;  %v945_v28 = vmul.f32 %v10097_v11, %v12995_v47  ;;  %v1022_v41 = vmul.f32 %v10104_v18, %v12995_v47  ;;  %v12996_v49 = vld [vmem:[#allocation54_spill] sm:$0xff]  ;;  %3370 = vst [vmem:[#allocation2 + $0x40] sm:$0xff] %v10198_v53  ;;  %v13000_v15 = vld [vmem:[#allocation55_spill] sm:$0xff] }
 0x253   : > { %v1135_v38 = vmul.f32 %v10111_v2, %v12996_v49  ;;  %v10196_v4 = vld [vmem:[#allocation2 + $0x2e] sm:$0xff]  ;;  %12998 = vst [vmem:[#allocation54_spill] sm:$0xff] %v10198_v53  ;;  %v2263_v49 = vld [vmem:[#allocation2 + $0xda] sm:$0xff]  ;;  %v1438_v7 = vmul.f32 %v10224_v5, %v13000_v15 }
 0x254   : > { %12997 = vst [vmem:[#allocation14_spill] sm:$0xff] %v10196_v4  ;;  %v12999_v58 = vld [vmem:[#allocation94_spill] sm:$0xff]  ;;  %4727 = vst [vmem:[#allocation2 + $0x28] sm:$0xff] %v4533_v25  ;;  %v6713_v4 = vpop.f32.mrb[97].mxu1  ;;  %v1058_v59 = vadd.f32 %v1022_v41, %v10030_v52  ;;  %v2453_v32 = vld [vmem:[#allocation2 + $0xdb] sm:$0xff]  ;;  %v3193_v52 = vpop.f32.mrb[104].mxu0  ;;  %v2944_v41 = vadd.f32 %v2908_v57, %v2831_v56  ;;  %v10228_v25 = vadd.f32 %v945_v28, %v868_v50 }
 0x255   : > { %v1248_v47 = vmul.f32 %v10206_v44, %v12999_v58  ;;  %v1325_v54 = vmul.f32 %v10217_v24, %v12999_v58  ;;  %v2566_v4 = vld [vmem:[#allocation2 + $0xdc] sm:$0xff]  ;;  %v4538_v3 = vpop.f32.mrb[98].mxu1  ;;  %3371 = vst [vmem:[#allocation2 + $0x48] sm:$0xff] %v3193_v52  ;;  %v6564_v56 = vpop.f32.mrb[105].mxu0  ;;  %v10269_v48 = vld [vmem:[#allocation2 + $0x31] sm:$0xff] }
 0x256   : > { %v10233_v53 = vld [vmem:[%s12397_s1 + $0x20] ss:$0 sm:$0xff]  ;;  %v13001_v58 = vld [vmem:[#allocation35_spill] sm:$0xff]  ;;  %v10240_v15 = vld [vmem:[%s12397_s1 + $0x1] ss:$0 sm:$0xff]  ;;  %v6716_v57 = vpop.f32.mrb[99].mxu1  ;;  %v1171_v50 = vadd.f32 %v1135_v38, %v1058_v59  ;;  %v10259_v38 = vadd.f32 %v2944_v41, %v10012_v14  ;;  %v2380_v59 = vmul.f32 %v9618_v27, %v2263_v49  ;;  %v2606_v56 = vmul.f32 %v9630_v9, %v2566_v4 }
 0x257   : > { %v1551_v19 = vmul.f32 %v10233_v53, %v13001_v58  ;;  %v10243_v37 = vmul.f32 %v7026_v10, %v10240_v15  ;;  %v1361_v28 = vadd.f32 %v1325_v54, %v10054_v16  ;;  %v10249_v58 = vld [vmem:[%s12397_s1 + $0x5] ss:$0 sm:$0xff]  ;;  %v2303_v10 = vmul.f32 %v10255_v55, %v2263_v49  ;;  %v2756_v57 = vld [vmem:[#allocation2 + $0xdd] sm:$0xff]  ;;  %v1623_v16 = vld [vmem:[%s7646_s25 + $0xc8] sm:$0xff]  ;;  %13003 = vst [vmem:[#allocation55_spill] sm:$0xff] %v10269_v48 }
 0x258   : > { %v2190_v39 = vmul.f32 %v10249_v58, %v2150_v0  ;;  %v2869_v52 = vld [vmem:[#allocation2 + $0xde] sm:$0xff]  ;;  %13002 = vst [vmem:[#allocation94_spill] sm:$0xff] %v10259_v38  ;;  %v2493_v54 = vmul.f32 %v9624_v63, %v2453_v32  ;;  %v10265_v0 = vadd.f32 %v1248_v47, %v1171_v50  ;;  %v2683_v8 = vmul.f32 %v9704_v17, %v2566_v4  ;;  %v10271_v43 = vld [vmem:[#allocation2 + $0x32] sm:$0xff]  ;;  %v13006_v9 = vld [vmem:[#allocation49_spill] sm:$0xff]  ;;  %v10288_v32 = vpop.f32.mrb[106].mxu0 }
 0x259   : > { %v1474_v22 = vadd.f32 %v1438_v7, %v1361_v28  ;;  %13004 = vst [vmem:[#allocation35_spill] sm:$0xff] %v10271_v43  ;;  %v10273_v14 = vld [vmem:[#allocation2 + $0x33] sm:$0xff]  ;;  %v2416_v41 = vadd.f32 %v2380_v59, %v10081_v45  ;;  %v2796_v27 = vmul.f32 %v9832_v23, %v2756_v57  ;;  %v2909_v63 = vmul.f32 %v9838_v33, %v2869_v52  ;;  %v4543_v7 = vpop.f32.mrb[100].mxu1  ;;  %v2151_v57 = vld [vmem:[#allocation2 + $0xe1] sm:$0xff] }
 0x25a   : > { %v2226_v1 = vadd.f32 %v2190_v39, %v10133_v51  ;;  %13005 = vst [vmem:[#allocation132_spill] sm:$0xff] %v10273_v14  ;;  %v10280_v47 = vmul.f32 %v10073_v61, %v13006_v9  ;;  %v10282_v49 = vld [vmem:[#allocation2 + $0x34] sm:$0xff]  ;;  %13010 = vst [vmem:[#allocation135_spill] sm:$0xff] %v10288_v32  ;;  %v2719_v45 = vadd.f32 %v2683_v8, %v10121_v12  ;;  %v2264_v52 = vld [vmem:[#allocation2 + $0xe2] sm:$0xff] }
 0x25b   : > { %13007 = vst [vmem:[#allocation49_spill] sm:$0xff] %v10282_v49  ;;  %v10284_v51 = vld [vmem:[#allocation2 + $0x35] sm:$0xff]  ;;  %v1587_v4 = vadd.f32 %v1551_v19, %v1474_v22  ;;  %v833_v28 = vmul.f32 %v9995_v6, %v9274_v60  ;;  %3372 = vst [vmem:[#allocation2 + $0x50] sm:$0xff] %v10288_v32  ;;  %v6567_v19 = vpop.f32.mrb[107].mxu0  ;;  %v946_v12 = vmul.f32 %v10097_v11, %v9276_v35  ;;  %v13014_v22 = vld [vmem:[#allocation97_spill] sm:$0xff] }
 0x25c   : > { %13008 = vst [vmem:[#allocation133_spill] sm:$0xff] %v10284_v51  ;;  %v10286_v39 = vld [vmem:[#allocation2 + $0x36] sm:$0xff]  ;;  %v10290_v50 = vadd.f32 %v2303_v10, %v2226_v1  ;;  %v2529_v1 = vadd.f32 %v2493_v54, %v2416_v41  ;;  %v1023_v60 = vmul.f32 %v10104_v18, %v9276_v35  ;;  %v1136_v8 = vmul.f32 %v10111_v2, %v13014_v22  ;;  %v2454_v10 = vld [vmem:[#allocation2 + $0xe3] sm:$0xff]  ;;  %v3203_v19 = vpop.f32.mrb[108].mxu0 }
 0x25d   : > { %13009 = vst [vmem:[#allocation134_spill] sm:$0xff] %v10286_v39  ;;  %v10295_v59 = vld [vmem:[#allocation2 + $0x39] sm:$0xff]  ;;  %4728 = vst [vmem:[#allocation2 + $0x30] sm:$0xff] %v4538_v3  ;;  %v6719_v39 = vpop.f32.mrb[101].mxu1  ;;  %v10314_v54 = vadd.f32 %v1623_v16, %v1587_v4  ;;  %v2832_v41 = vadd.f32 %v2796_v27, %v2719_v45  ;;  %v869_v32 = vadd.f32 %v833_v28, %v10166_v21  ;;  %v10319_v49 = vld [vmem:[#allocation2 + $0x41] sm:$0xff] }
 0x25e   : > { %13011 = vst [vmem:[#allocation136_spill] sm:$0xff] %v10295_v59  ;;  %v10297_v9 = vld [vmem:[#allocation2 + $0x3a] sm:$0xff]  ;;  %v2567_v59 = vld [vmem:[#allocation2 + $0xe4] sm:$0xff]  ;;  %v4548_v39 = vpop.f32.mrb[102].mxu1  ;;  %3373 = vst [vmem:[#allocation2 + $0x58] sm:$0xff] %v3203_v19  ;;  %v1059_v16 = vadd.f32 %v1023_v60, %v10128_v62  ;;  %v2191_v19 = vmul.f32 %v10249_v58, %v2151_v57 }
 0x25f   : > { %13012 = vst [vmem:[#allocation137_spill] sm:$0xff] %v10297_v9  ;;  %v10299_v38 = vld [vmem:[#allocation2 + $0x3b] sm:$0xff]  ;;  %v10323_v14 = vld [vmem:[#allocation2 + $0x43] sm:$0xff]  ;;  %v13022_v27 = vld [vmem:[#allocation98_spill] sm:$0xff] }
 0x260   : > { %13013 = vst [vmem:[#allocation138_spill] sm:$0xff] %v10299_v38  ;;  %v10308_v9 = vld [vmem:[#allocation2 + $0x3c] sm:$0xff]  ;;  %13021 = vst [vmem:[#allocation142_spill] sm:$0xff] %v10323_v14  ;;  %v1439_v4 = vmul.f32 %v10224_v5, %v13022_v27  ;;  %v10332_v45 = vld [vmem:[#allocation2 + $0x44] sm:$0xff]  ;;  %v2304_v27 = vmul.f32 %v10255_v55, %v2264_v52 }
 0x261   : > { %13015 = vst [vmem:[#allocation97_spill] sm:$0xff] %v10308_v9  ;;  %v10310_v38 = vld [vmem:[#allocation2 + $0x3d] sm:$0xff]  ;;  %v10325_v9 = vadd.f32 %v2606_v56, %v2529_v1  ;;  %13023 = vst [vmem:[#allocation98_spill] sm:$0xff] %v10332_v45  ;;  %v10334_v28 = vld [vmem:[#allocation2 + $0x45] sm:$0xff] }
 0x262   : > { %13016 = vst [vmem:[#allocation139_spill] sm:$0xff] %v10310_v38  ;;  %v10312_v3 = vld [vmem:[#allocation2 + $0x3e] sm:$0xff]  ;;  %v6722_v38 = vpop.f32.mrb[103].mxu1  ;;  %13024 = vst [vmem:[#allocation143_spill] sm:$0xff] %v10334_v28  ;;  %v7029_v1 = vld [vmem:[#allocation2 + $0xe8] sm:$0xff] }
 0x263   : > { %13017 = vst [vmem:[#allocation140_spill] sm:$0xff] %v10312_v3  ;;  %v13018_v51 = vld [vmem:[#allocation43_spill] sm:$0xff]  ;;  %v10321_v22 = vld [vmem:[#allocation2 + $0x42] sm:$0xff]  ;;  %4729 = vst [vmem:[#allocation2 + $0x38] sm:$0xff] %v4543_v7  ;;  %v6570_v3 = vpop.f32.mrb[109].mxu0  ;;  %v2945_v7 = vadd.f32 %v2909_v63, %v2832_v41  ;;  %v10338_v38 = vadd.f32 %v946_v12, %v869_v32  ;;  %v10343_v62 = vmul.f32 %v7029_v1, %v10240_v15 }
 0x264   : > { %v1249_v35 = vmul.f32 %v10206_v44, %v13018_v51  ;;  %13019 = vst [vmem:[#allocation43_spill] sm:$0xff] %v10319_v49  ;;  %13020 = vst [vmem:[#allocation141_spill] sm:$0xff] %v10321_v22  ;;  %v1326_v21 = vmul.f32 %v10217_v24, %v13018_v51  ;;  %v10336_v22 = vld [vmem:[#allocation2 + $0x46] sm:$0xff]  ;;  %v13026_v3 = vld [vmem:[#allocation99_spill] sm:$0xff]  ;;  %v1172_v51 = vadd.f32 %v1136_v8, %v1059_v16  ;;  %v10369_v41 = vpop.f32.mrb[110].mxu0 }
 0x265   : > { %13025 = vst [vmem:[#allocation144_spill] sm:$0xff] %v10336_v22  ;;  %v1552_v56 = vmul.f32 %v10233_v53, %v13026_v3  ;;  %4730 = vst [vmem:[#allocation2 + $0x40] sm:$0xff] %v4548_v39  ;;  %v2757_v28 = vld [vmem:[#allocation2 + $0xe5] sm:$0xff]  ;;  %v3017_v63 = vadd.f32 %v2945_v7, %v10116_v30  ;;  %v10352_v32 = vld [vmem:[%s12397_s1 + $0xd] ss:$0 sm:$0xff]  ;;  %v10367_v39 = vpop.f32.mrb[104].mxu1  ;;  %v2684_v7 = vmul.f32 %v9704_v17, %v2567_v59 }
 0x266   : > { %v1362_v60 = vadd.f32 %v1326_v21, %v10156_v13  ;;  %v2870_v22 = vld [vmem:[#allocation2 + $0xe6] sm:$0xff]  ;;  %v2381_v12 = vmul.f32 %v10352_v32, %v2264_v52  ;;  %v10358_v13 = vld [vmem:[%s12397_s1 + $0x11] ss:$0 sm:$0xff]  ;;  %v10364_v30 = vld [vmem:[%s12397_s1 + $0x15] ss:$0 sm:$0xff]  ;;  %13027 = vst [vmem:[#allocation99_spill] sm:$0xff] %v10369_v41  ;;  %v10371_v16 = vadd.f32 %v1249_v35, %v1172_v51  ;;  %v2227_v21 = vadd.f32 %v2191_v19, %v10243_v37 }
 0x267   : > { %v2494_v57 = vmul.f32 %v10358_v13, %v2454_v10  ;;  %v2607_v8 = vmul.f32 %v10364_v30, %v2567_v59  ;;  %v6725_v3 = vpop.f32.mrb[105].mxu1  ;;  %3374 = vst [vmem:[#allocation2 + $0x60] sm:$0xff] %v10369_v41  ;;  %v6573_v10 = vpop.f32.mrb[111].mxu0  ;;  %3053 = vst [vmem:[%s7646_s25 + $0xb8] sm:$0xff] %v3017_v63  ;;  %v1624_v1 = vld [vmem:[%s7646_s25 + $0xd0] sm:$0xff]  ;;  %v2797_v14 = vmul.f32 %v9832_v23, %v2757_v28  ;;  %v13028_v43 = vld [vmem:[#allocation15_spill] sm:$0xff] }
 0x268   : > { %v1475_v52 = vadd.f32 %v1439_v4, %v1362_v60  ;;  %v2417_v45 = vadd.f32 %v2381_v12, %v10174_v20  ;;  %v2910_v49 = vmul.f32 %v9838_v33, %v2870_v22  ;;  %v10383_v35 = vmul.f32 %v10073_v61, %v13028_v43  ;;  %v10385_v4 = vpop.f32.mrb[106].mxu1  ;;  %v3213_v37 = vpop.f32.mrb[112].mxu0  ;;  %v13030_v60 = vld [vmem:[#allocation27_spill] sm:$0xff]  ;;  %v13031_v22 = vld [vmem:[#allocation56_spill] sm:$0xff]  ;;  %v13032_v3 = vld [vmem:[#allocation29_spill] sm:$0xff] }
 0x269   : > { %13029 = vst [vmem:[#allocation15_spill] sm:$0xff] %v10385_v4  ;;  %v10387_v59 = vadd.f32 %v2304_v27, %v2227_v21  ;;  %v2720_v51 = vadd.f32 %v2684_v7, %v10211_v26  ;;  %v834_v19 = vmul.f32 %v9995_v6, %v13030_v60  ;;  %v6728_v20 = vpop.f32.mrb[107].mxu1  ;;  %3375 = vst [vmem:[#allocation2 + $0x68] sm:$0xff] %v3213_v37  ;;  %v6576_v28 = vpop.f32.mrb[113].mxu0  ;;  %v13035_v10 = vld [vmem:[#allocation30_spill] sm:$0xff]  ;;  %v13081_v4 = vld [vmem:[#allocation13_spill] sm:$0xff] }
 0x26a   : > { %v1588_v17 = vadd.f32 %v1552_v56, %v1475_v52  ;;  %v2530_v63 = vadd.f32 %v2494_v57, %v2417_v45  ;;  %v947_v12 = vmul.f32 %v10097_v11, %v13031_v22  ;;  %v1024_v43 = vmul.f32 %v10104_v18, %v13031_v22  ;;  %v10398_v27 = vpop.f32.mrb[108].mxu1  ;;  %v10400_v52 = vpop.f32.mrb[114].mxu0  ;;  %v2152_v57 = vld [vmem:[#allocation2 + $0xe9] sm:$0xff] }
 0x26b   : > { %v1137_v56 = vmul.f32 %v10111_v2, %v13032_v3  ;;  %13033 = vst [vmem:[#allocation27_spill] sm:$0xff] %v10398_v27  ;;  %13034 = vst [vmem:[#allocation56_spill] sm:$0xff] %v10400_v52  ;;  %v2833_v21 = vadd.f32 %v2797_v14, %v2720_v51  ;;  %v870_v7 = vadd.f32 %v834_v19, %v10280_v47  ;;  %v2265_v37 = vld [vmem:[#allocation2 + $0xea] sm:$0xff]  ;;  %v6731_v60 = vpop.f32.mrb[109].mxu1  ;;  %v6579_v20 = vpop.f32.mrb[115].mxu0 }
 0x26c   : > { %v10402_v26 = vadd.f32 %v1624_v1, %v1588_v17  ;;  %v1250_v45 = vmul.f32 %v10206_v44, %v13035_v10  ;;  %3376 = vst [vmem:[#allocation2 + $0x70] sm:$0xff] %v10400_v52  ;;  %v10408_v28 = vadd.f32 %v2607_v8, %v2530_v63  ;;  %v1060_v22 = vadd.f32 %v1024_v43, %v10228_v25  ;;  %v13036_v17 = vld [vmem:[#allocation57_spill] sm:$0xff]  ;;  %v10415_v19 = vpop.f32.mrb[110].mxu1  ;;  %v3223_v3 = vpop.f32.mrb[116].mxu0  ;;  %v13038_v52 = vld [vmem:[#allocation100_spill] sm:$0xff]  ;;  %v7033_v63 = vld [vmem:[#allocation2 + $0xf0] sm:$0xff] }
 0x26d   : > { %v1327_v1 = vmul.f32 %v10217_v24, %v13035_v10  ;;  %v1440_v14 = vmul.f32 %v10224_v5, %v13036_v17  ;;  %v2455_v47 = vld [vmem:[#allocation2 + $0xeb] sm:$0xff]  ;;  %13037 = vst [vmem:[#allocation29_spill] sm:$0xff] %v10415_v19  ;;  %v2946_v41 = vadd.f32 %v2910_v49, %v2833_v21  ;;  %v10417_v60 = vadd.f32 %v947_v12, %v870_v7  ;;  %v6734_v43 = vpop.f32.mrb[111].mxu1  ;;  %v6582_v10 = vpop.f32.mrb[117].mxu0 }
 0x26e   : > { %v2568_v51 = vld [vmem:[#allocation2 + $0xec] sm:$0xff]  ;;  %v1553_v8 = vmul.f32 %v10233_v53, %v13038_v52  ;;  %v10422_v25 = vmul.f32 %v7033_v63, %v10240_v15  ;;  %3377 = vst [vmem:[#allocation2 + $0x78] sm:$0xff] %v3223_v3  ;;  %v1173_v20 = vadd.f32 %v1137_v56, %v1060_v22  ;;  %v2192_v27 = vmul.f32 %v10249_v58, %v2152_v57  ;;  %v10427_v21 = vpop.f32.mrb[112].mxu1  ;;  %v10429_v52 = vpop.f32.mrb[118].mxu0  ;;  %v1625_v10 = vld [vmem:[%s7646_s25 + $0xd8] sm:$0xff] }
 0x26f   : > { %v1363_v17 = vadd.f32 %v1327_v1, %v10265_v0  ;;  %v2305_v19 = vmul.f32 %v10255_v55, %v2265_v37  ;;  %v2758_v49 = vld [vmem:[#allocation2 + $0xed] sm:$0xff]  ;;  %13039 = vst [vmem:[#allocation30_spill] sm:$0xff] %v10427_v21  ;;  %13040 = vst [vmem:[#allocation57_spill] sm:$0xff] %v10429_v52  ;;  %v10432_v7 = vadd.f32 %v2946_v41, %v10200_v36  ;;  %v6737_v22 = vpop.f32.mrb[113].mxu1  ;;  %v6585_v57 = vpop.f32.mrb[119].mxu0 }
 0x270   : > { %v2871_v12 = vld [vmem:[#allocation2 + $0xee] sm:$0xff]  ;;  %v2382_v3 = vmul.f32 %v10352_v32, %v2265_v37  ;;  %v2495_v56 = vmul.f32 %v10358_v13, %v2455_v47  ;;  %v2608_v0 = vmul.f32 %v10364_v30, %v2568_v51  ;;  %3378 = vst [vmem:[#allocation2 + $0x80] sm:$0xff] %v10429_v52  ;;  %v10438_v1 = vadd.f32 %v1250_v45, %v1173_v20  ;;  %v10444_v36 = vld [vmem:[%s12397_s1 + $0x19] ss:$0 sm:$0xff]  ;;  %v10447_v37 = vpop.f32.mrb[114].mxu1  ;;  %v3233_v47 = vpop.f32.mrb[120].mxu0 }
 0x271   : > { %13041 = vst [vmem:[#allocation100_spill] sm:$0xff] %v10432_v7  ;;  %v1476_v63 = vadd.f32 %v1440_v14, %v1363_v17  ;;  %v2228_v43 = vadd.f32 %v2192_v27, %v10343_v62  ;;  %v2685_v41 = vmul.f32 %v10444_v36, %v2568_v51  ;;  %13042 = vst [vmem:[#allocation145_spill] sm:$0xff] %v10447_v37  ;;  %v13043_v14 = vld [vmem:[#allocation95_spill] sm:$0xff]  ;;  %v6740_v27 = vpop.f32.mrb[115].mxu1  ;;  %v6588_v20 = vpop.f32.mrb[121].mxu0 }
 0x272   : > { %v2418_v22 = vadd.f32 %v2382_v3, %v10290_v50  ;;  %v2798_v57 = vmul.f32 %v9832_v23, %v2758_v49  ;;  %v2911_v45 = vmul.f32 %v9838_v33, %v2871_v12  ;;  %v10455_v62 = vmul.f32 %v10073_v61, %v13043_v14  ;;  %3379 = vst [vmem:[#allocation2 + $0x88] sm:$0xff] %v3233_v47  ;;  %v13044_v52 = vld [vmem:[#allocation47_spill] sm:$0xff]  ;;  %v13045_v3 = vld [vmem:[#allocation101_spill] sm:$0xff]  ;;  %v13046_v49 = vld [vmem:[#allocation102_spill] sm:$0xff]  ;;  %v10468_v47 = vpop.f32.mrb[116].mxu1 }
 0x273   : > { %v1589_v17 = vadd.f32 %v1553_v8, %v1476_v63  ;;  %v10457_v7 = vadd.f32 %v2305_v19, %v2228_v43  ;;  %v2721_v51 = vadd.f32 %v2685_v41, %v10325_v9  ;;  %v835_v37 = vmul.f32 %v9995_v6, %v13044_v52  ;;  %13047 = vst [vmem:[#allocation95_spill] sm:$0xff] %v10468_v47  ;;  %v10470_v8 = vpop.f32.mrb[122].mxu0  ;;  %v13049_v52 = vld [vmem:[#allocation103_spill] sm:$0xff] }
 0x274   : > { %v2531_v50 = vadd.f32 %v2495_v56, %v2418_v22  ;;  %v948_v23 = vmul.f32 %v10097_v11, %v13045_v3  ;;  %v1025_v33 = vmul.f32 %v10104_v18, %v13045_v3  ;;  %v1138_v12 = vmul.f32 %v10111_v2, %v13046_v49  ;;  %13048 = vst [vmem:[#allocation47_spill] sm:$0xff] %v10470_v8  ;;  %v2153_v43 = vld [vmem:[#allocation2 + $0xf1] sm:$0xff]  ;;  %v6743_v22 = vpop.f32.mrb[117].mxu1  ;;  %v6591_v14 = vpop.f32.mrb[123].mxu0 }
 0x275   : > { %v10472_v19 = vadd.f32 %v1625_v10, %v1589_v17  ;;  %v2834_v9 = vadd.f32 %v2798_v57, %v2721_v51  ;;  %v871_v63 = vadd.f32 %v835_v37, %v10383_v35  ;;  %v1251_v56 = vmul.f32 %v10206_v44, %v13049_v52  ;;  %v2266_v41 = vld [vmem:[#allocation2 + $0xf2] sm:$0xff]  ;;  %3380 = vst [vmem:[#allocation2 + $0x90] sm:$0xff] %v10470_v8  ;;  %v10485_v51 = vpop.f32.mrb[118].mxu1  ;;  %v3243_v3 = vpop.f32.mrb[124].mxu0  ;;  %v13052_v8 = vld [vmem:[#allocation104_spill] sm:$0xff] }
 0x276   : > { %v10478_v27 = vadd.f32 %v2608_v0, %v2531_v50  ;;  %v1061_v20 = vadd.f32 %v1025_v33, %v10338_v38  ;;  %v1328_v10 = vmul.f32 %v10217_v24, %v13049_v52  ;;  %v13050_v17 = vld [vmem:[#allocation58_spill] sm:$0xff]  ;;  %13051 = vst [vmem:[#allocation101_spill] sm:$0xff] %v10485_v51  ;;  %v1554_v0 = vmul.f32 %v10233_v53, %v13052_v8  ;;  %v7035_v50 = vld [vmem:[#allocation2 + $0xf8] sm:$0xff]  ;;  %v6746_v33 = vpop.f32.mrb[119].mxu1  ;;  %v6594_v52 = vpop.f32.mrb[125].mxu0 }
 0x277   : > { %v1441_v57 = vmul.f32 %v10224_v5, %v13050_v17  ;;  %v2456_v35 = vld [vmem:[#allocation2 + $0xf3] sm:$0xff]  ;;  %v2947_v49 = vadd.f32 %v2911_v45, %v2834_v9  ;;  %v10487_v22 = vadd.f32 %v948_v23, %v871_v63  ;;  %v10492_v38 = vmul.f32 %v7035_v50, %v10240_v15  ;;  %3381 = vst [vmem:[#allocation2 + $0x98] sm:$0xff] %v3243_v3  ;;  %v10497_v9 = vpop.f32.mrb[120].mxu1  ;;  %v10499_v8 = vpop.f32.mrb[126].mxu0 }
 0x278   : > { %v2569_v37 = vld [vmem:[#allocation2 + $0xf4] sm:$0xff]  ;;  %v1174_v14 = vadd.f32 %v1138_v12, %v1061_v20  ;;  %v1364_v17 = vadd.f32 %v1328_v10, %v10371_v16  ;;  %v2193_v47 = vmul.f32 %v10249_v58, %v2153_v43  ;;  %v2306_v51 = vmul.f32 %v10255_v55, %v2266_v41  ;;  %13053 = vst [vmem:[#allocation102_spill] sm:$0xff] %v10497_v9  ;;  %v6749_v20 = vpop.f32.mrb[121].mxu1  ;;  %v6597_v43 = vpop.f32.mrb[127].mxu0 }
 0x279   : > { %v2759_v45 = vld [vmem:[#allocation2 + $0xf5] sm:$0xff]  ;;  %13054 = vst [vmem:[#allocation103_spill] sm:$0xff] %v10499_v8  ;;  %v3019_v63 = vadd.f32 %v2947_v49, %v10314_v54  ;;  %v2383_v3 = vmul.f32 %v10352_v32, %v2266_v41  ;;  %v2496_v12 = vmul.f32 %v10358_v13, %v2456_v35  ;;  %v2609_v16 = vmul.f32 %v10364_v30, %v2569_v37  ;;  %v10510_v9 = vpop.f32.mrb[122].mxu1  ;;  %v3253_v54 = vpop.f32.mrb[128].mxu0  ;;  %v1626_v41 = vld [vmem:[%s7646_s25 + $0xe0] sm:$0xff] }
 0x27a   : > { %v2872_v23 = vld [vmem:[#allocation2 + $0xf6] sm:$0xff]  ;;  %3382 = vst [vmem:[#allocation2 + $0xa0] sm:$0xff] %v10499_v8  ;;  %v10506_v10 = vadd.f32 %v1251_v56, %v1174_v14  ;;  %v1477_v50 = vadd.f32 %v1441_v57, %v1364_v17  ;;  %v2229_v33 = vadd.f32 %v2193_v47, %v10422_v25  ;;  %v2686_v52 = vmul.f32 %v10444_v36, %v2569_v37  ;;  %v10524_v25 = vld [vmem:[%s12397_s1 + $0x21] ss:$0 sm:$0xff]  ;;  %v6752_v14 = vpop.f32.mrb[123].mxu1 }
 0x27b   : > { %13055 = vst [vmem:[#allocation58_spill] sm:$0xff] %v10510_v9  ;;  %3055 = vst [vmem:[%s7646_s25 + $0xc8] sm:$0xff] %v3019_v63  ;;  %v2419_v35 = vadd.f32 %v2383_v3, %v10387_v59  ;;  %v10518_v49 = vld [vmem:[%s12397_s1 + $0x1d] ss:$0 sm:$0xff]  ;;  %v2912_v47 = vmul.f32 %v10524_v25, %v2872_v23  ;;  %v13056_v57 = vld [vmem:[#allocation26_spill] sm:$0xff]  ;;  %v6600_v59 = vpop.f32.mrb[129].mxu0 }
 0x27c   : > { %v2799_v56 = vmul.f32 %v10518_v49, %v2759_v45  ;;  %v10529_v37 = vmul.f32 %v10073_v61, %v13056_v57  ;;  %3383 = vst [vmem:[#allocation2 + $0xa8] sm:$0xff] %v3253_v54  ;;  %v1590_v17 = vadd.f32 %v1554_v0, %v1477_v50  ;;  %v10531_v63 = vadd.f32 %v2306_v51, %v2229_v33  ;;  %v13057_v45 = vld [vmem:[#allocation59_spill] sm:$0xff]  ;;  %v13058_v8 = vld [vmem:[#allocation60_spill] sm:$0xff]  ;;  %v10542_v54 = vpop.f32.mrb[124].mxu1  ;;  %v10544_v0 = vpop.f32.mrb[130].mxu0  ;;  %v13062_v33 = vld [vmem:[#allocation106_spill] sm:$0xff] }
 0x27d   : > { %v2722_v3 = vadd.f32 %v2686_v52, %v10408_v28  ;;  %v836_v20 = vmul.f32 %v9995_v6, %v13057_v45  ;;  %v2532_v43 = vadd.f32 %v2496_v12, %v2419_v35  ;;  %v949_v9 = vmul.f32 %v10097_v11, %v13058_v8  ;;  %v13059_v57 = vld [vmem:[#allocation7_spill] sm:$0xff]  ;;  %13060 = vst [vmem:[#allocation104_spill] sm:$0xff] %v10542_v54  ;;  %v6755_v59 = vpop.f32.mrb[125].mxu1 }
 0x27e   : > { %v1026_v23 = vmul.f32 %v10104_v18, %v13058_v8  ;;  %v1139_v14 = vmul.f32 %v10111_v2, %v13059_v57  ;;  %13061 = vst [vmem:[#allocation26_spill] sm:$0xff] %v10544_v0  ;;  %v10546_v51 = vadd.f32 %v1626_v41, %v1590_v17  ;;  %v1252_v12 = vmul.f32 %v10206_v44, %v13062_v33  ;;  %v2154_v52 = vld [vmem:[#allocation2 + $0xf9] sm:$0xff]  ;;  %v6603_v8 = vpop.f32.mrb[131].mxu0 }
 0x27f   : > { %v2835_v28 = vadd.f32 %v2799_v56, %v2722_v3  ;;  %v872_v50 = vadd.f32 %v836_v20, %v10455_v62  ;;  %v10551_v35 = vld [vmem:[#allocation2 + $0xfa] sm:$0xff]  ;;  %3384 = vst [vmem:[#allocation2 + $0xb0] sm:$0xff] %v10544_v0  ;;  %v10554_v45 = vadd.f32 %v2609_v16, %v2532_v43  ;;  %v1329_v41 = vmul.f32 %v10217_v24, %v13062_v33  ;;  %v10561_v20 = vpop.f32.mrb[126].mxu1  ;;  %v10563_v54 = vpop.f32.mrb[132].mxu0 }
 0x280   : > { %v1062_v57 = vadd.f32 %v1026_v23, %v10417_v60  ;;  %v13063_v56 = vld [vmem:[#allocation107_spill] sm:$0xff]  ;;  %13064 = vst [vmem:[#allocation59_spill] sm:$0xff] %v10561_v20  ;;  %13065 = vst [vmem:[#allocation60_spill] sm:$0xff] %v10563_v54  ;;  %v13066_v8 = vld [vmem:[#allocation108_spill] sm:$0xff]  ;;  %v6758_v33 = vpop.f32.mrb[127].mxu1  ;;  %v10575_v48 = vmul.f32 %v10249_v58, %v2154_v52 }
 0x281   : > { %v1442_v62 = vmul.f32 %v10224_v5, %v13063_v56  ;;  %v2457_v17 = vld [vmem:[#allocation2 + $0xfb] sm:$0xff]  ;;  %v2948_v59 = vadd.f32 %v2912_v47, %v2835_v28  ;;  %v10565_v21 = vadd.f32 %v949_v9, %v872_v50  ;;  %v1555_v16 = vmul.f32 %v10233_v53, %v13066_v8  ;;  %3385 = vst [vmem:[#allocation2 + $0xb8] sm:$0xff] %v10563_v54  ;;  %v6606_v56 = vpop.f32.mrb[133].mxu0  ;;  %v10579_v28 = vpop.f32.mrb[128].mxu1 }
 0x282   : > { %v2570_v3 = vld [vmem:[#allocation2 + $0xfc] sm:$0xff]  ;;  %v1175_v0 = vadd.f32 %v1139_v14, %v1062_v57  ;;  %v1365_v20 = vadd.f32 %v1329_v41, %v10438_v1  ;;  %v2384_v9 = vmul.f32 %v10352_v32, %v10551_v35  ;;  %13067 = vst [vmem:[#allocation7_spill] sm:$0xff] %v10579_v28  ;;  %v10581_v50 = vpop.f32.mrb[134].mxu0  ;;  %v6761_v52 = vpop.f32.mrb[129].mxu1 }
 0x283   : > { %v7038_v43 = vld [vmem:[#allocation2 + $0x100] sm:$0xff]  ;;  %13068 = vst [vmem:[#allocation106_spill] sm:$0xff] %v10581_v50  ;;  %v10584_v8 = vadd.f32 %v2948_v59, %v10402_v26  ;;  %v2610_v14 = vmul.f32 %v10364_v30, %v2570_v3  ;;  %v2687_v1 = vmul.f32 %v10444_v36, %v2570_v3  ;;  %3386 = vst [vmem:[#allocation2 + $0xc0] sm:$0xff] %v10581_v50  ;;  %v6609_v57 = vpop.f32.mrb[135].mxu0  ;;  %v10594_v28 = vpop.f32.mrb[130].mxu1  ;;  %v13072_v52 = vld [vmem:[#allocation6_spill] sm:$0xff] }
 0x284   : > { %v10570_v60 = vmul.f32 %v7038_v43, %v10240_v15  ;;  %v2760_v23 = vld [vmem:[#allocation2 + $0xfd] sm:$0xff]  ;;  %v2497_v43 = vmul.f32 %v10358_v13, %v2457_v17  ;;  %v10590_v41 = vadd.f32 %v1252_v12, %v1175_v0  ;;  %v1478_v33 = vadd.f32 %v1442_v62, %v1365_v20  ;;  %13070 = vst [vmem:[#allocation108_spill] sm:$0xff] %v10594_v28  ;;  %v10596_v26 = vpop.f32.mrb[136].mxu0  ;;  %v1627_v17 = vld [vmem:[%s7646_s25 + $0xe8] sm:$0xff]  ;;  %v6764_v62 = vpop.f32.mrb[131].mxu1 }
 0x285   : > { %v2873_v47 = vld [vmem:[#allocation2 + $0xfe] sm:$0xff]  ;;  %13069 = vst [vmem:[#allocation107_spill] sm:$0xff] %v10584_v8  ;;  %v2420_v56 = vadd.f32 %v2384_v9, %v10457_v7  ;;  %v2800_v54 = vmul.f32 %v10518_v49, %v2760_v23  ;;  %13071 = vst [vmem:[#allocation146_spill] sm:$0xff] %v10596_v26  ;;  %v2723_v59 = vadd.f32 %v2687_v1, %v10478_v27  ;;  %v13073_v0 = vld [vmem:[#allocation33_spill] sm:$0xff]  ;;  %v6612_v7 = vpop.f32.mrb[137].mxu0 }
 0x286   : > { %v2913_v3 = vmul.f32 %v10524_v25, %v2873_v47  ;;  %v10603_v8 = vmul.f32 %v10073_v61, %v13072_v52  ;;  %v837_v12 = vmul.f32 %v9995_v6, %v13073_v0  ;;  %3387 = vst [vmem:[#allocation2 + $0xc8] sm:$0xff] %v10596_v26  ;;  %v1591_v20 = vadd.f32 %v1555_v16, %v1478_v33  ;;  %v13074_v9 = vld [vmem:[#allocation61_spill] sm:$0xff]  ;;  %v10616_v61 = vpop.f32.mrb[132].mxu1  ;;  %v10618_v1 = vpop.f32.mrb[138].mxu0  ;;  %v13077_v62 = vld [vmem:[#allocation62_spill] sm:$0xff] }
 0x287   : > { %v2533_v23 = vadd.f32 %v2497_v43, %v2420_v56  ;;  %v10610_v57 = vmul.f32 %v10097_v11, %v13074_v9  ;;  %v1027_v27 = vmul.f32 %v10104_v18, %v13074_v9  ;;  %v10614_v47 = vld [vmem:[#allocation2 + $0x102] sm:$0xff]  ;;  %13075 = vst [vmem:[#allocation6_spill] sm:$0xff] %v10616_v61  ;;  %13076 = vst [vmem:[#allocation33_spill] sm:$0xff] %v10618_v1  ;;  %v13078_v43 = vld [vmem:[#allocation34_spill] sm:$0xff]  ;;  %v6767_v26 = vpop.f32.mrb[133].mxu1  ;;  %v6615_v9 = vpop.f32.mrb[139].mxu0 }
 0x288   : > { %v2836_v52 = vadd.f32 %v2800_v54, %v2723_v59  ;;  %v10621_v0 = vadd.f32 %v837_v12, %v10529_v37  ;;  %v1140_v16 = vmul.f32 %v10111_v2, %v13077_v62  ;;  %v1253_v33 = vmul.f32 %v10206_v44, %v13078_v43  ;;  %v2458_v56 = vld [vmem:[#allocation2 + $0x103] sm:$0xff]  ;;  %3388 = vst [vmem:[#allocation2 + $0xd0] sm:$0xff] %v10618_v1  ;;  %v10635_v12 = vpop.f32.mrb[134].mxu1  ;;  %v10637_v62 = vpop.f32.mrb[140].mxu0  ;;  %v13082_v1 = vld [vmem:[#allocation63_spill] sm:$0xff] }
 0x289   : > { %v2571_v7 = vld [vmem:[#allocation2 + $0x104] sm:$0xff]  ;;  %v10628_v50 = vadd.f32 %v1627_v17, %v1591_v20  ;;  %v10630_v61 = vadd.f32 %v2610_v14, %v2533_v23  ;;  %v1063_v54 = vadd.f32 %v1027_v27, %v10487_v22  ;;  %v1330_v37 = vmul.f32 %v10217_v24, %v13078_v43  ;;  %13079 = vst [vmem:[#allocation61_spill] sm:$0xff] %v10635_v12  ;;  %v6770_v22 = vpop.f32.mrb[135].mxu1  ;;  %v6618_v23 = vpop.f32.mrb[141].mxu0 }
 0x28a   : > { %v2761_v59 = vld [vmem:[#allocation2 + $0x105] sm:$0xff]  ;;  %13080 = vst [vmem:[#allocation62_spill] sm:$0xff] %v10637_v62  ;;  %v2949_v28 = vadd.f32 %v2913_v3, %v2836_v52  ;;  %v1443_v26 = vmul.f32 %v10224_v5, %v13081_v4  ;;  %v1556_v17 = vmul.f32 %v10233_v53, %v13082_v1  ;;  %v2385_v14 = vmul.f32 %v10352_v32, %v10614_v47  ;;  %v10649_v4 = vpop.f32.mrb[136].mxu1  ;;  %v10651_v1 = vpop.f32.mrb[142].mxu0 }
 0x28b   : > { %v2874_v20 = vld [vmem:[#allocation2 + $0x106] sm:$0xff]  ;;  %3389 = vst [vmem:[#allocation2 + $0xd8] sm:$0xff] %v10637_v62  ;;  %v1176_v27 = vadd.f32 %v1140_v16, %v1063_v54  ;;  %v1366_v43 = vadd.f32 %v1330_v37, %v10506_v10  ;;  %v2498_v9 = vmul.f32 %v10358_v13, %v2458_v56  ;;  %v2611_v3 = vmul.f32 %v10364_v30, %v2571_v7  ;;  %v6773_v54 = vpop.f32.mrb[137].mxu1  ;;  %v6621_v10 = vpop.f32.mrb[143].mxu0 }
 0x28c   : > { %13083 = vst [vmem:[#allocation34_spill] sm:$0xff] %v10649_v4  ;;  %13084 = vst [vmem:[#allocation13_spill] sm:$0xff] %v10651_v1  ;;  %v3021_v52 = vadd.f32 %v2949_v28, %v10472_v19  ;;  %v2421_v22 = vadd.f32 %v2385_v14, %v10531_v63  ;;  %v2688_v62 = vmul.f32 %v10444_v36, %v2571_v7  ;;  %v10663_v12 = vpop.f32.mrb[138].mxu1  ;;  %v10665_v19 = vpop.f32.mrb[144].mxu0  ;;  %v1628_v63 = vld [vmem:[%s7646_s25 + $0xf0] sm:$0xff] }
 0x28d   : > { %v2801_v16 = vmul.f32 %v10518_v49, %v2761_v59  ;;  %3390 = vst [vmem:[#allocation2 + $0xe0] sm:$0xff] %v10651_v1  ;;  %v10658_v56 = vadd.f32 %v1253_v33, %v1176_v27  ;;  %v1479_v37 = vadd.f32 %v1443_v26, %v1366_v43  ;;  %v2914_v23 = vmul.f32 %v10524_v25, %v2874_v20  ;;  %v10676_v26 = vld [vmem:[#allocation2 + $0x10c] sm:$0xff]  ;;  %v6776_v14 = vpop.f32.mrb[139].mxu1  ;;  %v13087_v27 = vld [vmem:[#allocation31_spill] sm:$0xff] }
 0x28e   : > { %v838_v4 = vmul.f32 %v9995_v6, %v9578_v34  ;;  %13085 = vst [vmem:[#allocation63_spill] sm:$0xff] %v10663_v12  ;;  %13086 = vst [vmem:[#allocation147_spill] sm:$0xff] %v10665_v19  ;;  %v2534_v28 = vadd.f32 %v2498_v9, %v2421_v22  ;;  %v2724_v7 = vadd.f32 %v2688_v62, %v10554_v45  ;;  %v6624_v34 = vpop.f32.mrb[145].mxu0  ;;  %v13088_v45 = vld [vmem:[#allocation64_spill] sm:$0xff]  ;;  %v10684_v9 = vpop.f32.mrb[140].mxu1  ;;  %v2875_v10 = vld [vmem:[#allocation2 + $0x10e] sm:$0xff] }
 0x28f   : > { %3057 = vst [vmem:[%s7646_s25 + $0xd8] sm:$0xff] %v3021_v52  ;;  %v10672_v59 = vmul.f32 %v10097_v11, %v9580_v31  ;;  %v1028_v33 = vmul.f32 %v10104_v18, %v9580_v31  ;;  %3391 = vst [vmem:[#allocation2 + $0xe8] sm:$0xff] %v10665_v19  ;;  %v1592_v6 = vadd.f32 %v1556_v17, %v1479_v37  ;;  %v2762_v11 = vld [vmem:[#allocation2 + $0x10d] sm:$0xff]  ;;  %v6779_v17 = vpop.f32.mrb[141].mxu1 }
 0x290   : > { %v874_v20 = vadd.f32 %v838_v4, %v10603_v8  ;;  %v1141_v43 = vmul.f32 %v10111_v2, %v13087_v27  ;;  %v1254_v62 = vmul.f32 %v10206_v44, %v13088_v45  ;;  %v2647_v52 = vadd.f32 %v2611_v3, %v2534_v28  ;;  %v13089_v8 = vld [vmem:[#allocation65_spill] sm:$0xff]  ;;  %v13090_v14 = vld [vmem:[#allocation66_spill] sm:$0xff]  ;;  %v10697_v3 = vpop.f32.mrb[146].mxu0 }
 0x291   : > { %v2837_v31 = vadd.f32 %v2801_v16, %v2724_v7  ;;  %v1064_v22 = vadd.f32 %v1028_v33, %v10565_v21  ;;  %v1331_v54 = vmul.f32 %v10217_v24, %v13088_v45  ;;  %v10689_v37 = vadd.f32 %v1628_v63, %v1592_v6  ;;  %13091 = vst [vmem:[#allocation31_spill] sm:$0xff] %v10697_v3  ;;  %v10699_v16 = vpop.f32.mrb[142].mxu1  ;;  %v6627_v33 = vpop.f32.mrb[147].mxu0 }
 0x292   : > { %v1444_v4 = vmul.f32 %v10224_v5, %v13089_v8  ;;  %v1557_v34 = vmul.f32 %v10233_v53, %v13090_v14  ;;  %v2689_v27 = vmul.f32 %v10444_v36, %v10676_v26  ;;  %13092 = vst [vmem:[#allocation64_spill] sm:$0xff] %v10699_v16  ;;  %v2802_v63 = vmul.f32 %v10518_v49, %v2762_v11  ;;  %v6782_v6 = vpop.f32.mrb[143].mxu1  ;;  %v13093_v14 = vld [vmem:[#allocation110_spill] sm:$0xff]  ;;  %v1629_v33 = vld [vmem:[%s7646_s25 + $0xf8] sm:$0xff] }
 0x293   : > { %v2950_v21 = vadd.f32 %v2914_v23, %v2837_v31  ;;  %v1177_v28 = vadd.f32 %v1141_v43, %v1064_v22  ;;  %v1367_v7 = vadd.f32 %v1331_v54, %v10590_v41  ;;  %3392 = vst [vmem:[#allocation2 + $0xf0] sm:$0xff] %v10697_v3  ;;  %v2915_v17 = vmul.f32 %v10524_v25, %v2875_v10  ;;  %v10710_v43 = vld [vmem:[#allocation2 + $0x114] sm:$0xff]  ;;  %v10712_v41 = vpop.f32.mrb[144].mxu1 }
 0x294   : > { %v2725_v45 = vadd.f32 %v2689_v27, %v10630_v61  ;;  %v986_v8 = vadd.f32 %v10610_v57, %v10621_v0  ;;  %v1029_v23 = vmul.f32 %v10104_v18, %v13093_v14  ;;  %v13095_v54 = vld [vmem:[#allocation111_spill] sm:$0xff]  ;;  %v6785_v10 = vpop.f32.mrb[145].mxu1  ;;  %v13096_v0 = vld [vmem:[#allocation112_spill] sm:$0xff] }
 0x295   : > { %v10715_v11 = vadd.f32 %v2950_v21, %v10546_v51  ;;  %v1290_v31 = vadd.f32 %v1254_v62, %v1177_v28  ;;  %v1480_v22 = vadd.f32 %v1444_v4, %v1367_v7  ;;  %v1142_v61 = vmul.f32 %v10111_v2, %v13095_v54  ;;  %v2763_v27 = vld [vmem:[#allocation2 + $0x115] sm:$0xff]  ;;  %v10726_v51 = vpop.f32.mrb[148].mxu0  ;;  %v10728_v62 = vpop.f32.mrb[146].mxu1  ;;  %v13098_v21 = vld [vmem:[#allocation113_spill] sm:$0xff] }
 0x296   : > { %v2838_v6 = vadd.f32 %v2802_v63, %v2725_v45  ;;  %v1065_v57 = vadd.f32 %v1029_v23, %v986_v8  ;;  %v10722_v18 = vmul.f32 %v10206_v44, %v13096_v0  ;;  %v1332_v14 = vmul.f32 %v10217_v24, %v13096_v0  ;;  %v2876_v3 = vld [vmem:[#allocation2 + $0x116] sm:$0xff]  ;;  %13097 = vst [vmem:[#allocation66_spill] sm:$0xff] %v10726_v51  ;;  %v6630_v45 = vpop.f32.mrb[149].mxu0  ;;  %v6788_v8 = vpop.f32.mrb[147].mxu1 }
 0x297   : > { %13094 = vst [vmem:[#allocation65_spill] sm:$0xff] %v10715_v11  ;;  %v1593_v4 = vadd.f32 %v1557_v34, %v1480_v22  ;;  %v1445_v2 = vmul.f32 %v10224_v5, %v13098_v21  ;;  %v13099_v28 = vld [vmem:[#allocation114_spill] sm:$0xff]  ;;  %v2690_v63 = vmul.f32 %v10444_v36, %v10710_v43  ;;  %3393 = vst [vmem:[#allocation2 + $0xf8] sm:$0xff] %v10726_v51  ;;  %v10739_v34 = vpop.f32.mrb[148].mxu1  ;;  %v10745_v51 = vld [vmem:[#allocation2 + $0x101] sm:$0xff] }
 0x298   : > { %v1558_v7 = vmul.f32 %v10233_v53, %v13099_v28  ;;  %v2951_v23 = vadd.f32 %v2915_v17, %v2838_v6  ;;  %v1178_v54 = vadd.f32 %v1142_v61, %v1065_v57  ;;  %v1368_v10 = vadd.f32 %v1332_v14, %v10658_v56  ;;  %v6791_v19 = vpop.f32.mrb[149].mxu1  ;;  %v10747_v45 = vld [vmem:[#allocation2 + $0x10a] sm:$0xff]  ;;  %v1630_v6 = vld [vmem:[%s7646_s25 + $0x100] sm:$0xff]  ;;  %v13104_v14 = vld [vmem:[#allocation71_spill] sm:$0xff] }
 0x299   : > { %v2803_v0 = vmul.f32 %v10518_v49, %v2763_v27  ;;  %v10741_v22 = vadd.f32 %v1629_v33, %v1593_v4  ;;  %v2726_v21 = vadd.f32 %v2690_v63, %v2647_v52  ;;  %v2916_v28 = vmul.f32 %v10524_v25, %v2876_v3  ;;  %13100 = vst [vmem:[#allocation110_spill] sm:$0xff] %v10747_v45  ;;  %v7039_v61 = vld [vmem:[%s12397_s1 + $0xc] ss:$0 sm:$0xff]  ;;  %v13101_v27 = vld [vmem:[#allocation24_spill] sm:$0xff]  ;;  %v7040_v52 = vld [vmem:[%s12397_s1 + $0x10] ss:$0 sm:$0xff] }
 0x29a   : > { %v987_v11 = vadd.f32 %v10672_v59, %v874_v20  ;;  %v3023_v56 = vadd.f32 %v2951_v23, %v10628_v50  ;;  %v1481_v17 = vadd.f32 %v1445_v2, %v1368_v10  ;;  %v1030_v33 = vmul.f32 %v7039_v61, %v13101_v27  ;;  %v13102_v59 = vld [vmem:[#allocation70_spill] sm:$0xff]  ;;  %v10758_v20 = vpop.f32.mrb[150].mxu0  ;;  %v13105_v2 = vld [vmem:[#allocation37_spill] sm:$0xff] }
 0x29b   : > { %v1143_v19 = vmul.f32 %v7040_v52, %v13102_v59  ;;  %13103 = vst [vmem:[#allocation111_spill] sm:$0xff] %v10758_v20  ;;  %v2459_v3 = vld [vmem:[#allocation2 + $0x10b] sm:$0xff]  ;;  %v2839_v57 = vadd.f32 %v2803_v0, %v2726_v21  ;;  %v10763_v50 = vmul.f32 %v10206_v44, %v13104_v14  ;;  %v1333_v4 = vmul.f32 %v10217_v24, %v13104_v14  ;;  %v6633_v8 = vpop.f32.mrb[151].mxu0  ;;  %v10775_v44 = vld [vmem:[#allocation2 + $0x11c] sm:$0xff]  ;;  %v10777_v21 = vpop.f32.mrb[150].mxu1 }
 0x29c   : > { %v1446_v63 = vmul.f32 %v10224_v5, %v13105_v2  ;;  %3394 = vst [vmem:[#allocation2 + $0x100] sm:$0xff] %v10758_v20  ;;  %3059 = vst [vmem:[%s7646_s25 + $0xe8] sm:$0xff] %v3023_v56  ;;  %v1594_v23 = vadd.f32 %v1558_v7, %v1481_v17  ;;  %v1066_v10 = vadd.f32 %v1030_v33, %v987_v11  ;;  %v13106_v61 = vld [vmem:[#allocation38_spill] sm:$0xff]  ;;  %v2764_v7 = vld [vmem:[#allocation2 + $0x11d] sm:$0xff]  ;;  %v6794_v17 = vpop.f32.mrb[151].mxu1 }
 0x29d   : > { %v1559_v27 = vmul.f32 %v10233_v53, %v13106_v61  ;;  %v2230_v0 = vadd.f32 %v10575_v48, %v10492_v38  ;;  %13107 = vst [vmem:[#allocation112_spill] sm:$0xff] %v10775_v44  ;;  %v2952_v52 = vadd.f32 %v2916_v28, %v2839_v57  ;;  %v1369_v59 = vadd.f32 %v1333_v4, %v1290_v31  ;;  %v2877_v11 = vld [vmem:[#allocation2 + $0x11e] sm:$0xff]  ;;  %v10788_v28 = vpop.f32.mrb[152].mxu0  ;;  %v10790_v31 = vld [vmem:[#allocation2 + $0x108] sm:$0xff] }
 0x29e   : > { %v2307_v14 = vmul.f32 %v10255_v55, %v10551_v35  ;;  %v2386_v56 = vmul.f32 %v10352_v32, %v10747_v45  ;;  %v10783_v33 = vadd.f32 %v1630_v6, %v1594_v23  ;;  %v1179_v2 = vadd.f32 %v1143_v19, %v1066_v10  ;;  %13108 = vst [vmem:[#allocation113_spill] sm:$0xff] %v10788_v28  ;;  %v10792_v35 = vld [vmem:[#allocation2 + $0x109] sm:$0xff]  ;;  %v6636_v10 = vpop.f32.mrb[153].mxu0  ;;  %v13113_v20 = vld [vmem:[#allocation72_spill] sm:$0xff] }
 0x29f   : > { %v2499_v48 = vmul.f32 %v10358_v13, %v2459_v3  ;;  %v2612_v38 = vmul.f32 %v10364_v30, %v10676_v26  ;;  %13109 = vst [vmem:[#allocation114_spill] sm:$0xff] %v10790_v31  ;;  %13110 = vst [vmem:[#allocation24_spill] sm:$0xff] %v10792_v35  ;;  %v10795_v57 = vadd.f32 %v2952_v52, %v10689_v37  ;;  %v10799_v19 = vld [vmem:[#allocation2 + $0x124] sm:$0xff]  ;;  %v2879_v52 = vld [vmem:[#allocation2 + $0x12e] sm:$0xff] }
 0x2a0   : > { %v1482_v4 = vadd.f32 %v1446_v63, %v1369_v59  ;;  %v2343_v8 = vadd.f32 %v2307_v14, %v2230_v0  ;;  %v2691_v6 = vmul.f32 %v10444_v36, %v10775_v44  ;;  %v2765_v3 = vld [vmem:[#allocation2 + $0x125] sm:$0xff]  ;;  %3395 = vst [vmem:[#allocation2 + $0x108] sm:$0xff] %v10788_v28  ;;  %v2804_v61 = vmul.f32 %v10518_v49, %v2764_v7  ;;  %v2766_v0 = vld [vmem:[#allocation2 + $0x12d] sm:$0xff]  ;;  %v10810_v59 = vpop.f32.mrb[152].mxu1 }
 0x2a1   : > { %13111 = vst [vmem:[#allocation70_spill] sm:$0xff] %v10795_v57  ;;  %v2878_v23 = vld [vmem:[#allocation2 + $0x126] sm:$0xff]  ;;  %v10805_v17 = vmul.f32 %v10524_v25, %v2877_v11  ;;  %v1291_v37 = vadd.f32 %v10722_v18, %v1178_v54  ;;  %v1334_v63 = vmul.f32 %v10217_v24, %v9764_v40  ;;  %v1560_v7 = vmul.f32 %v10233_v53, %v13113_v20  ;;  %v6797_v1 = vpop.f32.mrb[153].mxu1  ;;  %v2460_v11 = vld [vmem:[#allocation2 + $0x113] sm:$0xff] }
 0x2a2   : > { %v1631_v26 = vld [vmem:[%s7646_s25 + $0x108] sm:$0xff]  ;;  %v1595_v14 = vadd.f32 %v1559_v27, %v1482_v4  ;;  %v2422_v57 = vadd.f32 %v2386_v56, %v2343_v8  ;;  %v10818_v18 = vmul.f32 %v10444_v36, %v10799_v19  ;;  %v10821_v40 = vmul.f32 %v10518_v49, %v2765_v3  ;;  %v2157_v27 = vld [vmem:[#allocation2 + $0x111] sm:$0xff]  ;;  %v10826_v4 = vpop.f32.mrb[154].mxu0  ;;  %v10835_v3 = vld [vmem:[#allocation2 + $0x11b] sm:$0xff] }
 0x2a3   : > { %v13112_v10 = vld [vmem:[#allocation17_spill] sm:$0xff]  ;;  %v1370_v44 = vadd.f32 %v1334_v63, %v1291_v37  ;;  %v10824_v54 = vmul.f32 %v10524_v25, %v2878_v23  ;;  %v2270_v56 = vld [vmem:[#allocation2 + $0x112] sm:$0xff]  ;;  %13114 = vst [vmem:[#allocation71_spill] sm:$0xff] %v10826_v4  ;;  %v10829_v8 = vmul.f32 %v10518_v49, %v2766_v0  ;;  %v10832_v37 = vmul.f32 %v10524_v25, %v2879_v52  ;;  %v6639_v63 = vpop.f32.mrb[155].mxu0  ;;  %v13119_v31 = vld [vmem:[#allocation76_spill] sm:$0xff] }
 0x2a4   : > { %v1447_v28 = vmul.f32 %v10224_v5, %v13112_v10  ;;  %v1667_v20 = vadd.f32 %v1631_v26, %v1595_v14  ;;  %v2535_v1 = vadd.f32 %v2499_v48, %v2422_v57  ;;  %3396 = vst [vmem:[#allocation2 + $0x110] sm:$0xff] %v10826_v4  ;;  %13117 = vst [vmem:[#allocation17_spill] sm:$0xff] %v10835_v3  ;;  %v13118_v45 = vld [vmem:[#allocation73_spill] sm:$0xff]  ;;  %v10842_v57 = vpop.f32.mrb[154].mxu1  ;;  %v1632_v0 = vld [vmem:[%s7646_s25 + $0x110] sm:$0xff] }
 0x2a5   : > { %13115 = vst [vmem:[#allocation37_spill] sm:$0xff] %v10829_v8  ;;  %13116 = vst [vmem:[#allocation38_spill] sm:$0xff] %v10832_v37  ;;  %v1292_v10 = vadd.f32 %v10763_v50, %v1179_v2  ;;  %v1335_v35 = vmul.f32 %v10217_v24, %v13118_v45  ;;  %v1448_v48 = vmul.f32 %v10224_v5, %v13119_v31  ;;  %v2349_v52 = vld [vmem:[#allocation2 + $0x122] sm:$0xff]  ;;  %v6800_v24 = vpop.f32.mrb[155].mxu1  ;;  %v10857_v31 = vld [vmem:[#allocation2 + $0x118] sm:$0xff] }
 0x2a6   : > { %v1483_v23 = vadd.f32 %v1447_v28, %v1370_v44  ;;  %1703 = vst [vmem:[%s7646_s25 + $0x108] sm:$0xff] %v1667_v20  ;;  %v2648_v26 = vadd.f32 %v2612_v38, %v2535_v1  ;;  %v2462_v14 = vld [vmem:[#allocation2 + $0x123] sm:$0xff]  ;;  %v2195_v50 = vmul.f32 %v10249_v58, %v10745_v51  ;;  %v2197_v5 = vmul.f32 %v10249_v58, %v2157_v27  ;;  %v10855_v28 = vpop.f32.mrb[156].mxu0  ;;  %v10859_v20 = vld [vmem:[#allocation2 + $0x119] sm:$0xff]  ;;  %v11424_v3 = vld [vmem:[#allocation2 + $0xb1] sm:$0xff] }
 0x2a7   : > { %v13120_v63 = vld [vmem:[#allocation77_spill] sm:$0xff]  ;;  %v1371_v2 = vadd.f32 %v1335_v35, %v1292_v10  ;;  %v2308_v38 = vmul.f32 %v10255_v55, %v10614_v47  ;;  %13122 = vst [vmem:[#allocation72_spill] sm:$0xff] %v10855_v28  ;;  %13123 = vst [vmem:[#allocation73_spill] sm:$0xff] %v10857_v31  ;;  %v2387_v35 = vmul.f32 %v10352_v32, %v2270_v56  ;;  %v6642_v58 = vpop.f32.mrb[157].mxu0  ;;  %v2767_v10 = vld [vmem:[#allocation2 + $0x135] sm:$0xff] }
 0x2a8   : > { %v1561_v37 = vmul.f32 %v10233_v53, %v13120_v63  ;;  %v13121_v8 = vld [vmem:[#allocation5_spill] sm:$0xff]  ;;  %v1596_v45 = vadd.f32 %v1560_v7, %v1483_v23  ;;  %13124 = vst [vmem:[#allocation76_spill] sm:$0xff] %v10859_v20  ;;  %v10861_v53 = vld [vmem:[#allocation2 + $0x11a] sm:$0xff]  ;;  %v2231_v51 = vadd.f32 %v2195_v50, %v10570_v60  ;;  %v2310_v7 = vmul.f32 %v10255_v55, %v2270_v56  ;;  %v10870_v63 = vpop.f32.mrb[156].mxu1 }
 0x2a9   : > { %v2120_v44 = vmul.f32 %v10240_v15, %v13121_v8  ;;  %13125 = vst [vmem:[#allocation77_spill] sm:$0xff] %v10861_v53  ;;  %v2727_v15 = vadd.f32 %v2691_v6, %v2648_v26  ;;  %3397 = vst [vmem:[#allocation2 + $0x118] sm:$0xff] %v10855_v28  ;;  %v1484_v27 = vadd.f32 %v1448_v48, %v1371_v2  ;;  %v2654_v23 = vld [vmem:[#allocation2 + $0x134] sm:$0xff]  ;;  %v6803_v24 = vpop.f32.mrb[157].mxu1  ;;  %v11371_v28 = vld [vmem:[#allocation2 + $0x6a] sm:$0xff] }
 0x2aa   : > { %v10867_v47 = vadd.f32 %v1632_v0, %v1596_v45  ;;  %v2389_v8 = vmul.f32 %v10352_v32, %v2349_v52  ;;  %v1633_v26 = vld [vmem:[%s7646_s25 + $0x118] sm:$0xff]  ;;  %v2344_v60 = vadd.f32 %v2308_v38, %v2231_v51  ;;  %v2500_v55 = vmul.f32 %v10358_v13, %v2460_v11  ;;  %v10887_v51 = vpop.f32.mrb[158].mxu1  ;;  %13289 = vst [vmem:[#allocation200_spill] sm:$0xff] %v11424_v3  ;;  %v11446_v3 = vld [vmem:[#allocation2 + $0xaa] sm:$0xff] }
 0x2ab   : > { %v2233_v1 = vadd.f32 %v2197_v5, %v2120_v44  ;;  %v2840_v6 = vadd.f32 %v2804_v61, %v2727_v15  ;;  %v2502_v56 = vmul.f32 %v10358_v13, %v2462_v14  ;;  %v2880_v50 = vld [vmem:[#allocation2 + $0x136] sm:$0xff]  ;;  %v1597_v58 = vadd.f32 %v1561_v37, %v1484_v27  ;;  %v3328_v44 = vpop.f32.mrb[158].mxu0  ;;  %13300 = vst [vmem:[#allocation211_spill] sm:$0xff] %v11446_v3 }
 0x2ac   : > { %v2613_v48 = vmul.f32 %v10364_v30, %v10710_v43  ;;  %v2615_v52 = vmul.f32 %v10364_v30, %v10799_v19  ;;  %v2423_v61 = vadd.f32 %v2387_v35, %v2344_v60  ;;  %v2694_v2 = vmul.f32 %v10444_v36, %v2654_v23  ;;  %v6645_v14 = vpop.f32.mrb[159].mxu0  ;;  %3398 = vst [vmem:[#allocation2 + $0x120] sm:$0xff] %v3328_v44  ;;  %v7041_v43 = vld [vmem:[%s12397_s1 + $0x1] ss:$0 sm:$0xff]  ;;  %v7042_v35 = vld [vmem:[%s12397_s1 + $0x5] ss:$0 sm:$0xff] }
 0x2ad   : > { %v2346_v0 = vadd.f32 %v2310_v7, %v2233_v1  ;;  %v2953_v45 = vadd.f32 %v10805_v17, %v2840_v6  ;;  %v2807_v11 = vmul.f32 %v10518_v49, %v2767_v10  ;;  %v1669_v5 = vadd.f32 %v1633_v26, %v1597_v58  ;;  %v13126_v19 = vld [vmem:[#allocation32_spill] sm:$0xff]  ;;  %v13127_v27 = vld [vmem:[#allocation11_spill] sm:$0xff]  ;;  %v6806_v10 = vpop.f32.mrb[159].mxu1  ;;  %v7043_v60 = vld [vmem:[%s12397_s1 + $0x9] ss:$0 sm:$0xff]  ;;  %v3333_v58 = vpop.f32.mrb[160].mxu0 }
 0x2ae   : > { %v2920_v38 = vmul.f32 %v10524_v25, %v2880_v50  ;;  %v2086_v15 = vmul.f32 %v7041_v43, %v13126_v19  ;;  %v2536_v7 = vadd.f32 %v2500_v55, %v2423_v61  ;;  %v2163_v1 = vmul.f32 %v7042_v35, %v13127_v27  ;;  %v13130_v55 = vld [vmem:[#allocation39_spill] sm:$0xff]  ;;  %v10904_v44 = vld [vmem:[#allocation2 + $0x12b] sm:$0xff]  ;;  %v13135_v19 = vld [vmem:[#allocation4_spill] sm:$0xff]  ;;  %v10916_v10 = vpop.f32.mrb[160].mxu1 }
 0x2af   : > { %v2425_v37 = vadd.f32 %v2389_v8, %v2346_v0  ;;  %v3025_v17 = vadd.f32 %v2953_v45, %v10741_v22  ;;  %v13128_v8 = vld [vmem:[#allocation80_spill] sm:$0xff]  ;;  %1705 = vst [vmem:[%s7646_s25 + $0x118] sm:$0xff] %v1669_v5  ;;  %v2167_v26 = vmul.f32 %v7042_v35, %v9967_v29  ;;  %v13129_v22 = vld [vmem:[#allocation79_spill] sm:$0xff]  ;;  %v2278_v24 = vmul.f32 %v7043_v60, %v13130_v55  ;;  %v10902_v0 = vld [vmem:[#allocation2 + $0x12a] sm:$0xff] }
 0x2b0   : > { %v2165_v23 = vmul.f32 %v7042_v35, %v13128_v8  ;;  %v2276_v50 = vmul.f32 %v7043_v60, %v13129_v22  ;;  %13131 = vst [vmem:[#allocation5_spill] sm:$0xff] %v10902_v0  ;;  %13132 = vst [vmem:[#allocation32_spill] sm:$0xff] %v10904_v44  ;;  %v10906_v45 = vld [vmem:[#allocation2 + $0x12c] sm:$0xff]  ;;  %v2199_v61 = vadd.f32 %v2163_v1, %v2086_v15  ;;  %v13134_v14 = vld [vmem:[#allocation3_spill] sm:$0xff] }
 0x2b1   : > { %v2538_v6 = vadd.f32 %v2502_v56, %v2425_v37  ;;  %13133 = vst [vmem:[#allocation11_spill] sm:$0xff] %v10906_v45  ;;  %3061 = vst [vmem:[%s7646_s25 + $0xf8] sm:$0xff] %v3025_v17  ;;  %v2649_v56 = vadd.f32 %v2613_v48, %v2536_v7  ;;  %v2280_v5 = vmul.f32 %v7043_v60, %v9969_v42  ;;  %v6648_v37 = vpop.f32.mrb[161].mxu0  ;;  %v13136_v7 = vld [vmem:[#allocation18_spill] sm:$0xff]  ;;  %v13138_v22 = vld [vmem:[#allocation83_spill] sm:$0xff] }
 0x2b2   : > { %v2201_v29 = vadd.f32 %v2165_v23, %v13134_v14  ;;  %3399 = vst [vmem:[#allocation2 + $0x128] sm:$0xff] %v3333_v58  ;;  %v2203_v35 = vadd.f32 %v2167_v26, %v13135_v19  ;;  %v2355_v27 = vmul.f32 %v10352_v32, %v13130_v55  ;;  %v2357_v8 = vmul.f32 %v10352_v32, %v9969_v42  ;;  %v6809_v23 = vpop.f32.mrb[161].mxu1  ;;  %v3338_v58 = vpop.f32.mrb[162].mxu0  ;;  %v11373_v4 = vld [vmem:[#allocation2 + $0x7a] sm:$0xff]  ;;  %v11383_v44 = vld [vmem:[#allocation2 + $0x6c] sm:$0xff] }
 0x2b3   : > { %v2651_v43 = vadd.f32 %v2615_v52, %v2538_v6  ;;  %v2728_v48 = vadd.f32 %v10818_v18, %v2649_v56  ;;  %v2312_v15 = vadd.f32 %v2276_v50, %v2199_v61  ;;  %v2359_v1 = vmul.f32 %v10352_v32, %v13136_v7  ;;  %v13137_v6 = vld [vmem:[#allocation45_spill] sm:$0xff]  ;;  %v6651_v50 = vpop.f32.mrb[163].mxu0  ;;  %3400 = vst [vmem:[#allocation2 + $0x130] sm:$0xff] %v3338_v58  ;;  %v13140_v61 = vld [vmem:[#allocation75_spill] sm:$0xff] }
 0x2b4   : > { %v2314_v17 = vadd.f32 %v2278_v24, %v2201_v29  ;;  %v2316_v52 = vadd.f32 %v2280_v5, %v2203_v35  ;;  %v2468_v26 = vmul.f32 %v10358_v13, %v13137_v6  ;;  %v2470_v55 = vmul.f32 %v10358_v13, %v13138_v22  ;;  %v13141_v35 = vld [vmem:[#allocation51_spill] sm:$0xff]  ;;  %v13148_v22 = vld [vmem:[#allocation86_spill] sm:$0xff]  ;;  %13273 = vst [vmem:[#allocation188_spill] sm:$0xff] %v11383_v44 }
 0x2b5   : > { %v2730_v60 = vadd.f32 %v2694_v2, %v2651_v43  ;;  %v2841_v42 = vadd.f32 %v10821_v40, %v2728_v48  ;;  %v2391_v14 = vadd.f32 %v2355_v27, %v2312_v15  ;;  %v2472_v18 = vmul.f32 %v10358_v13, %v10064_v46  ;;  %v13139_v2 = vld [vmem:[#allocation81_spill] sm:$0xff]  ;;  %v7044_v40 = vld [vmem:[%s12397_s1 + $0x15] ss:$0 sm:$0xff]  ;;  %v3343_v48 = vpop.f32.mrb[164].mxu0  ;;  %v10945_v15 = vld [vmem:[#allocation2 + $0x13e] sm:$0xff] }
 0x2b6   : > { %v2393_v37 = vadd.f32 %v2357_v8, %v2314_v17  ;;  %v2395_v24 = vadd.f32 %v2359_v1, %v2316_v52  ;;  %v2581_v56 = vmul.f32 %v10364_v30, %v13139_v2  ;;  %v2583_v29 = vmul.f32 %v10364_v30, %v13140_v61  ;;  %v10941_v30 = vld [vmem:[#allocation2 + $0x13c] sm:$0xff]  ;;  %13144 = vst [vmem:[#allocation39_spill] sm:$0xff] %v10945_v15  ;;  %v10960_v52 = vld [vmem:[%s12397_s1 + $0x6] ss:$0 sm:$0xff]  ;;  %v6654_v6 = vpop.f32.mrb[165].mxu0  ;;  %v10982_v50 = vld [vmem:[#allocation2 + $0xf2] sm:$0xff] }
 0x2b7   : > { %v2843_v32 = vadd.f32 %v2807_v11, %v2730_v60  ;;  %v2954_v5 = vadd.f32 %v10824_v54, %v2841_v42  ;;  %v2504_v43 = vadd.f32 %v2468_v26, %v2391_v14  ;;  %v2585_v46 = vmul.f32 %v7044_v40, %v13141_v35  ;;  %13142 = vst [vmem:[#allocation80_spill] sm:$0xff] %v10941_v30  ;;  %v10943_v54 = vld [vmem:[#allocation2 + $0x13d] sm:$0xff]  ;;  %v10972_v42 = vld [vmem:[%s12397_s1 + $0xa] ss:$0 sm:$0xff]  ;;  %v10988_v2 = vld [vmem:[#allocation2 + $0xf3] sm:$0xff] }
 0x2b8   : > { %v2506_v19 = vadd.f32 %v2470_v55, %v2393_v37  ;;  %v2508_v27 = vadd.f32 %v2472_v18, %v2395_v24  ;;  %v2660_v11 = vmul.f32 %v10444_v36, %v13140_v61  ;;  %v2662_v8 = vmul.f32 %v10444_v36, %v13141_v35  ;;  %13143 = vst [vmem:[#allocation79_spill] sm:$0xff] %v10943_v54  ;;  %v10955_v60 = vld [vmem:[%s12397_s1 + $0x2] ss:$0 sm:$0xff]  ;;  %v10974_v14 = vld [vmem:[#allocation2 + $0xe9] sm:$0xff]  ;;  %v10976_v37 = vld [vmem:[#allocation2 + $0xf1] sm:$0xff] }
 0x2b9   : > { %v2956_v13 = vadd.f32 %v2920_v38, %v2843_v32  ;;  %v10948_v17 = vadd.f32 %v2954_v5, %v10783_v33  ;;  %v2617_v7 = vadd.f32 %v2581_v56, %v2504_v43  ;;  %v13146_v38 = vld [vmem:[#allocation36_spill] sm:$0xff]  ;;  %3401 = vst [vmem:[#allocation2 + $0x138] sm:$0xff] %v3343_v48  ;;  %v2773_v55 = vmul.f32 %v10518_v49, %v13148_v22  ;;  %v10986_v24 = vld [vmem:[#allocation2 + $0xeb] sm:$0xff]  ;;  %v11404_v44 = vld [vmem:[#allocation2 + $0x93] sm:$0xff] }
 0x2ba   : > { %v2619_v1 = vadd.f32 %v2583_v29, %v2506_v19  ;;  %v2664_v23 = vmul.f32 %v10444_v36, %v13146_v38  ;;  %v2621_v26 = vadd.f32 %v2585_v46, %v2508_v27  ;;  %v13149_v36 = vld [vmem:[#allocation118_spill] sm:$0xff]  ;;  %13150 = vst [vmem:[#allocation18_spill] sm:$0xff] %v10974_v14  ;;  %13151 = vst [vmem:[#allocation45_spill] sm:$0xff] %v10976_v37  ;;  %v10978_v18 = vld [vmem:[#allocation2 + $0xf9] sm:$0xff] }
 0x2bb   : > { %13145 = vst [vmem:[#allocation3_spill] sm:$0xff] %v10948_v17  ;;  %v10963_v33 = vadd.f32 %v2956_v13, %v10867_v47  ;;  %v2775_v58 = vmul.f32 %v10518_v49, %v13149_v36  ;;  %13152 = vst [vmem:[#allocation83_spill] sm:$0xff] %v10978_v18  ;;  %v10980_v47 = vld [vmem:[#allocation2 + $0xea] sm:$0xff]  ;;  %v10984_v32 = vld [vmem:[#allocation2 + $0xfa] sm:$0xff]  ;;  %v2696_v19 = vadd.f32 %v2660_v11, %v2617_v7 }
 0x2bc   : > { %13153 = vst [vmem:[#allocation81_spill] sm:$0xff] %v10980_v47  ;;  %13154 = vst [vmem:[#allocation75_spill] sm:$0xff] %v10982_v50  ;;  %v10990_v56 = vld [vmem:[#allocation2 + $0xfb] sm:$0xff]  ;;  %v10992_v61 = vld [vmem:[#allocation2 + $0xec] sm:$0xff]  ;;  %v2698_v40 = vadd.f32 %v2662_v8, %v2619_v1 }
 0x2bd   : > { %13147 = vst [vmem:[#allocation4_spill] sm:$0xff] %v10963_v33  ;;  %13155 = vst [vmem:[#allocation51_spill] sm:$0xff] %v10984_v32  ;;  %v10994_v29 = vld [vmem:[#allocation2 + $0xf4] sm:$0xff]  ;;  %v10996_v5 = vld [vmem:[#allocation2 + $0xfc] sm:$0xff] }
 0x2be   : > { %13156 = vst [vmem:[#allocation36_spill] sm:$0xff] %v10986_v24  ;;  %13157 = vst [vmem:[#allocation86_spill] sm:$0xff] %v10988_v2  ;;  %v10998_v43 = vld [vmem:[#allocation2 + $0xed] sm:$0xff]  ;;  %v11007_v48 = vld [vmem:[%s12397_s1 + $0x3] ss:$0 sm:$0xff]  ;;  %v3348_v2 = vpop.f32.mrb[166].mxu0 }
 0x2bf   : > { %13158 = vst [vmem:[#allocation118_spill] sm:$0xff] %v10990_v56  ;;  %13159 = vst [vmem:[#allocation148_spill] sm:$0xff] %v10992_v61  ;;  %v13163_v35 = vld [vmem:[#allocation130_spill] sm:$0xff]  ;;  %v13164_v13 = vld [vmem:[#allocation9_spill] sm:$0xff] }
 0x2c0   : > { %13160 = vst [vmem:[#allocation149_spill] sm:$0xff] %v10994_v29  ;;  %13161 = vst [vmem:[#allocation150_spill] sm:$0xff] %v10996_v5  ;;  %v2777_v46 = vmul.f32 %v10518_v49, %v13163_v35  ;;  %v2886_v27 = vmul.f32 %v10524_v25, %v13164_v13  ;;  %v11009_v38 = vld [vmem:[#allocation2 + $0x101] sm:$0xff]  ;;  %v11011_v6 = vld [vmem:[#allocation2 + $0x109] sm:$0xff]  ;;  %v2700_v29 = vadd.f32 %v2664_v23, %v2621_v26 }
 0x2c1   : > { %13162 = vst [vmem:[#allocation151_spill] sm:$0xff] %v10998_v43  ;;  %13165 = vst [vmem:[#allocation130_spill] sm:$0xff] %v11009_v38  ;;  %v11013_v22 = vld [vmem:[#allocation2 + $0x111] sm:$0xff]  ;;  %v11015_v36 = vld [vmem:[#allocation2 + $0x102] sm:$0xff] }
 0x2c2   : > { %13166 = vst [vmem:[#allocation9_spill] sm:$0xff] %v11011_v6  ;;  %13167 = vst [vmem:[#allocation152_spill] sm:$0xff] %v11013_v22  ;;  %v11017_v11 = vld [vmem:[#allocation2 + $0x10a] sm:$0xff]  ;;  %v11019_v8 = vld [vmem:[#allocation2 + $0x112] sm:$0xff] }
 0x2c3   : > { %13168 = vst [vmem:[#allocation153_spill] sm:$0xff] %v11015_v36  ;;  %13169 = vst [vmem:[#allocation154_spill] sm:$0xff] %v11017_v11  ;;  %v11021_v49 = vld [vmem:[#allocation2 + $0x103] sm:$0xff]  ;;  %v11023_v7 = vld [vmem:[#allocation2 + $0x10b] sm:$0xff]  ;;  %v2811_v11 = vadd.f32 %v2775_v58, %v2698_v40 }
 0x2c4   : > { %13170 = vst [vmem:[#allocation155_spill] sm:$0xff] %v11019_v8  ;;  %13171 = vst [vmem:[#allocation156_spill] sm:$0xff] %v11021_v49  ;;  %v11025_v1 = vld [vmem:[#allocation2 + $0x113] sm:$0xff]  ;;  %v11027_v35 = vld [vmem:[#allocation2 + $0x104] sm:$0xff]  ;;  %v2809_v8 = vadd.f32 %v2773_v55, %v2696_v19 }
 0x2c5   : > { %13172 = vst [vmem:[#allocation157_spill] sm:$0xff] %v11023_v7  ;;  %13173 = vst [vmem:[#allocation158_spill] sm:$0xff] %v11025_v1  ;;  %v11029_v13 = vld [vmem:[#allocation2 + $0x10c] sm:$0xff]  ;;  %v11031_v33 = vld [vmem:[#allocation2 + $0x114] sm:$0xff] }
 0x2c6   : > { %13174 = vst [vmem:[#allocation159_spill] sm:$0xff] %v11027_v35  ;;  %13175 = vst [vmem:[#allocation160_spill] sm:$0xff] %v11029_v13  ;;  %v11033_v17 = vld [vmem:[#allocation2 + $0xf5] sm:$0xff]  ;;  %v11035_v43 = vld [vmem:[#allocation2 + $0xfd] sm:$0xff] }
 0x2c7   : > { %13176 = vst [vmem:[#allocation161_spill] sm:$0xff] %v11031_v33  ;;  %13177 = vst [vmem:[#allocation162_spill] sm:$0xff] %v11033_v17  ;;  %v11037_v5 = vld [vmem:[#allocation2 + $0x105] sm:$0xff]  ;;  %v13180_v61 = vld [vmem:[#allocation119_spill] sm:$0xff] }
 0x2c8   : > { %13178 = vst [vmem:[#allocation163_spill] sm:$0xff] %v11035_v43  ;;  %13179 = vst [vmem:[#allocation164_spill] sm:$0xff] %v11037_v5  ;;  %v2888_v49 = vmul.f32 %v10524_v25, %v13180_v61  ;;  %v13181_v56 = vld [vmem:[#allocation131_spill] sm:$0xff]  ;;  %v13182_v1 = vld [vmem:[#allocation44_spill] sm:$0xff] }
 0x2c9   : > { %v2890_v7 = vmul.f32 %v10524_v25, %v13181_v56  ;;  %v3447_v35 = vmul.f32 %v10955_v60, %v13182_v1  ;;  %v11045_v13 = vld [vmem:[#allocation2 + $0xe1] sm:$0xff]  ;;  %v11047_v33 = vld [vmem:[#allocation2 + $0x119] sm:$0xff]  ;;  %v11063_v56 = vld [vmem:[#allocation2 + $0x10d] sm:$0xff]  ;;  %3402 = vst [vmem:[#allocation2 + $0x140] sm:$0xff] %v3348_v2  ;;  %v2813_v2 = vadd.f32 %v2777_v46, %v2700_v29 }
 0x2ca   : > { %13183 = vst [vmem:[#allocation119_spill] sm:$0xff] %v11045_v13  ;;  %13184 = vst [vmem:[#allocation131_spill] sm:$0xff] %v11047_v33  ;;  %v11049_v17 = vld [vmem:[#allocation2 + $0xe2] sm:$0xff]  ;;  %v11051_v43 = vld [vmem:[#allocation2 + $0x11a] sm:$0xff] }
 0x2cb   : > { %13185 = vst [vmem:[#allocation44_spill] sm:$0xff] %v11049_v17  ;;  %13186 = vst [vmem:[#allocation165_spill] sm:$0xff] %v11051_v43  ;;  %v11053_v5 = vld [vmem:[#allocation2 + $0xe3] sm:$0xff]  ;;  %v11055_v23 = vld [vmem:[#allocation2 + $0x11b] sm:$0xff] }
 0x2cc   : > { %13187 = vst [vmem:[#allocation166_spill] sm:$0xff] %v11053_v5  ;;  %13188 = vst [vmem:[#allocation167_spill] sm:$0xff] %v11055_v23  ;;  %v11057_v26 = vld [vmem:[#allocation2 + $0xe4] sm:$0xff]  ;;  %v11059_v61 = vld [vmem:[#allocation2 + $0x11c] sm:$0xff] }
 0x2cd   : > { %13189 = vst [vmem:[#allocation168_spill] sm:$0xff] %v11057_v26  ;;  %13190 = vst [vmem:[#allocation169_spill] sm:$0xff] %v11059_v61  ;;  %v11061_v25 = vld [vmem:[#allocation2 + $0xe5] sm:$0xff]  ;;  %v11065_v1 = vld [vmem:[#allocation2 + $0x115] sm:$0xff]  ;;  %v6657_v61 = vpop.f32.mrb[167].mxu0 }
 0x2ce   : > { %13191 = vst [vmem:[#allocation170_spill] sm:$0xff] %v11061_v25  ;;  %13192 = vst [vmem:[#allocation171_spill] sm:$0xff] %v11063_v56  ;;  %v11067_v24 = vld [vmem:[#allocation2 + $0x11d] sm:$0xff]  ;;  %v13195_v36 = vld [vmem:[#allocation46_spill] sm:$0xff] }
 0x2cf   : > { %13193 = vst [vmem:[#allocation172_spill] sm:$0xff] %v11065_v1  ;;  %13194 = vst [vmem:[#allocation173_spill] sm:$0xff] %v11067_v24  ;;  %v11071_v5 = vmul.f32 %v10955_v60, %v13195_v36  ;;  %v13196_v23 = vld [vmem:[#allocation41_spill] sm:$0xff]  ;;  %v2958_v43 = vld [vmem:[%s7646_s25] sm:$0xff] }
 0x2d0   : > { %v3524_v26 = vmul.f32 %v10960_v52, %v13196_v23  ;;  %v11078_v25 = vld [vmem:[%s12397_s1 + $0xe] ss:$0 sm:$0xff]  ;;  %v11080_v1 = vld [vmem:[#allocation2 + $0x122] sm:$0xff]  ;;  %v13206_v32 = vld [vmem:[#allocation23_spill] sm:$0xff]  ;;  %13279 = vst [vmem:[#allocation190_spill] sm:$0xff] %v11404_v44 }
 0x2d1   : > { %13197 = vst [vmem:[#allocation46_spill] sm:$0xff] %v11080_v1  ;;  %v11082_v24 = vld [vmem:[#allocation2 + $0x12a] sm:$0xff]  ;;  %v13208_v50 = vld [vmem:[#allocation88_spill] sm:$0xff]  ;;  %v11114_v29 = vld [vmem:[%s12397_s1 + $0x16] ss:$0 sm:$0xff] }
 0x2d2   : > { %13198 = vst [vmem:[#allocation41_spill] sm:$0xff] %v11082_v24  ;;  %v11084_v55 = vld [vmem:[#allocation2 + $0x123] sm:$0xff]  ;;  %v11086_v58 = vld [vmem:[#allocation2 + $0x12b] sm:$0xff]  ;;  %v3637_v24 = vmul.f32 %v10972_v42, %v13206_v32  ;;  %v11118_v61 = vld [vmem:[#allocation2 + $0xf6] sm:$0xff] }
 0x2d3   : > { %13199 = vst [vmem:[#allocation174_spill] sm:$0xff] %v11084_v55  ;;  %13200 = vst [vmem:[#allocation175_spill] sm:$0xff] %v11086_v58  ;;  %v11088_v19 = vld [vmem:[#allocation2 + $0x124] sm:$0xff]  ;;  %v11090_v40 = vld [vmem:[#allocation2 + $0x12c] sm:$0xff] }
 0x2d4   : > { %13201 = vst [vmem:[#allocation176_spill] sm:$0xff] %v11088_v19  ;;  %13202 = vst [vmem:[#allocation177_spill] sm:$0xff] %v11090_v40  ;;  %v11092_v36 = vld [vmem:[#allocation2 + $0x125] sm:$0xff]  ;;  %v11094_v23 = vld [vmem:[#allocation2 + $0x12d] sm:$0xff]  ;;  %v3523_v19 = vmul.f32 %v10960_v52, %v13208_v50 }
 0x2d5   : > { %13203 = vst [vmem:[#allocation178_spill] sm:$0xff] %v11092_v36  ;;  %13204 = vst [vmem:[#allocation179_spill] sm:$0xff] %v11094_v23  ;;  %v11096_v56 = vld [vmem:[#allocation2 + $0xe6] sm:$0xff]  ;;  %v2960_v1 = vld [vmem:[%s7646_s25 + $0x10] sm:$0xff]  ;;  %v3560_v23 = vadd.f32 %v3524_v26, %v3447_v35 }
 0x2d6   : > { %13205 = vst [vmem:[#allocation180_spill] sm:$0xff] %v11096_v56  ;;  %v13207_v55 = vld [vmem:[#allocation42_spill] sm:$0xff]  ;;  %v11120_v32 = vld [vmem:[#allocation2 + $0xfe] sm:$0xff]  ;;  %v2924_v56 = vadd.f32 %v2888_v49, %v2811_v11  ;;  %v11127_v47 = vld [vmem:[%s12397_s1 + $0x7] ss:$0 sm:$0xff] }
 0x2d7   : > { %v3446_v58 = vmul.f32 %v10955_v60, %v13207_v55  ;;  %v11109_v36 = vld [vmem:[%s12397_s1 + $0x12] ss:$0 sm:$0xff]  ;;  %13210 = vst [vmem:[#allocation42_spill] sm:$0xff] %v11118_v61  ;;  %13211 = vst [vmem:[#allocation88_spill] sm:$0xff] %v11120_v32  ;;  %v2922_v55 = vadd.f32 %v2886_v27, %v2809_v8  ;;  %v11129_v17 = vld [vmem:[#allocation2 + $0x106] sm:$0xff]  ;;  %v2926_v27 = vadd.f32 %v2890_v7, %v2813_v2 }
 0x2d8   : > { %v11116_v46 = vld [vmem:[#allocation2 + $0xee] sm:$0xff]  ;;  %4753 = vst [vmem:[#allocation2 + $0xf8] sm:$0xff] %v10739_v34  ;;  %v7045_v8 = vld [vmem:[#allocation2] sm:$0xff]  ;;  %4754 = vst [vmem:[#allocation2 + $0x100] sm:$0xff] %v10777_v21  ;;  %v11153_v34 = vadd.f32 %v2960_v1, %v2924_v56  ;;  %v3673_v7 = vadd.f32 %v3637_v24, %v3560_v23 }
 0x2d9   : > { %13209 = vst [vmem:[#allocation23_spill] sm:$0xff] %v11116_v46  ;;  %v13212_v50 = vld [vmem:[#allocation22_spill] sm:$0xff]  ;;  %4751 = vst [vmem:[#allocation2 + $0xe8] sm:$0xff] %v10712_v41  ;;  %v3559_v11 = vadd.f32 %v3523_v19, %v3446_v58  ;;  %v4806_v49 = vmul.f32 %v7045_v8, %v11007_v48  ;;  %v3353_v41 = vpop.f32.mrb[168].mxu0  ;;  %v13218_v58 = vld [vmem:[#allocation8_spill] sm:$0xff] }
 0x2da   : > { %v3636_v40 = vmul.f32 %v10972_v42, %v13212_v50  ;;  %13213 = vst [vmem:[#allocation22_spill] sm:$0xff] %v11129_v17  ;;  %v11131_v33 = vld [vmem:[#allocation2 + $0x10e] sm:$0xff]  ;;  %v11133_v46 = vld [vmem:[#allocation2 + $0x116] sm:$0xff]  ;;  %4752 = vst [vmem:[#allocation2 + $0xf0] sm:$0xff] %v10728_v62  ;;  %v11151_v62 = vadd.f32 %v2958_v43, %v2922_v55  ;;  %v3525_v19 = vmul.f32 %v10960_v52, %v13218_v58  ;;  %v6660_v21 = vpop.f32.mrb[169].mxu0 }
 0x2db   : > { %13214 = vst [vmem:[#allocation181_spill] sm:$0xff] %v11131_v33  ;;  %13215 = vst [vmem:[#allocation182_spill] sm:$0xff] %v11133_v46  ;;  %v13216_v35 = vld [vmem:[#allocation82_spill] sm:$0xff]  ;;  %v4843_v50 = vld [vmem:[#allocation2 + $0x1] sm:$0xff] }
 0x2dc   : > { %v3449_v26 = vmul.f32 %v10955_v60, %v13216_v35  ;;  %v11144_v33 = vld [vmem:[%s12397_s1 + $0xb] ss:$0 sm:$0xff]  ;;  %v11146_v46 = vld [vmem:[#allocation2 + $0x11e] sm:$0xff]  ;;  %4755 = vst [vmem:[#allocation2 + $0x108] sm:$0xff] %v10810_v59  ;;  %4756 = vst [vmem:[#allocation2 + $0x110] sm:$0xff] %v10842_v57  ;;  %v3672_v57 = vadd.f32 %v3636_v40, %v3559_v11  ;;  %v3561_v1 = vadd.f32 %v3525_v19, %v11071_v5 }
 0x2dd   : > { %13217 = vst [vmem:[#allocation82_spill] sm:$0xff] %v11146_v46  ;;  %v4956_v2 = vld [vmem:[#allocation2 + $0x2] sm:$0xff]  ;;  %v11159_v35 = vld [vmem:[#allocation2 + $0x12e] sm:$0xff]  ;;  %4757 = vst [vmem:[#allocation2 + $0x118] sm:$0xff] %v10870_v63  ;;  %v4883_v58 = vmul.f32 %v11127_v47, %v4843_v50 }
 0x2de   : > { %v11157_v8 = vld [vmem:[#allocation2 + $0x126] sm:$0xff]  ;;  %13220 = vst [vmem:[#allocation183_spill] sm:$0xff] %v11159_v35  ;;  %v4996_v21 = vmul.f32 %v11144_v33, %v4956_v2  ;;  %v13226_v19 = vld [vmem:[#allocation115_spill] sm:$0xff]  ;;  %v7047_v22 = vld [vmem:[#allocation2 + $0x10] sm:$0xff] }
 0x2df   : > { %13219 = vst [vmem:[#allocation8_spill] sm:$0xff] %v11157_v8  ;;  %v13221_v59 = vld [vmem:[#allocation28_spill] sm:$0xff]  ;;  %4758 = vst [vmem:[#allocation2 + $0x120] sm:$0xff] %v10887_v51  ;;  %v13223_v23 = vld [vmem:[#allocation25_spill] sm:$0xff]  ;;  %v4919_v8 = vadd.f32 %v4883_v58, %v4806_v49 }
 0x2e0   : > { %v11163_v46 = vadd.f32 %v2926_v27, %v13221_v59  ;;  %v13222_v43 = vld [vmem:[#allocation48_spill] sm:$0xff]  ;;  %4759 = vst [vmem:[#allocation2 + $0x128] sm:$0xff] %v10916_v10  ;;  %v3828_v63 = vmul.f32 %v11109_v36, %v13223_v23  ;;  %v7046_v41 = vld [vmem:[#allocation2 + $0x8] sm:$0xff]  ;;  %v13225_v59 = vld [vmem:[#allocation87_spill] sm:$0xff]  ;;  %v3526_v23 = vmul.f32 %v10960_v52, %v13226_v19 }
 0x2e1   : > { %v3638_v56 = vmul.f32 %v10972_v42, %v13222_v43  ;;  %v3715_v24 = vmul.f32 %v11078_v25, %v13222_v43  ;;  %v13224_v55 = vld [vmem:[#allocation92_spill] sm:$0xff]  ;;  %v4807_v40 = vmul.f32 %v7046_v41, %v11007_v48  ;;  %v3450_v51 = vmul.f32 %v10955_v60, %v13225_v59  ;;  %v4844_v10 = vld [vmem:[#allocation2 + $0x9] sm:$0xff]  ;;  %v3358_v43 = vpop.f32.mrb[170].mxu0  ;;  %v11195_v19 = vld [vmem:[#allocation2 + $0x136] sm:$0xff] }
 0x2e2   : > { %v3941_v27 = vmul.f32 %v11114_v29, %v13224_v55  ;;  %v13227_v35 = vld [vmem:[#allocation116_spill] sm:$0xff]  ;;  %v13228_v2 = vld [vmem:[#allocation117_spill] sm:$0xff]  ;;  %13232 = vst [vmem:[#allocation25_spill] sm:$0xff] %v11195_v19  ;;  %v3562_v32 = vadd.f32 %v3526_v23, %v3449_v26  ;;  %v11202_v49 = vld [vmem:[%s12397_s1 + $0x1a] ss:$0 sm:$0xff]  ;;  %v5032_v58 = vadd.f32 %v4996_v21, %v4919_v8 }
 0x2e3   : > { %v3751_v11 = vadd.f32 %v3715_v24, %v3672_v57  ;;  %v3674_v5 = vadd.f32 %v3638_v56, %v3561_v1  ;;  %v3639_v55 = vmul.f32 %v10972_v42, %v13227_v35  ;;  %v3716_v41 = vmul.f32 %v11078_v25, %v13227_v35  ;;  %v4957_v57 = vld [vmem:[#allocation2 + $0xa] sm:$0xff]  ;;  %v6663_v24 = vpop.f32.mrb[171].mxu0  ;;  %v13229_v59 = vld [vmem:[#allocation84_spill] sm:$0xff]  ;;  %v11191_v56 = vld [vmem:[#allocation2 + $0x134] sm:$0xff] }
 0x2e4   : > { %v3829_v17 = vmul.f32 %v11109_v36, %v13228_v2  ;;  %v3942_v43 = vmul.f32 %v11114_v29, %v13229_v59  ;;  %13230 = vst [vmem:[#allocation28_spill] sm:$0xff] %v11191_v56  ;;  %v11193_v1 = vld [vmem:[#allocation2 + $0x135] sm:$0xff]  ;;  %v4808_v35 = vmul.f32 %v7047_v22, %v11007_v48  ;;  %v4997_v24 = vmul.f32 %v11144_v33, %v4957_v57  ;;  %v13233_v2 = vld [vmem:[#allocation89_spill] sm:$0xff]  ;;  %v11213_v48 = vld [vmem:[#allocation2 + $0x13e] sm:$0xff]  ;;  %v4698_v22 = vpop.f32.mrb[162].mxu1 }
 0x2e5   : > { %v3864_v50 = vadd.f32 %v3828_v63, %v3751_v11  ;;  %13231 = vst [vmem:[#allocation48_spill] sm:$0xff] %v11193_v1  ;;  %v3752_v61 = vadd.f32 %v3716_v41, %v3673_v7  ;;  %v4884_v63 = vmul.f32 %v11127_v47, %v4844_v10  ;;  %v11207_v59 = vmul.f32 %v10955_v60, %v13233_v2  ;;  %v11209_v26 = vld [vmem:[#allocation2 + $0x13c] sm:$0xff]  ;;  %v13237_v19 = vld [vmem:[#allocation93_spill] sm:$0xff]  ;;  %v4845_v57 = vld [vmem:[#allocation2 + $0x11] sm:$0xff] }
 0x2e6   : > { %13234 = vst [vmem:[#allocation92_spill] sm:$0xff] %v11209_v26  ;;  %v11211_v7 = vld [vmem:[#allocation2 + $0x13d] sm:$0xff]  ;;  %13236 = vst [vmem:[#allocation115_spill] sm:$0xff] %v11213_v48  ;;  %v11215_v10 = vadd.f32 %v3639_v55, %v3562_v32  ;;  %v3527_v8 = vmul.f32 %v10960_v52, %v13237_v19  ;;  %v4958_v2 = vld [vmem:[#allocation2 + $0x12] sm:$0xff] }
 0x2e7   : > { %v3977_v11 = vadd.f32 %v3941_v27, %v3864_v50  ;;  %13235 = vst [vmem:[#allocation87_spill] sm:$0xff] %v11211_v7  ;;  %v3865_v23 = vadd.f32 %v3829_v17, %v3752_v61  ;;  %v4920_v41 = vadd.f32 %v4884_v63, %v4807_v40  ;;  %v11222_v27 = vld [vmem:[%s12397_s1 + $0x1e] ss:$0 sm:$0xff]  ;;  %v11227_v21 = vld [vmem:[%s12397_s1 + $0x22] ss:$0 sm:$0xff]  ;;  %4760 = vst [vmem:[#allocation2 + $0x130] sm:$0xff] %v4698_v22 }
 0x2e8   : > { %v6812_v50 = vpop.f32.mrb[163].mxu1  ;;  %v13238_v32 = vld [vmem:[#allocation52_spill] sm:$0xff]  ;;  %v13239_v40 = vld [vmem:[#allocation121_spill] sm:$0xff]  ;;  %v13240_v19 = vld [vmem:[#allocation123_spill] sm:$0xff] }
 0x2e9   : > { %v3640_v17 = vmul.f32 %v10972_v42, %v13238_v32  ;;  %v3717_v61 = vmul.f32 %v11078_v25, %v13238_v32  ;;  %v3830_v55 = vmul.f32 %v11109_v36, %v13239_v40  ;;  %v3943_v63 = vmul.f32 %v11114_v29, %v13240_v19  ;;  %v5937_v48 = vld [vmem:[%s12397_s1 + $0xf] ss:$0 sm:$0xff]  ;;  %v5938_v22 = vld [vmem:[%s12397_s1 + $0x13] ss:$0 sm:$0xff]  ;;  %v4703_v50 = vpop.f32.mrb[164].mxu1  ;;  %v5261_v6 = vld [vmem:[#allocation2 + $0x14] sm:$0xff] }
 0x2ea   : > { %v11243_v7 = vadd.f32 %v3942_v43, %v3865_v23  ;;  %v11245_v1 = vadd.f32 %v4997_v24, %v4920_v41  ;;  %v3563_v32 = vadd.f32 %v3527_v8, %v3450_v51  ;;  %v4020_v40 = vmul.f32 %v11202_v49, %v13240_v19  ;;  %v5148_v26 = vld [vmem:[#allocation2 + $0x13] sm:$0xff]  ;;  %4761 = vst [vmem:[#allocation2 + $0x138] sm:$0xff] %v4703_v50  ;;  %v6815_v38 = vpop.f32.mrb[165].mxu1  ;;  %v13242_v37 = vld [vmem:[#allocation124_spill] sm:$0xff]  ;;  %v13243_v43 = vld [vmem:[#allocation125_spill] sm:$0xff] }
 0x2eb   : > { %v5939_v56 = vld [vmem:[%s12397_s1 + $0x17] ss:$0 sm:$0xff]  ;;  %v3753_v18 = vadd.f32 %v3717_v61, %v3674_v5  ;;  %v4133_v14 = vmul.f32 %v11222_v27, %v13242_v37  ;;  %v4246_v24 = vmul.f32 %v11227_v21, %v13243_v43  ;;  %v4885_v51 = vmul.f32 %v11127_v47, %v4845_v57  ;;  %v11262_v13 = vld [vmem:[#allocation2 + $0x4d] sm:$0xff]  ;;  %v11375_v15 = vld [vmem:[#allocation2 + $0x5b] sm:$0xff] }
 0x2ec   : > { %13241 = vst [vmem:[#allocation116_spill] sm:$0xff] %v11245_v1  ;;  %v11257_v23 = vadd.f32 %v3640_v17, %v3563_v32  ;;  %v4056_v41 = vadd.f32 %v4020_v40, %v3977_v11  ;;  %v4998_v8 = vmul.f32 %v11144_v33, %v4958_v2  ;;  %v5075_v19 = vmul.f32 %v5937_v48, %v4958_v2  ;;  %v11260_v1 = vld [vmem:[#allocation2 + $0x4b] sm:$0xff]  ;;  %v11270_v57 = vld [vmem:[#allocation2 + $0x53] sm:$0xff]  ;;  %v13247_v2 = vld [vmem:[#allocation120_spill] sm:$0xff] }
 0x2ed   : > { %13244 = vst [vmem:[#allocation117_spill] sm:$0xff] %v11260_v1  ;;  %13245 = vst [vmem:[#allocation84_spill] sm:$0xff] %v11262_v13  ;;  %v11264_v38 = vld [vmem:[#allocation2 + $0x4e] sm:$0xff]  ;;  %v3866_v61 = vadd.f32 %v3830_v55, %v3753_v18  ;;  %v4921_v50 = vadd.f32 %v4885_v51, %v4808_v35  ;;  %v5188_v43 = vmul.f32 %v5938_v22, %v5148_v26  ;;  %v11282_v13 = vld [vmem:[#allocation2 + $0x56] sm:$0xff] }
 0x2ee   : > { %13246 = vst [vmem:[#allocation89_spill] sm:$0xff] %v11264_v38  ;;  %v11266_v5 = vld [vmem:[#allocation2 + $0x51] sm:$0xff]  ;;  %v5301_v47 = vmul.f32 %v5939_v56, %v5261_v6  ;;  %v4169_v48 = vadd.f32 %v4133_v14, %v4056_v41  ;;  %v5111_v17 = vadd.f32 %v5075_v19, %v5032_v58  ;;  %v11278_v32 = vmul.f32 %v10955_v60, %v13247_v2  ;;  %v11284_v18 = vld [vmem:[#allocation2 + $0x49] sm:$0xff]  ;;  %v11379_v30 = vld [vmem:[#allocation2 + $0x7b] sm:$0xff] }
 0x2ef   : > { %v11268_v37 = vld [vmem:[#allocation2 + $0x52] sm:$0xff]  ;;  %13249 = vst [vmem:[#allocation93_spill] sm:$0xff] %v11284_v18  ;;  %v11286_v6 = vld [vmem:[#allocation2 + $0x4a] sm:$0xff]  ;;  %v11288_v56 = vadd.f32 %v3943_v63, %v3866_v61  ;;  %v11290_v35 = vadd.f32 %v4998_v8, %v4921_v50  ;;  %v13256_v8 = vld [vmem:[#allocation128_spill] sm:$0xff] }
 0x2f0   : > { %v11272_v11 = vld [vmem:[#allocation2 + $0x54] sm:$0xff]  ;;  %13250 = vst [vmem:[#allocation52_spill] sm:$0xff] %v11286_v6  ;;  %v4282_v55 = vadd.f32 %v4246_v24, %v4169_v48  ;;  %v5224_v22 = vadd.f32 %v5188_v43, %v5111_v17  ;;  %v13253_v41 = vld [vmem:[#allocation53_spill] sm:$0xff]  ;;  %v11306_v61 = vmul.f32 %v11114_v29, %v13256_v8  ;;  %v4021_v50 = vmul.f32 %v11202_v49, %v13256_v8  ;;  %v11381_v45 = vld [vmem:[#allocation2 + $0x5c] sm:$0xff] }
 0x2f1   : > { %v11274_v33 = vld [vmem:[#allocation2 + $0x55] sm:$0xff]  ;;  %13251 = vst [vmem:[#allocation121_spill] sm:$0xff] %v11290_v35  ;;  %v3831_v19 = vmul.f32 %v11109_v36, %v13253_v41  ;;  %v11299_v2 = vld [vmem:[#allocation2 + $0x48] sm:$0xff]  ;;  %13269 = vst [vmem:[#allocation184_spill] sm:$0xff] %v11375_v15 }
 0x2f2   : > { %v13248_v40 = vld [vmem:[#allocation90_spill] sm:$0xff]  ;;  %13254 = vst [vmem:[#allocation123_spill] sm:$0xff] %v11299_v2  ;;  %v13257_v24 = vld [vmem:[#allocation129_spill] sm:$0xff]  ;;  %v11319_v48 = vadd.f32 %v5301_v47, %v5224_v22  ;;  %v11363_v2 = vld [vmem:[#allocation2 + $0x59] sm:$0xff] }
 0x2f3   : > { %v3528_v38 = vmul.f32 %v10960_v52, %v13248_v40  ;;  %v13252_v26 = vld [vmem:[#allocation126_spill] sm:$0xff]  ;;  %v11312_v43 = vmul.f32 %v11222_v27, %v13257_v24  ;;  %v11329_v41 = vld [vmem:[#allocation2 + $0x62] sm:$0xff]  ;;  %v11369_v35 = vld [vmem:[#allocation2 + $0x5a] sm:$0xff]  ;;  %13271 = vst [vmem:[#allocation186_spill] sm:$0xff] %v11379_v30 }
 0x2f4   : > { %v3641_v14 = vmul.f32 %v10972_v42, %v13252_v26  ;;  %v3718_v58 = vmul.f32 %v11078_v25, %v13252_v26  ;;  %v11301_v40 = vld [vmem:[#allocation2 + $0x4c] sm:$0xff]  ;;  %13260 = vst [vmem:[#allocation120_spill] sm:$0xff] %v11319_v48  ;;  %v11331_v8 = vld [vmem:[#allocation2 + $0x63] sm:$0xff]  ;;  %v11345_v22 = vld [vmem:[#allocation2 + $0x74] sm:$0xff] }
 0x2f5   : > { %v3564_v51 = vadd.f32 %v3528_v38, %v11207_v59  ;;  %13255 = vst [vmem:[#allocation124_spill] sm:$0xff] %v11301_v40  ;;  %4731 = vst [vmem:[#allocation2 + $0x48] sm:$0xff] %v10367_v39  ;;  %v13258_v59 = vld [vmem:[#allocation15_spill] sm:$0xff]  ;;  %v11317_v38 = vadd.f32 %v4282_v55, %v11151_v62  ;;  %v13262_v17 = vld [vmem:[#allocation14_spill] sm:$0xff] }
 0x2f6   : > { %v3754_v63 = vadd.f32 %v3718_v58, %v11215_v10  ;;  %4732 = vst [vmem:[#allocation2 + $0x50] sm:$0xff] %v13258_v59  ;;  %v11325_v26 = vmul.f32 %v11227_v21, %v13262_v17  ;;  %v11327_v58 = vld [vmem:[#allocation2 + $0x61] sm:$0xff]  ;;  %v11339_v47 = vld [vmem:[#allocation2 + $0x71] sm:$0xff]  ;;  %13263 = vst [vmem:[#allocation126_spill] sm:$0xff] %v11363_v2 }
 0x2f7   : > { %13259 = vst [vmem:[#allocation125_spill] sm:$0xff] %v11317_v38  ;;  %v11321_v10 = vadd.f32 %v3641_v14, %v3564_v51  ;;  %v11333_v39 = vld [vmem:[#allocation2 + $0x64] sm:$0xff]  ;;  %v11341_v14 = vld [vmem:[#allocation2 + $0x72] sm:$0xff]  ;;  %13266 = vst [vmem:[#allocation129_spill] sm:$0xff] %v11369_v35  ;;  %v11390_v35 = vadd.f32 %v4021_v50, %v11243_v7 }
 0x2f8   : > { %v11335_v24 = vld [vmem:[#allocation2 + $0x65] sm:$0xff]  ;;  %v11343_v55 = vld [vmem:[#allocation2 + $0x73] sm:$0xff]  ;;  %13267 = vst [vmem:[#allocation15_spill] sm:$0xff] %v11371_v28  ;;  %13268 = vst [vmem:[#allocation14_spill] sm:$0xff] %v11373_v4 }
 0x2f9   : > { %13261 = vst [vmem:[#allocation90_spill] sm:$0xff] %v11321_v10  ;;  %v11337_v62 = vld [vmem:[#allocation2 + $0x66] sm:$0xff]  ;;  %v11347_v51 = vld [vmem:[#allocation2 + $0x75] sm:$0xff]  ;;  %13272 = vst [vmem:[#allocation187_spill] sm:$0xff] %v11381_v45 }
 0x2fa   : > { %v11349_v59 = vld [vmem:[#allocation2 + $0x76] sm:$0xff]  ;;  %v11351_v17 = vld [vmem:[#allocation2 + $0x81] sm:$0xff]  ;;  %v11365_v38 = vld [vmem:[#allocation2 + $0x69] sm:$0xff] }
 0x2fb   : > { %v11353_v40 = vld [vmem:[#allocation2 + $0x82] sm:$0xff]  ;;  %13264 = vst [vmem:[#allocation53_spill] sm:$0xff] %v11365_v38  ;;  %v11367_v48 = vld [vmem:[#allocation2 + $0x79] sm:$0xff]  ;;  %v11377_v54 = vld [vmem:[#allocation2 + $0x6b] sm:$0xff]  ;;  %v11387_v38 = vadd.f32 %v3831_v19, %v3754_v63 }
 0x2fc   : > { %v11355_v1 = vld [vmem:[#allocation2 + $0x83] sm:$0xff]  ;;  %13265 = vst [vmem:[#allocation128_spill] sm:$0xff] %v11367_v48  ;;  %13270 = vst [vmem:[#allocation185_spill] sm:$0xff] %v11377_v54  ;;  %v13275_v28 = vld [vmem:[#allocation127_spill] sm:$0xff] }
 0x2fd   : > { %v11357_v10 = vld [vmem:[#allocation2 + $0x84] sm:$0xff]  ;;  %v11385_v2 = vld [vmem:[#allocation2 + $0x7c] sm:$0xff]  ;;  %v11394_v4 = vmul.f32 %v10955_v60, %v13275_v28  ;;  %v11400_v30 = vld [vmem:[#allocation2 + $0x91] sm:$0xff] }
 0x2fe   : > { %v11359_v6 = vld [vmem:[#allocation2 + $0x85] sm:$0xff]  ;;  %13274 = vst [vmem:[#allocation189_spill] sm:$0xff] %v11385_v2  ;;  %v13277_v15 = vld [vmem:[#allocation55_spill] sm:$0xff] }
 0x2ff   : > { %v11361_v18 = vld [vmem:[#allocation2 + $0x86] sm:$0xff]  ;;  %13276 = vst [vmem:[#allocation127_spill] sm:$0xff] %v11394_v4  ;;  %v11398_v54 = vmul.f32 %v10960_v52, %v13277_v15  ;;  %v11402_v45 = vld [vmem:[#allocation2 + $0x92] sm:$0xff] }
 0x300   : > { %13278 = vst [vmem:[#allocation55_spill] sm:$0xff] %v11402_v45  ;;  %v11406_v2 = vld [vmem:[#allocation2 + $0x94] sm:$0xff]  ;;  %v11412_v63 = vld [vmem:[#allocation2 + $0xa1] sm:$0xff]  ;;  %v11494_v44 = vld [vmem:[#allocation2 + $0xca] sm:$0xff] }
 0x301   : > { %13280 = vst [vmem:[#allocation191_spill] sm:$0xff] %v11406_v2  ;;  %v11408_v19 = vld [vmem:[#allocation2 + $0x95] sm:$0xff]  ;;  %13283 = vst [vmem:[#allocation194_spill] sm:$0xff] %v11412_v63  ;;  %v11414_v28 = vld [vmem:[#allocation2 + $0xa2] sm:$0xff] }
 0x302   : > { %13281 = vst [vmem:[#allocation192_spill] sm:$0xff] %v11408_v19  ;;  %v11410_v7 = vld [vmem:[#allocation2 + $0x96] sm:$0xff]  ;;  %13284 = vst [vmem:[#allocation195_spill] sm:$0xff] %v11414_v28  ;;  %v11416_v50 = vld [vmem:[#allocation2 + $0xa3] sm:$0xff] }
 0x303   : > { %13282 = vst [vmem:[#allocation193_spill] sm:$0xff] %v11410_v7  ;;  %13285 = vst [vmem:[#allocation196_spill] sm:$0xff] %v11416_v50  ;;  %v11418_v15 = vld [vmem:[#allocation2 + $0xa4] sm:$0xff]  ;;  %v11426_v0 = vld [vmem:[#allocation2 + $0xb3] sm:$0xff] }
 0x304   : > { %13286 = vst [vmem:[#allocation197_spill] sm:$0xff] %v11418_v15  ;;  %v11420_v4 = vld [vmem:[#allocation2 + $0xa5] sm:$0xff]  ;;  %13290 = vst [vmem:[#allocation201_spill] sm:$0xff] %v11426_v0  ;;  %v11428_v53 = vld [vmem:[#allocation2 + $0xb4] sm:$0xff] }
 0x305   : > { %13287 = vst [vmem:[#allocation198_spill] sm:$0xff] %v11420_v4  ;;  %v11422_v48 = vld [vmem:[#allocation2 + $0xa6] sm:$0xff]  ;;  %13291 = vst [vmem:[#allocation202_spill] sm:$0xff] %v11428_v53  ;;  %v11430_v20 = vld [vmem:[#allocation2 + $0xb5] sm:$0xff] }
 0x306   : > { %13288 = vst [vmem:[#allocation199_spill] sm:$0xff] %v11422_v48  ;;  %13292 = vst [vmem:[#allocation203_spill] sm:$0xff] %v11430_v20  ;;  %v11432_v31 = vld [vmem:[#allocation2 + $0xb6] sm:$0xff]  ;;  %v11436_v28 = vld [vmem:[#allocation2 + $0x89] sm:$0xff] }
 0x307   : > { %13293 = vst [vmem:[#allocation204_spill] sm:$0xff] %v11432_v31  ;;  %v11434_v63 = vld [vmem:[#allocation2 + $0xb2] sm:$0xff]  ;;  %13295 = vst [vmem:[#allocation206_spill] sm:$0xff] %v11436_v28  ;;  %v11440_v15 = vld [vmem:[#allocation2 + $0xa9] sm:$0xff] }
 0x308   : > { %13294 = vst [vmem:[#allocation205_spill] sm:$0xff] %v11434_v63  ;;  %v11438_v50 = vld [vmem:[#allocation2 + $0x99] sm:$0xff]  ;;  %13297 = vst [vmem:[#allocation208_spill] sm:$0xff] %v11440_v15  ;;  %v11442_v4 = vld [vmem:[#allocation2 + $0x8a] sm:$0xff] }
 0x309   : > { %13296 = vst [vmem:[#allocation207_spill] sm:$0xff] %v11438_v50  ;;  %13298 = vst [vmem:[#allocation209_spill] sm:$0xff] %v11442_v4  ;;  %v11444_v48 = vld [vmem:[#allocation2 + $0x9a] sm:$0xff]  ;;  %v11448_v0 = vld [vmem:[#allocation2 + $0x8b] sm:$0xff] }
 0x30a   : > { %13299 = vst [vmem:[#allocation210_spill] sm:$0xff] %v11444_v48  ;;  %13301 = vst [vmem:[#allocation212_spill] sm:$0xff] %v11448_v0  ;;  %v11450_v53 = vld [vmem:[#allocation2 + $0x9b] sm:$0xff]  ;;  %v11452_v20 = vld [vmem:[#allocation2 + $0xab] sm:$0xff] }
 0x30b   : > { %13302 = vst [vmem:[#allocation213_spill] sm:$0xff] %v11450_v53  ;;  %13303 = vst [vmem:[#allocation214_spill] sm:$0xff] %v11452_v20  ;;  %v11454_v31 = vld [vmem:[#allocation2 + $0x8c] sm:$0xff]  ;;  %v11456_v63 = vld [vmem:[#allocation2 + $0x9c] sm:$0xff] }
 0x30c   : > { %13304 = vst [vmem:[#allocation215_spill] sm:$0xff] %v11454_v31  ;;  %13305 = vst [vmem:[#allocation216_spill] sm:$0xff] %v11456_v63  ;;  %v11458_v28 = vld [vmem:[#allocation2 + $0xac] sm:$0xff]  ;;  %v11460_v50 = vld [vmem:[#allocation2 + $0x5d] sm:$0xff] }
 0x30d   : > { %13306 = vst [vmem:[#allocation217_spill] sm:$0xff] %v11458_v28  ;;  %13307 = vst [vmem:[#allocation218_spill] sm:$0xff] %v11460_v50  ;;  %v11462_v15 = vld [vmem:[#allocation2 + $0x6d] sm:$0xff]  ;;  %v11464_v4 = vld [vmem:[#allocation2 + $0x7d] sm:$0xff] }
 0x30e   : > { %13308 = vst [vmem:[#allocation219_spill] sm:$0xff] %v11462_v15  ;;  %13309 = vst [vmem:[#allocation220_spill] sm:$0xff] %v11464_v4  ;;  %v13310_v48 = vld [vmem:[#allocation35_spill] sm:$0xff]  ;;  %v13311_v0 = vld [vmem:[#allocation132_spill] sm:$0xff] }
 0x30f   : > { %v3642_v3 = vmul.f32 %v10972_v42, %v13310_v48  ;;  %v3719_v53 = vmul.f32 %v11078_v25, %v13310_v48  ;;  %v3832_v20 = vmul.f32 %v11109_v36, %v13311_v0  ;;  %v13312_v31 = vld [vmem:[#allocation49_spill] sm:$0xff]  ;;  %v11480_v15 = vld [vmem:[#allocation2 + $0xb9] sm:$0xff]  ;;  %v11486_v19 = vld [vmem:[#allocation2 + $0xd1] sm:$0xff]  ;;  %13322 = vst [vmem:[#allocation227_spill] sm:$0xff] %v11494_v44 }
 0x310   : > { %v11474_v63 = vmul.f32 %v11114_v29, %v13312_v31  ;;  %v11476_v28 = vld [vmem:[#allocation2 + $0xc5] sm:$0xff]  ;;  %13315 = vst [vmem:[#allocation49_spill] sm:$0xff] %v11480_v15  ;;  %13318 = vst [vmem:[#allocation223_spill] sm:$0xff] %v11486_v19  ;;  %v11488_v48 = vld [vmem:[#allocation2 + $0xd9] sm:$0xff] }
 0x311   : > { %13313 = vst [vmem:[#allocation35_spill] sm:$0xff] %v11476_v28  ;;  %v11478_v50 = vld [vmem:[#allocation2 + $0xc6] sm:$0xff]  ;;  %13319 = vst [vmem:[#allocation224_spill] sm:$0xff] %v11488_v48  ;;  %v11490_v2 = vld [vmem:[#allocation2 + $0xba] sm:$0xff] }
 0x312   : > { %13314 = vst [vmem:[#allocation132_spill] sm:$0xff] %v11478_v50  ;;  %v11482_v4 = vld [vmem:[#allocation2 + $0xc1] sm:$0xff]  ;;  %v11484_v7 = vld [vmem:[#allocation2 + $0xc9] sm:$0xff]  ;;  %13320 = vst [vmem:[#allocation225_spill] sm:$0xff] %v11490_v2 }
 0x313   : > { %13316 = vst [vmem:[#allocation221_spill] sm:$0xff] %v11482_v4  ;;  %13317 = vst [vmem:[#allocation222_spill] sm:$0xff] %v11484_v7  ;;  %v11492_v0 = vld [vmem:[#allocation2 + $0xc2] sm:$0xff]  ;;  %v11496_v45 = vld [vmem:[#allocation2 + $0xd2] sm:$0xff] }
 0x314   : > { %13321 = vst [vmem:[#allocation226_spill] sm:$0xff] %v11492_v0  ;;  %13323 = vst [vmem:[#allocation228_spill] sm:$0xff] %v11496_v45  ;;  %v11498_v28 = vld [vmem:[#allocation2 + $0xda] sm:$0xff]  ;;  %v11500_v50 = vld [vmem:[#allocation2 + $0xc3] sm:$0xff] }
 0x315   : > { %13324 = vst [vmem:[#allocation229_spill] sm:$0xff] %v11498_v28  ;;  %13325 = vst [vmem:[#allocation230_spill] sm:$0xff] %v11500_v50  ;;  %v11502_v15 = vld [vmem:[#allocation2 + $0xcb] sm:$0xff]  ;;  %v11504_v4 = vld [vmem:[#allocation2 + $0xd3] sm:$0xff] }
 0x316   : > { %13326 = vst [vmem:[#allocation231_spill] sm:$0xff] %v11502_v15  ;;  %13327 = vst [vmem:[#allocation232_spill] sm:$0xff] %v11504_v4  ;;  %v11506_v7 = vld [vmem:[#allocation2 + $0xdb] sm:$0xff]  ;;  %v11508_v19 = vld [vmem:[#allocation2 + $0xc4] sm:$0xff] }
 0x317   : > { %13328 = vst [vmem:[#allocation233_spill] sm:$0xff] %v11506_v7  ;;  %13329 = vst [vmem:[#allocation234_spill] sm:$0xff] %v11508_v19  ;;  %v11510_v48 = vld [vmem:[#allocation2 + $0xcc] sm:$0xff]  ;;  %v11512_v2 = vld [vmem:[#allocation2 + $0xd4] sm:$0xff] }
 0x318   : > { %13330 = vst [vmem:[#allocation235_spill] sm:$0xff] %v11510_v48  ;;  %13331 = vst [vmem:[#allocation236_spill] sm:$0xff] %v11512_v2  ;;  %v11514_v0 = vld [vmem:[#allocation2 + $0xdc] sm:$0xff]  ;;  %v11522_v50 = vld [vmem:[#allocation2 + $0x68] sm:$0xff] }
 0x319   : > { %v11516_v44 = vld [vmem:[#allocation2 + $0xd5] sm:$0xff]  ;;  %13335 = vst [vmem:[#allocation240_spill] sm:$0xff] %v11522_v50  ;;  %v11530_v19 = vld [vmem:[#allocation2 + $0x8d] sm:$0xff]  ;;  %v11532_v48 = vld [vmem:[#allocation2 + $0x9d] sm:$0xff]  ;;  %v3565_v50 = vadd.f32 %v11398_v54, %v11278_v32 }
 0x31a   : > { %13332 = vst [vmem:[#allocation237_spill] sm:$0xff] %v11516_v44  ;;  %v11518_v45 = vld [vmem:[#allocation2 + $0xd6] sm:$0xff]  ;;  %13339 = vst [vmem:[#allocation244_spill] sm:$0xff] %v11530_v19  ;;  %v11534_v2 = vld [vmem:[#allocation2 + $0xad] sm:$0xff]  ;;  %v3980_v44 = vadd.f32 %v11306_v61, %v11387_v38 }
 0x31b   : > { %13333 = vst [vmem:[#allocation238_spill] sm:$0xff] %v11518_v45  ;;  %v11520_v28 = vld [vmem:[#allocation2 + $0x58] sm:$0xff]  ;;  %13340 = vst [vmem:[#allocation245_spill] sm:$0xff] %v11532_v48  ;;  %v11548_v19 = vld [vmem:[#allocation2 + $0xa8] sm:$0xff] }
 0x31c   : > { %13334 = vst [vmem:[#allocation239_spill] sm:$0xff] %v11520_v28  ;;  %v11524_v15 = vld [vmem:[#allocation2 + $0x78] sm:$0xff]  ;;  %13341 = vst [vmem:[#allocation246_spill] sm:$0xff] %v11534_v2  ;;  %v4170_v28 = vadd.f32 %v11312_v43, %v11390_v35  ;;  %v11552_v2 = vld [vmem:[#allocation2 + $0xcd] sm:$0xff]  ;;  %v3755_v35 = vadd.f32 %v3719_v53, %v11257_v23 }
 0x31d   : > { %13336 = vst [vmem:[#allocation241_spill] sm:$0xff] %v11524_v15  ;;  %v11526_v4 = vld [vmem:[#allocation2 + $0xbb] sm:$0xff]  ;;  %v11544_v15 = vld [vmem:[#allocation2 + $0x88] sm:$0xff]  ;;  %13344 = vst [vmem:[#allocation249_spill] sm:$0xff] %v11548_v19 }
 0x31e   : > { %13337 = vst [vmem:[#allocation242_spill] sm:$0xff] %v11526_v4  ;;  %v11528_v7 = vld [vmem:[#allocation2 + $0xbc] sm:$0xff]  ;;  %v4022_v4 = vmul.f32 %v11202_v49, %v13312_v31  ;;  %13342 = vst [vmem:[#allocation247_spill] sm:$0xff] %v11544_v15  ;;  %v13348_v43 = vld [vmem:[#allocation133_spill] sm:$0xff] }
 0x31f   : > { %13338 = vst [vmem:[#allocation243_spill] sm:$0xff] %v11528_v7  ;;  %v11546_v7 = vld [vmem:[#allocation2 + $0x98] sm:$0xff]  ;;  %13346 = vst [vmem:[#allocation251_spill] sm:$0xff] %v11552_v2  ;;  %v4135_v54 = vmul.f32 %v11222_v27, %v13348_v43  ;;  %v13349_v32 = vld [vmem:[#allocation134_spill] sm:$0xff]  ;;  %v4283_v2 = vadd.f32 %v11325_v26, %v4170_v28 }
 0x320   : > { %13343 = vst [vmem:[#allocation248_spill] sm:$0xff] %v11546_v7  ;;  %v11550_v48 = vld [vmem:[#allocation2 + $0xbd] sm:$0xff]  ;;  %v4248_v31 = vmul.f32 %v11227_v21, %v13349_v32  ;;  %v13350_v38 = vld [vmem:[#allocation54_spill] sm:$0xff]  ;;  %v4058_v53 = vadd.f32 %v4022_v4, %v11288_v56  ;;  %v13362_v26 = vld [vmem:[#allocation145_spill] sm:$0xff]  ;;  %v3868_v56 = vadd.f32 %v3832_v20, %v3755_v35 }
 0x321   : > { %13345 = vst [vmem:[#allocation250_spill] sm:$0xff] %v11550_v48  ;;  %v11554_v61 = vld [vmem:[#allocation2 + $0xdd] sm:$0xff]  ;;  %v3454_v15 = vmul.f32 %v10955_v60, %v13350_v38  ;;  %v11565_v19 = vld [vmem:[#allocation2 + $0x6e] sm:$0xff] }
 0x322   : > { %13347 = vst [vmem:[#allocation252_spill] sm:$0xff] %v11554_v61  ;;  %v11563_v7 = vld [vmem:[#allocation2 + $0x5e] sm:$0xff]  ;;  %13352 = vst [vmem:[#allocation134_spill] sm:$0xff] %v11565_v19  ;;  %v3678_v61 = vadd.f32 %v3642_v3, %v3565_v50  ;;  %v11575_v45 = vld [vmem:[#allocation2 + $0x8e] sm:$0xff] }
 0x323   : > { %13351 = vst [vmem:[#allocation133_spill] sm:$0xff] %v11563_v7  ;;  %v11567_v48 = vld [vmem:[#allocation2 + $0x7e] sm:$0xff]  ;;  %13356 = vst [vmem:[#allocation253_spill] sm:$0xff] %v11575_v45  ;;  %v11579_v38 = vld [vmem:[#allocation2 + $0xae] sm:$0xff] }
 0x324   : > { %13353 = vst [vmem:[#allocation54_spill] sm:$0xff] %v11567_v48  ;;  %v13354_v23 = vld [vmem:[#allocation136_spill] sm:$0xff]  ;;  %13358 = vst [vmem:[#allocation255_spill] sm:$0xff] %v11579_v38  ;;  %v13359_v7 = vld [vmem:[#allocation27_spill] sm:$0xff] }
 0x325   : > { %v11573_v43 = vmul.f32 %v10960_v52, %v13354_v23  ;;  %v11577_v32 = vld [vmem:[#allocation2 + $0x9e] sm:$0xff]  ;;  %4733 = vst [vmem:[#allocation2 + $0x58] sm:$0xff] %v13359_v7  ;;  %v13360_v19 = vld [vmem:[#allocation29_spill] sm:$0xff]  ;;  %v13361_v48 = vld [vmem:[#allocation30_spill] sm:$0xff] }
 0x326   : > { %13357 = vst [vmem:[#allocation254_spill] sm:$0xff] %v11577_v32  ;;  %4734 = vst [vmem:[#allocation2 + $0x60] sm:$0xff] %v13360_v19  ;;  %v13363_v3 = vld [vmem:[#allocation95_spill] sm:$0xff]  ;;  %v13364_v4 = vld [vmem:[#allocation101_spill] sm:$0xff] }
 0x327   : > { %13355 = vst [vmem:[#allocation136_spill] sm:$0xff] %v11573_v43  ;;  %4735 = vst [vmem:[#allocation2 + $0x68] sm:$0xff] %v13361_v48  ;;  %v13365_v28 = vld [vmem:[#allocation137_spill] sm:$0xff]  ;;  %v13367_v23 = vld [vmem:[#allocation138_spill] sm:$0xff] }
 0x328   : > { %4736 = vst [vmem:[#allocation2 + $0x70] sm:$0xff] %v13362_v26  ;;  %4737 = vst [vmem:[#allocation2 + $0x78] sm:$0xff] %v13363_v3  ;;  %v11589_v50 = vmul.f32 %v11078_v25, %v13365_v28  ;;  %v11593_v38 = vmul.f32 %v11109_v36, %v13367_v23  ;;  %v13369_v7 = vld [vmem:[#allocation97_spill] sm:$0xff]  ;;  %v11597_v45 = vld [vmem:[#allocation2 + $0xbe] sm:$0xff] }
 0x329   : > { %4738 = vst [vmem:[#allocation2 + $0x80] sm:$0xff] %v13364_v4  ;;  %v4023_v32 = vmul.f32 %v11202_v49, %v13369_v7  ;;  %13370 = vst [vmem:[#allocation95_spill] sm:$0xff] %v11597_v45  ;;  %v11599_v48 = vld [vmem:[#allocation2 + $0xce] sm:$0xff]  ;;  %v11601_v43 = vld [vmem:[#allocation2 + $0xde] sm:$0xff]  ;;  %v4171_v45 = vadd.f32 %v4135_v54, %v4058_v53 }
 0x32a   : > { %13366 = vst [vmem:[#allocation27_spill] sm:$0xff] %v11589_v50  ;;  %13368 = vst [vmem:[#allocation30_spill] sm:$0xff] %v11593_v38  ;;  %v13373_v3 = vld [vmem:[#allocation102_spill] sm:$0xff]  ;;  %v13375_v35 = vld [vmem:[#allocation104_spill] sm:$0xff] }
 0x32b   : > { %13371 = vst [vmem:[#allocation138_spill] sm:$0xff] %v11599_v48  ;;  %13372 = vst [vmem:[#allocation256_spill] sm:$0xff] %v11601_v43  ;;  %v13374_v20 = vld [vmem:[#allocation58_spill] sm:$0xff]  ;;  %v13376_v50 = vld [vmem:[#allocation59_spill] sm:$0xff]  ;;  %v4059_v54 = vadd.f32 %v4023_v32, %v3980_v44 }
 0x32c   : > { %4739 = vst [vmem:[#allocation2 + $0x88] sm:$0xff] %v13373_v3  ;;  %4740 = vst [vmem:[#allocation2 + $0x90] sm:$0xff] %v13374_v20  ;;  %v13377_v28 = vld [vmem:[#allocation7_spill] sm:$0xff]  ;;  %v13378_v23 = vld [vmem:[#allocation108_spill] sm:$0xff] }
 0x32d   : > { %4741 = vst [vmem:[#allocation2 + $0x98] sm:$0xff] %v13375_v35  ;;  %4742 = vst [vmem:[#allocation2 + $0xa0] sm:$0xff] %v13376_v50  ;;  %v13379_v7 = vld [vmem:[#allocation21_spill] sm:$0xff]  ;;  %v13380_v4 = vld [vmem:[#allocation139_spill] sm:$0xff] }
 0x32e   : > { %4743 = vst [vmem:[#allocation2 + $0xa8] sm:$0xff] %v13377_v28  ;;  %4744 = vst [vmem:[#allocation2 + $0xb0] sm:$0xff] %v13378_v23  ;;  %v4355_v38 = vadd.f32 %v4283_v2, %v13379_v7  ;;  %v4136_v48 = vmul.f32 %v11222_v27, %v13380_v4  ;;  %v13381_v43 = vld [vmem:[#allocation140_spill] sm:$0xff]  ;;  %v13383_v20 = vld [vmem:[#allocation6_spill] sm:$0xff]  ;;  %v3981_v2 = vadd.f32 %v11474_v63, %v3868_v56 }
 0x32f   : > { %v11614_v3 = vmul.f32 %v11227_v21, %v13381_v43  ;;  %4745 = vst [vmem:[#allocation2 + $0xb8] sm:$0xff] %v13383_v20  ;;  %v13384_v35 = vld [vmem:[#allocation61_spill] sm:$0xff]  ;;  %v13385_v50 = vld [vmem:[#allocation34_spill] sm:$0xff]  ;;  %4748 = vst [vmem:[#allocation2 + $0xd0] sm:$0xff] %v10663_v12  ;;  %v4284_v7 = vadd.f32 %v4248_v31, %v4171_v45 }
 0x330   : > { %4746 = vst [vmem:[#allocation2 + $0xc0] sm:$0xff] %v13384_v35  ;;  %4747 = vst [vmem:[#allocation2 + $0xc8] sm:$0xff] %v13385_v50  ;;  %v13386_v53 = vld [vmem:[#allocation43_spill] sm:$0xff]  ;;  %v13387_v43 = vld [vmem:[#allocation141_spill] sm:$0xff]  ;;  %v11634_v12 = vadd.f32 %v4136_v48, %v4059_v54  ;;  %v3646_v54 = vmul.f32 %v10972_v42, %v11268_v37 }
 0x331   : > { %13382 = vst [vmem:[#allocation102_spill] sm:$0xff] %v11614_v3  ;;  %4749 = vst [vmem:[#allocation2 + $0xd8] sm:$0xff] %v10684_v9  ;;  %v3531_v4 = vmul.f32 %v10960_v52, %v13386_v53  ;;  %v3644_v28 = vmul.f32 %v10972_v42, %v13387_v43  ;;  %v3721_v50 = vmul.f32 %v11078_v25, %v13387_v43  ;;  %v13388_v20 = vld [vmem:[#allocation142_spill] sm:$0xff]  ;;  %v13391_v32 = vld [vmem:[#allocation143_spill] sm:$0xff] }
 0x332   : > { %4750 = vst [vmem:[#allocation2 + $0xe0] sm:$0xff] %v10699_v16  ;;  %4391 = vst [vmem:[%s7646_s25 + $0x8] sm:$0xff] %v4355_v38  ;;  %v3834_v3 = vmul.f32 %v11109_v36, %v13388_v20  ;;  %v13389_v9 = vld [vmem:[#allocation98_spill] sm:$0xff]  ;;  %v4137_v56 = vmul.f32 %v11222_v27, %v13391_v32  ;;  %v11641_v45 = vadd.f32 %v4284_v7, %v11153_v34  ;;  %v13393_v38 = vld [vmem:[#allocation144_spill] sm:$0xff] }
 0x333   : > { %v3947_v16 = vmul.f32 %v11114_v29, %v13389_v9  ;;  %13390 = vst [vmem:[#allocation104_spill] sm:$0xff] %v11634_v12  ;;  %v3567_v44 = vadd.f32 %v3531_v4, %v3454_v15  ;;  %v4024_v63 = vmul.f32 %v11202_v49, %v13389_v9  ;;  %v3757_v31 = vadd.f32 %v3721_v50, %v3678_v61  ;;  %v13394_v43 = vld [vmem:[#allocation135_spill] sm:$0xff] }
 0x334   : > { %13392 = vst [vmem:[#allocation7_spill] sm:$0xff] %v11641_v45  ;;  %v4250_v53 = vmul.f32 %v11227_v21, %v13393_v38  ;;  %v3456_v20 = vmul.f32 %v10955_v60, %v13394_v43  ;;  %v3533_v15 = vmul.f32 %v10960_v52, %v11266_v5  ;;  %v3723_v34 = vmul.f32 %v11078_v25, %v11268_v37  ;;  %v13395_v37 = vld [vmem:[#allocation99_spill] sm:$0xff] }
 0x335   : > { %v3680_v35 = vadd.f32 %v3644_v28, %v3567_v44  ;;  %v4060_v48 = vadd.f32 %v4024_v63, %v3981_v2  ;;  %v3870_v4 = vadd.f32 %v3834_v3, %v3757_v31  ;;  %v3836_v61 = vmul.f32 %v11109_v36, %v11270_v57 }
 0x336   : > { %v3949_v7 = vmul.f32 %v11114_v29, %v11272_v11  ;;  %v3569_v9 = vadd.f32 %v3533_v15, %v3456_v20  ;;  %v4026_v2 = vmul.f32 %v11202_v49, %v11272_v11  ;;  %v4139_v5 = vmul.f32 %v11222_v27, %v11274_v33 }
 0x337   : > { %v4173_v50 = vadd.f32 %v4137_v56, %v4060_v48  ;;  %v3983_v28 = vadd.f32 %v3947_v16, %v3870_v4  ;;  %v3759_v44 = vadd.f32 %v3723_v34, %v3680_v35  ;;  %v4252_v3 = vmul.f32 %v11227_v21, %v11282_v13 }
 0x338   : > { %v3458_v63 = vmul.f32 %v10955_v60, %v13395_v37  ;;  %v3682_v32 = vadd.f32 %v3646_v54, %v3569_v9  ;;  %v3535_v56 = vmul.f32 %v10960_v52, %v11327_v58  ;;  %v3648_v31 = vmul.f32 %v10972_v42, %v11329_v41  ;;  %v13397_v54 = vld [vmem:[#allocation56_spill] sm:$0xff] }
 0x339   : > { %v4286_v57 = vadd.f32 %v4250_v53, %v4173_v50  ;;  %v3872_v11 = vadd.f32 %v3836_v61, %v3759_v44  ;;  %v4062_v38 = vadd.f32 %v4026_v2, %v3983_v28  ;;  %v3725_v16 = vmul.f32 %v11078_v25, %v11329_v41  ;;  %v13398_v2 = vld [vmem:[#allocation67_spill] sm:$0xff] }
 0x33a   : > { %v3838_v33 = vmul.f32 %v11109_v36, %v11331_v8  ;;  %v3571_v35 = vadd.f32 %v3535_v56, %v3458_v63  ;;  %v3951_v53 = vmul.f32 %v11114_v29, %v11333_v39  ;;  %v4028_v58 = vmul.f32 %v11202_v49, %v11333_v39 }
 0x33b   : > { %v11674_v13 = vadd.f32 %v4286_v57, %v11163_v46  ;;  %v3985_v43 = vadd.f32 %v3949_v7, %v3872_v11  ;;  %v4175_v20 = vadd.f32 %v4139_v5, %v4062_v38  ;;  %v3761_v48 = vadd.f32 %v3725_v16, %v3682_v32  ;;  %v13399_v32 = vld [vmem:[#allocation57_spill] sm:$0xff] }
 0x33c   : > { %v4141_v15 = vmul.f32 %v11222_v27, %v11335_v24  ;;  %v3684_v41 = vadd.f32 %v3648_v31, %v3571_v35  ;;  %v4254_v8 = vmul.f32 %v11227_v21, %v11337_v62  ;;  %v3460_v46 = vmul.f32 %v10955_v60, %v13397_v54  ;;  %v13400_v38 = vld [vmem:[#allocation85_spill] sm:$0xff] }
 0x33d   : > { %13396 = vst [vmem:[#allocation21_spill] sm:$0xff] %v11674_v13  ;;  %v3537_v4 = vmul.f32 %v10960_v52, %v11339_v47  ;;  %v4288_v34 = vadd.f32 %v4252_v3, %v4175_v20  ;;  %v3874_v61 = vadd.f32 %v3838_v33, %v3761_v48  ;;  %v4064_v39 = vadd.f32 %v4028_v58, %v3985_v43 }
 0x33e   : > { %v3650_v7 = vmul.f32 %v10972_v42, %v11341_v14  ;;  %v3727_v24 = vmul.f32 %v11078_v25, %v11341_v14  ;;  %v3840_v62 = vmul.f32 %v11109_v36, %v11343_v55  ;;  %v3953_v9 = vmul.f32 %v11114_v29, %v11345_v22 }
 0x33f   : > { %v3573_v50 = vadd.f32 %v3537_v4, %v3460_v46  ;;  %v4360_v5 = vadd.f32 %v4288_v34, %v13398_v2  ;;  %v3987_v47 = vadd.f32 %v3951_v53, %v3874_v61  ;;  %v4177_v28 = vadd.f32 %v4141_v15, %v4064_v39  ;;  %v13401_v15 = vld [vmem:[#allocation47_spill] sm:$0xff]  ;;  %v13403_v34 = vld [vmem:[#allocation96_spill] sm:$0xff]  ;;  %v13404_v39 = vld [vmem:[#allocation190_spill] sm:$0xff] }
 0x340   : > { %v4030_v44 = vmul.f32 %v11202_v49, %v11345_v22  ;;  %v3763_v37 = vadd.f32 %v3727_v24, %v3684_v41  ;;  %v4143_v63 = vmul.f32 %v11222_v27, %v11347_v51  ;;  %v4256_v14 = vmul.f32 %v11227_v21, %v11349_v59  ;;  %v13402_v4 = vld [vmem:[#allocation55_spill] sm:$0xff] }
 0x341   : > { %v3686_v3 = vadd.f32 %v3650_v7, %v3573_v50  ;;  %4396 = vst [vmem:[%s7646_s25 + $0x30] sm:$0xff] %v4360_v5  ;;  %v4290_v55 = vadd.f32 %v4254_v8, %v4177_v28  ;;  %v3462_v56 = vmul.f32 %v10955_v60, %v13399_v32  ;;  %v3539_v31 = vmul.f32 %v10960_v52, %v11351_v17  ;;  %v13406_v5 = vld [vmem:[#allocation192_spill] sm:$0xff]  ;;  %v13407_v28 = vld [vmem:[#allocation193_spill] sm:$0xff] }
 0x342   : > { %v4066_v57 = vadd.f32 %v4030_v44, %v3987_v47  ;;  %v3876_v11 = vadd.f32 %v3840_v62, %v3763_v37  ;;  %v3652_v22 = vmul.f32 %v10972_v42, %v11353_v40  ;;  %v3729_v51 = vmul.f32 %v11078_v25, %v11353_v40 }
 0x343   : > { %v3842_v59 = vmul.f32 %v11109_v36, %v11355_v1  ;;  %v4362_v16 = vadd.f32 %v4290_v55, %v13400_v38  ;;  %v3575_v35 = vadd.f32 %v3539_v31, %v3462_v56  ;;  %v3955_v53 = vmul.f32 %v11114_v29, %v11357_v10  ;;  %v13410_v31 = vld [vmem:[#allocation195_spill] sm:$0xff]  ;;  %v13412_v38 = vld [vmem:[#allocation105_spill] sm:$0xff] }
 0x344   : > { %v4179_v33 = vadd.f32 %v4143_v63, %v4066_v57  ;;  %v3989_v58 = vadd.f32 %v3953_v9, %v3876_v11  ;;  %v3765_v43 = vadd.f32 %v3729_v51, %v3686_v3  ;;  %v4032_v17 = vmul.f32 %v11202_v49, %v11357_v10  ;;  %v13408_v3 = vld [vmem:[#allocation103_spill] sm:$0xff]  ;;  %v13409_v57 = vld [vmem:[#allocation194_spill] sm:$0xff]  ;;  %v13411_v51 = vld [vmem:[#allocation196_spill] sm:$0xff] }
 0x345   : > { %v4145_v20 = vmul.f32 %v11222_v27, %v11359_v6  ;;  %4398 = vst [vmem:[%s7646_s25 + $0x40] sm:$0xff] %v4362_v16  ;;  %v3688_v48 = vadd.f32 %v3652_v22, %v3575_v35  ;;  %v4258_v1 = vmul.f32 %v11227_v21, %v11361_v18  ;;  %v3464_v41 = vmul.f32 %v10955_v60, %v13401_v15  ;;  %v13405_v18 = vld [vmem:[#allocation191_spill] sm:$0xff]  ;;  %v13413_v35 = vld [vmem:[#allocation197_spill] sm:$0xff] }
 0x346   : > { %v4292_v40 = vadd.f32 %v4256_v14, %v4179_v33  ;;  %v3878_v8 = vadd.f32 %v3842_v59, %v3765_v43  ;;  %v4068_v54 = vadd.f32 %v4032_v17, %v3989_v58  ;;  %v3541_v46 = vmul.f32 %v10960_v52, %v11400_v30  ;;  %v13414_v17 = vld [vmem:[#allocation198_spill] sm:$0xff] }
 0x347   : > { %v3654_v10 = vmul.f32 %v10972_v42, %v13402_v4  ;;  %v3731_v61 = vmul.f32 %v11078_v25, %v13402_v4  ;;  %v3844_v7 = vmul.f32 %v11109_v36, %v13404_v39  ;;  %v3957_v50 = vmul.f32 %v11114_v29, %v13405_v18  ;;  %v13421_v39 = vld [vmem:[#allocation35_spill] sm:$0xff] }
 0x348   : > { %v4364_v6 = vadd.f32 %v4292_v40, %v13403_v34  ;;  %v3991_v24 = vadd.f32 %v3955_v53, %v3878_v8  ;;  %v4181_v62 = vadd.f32 %v4145_v20, %v4068_v54  ;;  %v3577_v9 = vadd.f32 %v3541_v46, %v3464_v41  ;;  %v13415_v40 = vld [vmem:[#allocation199_spill] sm:$0xff]  ;;  %v13417_v8 = vld [vmem:[#allocation202_spill] sm:$0xff] }
 0x349   : > { %v4034_v30 = vmul.f32 %v11202_v49, %v13405_v18  ;;  %v3767_v2 = vadd.f32 %v3731_v61, %v3688_v48  ;;  %v4147_v47 = vmul.f32 %v11222_v27, %v13406_v5  ;;  %v4260_v44 = vmul.f32 %v11227_v21, %v13407_v28  ;;  %v13418_v46 = vld [vmem:[#allocation203_spill] sm:$0xff]  ;;  %v13422_v18 = vld [vmem:[#allocation132_spill] sm:$0xff] }
 0x34a   : > { %4400 = vst [vmem:[%s7646_s25 + $0x50] sm:$0xff] %v4364_v6  ;;  %v3466_v37 = vmul.f32 %v10955_v60, %v13408_v3  ;;  %v4294_v63 = vadd.f32 %v4258_v1, %v4181_v62  ;;  %v3690_v14 = vadd.f32 %v3654_v10, %v3577_v9  ;;  %v3543_v32 = vmul.f32 %v10960_v52, %v13409_v57  ;;  %v13416_v1 = vld [vmem:[#allocation201_spill] sm:$0xff]  ;;  %v13419_v10 = vld [vmem:[#allocation68_spill] sm:$0xff]  ;;  %v13424_v62 = vld [vmem:[#allocation114_spill] sm:$0xff] }
 0x34b   : > { %v4070_v55 = vadd.f32 %v4034_v30, %v3991_v24  ;;  %v3880_v56 = vadd.f32 %v3844_v7, %v3767_v2  ;;  %v3656_v11 = vmul.f32 %v10972_v42, %v13410_v31  ;;  %v3733_v22 = vmul.f32 %v11078_v25, %v13410_v31  ;;  %v13420_v6 = vld [vmem:[#allocation204_spill] sm:$0xff]  ;;  %v13425_v30 = vld [vmem:[#allocation73_spill] sm:$0xff]  ;;  %v13428_v3 = vld [vmem:[#allocation110_spill] sm:$0xff] }
 0x34c   : > { %v3846_v59 = vmul.f32 %v11109_v36, %v13411_v51  ;;  %v4366_v16 = vadd.f32 %v4294_v63, %v13412_v38  ;;  %v3579_v33 = vadd.f32 %v3543_v32, %v3466_v37  ;;  %v3959_v53 = vmul.f32 %v11114_v29, %v13413_v35  ;;  %v13426_v5 = vld [vmem:[#allocation24_spill] sm:$0xff]  ;;  %v13429_v63 = vld [vmem:[#allocation77_spill] sm:$0xff] }
 0x34d   : > { %v4183_v60 = vadd.f32 %v4147_v47, %v4070_v55  ;;  %v3993_v58 = vadd.f32 %v3957_v50, %v3880_v56  ;;  %v3769_v43 = vadd.f32 %v3733_v22, %v3690_v14  ;;  %v4036_v52 = vmul.f32 %v11202_v49, %v13413_v35  ;;  %v13427_v28 = vld [vmem:[#allocation76_spill] sm:$0xff]  ;;  %v7051_v32 = vld [vmem:[%s12397_s1 + $0xd] ss:$0 sm:$0xff] }
 0x34e   : > { %v4149_v42 = vmul.f32 %v11222_v27, %v13414_v17  ;;  %4402 = vst [vmem:[%s7646_s25 + $0x60] sm:$0xff] %v4366_v16  ;;  %v11762_v20 = vadd.f32 %v3656_v11, %v3579_v33  ;;  %v4262_v48 = vmul.f32 %v11227_v21, %v13415_v40  ;;  %v11768_v15 = vmul.f32 %v11109_v36, %v13416_v1  ;;  %v13430_v31 = vld [vmem:[#allocation5_spill] sm:$0xff]  ;;  %v13433_v35 = vld [vmem:[#allocation12_spill] sm:$0xff]  ;;  %v7054_v1 = vld [vmem:[%s12397_s1 + $0x19] ss:$0 sm:$0xff] }
 0x34f   : > { %v4296_v25 = vadd.f32 %v4260_v44, %v4183_v60  ;;  %v3882_v29 = vadd.f32 %v3846_v59, %v3769_v43  ;;  %v4072_v41 = vadd.f32 %v4036_v52, %v3993_v58  ;;  %v4038_v54 = vmul.f32 %v11202_v49, %v13417_v8  ;;  %v7048_v49 = vld [vmem:[%s12397_s1 + $0x1] ss:$0 sm:$0xff]  ;;  %v7050_v44 = vld [vmem:[%s12397_s1 + $0x9] ss:$0 sm:$0xff]  ;;  %v7052_v59 = vld [vmem:[%s12397_s1 + $0x11] ss:$0 sm:$0xff] }
 0x350   : > { %v4151_v4 = vmul.f32 %v11222_v27, %v13418_v46  ;;  %v4264_v61 = vmul.f32 %v11227_v21, %v13420_v6  ;;  %v11779_v7 = vmul.f32 %v11222_v27, %v13421_v39  ;;  %v11783_v36 = vmul.f32 %v11227_v21, %v13422_v18  ;;  %v7049_v27 = vld [vmem:[%s12397_s1 + $0x5] ss:$0 sm:$0xff]  ;;  %v13431_v38 = vld [vmem:[#allocation17_spill] sm:$0xff]  ;;  %v7053_v43 = vld [vmem:[%s12397_s1 + $0x15] ss:$0 sm:$0xff] }
 0x351   : > { %v4368_v34 = vadd.f32 %v4296_v25, %v13419_v10  ;;  %v3995_v50 = vadd.f32 %v3959_v53, %v3882_v29  ;;  %v4185_v24 = vadd.f32 %v4149_v42, %v4072_v41  ;;  %v2119_v9 = vmul.f32 %v7048_v49, %v13424_v62  ;;  %v13432_v60 = vld [vmem:[#allocation32_spill] sm:$0xff]  ;;  %v13435_v42 = vld [vmem:[#allocation11_spill] sm:$0xff] }
 0x352   : > { %13423 = vst [vmem:[#allocation139_spill] sm:$0xff] %v11783_v36  ;;  %v2121_v2 = vmul.f32 %v7048_v49, %v13425_v30  ;;  %v2196_v47 = vmul.f32 %v7049_v27, %v13426_v5  ;;  %v2198_v21 = vmul.f32 %v7049_v27, %v13427_v28  ;;  %v2309_v37 = vmul.f32 %v7050_v44, %v13428_v3  ;;  %v13434_v52 = vld [vmem:[#allocation112_spill] sm:$0xff]  ;;  %v13437_v10 = vld [vmem:[#allocation79_spill] sm:$0xff]  ;;  %v13442_v5 = vld [vmem:[#allocation69_spill] sm:$0xff] }
 0x353   : > { %4404 = vst [vmem:[%s7646_s25 + $0x70] sm:$0xff] %v4368_v34  ;;  %v2311_v14 = vmul.f32 %v7050_v44, %v13429_v63  ;;  %v4298_v55 = vadd.f32 %v4262_v48, %v4185_v24  ;;  %v4074_v57 = vadd.f32 %v4038_v54, %v3995_v50  ;;  %v2388_v56 = vmul.f32 %v7051_v32, %v13429_v63  ;;  %v13436_v41 = vld [vmem:[#allocation80_spill] sm:$0xff]  ;;  %v13438_v39 = vld [vmem:[#allocation39_spill] sm:$0xff]  ;;  %v13439_v24 = vld [vmem:[#allocation26_spill] sm:$0xff] }
 0x354   : > { %v2390_v11 = vmul.f32 %v7051_v32, %v13430_v31  ;;  %v2232_v22 = vadd.f32 %v2196_v47, %v2119_v9  ;;  %v2234_v51 = vadd.f32 %v2198_v21, %v2121_v2  ;;  %v2501_v16 = vmul.f32 %v7052_v59, %v13431_v38  ;;  %v7056_v6 = vld [vmem:[%s12397_s1 + $0x21] ss:$0 sm:$0xff]  ;;  %v7057_v50 = vld [vmem:[%s12397_s1 + $0x2] ss:$0 sm:$0xff]  ;;  %v13441_v2 = vld [vmem:[#allocation106_spill] sm:$0xff] }
 0x355   : > { %v2503_v33 = vmul.f32 %v7052_v59, %v13432_v60  ;;  %v4370_v53 = vadd.f32 %v4298_v55, %v13433_v35  ;;  %v4187_v58 = vadd.f32 %v4151_v4, %v4074_v57  ;;  %v2614_v17 = vmul.f32 %v7053_v43, %v13434_v52  ;;  %v7055_v4 = vld [vmem:[%s12397_s1 + $0x1d] ss:$0 sm:$0xff]  ;;  %v13440_v9 = vld [vmem:[#allocation60_spill] sm:$0xff]  ;;  %v13443_v28 = vld [vmem:[#allocation146_spill] sm:$0xff] }
 0x356   : > { %v2616_v25 = vmul.f32 %v7053_v43, %v13435_v42  ;;  %v2345_v40 = vadd.f32 %v2309_v37, %v2232_v22  ;;  %v2347_v48 = vadd.f32 %v2311_v14, %v2234_v51  ;;  %v2693_v29 = vmul.f32 %v7054_v1, %v13435_v42  ;;  %v13444_v44 = vld [vmem:[#allocation33_spill] sm:$0xff]  ;;  %v13445_v37 = vld [vmem:[#allocation62_spill] sm:$0xff]  ;;  %v13447_v31 = vld [vmem:[#allocation147_spill] sm:$0xff] }
 0x357   : > { %v2695_v54 = vmul.f32 %v7054_v1, %v13436_v41  ;;  %4406 = vst [vmem:[%s7646_s25 + $0x80] sm:$0xff] %v4370_v53  ;;  %v4300_v46 = vadd.f32 %v4264_v61, %v4187_v58  ;;  %v2808_v34 = vmul.f32 %v7055_v4, %v13437_v10  ;;  %v2921_v18 = vmul.f32 %v7056_v6, %v13438_v39  ;;  %v13446_v57 = vld [vmem:[#allocation13_spill] sm:$0xff]  ;;  %v13449_v51 = vld [vmem:[#allocation66_spill] sm:$0xff]  ;;  %v13450_v38 = vld [vmem:[#allocation111_spill] sm:$0xff] }
 0x358   : > { %v3468_v49 = vmul.f32 %v7057_v50, %v13439_v24  ;;  %v2424_v61 = vadd.f32 %v2388_v56, %v2345_v40  ;;  %v2426_v62 = vadd.f32 %v2390_v11, %v2347_v48  ;;  %v3469_v30 = vmul.f32 %v7057_v50, %v13440_v9  ;;  %v13448_v56 = vld [vmem:[#allocation31_spill] sm:$0xff]  ;;  %v13451_v35 = vld [vmem:[#allocation113_spill] sm:$0xff]  ;;  %v13453_v40 = vld [vmem:[#allocation72_spill] sm:$0xff] }
 0x359   : > { %v3470_v27 = vmul.f32 %v7057_v50, %v13441_v2  ;;  %v4372_v47 = vadd.f32 %v4300_v46, %v13442_v5  ;;  %v3471_v21 = vmul.f32 %v7057_v50, %v13443_v28  ;;  %v3472_v3 = vmul.f32 %v7057_v50, %v13444_v44  ;;  %v13452_v52 = vld [vmem:[#allocation71_spill] sm:$0xff]  ;;  %v13454_v48 = vld [vmem:[#allocation200_spill] sm:$0xff]  ;;  %v13455_v41 = vld [vmem:[#allocation49_spill] sm:$0xff] }
 0x35a   : > { %v3473_v63 = vmul.f32 %v7057_v50, %v13445_v37  ;;  %v2537_v14 = vadd.f32 %v2501_v16, %v2424_v61  ;;  %v2539_v55 = vadd.f32 %v2503_v33, %v2426_v62  ;;  %v3474_v32 = vmul.f32 %v7057_v50, %v13446_v57  ;;  %v7058_v33 = vld [vmem:[%s12397_s1 + $0x6] ss:$0 sm:$0xff]  ;;  %v13456_v4 = vld [vmem:[#allocation221_spill] sm:$0xff]  ;;  %v13457_v6 = vld [vmem:[#allocation222_spill] sm:$0xff] }
 0x35b   : > { %v3475_v22 = vmul.f32 %v7057_v50, %v13447_v31  ;;  %4408 = vst [vmem:[%s7646_s25 + $0x90] sm:$0xff] %v4372_v47  ;;  %v3476_v11 = vmul.f32 %v7057_v50, %v13448_v56  ;;  %v3477_v59 = vmul.f32 %v7057_v50, %v13449_v51  ;;  %v3478_v60 = vmul.f32 %v7057_v50, %v13450_v38  ;;  %v13459_v62 = vld [vmem:[#allocation224_spill] sm:$0xff]  ;;  %v13461_v5 = vld [vmem:[#allocation18_spill] sm:$0xff]  ;;  %v13462_v28 = vld [vmem:[#allocation45_spill] sm:$0xff] }
 0x35c   : > { %v3479_v53 = vmul.f32 %v7057_v50, %v13451_v35  ;;  %v2650_v58 = vadd.f32 %v2614_v17, %v2537_v14  ;;  %v2652_v43 = vadd.f32 %v2616_v25, %v2539_v55  ;;  %v3480_v42 = vmul.f32 %v7057_v50, %v13452_v52  ;;  %v13458_v25 = vld [vmem:[#allocation223_spill] sm:$0xff]  ;;  %v13464_v55 = vld [vmem:[#allocation37_spill] sm:$0xff]  ;;  %v13465_v56 = vld [vmem:[#allocation130_spill] sm:$0xff] }
 0x35d   : > { %v3481_v16 = vmul.f32 %v7057_v50, %v13453_v40  ;;  %v3545_v1 = vmul.f32 %v7058_v33, %v13454_v48  ;;  %v3546_v46 = vmul.f32 %v7058_v33, %v13455_v41  ;;  %v3547_v10 = vmul.f32 %v7058_v33, %v13456_v4  ;;  %v13460_v50 = vld [vmem:[#allocation119_spill] sm:$0xff]  ;;  %v13467_v35 = vld [vmem:[#allocation152_spill] sm:$0xff]  ;;  %v13469_v41 = vld [vmem:[#allocation38_spill] sm:$0xff] }
 0x35e   : > { %v3548_v39 = vmul.f32 %v7058_v33, %v13457_v6  ;;  %v2729_v24 = vadd.f32 %v2693_v29, %v2650_v58  ;;  %v2731_v17 = vadd.f32 %v2695_v54, %v2652_v43  ;;  %v3549_v61 = vmul.f32 %v7058_v33, %v13458_v25  ;;  %v13463_v37 = vld [vmem:[#allocation83_spill] sm:$0xff]  ;;  %v13466_v29 = vld [vmem:[#allocation9_spill] sm:$0xff] }
 0x35f   : > { %v3550_v9 = vmul.f32 %v7058_v33, %v13459_v62  ;;  %v3551_v2 = vmul.f32 %v7058_v33, %v13460_v50  ;;  %v3552_v47 = vmul.f32 %v7058_v33, %v13461_v5  ;;  %v3553_v44 = vmul.f32 %v7058_v33, %v13462_v28  ;;  %v2993_v38 = vld [vmem:[%s7646_s25 + $0x118] sm:$0xff]  ;;  %v2991_v50 = vld [vmem:[%s7646_s25 + $0x108] sm:$0xff] }
 0x360   : > { %v3554_v14 = vmul.f32 %v7058_v33, %v13463_v37  ;;  %v2842_v57 = vadd.f32 %v13464_v55, %v2729_v24  ;;  %v2844_v31 = vadd.f32 %v2808_v34, %v2731_v17  ;;  %v3555_v51 = vmul.f32 %v7058_v33, %v13465_v56  ;;  %v13468_v43 = vld [vmem:[#allocation131_spill] sm:$0xff] }
 0x361   : > { %v3556_v54 = vmul.f32 %v7058_v33, %v13466_v29  ;;  %v3557_v58 = vmul.f32 %v7058_v33, %v13467_v35  ;;  %v3558_v52 = vmul.f32 %v7058_v33, %v13468_v43  ;;  %v3581_v40 = vadd.f32 %v3545_v1, %v3468_v49  ;;  %v13474_v1 = vld [vmem:[#allocation227_spill] sm:$0xff] }
 0x362   : > { %v3582_v48 = vadd.f32 %v3546_v46, %v3469_v30  ;;  %v2955_v4 = vadd.f32 %v13469_v41, %v2842_v57  ;;  %v2957_v6 = vadd.f32 %v2921_v18, %v2844_v31  ;;  %v3583_v25 = vadd.f32 %v3547_v10, %v3470_v27  ;;  %v7059_v18 = vld [vmem:[%s12397_s1 + $0xa] ss:$0 sm:$0xff]  ;;  %v13475_v10 = vld [vmem:[#allocation228_spill] sm:$0xff]  ;;  %v13482_v57 = vld [vmem:[#allocation154_spill] sm:$0xff] }
 0x363   : > { %v3584_v62 = vadd.f32 %v3548_v39, %v3471_v21  ;;  %v3585_v5 = vadd.f32 %v3549_v61, %v3472_v3  ;;  %v3586_v24 = vadd.f32 %v3550_v9, %v3473_v63  ;;  %v3587_v34 = vadd.f32 %v3551_v2, %v3474_v32  ;;  %v13471_v27 = vld [vmem:[#allocation205_spill] sm:$0xff]  ;;  %v13473_v32 = vld [vmem:[#allocation226_spill] sm:$0xff]  ;;  %v13479_v61 = vld [vmem:[#allocation75_spill] sm:$0xff] }
 0x364   : > { %v3588_v17 = vadd.f32 %v3552_v47, %v3475_v22  ;;  %v11871_v28 = vadd.f32 %v2991_v50, %v2955_v4  ;;  %v11873_v37 = vadd.f32 %v2993_v38, %v2957_v6  ;;  %v3589_v55 = vadd.f32 %v3553_v44, %v3476_v11  ;;  %v13472_v3 = vld [vmem:[#allocation225_spill] sm:$0xff]  ;;  %v13480_v2 = vld [vmem:[#allocation51_spill] sm:$0xff] }
 0x365   : > { %v3590_v56 = vadd.f32 %v3554_v14, %v3477_v59  ;;  %v3591_v29 = vadd.f32 %v3555_v51, %v3478_v60  ;;  %v3592_v33 = vadd.f32 %v3556_v54, %v3479_v53  ;;  %v3593_v49 = vadd.f32 %v3557_v58, %v3480_v42  ;;  %v13476_v11 = vld [vmem:[#allocation229_spill] sm:$0xff]  ;;  %v13477_v60 = vld [vmem:[#allocation44_spill] sm:$0xff]  ;;  %v13483_v51 = vld [vmem:[#allocation155_spill] sm:$0xff] }
 0x366   : > { %13470 = vst [vmem:[#allocation140_spill] sm:$0xff] %v11873_v37  ;;  %v3594_v30 = vadd.f32 %v3558_v52, %v3481_v16  ;;  %v3658_v21 = vmul.f32 %v7059_v18, %v13471_v27  ;;  %v3659_v63 = vmul.f32 %v7059_v18, %v13472_v3  ;;  %v3660_v22 = vmul.f32 %v7059_v18, %v13473_v32  ;;  %v13478_v42 = vld [vmem:[#allocation81_spill] sm:$0xff] }
 0x367   : > { %v3661_v46 = vmul.f32 %v7059_v18, %v13474_v1  ;;  %v3662_v39 = vmul.f32 %v7059_v18, %v13475_v10  ;;  %v3663_v59 = vmul.f32 %v7059_v18, %v13476_v11  ;;  %v3664_v53 = vmul.f32 %v7059_v18, %v13477_v60  ;;  %v13481_v44 = vld [vmem:[#allocation153_spill] sm:$0xff] }
 0x368   : > { %v3665_v16 = vmul.f32 %v7059_v18, %v13478_v42  ;;  %v3666_v9 = vmul.f32 %v7059_v18, %v13479_v61  ;;  %v3667_v47 = vmul.f32 %v7059_v18, %v13480_v2  ;;  %v3668_v14 = vmul.f32 %v7059_v18, %v13481_v44  ;;  %v13484_v38 = vld [vmem:[#allocation165_spill] sm:$0xff] }
 0x369   : > { %v3669_v31 = vmul.f32 %v7059_v18, %v13482_v57  ;;  %v3670_v54 = vmul.f32 %v7059_v18, %v13483_v51  ;;  %v3671_v35 = vmul.f32 %v7059_v18, %v13484_v38  ;;  %v3694_v58 = vadd.f32 %v3658_v21, %v3581_v40  ;;  %v7060_v37 = vld [vmem:[%s12397_s1 + $0xe] ss:$0 sm:$0xff] }
 0x36a   : > { %v3695_v43 = vadd.f32 %v3659_v63, %v3582_v48  ;;  %v3696_v52 = vadd.f32 %v3660_v22, %v3583_v25  ;;  %v3697_v41 = vadd.f32 %v3661_v46, %v3584_v62  ;;  %v3698_v4 = vadd.f32 %v3662_v39, %v3585_v5  ;;  %v13487_v21 = vld [vmem:[#allocation41_spill] sm:$0xff] }
 0x36b   : > { %v3699_v6 = vadd.f32 %v3663_v59, %v3586_v24  ;;  %v3700_v50 = vadd.f32 %v3664_v53, %v3587_v34  ;;  %v3701_v12 = vadd.f32 %v3665_v16, %v3588_v17  ;;  %v3702_v13 = vadd.f32 %v3666_v9, %v3589_v55 }
 0x36c   : > { %v3703_v45 = vadd.f32 %v3667_v47, %v3590_v56  ;;  %v3704_v23 = vadd.f32 %v3668_v14, %v3591_v29  ;;  %v3705_v26 = vadd.f32 %v3669_v31, %v3592_v33  ;;  %v3706_v19 = vadd.f32 %v3670_v54, %v3593_v49  ;;  %v13489_v47 = vld [vmem:[#allocation231_spill] sm:$0xff]  ;;  %v13490_v14 = vld [vmem:[#allocation232_spill] sm:$0xff]  ;;  %v13491_v31 = vld [vmem:[#allocation233_spill] sm:$0xff] }
 0x36d   : > { %v3707_v36 = vadd.f32 %v3671_v35, %v3594_v30  ;;  %v3735_v18 = vmul.f32 %v7060_v37, %v13471_v27  ;;  %v11897_v40 = vmul.f32 %v7060_v37, %v13472_v3  ;;  %v3737_v48 = vmul.f32 %v7060_v37, %v13473_v32  ;;  %v13486_v30 = vld [vmem:[#allocation46_spill] sm:$0xff] }
 0x36e   : > { %v3738_v25 = vmul.f32 %v7060_v37, %v13474_v1  ;;  %v3739_v62 = vmul.f32 %v7060_v37, %v13475_v10  ;;  %v3740_v5 = vmul.f32 %v7060_v37, %v13476_v11  ;;  %v3741_v24 = vmul.f32 %v7060_v37, %v13477_v60  ;;  %v13492_v54 = vld [vmem:[#allocation166_spill] sm:$0xff] }
 0x36f   : > { %13485 = vst [vmem:[#allocation6_spill] sm:$0xff] %v11897_v40  ;;  %v3742_v34 = vmul.f32 %v7060_v37, %v13478_v42  ;;  %v3743_v17 = vmul.f32 %v7060_v37, %v13479_v61  ;;  %v3744_v55 = vmul.f32 %v7060_v37, %v13480_v2  ;;  %v3745_v56 = vmul.f32 %v7060_v37, %v13481_v44  ;;  %v13488_v2 = vld [vmem:[#allocation230_spill] sm:$0xff] }
 0x370   : > { %v3746_v29 = vmul.f32 %v7060_v37, %v13482_v57  ;;  %v3747_v33 = vmul.f32 %v7060_v37, %v13483_v51  ;;  %v3748_v49 = vmul.f32 %v7060_v37, %v13484_v38  ;;  %v3749_v27 = vmul.f32 %v7060_v37, %v13486_v30  ;;  %v13496_v38 = vld [vmem:[#allocation156_spill] sm:$0xff] }
 0x371   : > { %v3750_v3 = vmul.f32 %v7060_v37, %v13487_v21  ;;  %v3771_v63 = vadd.f32 %v3735_v18, %v11762_v20  ;;  %v3773_v32 = vadd.f32 %v3737_v48, %v3694_v58  ;;  %v3774_v22 = vadd.f32 %v3738_v25, %v3695_v43  ;;  %v7061_v37 = vld [vmem:[%s12397_s1 + $0x12] ss:$0 sm:$0xff]  ;;  %v13497_v58 = vld [vmem:[#allocation157_spill] sm:$0xff]  ;;  %v13501_v48 = vld [vmem:[#allocation175_spill] sm:$0xff] }
 0x372   : > { %v3775_v1 = vadd.f32 %v3739_v62, %v3696_v52  ;;  %v3776_v46 = vadd.f32 %v3740_v5, %v3697_v41  ;;  %v3777_v10 = vadd.f32 %v3741_v24, %v3698_v4  ;;  %v3778_v39 = vadd.f32 %v3742_v34, %v3699_v6  ;;  %v13498_v52 = vld [vmem:[#allocation158_spill] sm:$0xff]  ;;  %v13499_v4 = vld [vmem:[#allocation167_spill] sm:$0xff] }
 0x373   : > { %v3779_v11 = vadd.f32 %v3743_v17, %v3700_v50  ;;  %v3780_v59 = vadd.f32 %v3744_v55, %v3701_v12  ;;  %v3781_v60 = vadd.f32 %v3745_v56, %v3702_v13  ;;  %v3782_v53 = vadd.f32 %v3746_v29, %v3703_v45  ;;  %v13493_v13 = vld [vmem:[#allocation36_spill] sm:$0xff]  ;;  %v13500_v50 = vld [vmem:[#allocation174_spill] sm:$0xff] }
 0x374   : > { %v3783_v42 = vadd.f32 %v3747_v33, %v3704_v23  ;;  %v3784_v16 = vadd.f32 %v3748_v49, %v3705_v26  ;;  %v3785_v61 = vadd.f32 %v3749_v27, %v3706_v19  ;;  %v3786_v9 = vadd.f32 %v3750_v3, %v3707_v36  ;;  %v13494_v23 = vld [vmem:[#allocation86_spill] sm:$0xff] }
 0x375   : > { %v3850_v20 = vmul.f32 %v7061_v37, %v13488_v2  ;;  %v3851_v44 = vmul.f32 %v7061_v37, %v13489_v47  ;;  %v3852_v57 = vmul.f32 %v7061_v37, %v13490_v14  ;;  %v3853_v51 = vmul.f32 %v7061_v37, %v13491_v31  ;;  %v13495_v19 = vld [vmem:[#allocation118_spill] sm:$0xff]  ;;  %v13511_v14 = vld [vmem:[#allocation161_spill] sm:$0xff] }
 0x376   : > { %v3854_v12 = vmul.f32 %v7061_v37, %v13492_v54  ;;  %v3855_v45 = vmul.f32 %v7061_v37, %v13493_v13  ;;  %v3856_v26 = vmul.f32 %v7061_v37, %v13494_v23  ;;  %v3857_v36 = vmul.f32 %v7061_v37, %v13495_v19  ;;  %v13512_v31 = vld [vmem:[#allocation169_spill] sm:$0xff]  ;;  %v13513_v54 = vld [vmem:[#allocation176_spill] sm:$0xff] }
 0x377   : > { %v3858_v35 = vmul.f32 %v7061_v37, %v13496_v38  ;;  %v3859_v43 = vmul.f32 %v7061_v37, %v13497_v58  ;;  %v3860_v41 = vmul.f32 %v7061_v37, %v13498_v52  ;;  %v3861_v6 = vmul.f32 %v7061_v37, %v13499_v4  ;;  %v13514_v13 = vld [vmem:[#allocation177_spill] sm:$0xff] }
 0x378   : > { %v3862_v18 = vmul.f32 %v7061_v37, %v13500_v50  ;;  %v3863_v25 = vmul.f32 %v7061_v37, %v13501_v48  ;;  %v3884_v62 = vadd.f32 %v11768_v15, %v3771_v63  ;;  %v3886_v5 = vadd.f32 %v3850_v20, %v3773_v32  ;;  %v7062_v37 = vld [vmem:[%s12397_s1 + $0x16] ss:$0 sm:$0xff]  ;;  %v13509_v20 = vld [vmem:[#allocation159_spill] sm:$0xff] }
 0x379   : > { %v3887_v24 = vadd.f32 %v3851_v44, %v3774_v22  ;;  %v3888_v34 = vadd.f32 %v3852_v57, %v3775_v1  ;;  %v3889_v17 = vadd.f32 %v3853_v51, %v3776_v46  ;;  %v3890_v55 = vadd.f32 %v3854_v12, %v3777_v10  ;;  %v13502_v63 = vld [vmem:[#allocation234_spill] sm:$0xff]  ;;  %v13503_v22 = vld [vmem:[#allocation235_spill] sm:$0xff]  ;;  %v13504_v46 = vld [vmem:[#allocation236_spill] sm:$0xff] }
 0x37a   : > { %v3891_v56 = vadd.f32 %v3855_v45, %v3778_v39  ;;  %v3892_v29 = vadd.f32 %v3856_v26, %v3779_v11  ;;  %v3893_v33 = vadd.f32 %v3857_v36, %v3780_v59  ;;  %v3894_v49 = vadd.f32 %v3858_v35, %v3781_v60  ;;  %v13505_v11 = vld [vmem:[#allocation168_spill] sm:$0xff] }
 0x37b   : > { %v3895_v30 = vadd.f32 %v3859_v43, %v3782_v53  ;;  %v3896_v27 = vadd.f32 %v3860_v41, %v3783_v42  ;;  %v3897_v21 = vadd.f32 %v3861_v6, %v3784_v16  ;;  %v3898_v3 = vadd.f32 %v3862_v18, %v3785_v61  ;;  %v13506_v60 = vld [vmem:[#allocation148_spill] sm:$0xff]  ;;  %v13507_v42 = vld [vmem:[#allocation149_spill] sm:$0xff]  ;;  %v13508_v61 = vld [vmem:[#allocation150_spill] sm:$0xff] }
 0x37c   : > { %v3899_v2 = vadd.f32 %v3863_v25, %v3786_v9  ;;  %v3961_v15 = vmul.f32 %v7062_v37, %v13417_v8  ;;  %v3963_v32 = vmul.f32 %v7062_v37, %v13502_v63  ;;  %v3964_v1 = vmul.f32 %v7062_v37, %v13503_v22  ;;  %v13510_v44 = vld [vmem:[#allocation160_spill] sm:$0xff]  ;;  %v7063_v25 = vld [vmem:[%s12397_s1 + $0x1a] ss:$0 sm:$0xff] }
 0x37d   : > { %v3965_v10 = vmul.f32 %v7062_v37, %v13504_v46  ;;  %v3966_v39 = vmul.f32 %v7062_v37, %v11514_v0  ;;  %v3967_v59 = vmul.f32 %v7062_v37, %v13505_v11  ;;  %v3968_v53 = vmul.f32 %v7062_v37, %v13506_v60 }
 0x37e   : > { %v3969_v16 = vmul.f32 %v7062_v37, %v13507_v42  ;;  %v3970_v9 = vmul.f32 %v7062_v37, %v13508_v61  ;;  %v3971_v47 = vmul.f32 %v7062_v37, %v13509_v20  ;;  %v3972_v8 = vmul.f32 %v7062_v37, %v13510_v44 }
 0x37f   : > { %v3973_v57 = vmul.f32 %v7062_v37, %v13511_v14  ;;  %v3974_v51 = vmul.f32 %v7062_v37, %v13512_v31  ;;  %v3975_v12 = vmul.f32 %v7062_v37, %v13513_v54  ;;  %v3976_v45 = vmul.f32 %v7062_v37, %v13514_v13  ;;  %v13517_v37 = vld [vmem:[#allocation92_spill] sm:$0xff] }
 0x380   : > { %v3997_v23 = vadd.f32 %v3961_v15, %v3884_v62  ;;  %v3999_v26 = vadd.f32 %v3963_v32, %v3886_v5  ;;  %v4000_v19 = vadd.f32 %v3964_v1, %v3887_v24  ;;  %v4001_v36 = vadd.f32 %v3965_v10, %v3888_v34 }
 0x381   : > { %v4002_v38 = vadd.f32 %v3966_v39, %v3889_v17  ;;  %v4003_v35 = vadd.f32 %v3967_v59, %v3890_v55  ;;  %v4004_v58 = vadd.f32 %v3968_v53, %v3891_v56  ;;  %v4005_v43 = vadd.f32 %v3969_v16, %v3892_v29 }
 0x382   : > { %v4006_v52 = vadd.f32 %v3970_v9, %v3893_v33  ;;  %v4007_v41 = vadd.f32 %v3971_v47, %v3894_v49  ;;  %v4008_v4 = vadd.f32 %v3972_v8, %v3895_v30  ;;  %v4009_v6 = vadd.f32 %v3973_v57, %v3896_v27  ;;  %v13519_v47 = vld [vmem:[#allocation237_spill] sm:$0xff]  ;;  %v13520_v8 = vld [vmem:[#allocation170_spill] sm:$0xff]  ;;  %v13521_v57 = vld [vmem:[#allocation151_spill] sm:$0xff] }
 0x383   : > { %v4010_v50 = vadd.f32 %v3974_v51, %v3897_v21  ;;  %v4011_v18 = vadd.f32 %v3975_v12, %v3898_v3  ;;  %v4012_v48 = vadd.f32 %v3976_v45, %v3899_v2  ;;  %v4040_v62 = vmul.f32 %v7063_v25, %v13502_v63  ;;  %v13516_v3 = vld [vmem:[#allocation28_spill] sm:$0xff]  ;;  %v13522_v51 = vld [vmem:[#allocation162_spill] sm:$0xff]  ;;  %v13523_v12 = vld [vmem:[#allocation163_spill] sm:$0xff] }
 0x384   : > { %v11955_v5 = vmul.f32 %v7063_v25, %v13503_v22  ;;  %v4042_v24 = vmul.f32 %v7063_v25, %v13504_v46  ;;  %v4043_v34 = vmul.f32 %v7063_v25, %v11514_v0  ;;  %v4044_v17 = vmul.f32 %v7063_v25, %v13505_v11  ;;  %v13524_v45 = vld [vmem:[#allocation164_spill] sm:$0xff] }
 0x385   : > { %v4045_v55 = vmul.f32 %v7063_v25, %v13506_v60  ;;  %v4046_v56 = vmul.f32 %v7063_v25, %v13507_v42  ;;  %v4047_v29 = vmul.f32 %v7063_v25, %v13508_v61  ;;  %v4048_v33 = vmul.f32 %v7063_v25, %v13509_v20  ;;  %v7064_v20 = vld [vmem:[%s12397_s1 + $0x1e] ss:$0 sm:$0xff] }
 0x386   : > { %13515 = vst [vmem:[#allocation34_spill] sm:$0xff] %v11955_v5  ;;  %v4049_v49 = vmul.f32 %v7063_v25, %v13510_v44  ;;  %v4050_v30 = vmul.f32 %v7063_v25, %v13511_v14  ;;  %v4051_v27 = vmul.f32 %v7063_v25, %v13512_v31  ;;  %v4052_v21 = vmul.f32 %v7063_v25, %v13513_v54 }
 0x387   : > { %v4053_v0 = vmul.f32 %v7063_v25, %v13514_v13  ;;  %v4054_v2 = vmul.f32 %v7063_v25, %v13516_v3  ;;  %v4055_v15 = vmul.f32 %v7063_v25, %v13517_v37  ;;  %v4076_v63 = vadd.f32 %v4040_v62, %v3997_v23  ;;  %v13532_v37 = vld [vmem:[#allocation238_spill] sm:$0xff] }
 0x388   : > { %v4078_v32 = vadd.f32 %v4042_v24, %v3999_v26  ;;  %v11971_v22 = vadd.f32 %v4043_v34, %v4000_v19  ;;  %v4080_v1 = vadd.f32 %v4044_v17, %v4001_v36  ;;  %v4081_v46 = vadd.f32 %v4045_v55, %v4002_v38  ;;  %v13525_v26 = vld [vmem:[#allocation171_spill] sm:$0xff]  ;;  %v13526_v36 = vld [vmem:[#allocation172_spill] sm:$0xff] }
 0x389   : > { %v4082_v10 = vadd.f32 %v4046_v56, %v4003_v35  ;;  %v4083_v39 = vadd.f32 %v4047_v29, %v4004_v58  ;;  %v4084_v11 = vadd.f32 %v4048_v33, %v4005_v43  ;;  %v4085_v59 = vadd.f32 %v4049_v49, %v4006_v52  ;;  %v13527_v35 = vld [vmem:[#allocation173_spill] sm:$0xff]  ;;  %v13528_v43 = vld [vmem:[#allocation178_spill] sm:$0xff] }
 0x38a   : > { %13518 = vst [vmem:[#allocation43_spill] sm:$0xff] %v11971_v22  ;;  %v4086_v60 = vadd.f32 %v4050_v30, %v4007_v41  ;;  %v4087_v53 = vadd.f32 %v4051_v27, %v4008_v4  ;;  %v4088_v42 = vadd.f32 %v4052_v21, %v4009_v6  ;;  %v4089_v16 = vadd.f32 %v4053_v0, %v4010_v50  ;;  %v13529_v41 = vld [vmem:[#allocation179_spill] sm:$0xff]  ;;  %v13530_v6 = vld [vmem:[#allocation48_spill] sm:$0xff]  ;;  %v4708_v30 = vpop.f32.mrb[166].mxu1 }
 0x38b   : > { %v4090_v61 = vadd.f32 %v4054_v2, %v4011_v18  ;;  %v4091_v9 = vadd.f32 %v4055_v15, %v4012_v48  ;;  %v4155_v44 = vmul.f32 %v7064_v20, %v13519_v47  ;;  %v4157_v14 = vmul.f32 %v7064_v20, %v13520_v8  ;;  %v13531_v18 = vld [vmem:[#allocation87_spill] sm:$0xff]  ;;  %4762 = vst [vmem:[#allocation2 + $0x140] sm:$0xff] %v4708_v30  ;;  %v6818_v2 = vpop.f32.mrb[167].mxu1 }
 0x38c   : > { %v4158_v31 = vmul.f32 %v7064_v20, %v13521_v57  ;;  %v4159_v54 = vmul.f32 %v7064_v20, %v13522_v51  ;;  %v4160_v13 = vmul.f32 %v7064_v20, %v13523_v12  ;;  %v4161_v23 = vmul.f32 %v7064_v20, %v13524_v45 }
 0x38d   : > { %v4162_v19 = vmul.f32 %v7064_v20, %v13525_v26  ;;  %v4163_v38 = vmul.f32 %v7064_v20, %v13526_v36  ;;  %v4164_v58 = vmul.f32 %v7064_v20, %v13527_v35  ;;  %v4165_v52 = vmul.f32 %v7064_v20, %v13528_v43 }
 0x38e   : > { %v4166_v4 = vmul.f32 %v7064_v20, %v13529_v41  ;;  %v4167_v50 = vmul.f32 %v7064_v20, %v13530_v6  ;;  %v4168_v48 = vmul.f32 %v7064_v20, %v13531_v18  ;;  %v11990_v25 = vadd.f32 %v11779_v7, %v4076_v63  ;;  %v7065_v7 = vld [vmem:[%s12397_s1 + $0x22] ss:$0 sm:$0xff]  ;;  %v13540_v20 = vld [vmem:[#allocation82_spill] sm:$0xff]  ;;  %v4345_v6 = vld [vmem:[%s7646_s25 + $0xd8] sm:$0xff] }
 0x38f   : > { %v4191_v62 = vadd.f32 %v4155_v44, %v4078_v32  ;;  %v4193_v24 = vadd.f32 %v4157_v14, %v4080_v1  ;;  %v4194_v34 = vadd.f32 %v4158_v31, %v4081_v46  ;;  %v4195_v17 = vadd.f32 %v4159_v54, %v4082_v10  ;;  %v13533_v63 = vld [vmem:[#allocation180_spill] sm:$0xff]  ;;  %v13534_v1 = vld [vmem:[#allocation23_spill] sm:$0xff]  ;;  %v13535_v10 = vld [vmem:[#allocation42_spill] sm:$0xff] }
 0x390   : > { %v4196_v55 = vadd.f32 %v4160_v13, %v4083_v39  ;;  %v4197_v56 = vadd.f32 %v4161_v23, %v4084_v11  ;;  %v4198_v29 = vadd.f32 %v4162_v19, %v4085_v59  ;;  %v4199_v33 = vadd.f32 %v4163_v38, %v4086_v60  ;;  %v13536_v11 = vld [vmem:[#allocation88_spill] sm:$0xff]  ;;  %v13537_v60 = vld [vmem:[#allocation22_spill] sm:$0xff]  ;;  %v13542_v14 = vld [vmem:[#allocation183_spill] sm:$0xff] }
 0x391   : > { %v4200_v49 = vadd.f32 %v4164_v58, %v4087_v53  ;;  %v4201_v27 = vadd.f32 %v4165_v52, %v4088_v42  ;;  %v4202_v21 = vadd.f32 %v4166_v4, %v4089_v16  ;;  %v4203_v0 = vadd.f32 %v4167_v50, %v4090_v61  ;;  %v13538_v42 = vld [vmem:[#allocation181_spill] sm:$0xff]  ;;  %v13539_v61 = vld [vmem:[#allocation182_spill] sm:$0xff]  ;;  %v13541_v44 = vld [vmem:[#allocation8_spill] sm:$0xff] }
 0x392   : > { %v4204_v3 = vadd.f32 %v4168_v48, %v4091_v9  ;;  %v4268_v15 = vmul.f32 %v7065_v7, %v13532_v37  ;;  %v4270_v32 = vmul.f32 %v7065_v7, %v13533_v63  ;;  %v4271_v46 = vmul.f32 %v7065_v7, %v13534_v1  ;;  %v13543_v31 = vld [vmem:[#allocation25_spill] sm:$0xff]  ;;  %v13544_v54 = vld [vmem:[#allocation115_spill] sm:$0xff]  ;;  %v13546_v18 = vld [vmem:[#allocation100_spill] sm:$0xff] }
 0x393   : > { %v4272_v39 = vmul.f32 %v7065_v7, %v13535_v10  ;;  %v4273_v59 = vmul.f32 %v7065_v7, %v13536_v11  ;;  %v4274_v53 = vmul.f32 %v7065_v7, %v13537_v60  ;;  %v4275_v16 = vmul.f32 %v7065_v7, %v13538_v42  ;;  %v4347_v50 = vld [vmem:[%s7646_s25 + $0xe8] sm:$0xff]  ;;  %v13551_v37 = vld [vmem:[#allocation4_spill] sm:$0xff]  ;;  %v13554_v1 = vld [vmem:[#allocation139_spill] sm:$0xff] }
 0x394   : > { %v4276_v9 = vmul.f32 %v7065_v7, %v13539_v61  ;;  %v4277_v47 = vmul.f32 %v7065_v7, %v13540_v20  ;;  %v4278_v8 = vmul.f32 %v7065_v7, %v13541_v44  ;;  %v4279_v57 = vmul.f32 %v7065_v7, %v13542_v14  ;;  %v13553_v63 = vld [vmem:[#allocation140_spill] sm:$0xff]  ;;  %v13555_v10 = vld [vmem:[#allocation94_spill] sm:$0xff] }
 0x395   : > { %v4280_v51 = vmul.f32 %v7065_v7, %v13543_v31  ;;  %v4281_v12 = vmul.f32 %v7065_v7, %v13544_v54  ;;  %v4304_v13 = vadd.f32 %v4268_v15, %v4191_v62  ;;  %v4306_v45 = vadd.f32 %v4270_v32, %v4193_v24  ;;  %v13547_v62 = vld [vmem:[#allocation107_spill] sm:$0xff] }
 0x396   : > { %v12008_v23 = vadd.f32 %v4271_v46, %v4194_v34  ;;  %v4308_v26 = vadd.f32 %v4272_v39, %v4195_v17  ;;  %v4309_v19 = vadd.f32 %v4273_v59, %v4196_v55  ;;  %v4310_v36 = vadd.f32 %v4274_v53, %v4197_v56  ;;  %v4770_v34 = vld [vmem:[#allocation2 + $0x20] sm:$0xff]  ;;  %v4349_v17 = vld [vmem:[%s7646_s25 + $0xf8] sm:$0xff]  ;;  %v13548_v56 = vld [vmem:[#allocation65_spill] sm:$0xff] }
 0x397   : > { %v4311_v38 = vadd.f32 %v4275_v16, %v4198_v29  ;;  %v4312_v35 = vadd.f32 %v4276_v9, %v4199_v33  ;;  %v4313_v58 = vadd.f32 %v4277_v47, %v4200_v49  ;;  %v4314_v43 = vadd.f32 %v4278_v8, %v4201_v27  ;;  %v13549_v49 = vld [vmem:[#allocation70_spill] sm:$0xff]  ;;  %v13557_v16 = vld [vmem:[#allocation29_spill] sm:$0xff]  ;;  %v13558_v47 = vld [vmem:[#allocation91_spill] sm:$0xff] }
 0x398   : > { %13545 = vst [vmem:[#allocation141_spill] sm:$0xff] %v12008_v23  ;;  %v4315_v52 = vadd.f32 %v4279_v57, %v4202_v21  ;;  %v4316_v41 = vadd.f32 %v4280_v51, %v4203_v0  ;;  %v4317_v4 = vadd.f32 %v4281_v12, %v4204_v3  ;;  %v4378_v48 = vadd.f32 %v4306_v45, %v13546_v18  ;;  %v4772_v27 = vld [vmem:[#allocation2 + $0x30] sm:$0xff]  ;;  %v4774_v21 = vld [vmem:[#allocation2 + $0x40] sm:$0xff]  ;;  %v13550_v3 = vld [vmem:[#allocation3_spill] sm:$0xff] }
 0x399   : > { %v4380_v24 = vadd.f32 %v4308_v26, %v13547_v62  ;;  %v4381_v55 = vadd.f32 %v4345_v6, %v4309_v19  ;;  %v4382_v29 = vadd.f32 %v4310_v36, %v13548_v56  ;;  %v4383_v33 = vadd.f32 %v4347_v50, %v4311_v38  ;;  %v7067_v53 = vld [vmem:[#allocation2 + $0x50] sm:$0xff]  ;;  %v4847_v9 = vld [vmem:[#allocation2 + $0x21] sm:$0xff]  ;;  %v13563_v26 = vld [vmem:[#allocation59_spill] sm:$0xff] }
 0x39a   : > { %v4384_v30 = vadd.f32 %v4312_v35, %v13549_v49  ;;  %v4385_v0 = vadd.f32 %v4349_v17, %v4313_v58  ;;  %v4386_v2 = vadd.f32 %v4314_v43, %v13550_v3  ;;  %v4387_v7 = vadd.f32 %v4315_v52, %v11871_v28  ;;  %4414 = vst [vmem:[%s7646_s25 + $0xc0] sm:$0xff] %v4378_v48  ;;  %v7066_v28 = vld [vmem:[%s12397_s1 + $0x3] ss:$0 sm:$0xff]  ;;  %v4849_v20 = vld [vmem:[#allocation2 + $0x31] sm:$0xff]  ;;  %v13560_v8 = vld [vmem:[#allocation145_spill] sm:$0xff] }
 0x39b   : > { %v12020_v15 = vadd.f32 %v4316_v41, %v13551_v37  ;;  %4416 = vst [vmem:[%s7646_s25 + $0xd0] sm:$0xff] %v4380_v24  ;;  %v4389_v32 = vadd.f32 %v4317_v4, %v13553_v63  ;;  %4418 = vst [vmem:[%s7646_s25 + $0xe0] sm:$0xff] %v4382_v29  ;;  %v4302_v46 = vadd.f32 %v13554_v1, %v11990_v25  ;;  %v4851_v25 = vld [vmem:[#allocation2 + $0x41] sm:$0xff]  ;;  %v13562_v51 = vld [vmem:[#allocation58_spill] sm:$0xff] }
 0x39c   : > { %4420 = vst [vmem:[%s7646_s25 + $0xf0] sm:$0xff] %v4384_v30  ;;  %4417 = vst [vmem:[%s7646_s25 + $0xd8] sm:$0xff] %v4381_v55  ;;  %v12032_v39 = vadd.f32 %v4304_v13, %v13555_v10  ;;  %v4810_v11 = vmul.f32 %v7066_v28, %v4770_v34  ;;  %v4812_v59 = vmul.f32 %v7066_v28, %v4772_v27  ;;  %v13561_v57 = vld [vmem:[#allocation101_spill] sm:$0xff]  ;;  %v4853_v12 = vld [vmem:[#allocation2 + $0x51] sm:$0xff] }
 0x39d   : > { %13552 = vst [vmem:[#allocation142_spill] sm:$0xff] %v12020_v15  ;;  %4419 = vst [vmem:[%s7646_s25 + $0xe8] sm:$0xff] %v4383_v33  ;;  %v4814_v60 = vmul.f32 %v7066_v28, %v4774_v21  ;;  %v4816_v42 = vmul.f32 %v7067_v53, %v7066_v28  ;;  %v4818_v61 = vmul.f32 %v7066_v28, %v13557_v16  ;;  %v4855_v13 = vld [vmem:[#allocation2 + $0x61] sm:$0xff]  ;;  %v4857_v45 = vld [vmem:[#allocation2 + $0x71] sm:$0xff] }
 0x39e   : > { %13556 = vst [vmem:[#allocation98_spill] sm:$0xff] %v12032_v39  ;;  %4421 = vst [vmem:[%s7646_s25 + $0xf8] sm:$0xff] %v4385_v0  ;;  %v12043_v44 = vadd.f32 %v4302_v46, %v13558_v47  ;;  %v4820_v14 = vmul.f32 %v7066_v28, %v13560_v8  ;;  %v4822_v31 = vmul.f32 %v7066_v28, %v13561_v57  ;;  %v13564_v36 = vld [vmem:[#allocation108_spill] sm:$0xff]  ;;  %v13565_v35 = vld [vmem:[#allocation61_spill] sm:$0xff] }
 0x39f   : > { %4422 = vst [vmem:[%s7646_s25 + $0x100] sm:$0xff] %v4386_v2  ;;  %4423 = vst [vmem:[%s7646_s25 + $0x108] sm:$0xff] %v4387_v7  ;;  %v4824_v54 = vmul.f32 %v7066_v28, %v13562_v51  ;;  %v4826_v19 = vmul.f32 %v7066_v28, %v13563_v26  ;;  %v4828_v38 = vmul.f32 %v7066_v28, %v13564_v36  ;;  %v13566_v43 = vld [vmem:[#allocation63_spill] sm:$0xff]  ;;  %v4859_v41 = vld [vmem:[#allocation2 + $0x81] sm:$0xff] }
 0x3a0   : > { %4425 = vst [vmem:[%s7646_s25 + $0x118] sm:$0xff] %v4389_v32  ;;  %13559 = vst [vmem:[#allocation143_spill] sm:$0xff] %v12043_v44  ;;  %v4830_v58 = vmul.f32 %v7066_v28, %v13565_v35  ;;  %v4832_v52 = vmul.f32 %v7066_v28, %v13566_v43  ;;  %v4861_v4 = vld [vmem:[#allocation2 + $0x91] sm:$0xff]  ;;  %v4863_v6 = vld [vmem:[#allocation2 + $0xa1] sm:$0xff] }
 0x3a1   : > { %v4873_v50 = vld [vmem:[#allocation2 + $0xf1] sm:$0xff]  ;;  %v13567_v18 = vld [vmem:[#allocation64_spill] sm:$0xff] }
 0x3a2   : > { %v4834_v48 = vmul.f32 %v7066_v28, %v13567_v18  ;;  %v7068_v62 = vld [vmem:[#allocation2 + $0xf0] sm:$0xff]  ;;  %v7069_v34 = vld [vmem:[#allocation2 + $0x100] sm:$0xff] }
 0x3a3   : > { %v4836_v24 = vmul.f32 %v7068_v62, %v7066_v28  ;;  %v4838_v17 = vmul.f32 %v7069_v34, %v7066_v28  ;;  %v7070_v55 = vld [vmem:[#allocation2 + $0x110] sm:$0xff]  ;;  %v4867_v33 = vld [vmem:[#allocation2 + $0xc1] sm:$0xff] }
 0x3a4   : > { %v4840_v56 = vmul.f32 %v7070_v55, %v7066_v28  ;;  %v4865_v29 = vld [vmem:[#allocation2 + $0xb1] sm:$0xff]  ;;  %v4871_v30 = vld [vmem:[#allocation2 + $0xe1] sm:$0xff] }
 0x3a5   : > { %v4869_v49 = vld [vmem:[#allocation2 + $0xd1] sm:$0xff]  ;;  %v4875_v27 = vld [vmem:[#allocation2 + $0x101] sm:$0xff] }
 0x3a6   : > { %v4877_v21 = vld [vmem:[#allocation2 + $0x111] sm:$0xff]  ;;  %v7071_v0 = vld [vmem:[%s12397_s1 + $0x7] ss:$0 sm:$0xff] }
 0x3a7   : > { %v4887_v3 = vmul.f32 %v7071_v0, %v4847_v9  ;;  %v4889_v2 = vmul.f32 %v7071_v0, %v4849_v20  ;;  %v4891_v7 = vmul.f32 %v7071_v0, %v4851_v25  ;;  %v4893_v37 = vmul.f32 %v7071_v0, %v4853_v12  ;;  %v4960_v9 = vld [vmem:[#allocation2 + $0x22] sm:$0xff]  ;;  %v4962_v20 = vld [vmem:[#allocation2 + $0x32] sm:$0xff] }
 0x3a8   : > { %v4895_v63 = vmul.f32 %v7071_v0, %v4855_v13  ;;  %v4897_v32 = vmul.f32 %v7071_v0, %v4857_v45  ;;  %v4899_v1 = vmul.f32 %v7071_v0, %v4859_v41  ;;  %v4901_v46 = vmul.f32 %v7071_v0, %v4861_v4  ;;  %v4964_v25 = vld [vmem:[#allocation2 + $0x42] sm:$0xff]  ;;  %v4966_v4 = vld [vmem:[#allocation2 + $0x52] sm:$0xff] }
 0x3a9   : > { %v4903_v10 = vmul.f32 %v7071_v0, %v4863_v6  ;;  %v4905_v28 = vmul.f32 %v7071_v0, %v4865_v29  ;;  %v4907_v53 = vmul.f32 %v7071_v0, %v4867_v33  ;;  %v4909_v16 = vmul.f32 %v7071_v0, %v4869_v49  ;;  %v4968_v6 = vld [vmem:[#allocation2 + $0x62] sm:$0xff]  ;;  %v4970_v18 = vld [vmem:[#allocation2 + $0x72] sm:$0xff] }
 0x3aa   : > { %v4911_v47 = vmul.f32 %v7071_v0, %v4871_v30  ;;  %v4913_v8 = vmul.f32 %v7071_v0, %v4873_v50  ;;  %v4915_v57 = vmul.f32 %v7071_v0, %v4875_v27  ;;  %v4917_v51 = vmul.f32 %v7071_v0, %v4877_v21  ;;  %v4972_v29 = vld [vmem:[#allocation2 + $0x82] sm:$0xff]  ;;  %v4974_v33 = vld [vmem:[#allocation2 + $0x92] sm:$0xff] }
 0x3ab   : > { %v4923_v26 = vadd.f32 %v4887_v3, %v4810_v11  ;;  %v4925_v36 = vadd.f32 %v4889_v2, %v4812_v59  ;;  %v4927_v35 = vadd.f32 %v4891_v7, %v4814_v60  ;;  %v4929_v43 = vadd.f32 %v4893_v37, %v4816_v42  ;;  %v4976_v11 = vld [vmem:[#allocation2 + $0xa2] sm:$0xff]  ;;  %v4986_v59 = vld [vmem:[#allocation2 + $0xf2] sm:$0xff] }
 0x3ac   : > { %v4931_v12 = vadd.f32 %v4895_v63, %v4818_v61  ;;  %v4933_v13 = vadd.f32 %v4897_v32, %v4820_v14  ;;  %v4935_v45 = vadd.f32 %v4899_v1, %v4822_v31  ;;  %v4937_v41 = vadd.f32 %v4901_v46, %v4824_v54  ;;  %v4978_v27 = vld [vmem:[#allocation2 + $0xb2] sm:$0xff]  ;;  %v4980_v61 = vld [vmem:[#allocation2 + $0xc2] sm:$0xff] }
 0x3ad   : > { %v4939_v62 = vadd.f32 %v4903_v10, %v4826_v19  ;;  %v4941_v34 = vadd.f32 %v4905_v28, %v4828_v38  ;;  %v4943_v55 = vadd.f32 %v4907_v53, %v4830_v58  ;;  %v4945_v50 = vadd.f32 %v4909_v16, %v4832_v52  ;;  %v4982_v14 = vld [vmem:[#allocation2 + $0xd2] sm:$0xff]  ;;  %v4984_v31 = vld [vmem:[#allocation2 + $0xe2] sm:$0xff]  ;;  %v7072_v19 = vld [vmem:[%s12397_s1 + $0xb] ss:$0 sm:$0xff] }
 0x3ae   : > { %v4947_v60 = vadd.f32 %v4911_v47, %v4834_v48  ;;  %v4949_v42 = vadd.f32 %v4913_v8, %v4836_v24  ;;  %v4951_v49 = vadd.f32 %v4915_v57, %v4838_v17  ;;  %v4953_v30 = vadd.f32 %v4917_v51, %v4840_v56  ;;  %v4988_v54 = vld [vmem:[#allocation2 + $0x102] sm:$0xff]  ;;  %v4990_v21 = vld [vmem:[#allocation2 + $0x112] sm:$0xff] }
 0x3af   : > { %v5000_v38 = vmul.f32 %v7072_v19, %v4960_v9  ;;  %v5002_v58 = vmul.f32 %v7072_v19, %v4962_v20  ;;  %v5004_v52 = vmul.f32 %v7072_v19, %v4964_v25  ;;  %v5006_v0 = vmul.f32 %v7072_v19, %v4966_v4 }
 0x3b0   : > { %v5008_v3 = vmul.f32 %v7072_v19, %v4968_v6  ;;  %v5010_v2 = vmul.f32 %v7072_v19, %v4970_v18  ;;  %v5012_v48 = vmul.f32 %v7072_v19, %v4972_v29  ;;  %v5014_v24 = vmul.f32 %v7072_v19, %v4974_v33 }
 0x3b1   : > { %v5016_v17 = vmul.f32 %v7072_v19, %v4976_v11  ;;  %v5018_v56 = vmul.f32 %v7072_v19, %v4978_v27  ;;  %v5020_v7 = vmul.f32 %v7072_v19, %v4980_v61  ;;  %v5022_v37 = vmul.f32 %v7072_v19, %v4982_v14 }
 0x3b2   : > { %v5024_v63 = vmul.f32 %v7072_v19, %v4984_v31  ;;  %v5026_v32 = vmul.f32 %v7072_v19, %v4986_v59  ;;  %v5028_v1 = vmul.f32 %v7072_v19, %v4988_v54  ;;  %v5030_v46 = vmul.f32 %v7072_v19, %v4990_v21 }
 0x3b3   : > { %v5036_v10 = vadd.f32 %v5000_v38, %v4923_v26  ;;  %v5038_v28 = vadd.f32 %v5002_v58, %v4925_v36  ;;  %v5040_v53 = vadd.f32 %v5004_v52, %v4927_v35  ;;  %v5042_v16 = vadd.f32 %v5006_v0, %v4929_v43  ;;  %v7073_v26 = vld [vmem:[%s12397_s1 + $0xf] ss:$0 sm:$0xff] }
 0x3b4   : > { %v5044_v47 = vadd.f32 %v5008_v3, %v4931_v12  ;;  %v5046_v8 = vadd.f32 %v5010_v2, %v4933_v13  ;;  %v5048_v57 = vadd.f32 %v5012_v48, %v4935_v45  ;;  %v5050_v51 = vadd.f32 %v5014_v24, %v4937_v41  ;;  %v5069_v12 = vld [vmem:[#allocation2 + $0x122] sm:$0xff]  ;;  %v5164_v48 = vld [vmem:[#allocation2 + $0x93] sm:$0xff] }
 0x3b5   : > { %v5052_v23 = vadd.f32 %v5016_v17, %v4939_v62  ;;  %v5054_v22 = vadd.f32 %v5018_v56, %v4941_v34  ;;  %v5056_v5 = vadd.f32 %v5020_v7, %v4943_v55  ;;  %v5058_v40 = vadd.f32 %v5022_v37, %v4945_v50  ;;  %v13568_v0 = vld [vmem:[#allocation121_spill] sm:$0xff] }
 0x3b6   : > { %v5060_v15 = vadd.f32 %v5024_v63, %v4947_v60  ;;  %v5062_v39 = vadd.f32 %v5026_v32, %v4949_v42  ;;  %v5064_v44 = vadd.f32 %v5028_v1, %v4951_v49  ;;  %v5066_v19 = vadd.f32 %v5030_v46, %v4953_v30  ;;  %v5166_v37 = vld [vmem:[#allocation2 + $0xa3] sm:$0xff]  ;;  %v5168_v63 = vld [vmem:[#allocation2 + $0xb3] sm:$0xff] }
 0x3b7   : > { %v5077_v38 = vmul.f32 %v7073_v26, %v4960_v9  ;;  %v5079_v36 = vmul.f32 %v7073_v26, %v4962_v20  ;;  %v5081_v35 = vmul.f32 %v7073_v26, %v4964_v25  ;;  %v5083_v43 = vmul.f32 %v7073_v26, %v4966_v4  ;;  %v5150_v25 = vld [vmem:[#allocation2 + $0x23] sm:$0xff]  ;;  %v5152_v4 = vld [vmem:[#allocation2 + $0x33] sm:$0xff] }
 0x3b8   : > { %v5085_v13 = vmul.f32 %v7073_v26, %v4968_v6  ;;  %v5087_v45 = vmul.f32 %v7073_v26, %v4970_v18  ;;  %v5089_v41 = vmul.f32 %v7073_v26, %v4972_v29  ;;  %v5091_v62 = vmul.f32 %v7073_v26, %v4974_v33  ;;  %v5154_v33 = vld [vmem:[#allocation2 + $0x43] sm:$0xff] }
 0x3b9   : > { %v5093_v34 = vmul.f32 %v7073_v26, %v4976_v11  ;;  %v5095_v55 = vmul.f32 %v7073_v26, %v4978_v27  ;;  %v5097_v50 = vmul.f32 %v7073_v26, %v4980_v61  ;;  %v5099_v60 = vmul.f32 %v7073_v26, %v4982_v14  ;;  %v5156_v11 = vld [vmem:[#allocation2 + $0x53] sm:$0xff]  ;;  %v5158_v27 = vld [vmem:[#allocation2 + $0x63] sm:$0xff] }
 0x3ba   : > { %v5101_v42 = vmul.f32 %v7073_v26, %v4984_v31  ;;  %v5103_v49 = vmul.f32 %v7073_v26, %v4986_v59  ;;  %v5105_v30 = vmul.f32 %v7073_v26, %v4988_v54  ;;  %v5107_v58 = vmul.f32 %v7073_v26, %v4990_v21  ;;  %v5160_v54 = vld [vmem:[#allocation2 + $0x73] sm:$0xff]  ;;  %v5162_v21 = vld [vmem:[#allocation2 + $0x83] sm:$0xff] }
 0x3bb   : > { %v5109_v52 = vmul.f32 %v7073_v26, %v5069_v12  ;;  %v5113_v3 = vadd.f32 %v5077_v38, %v13568_v0  ;;  %v5115_v9 = vadd.f32 %v5079_v36, %v5036_v10  ;;  %v5117_v20 = vadd.f32 %v5081_v35, %v5038_v28  ;;  %v5170_v32 = vld [vmem:[#allocation2 + $0xc3] sm:$0xff]  ;;  %v5172_v10 = vld [vmem:[#allocation2 + $0xd3] sm:$0xff] }
 0x3bc   : > { %v5119_v2 = vadd.f32 %v5083_v43, %v5040_v53  ;;  %v5121_v6 = vadd.f32 %v5085_v13, %v5042_v16  ;;  %v5123_v18 = vadd.f32 %v5087_v45, %v5044_v47  ;;  %v5125_v29 = vadd.f32 %v5089_v41, %v5046_v8  ;;  %v5174_v28 = vld [vmem:[#allocation2 + $0xe3] sm:$0xff]  ;;  %v5176_v53 = vld [vmem:[#allocation2 + $0xf3] sm:$0xff] }
 0x3bd   : > { %v5127_v61 = vadd.f32 %v5091_v62, %v5048_v57  ;;  %v5129_v14 = vadd.f32 %v5093_v34, %v5050_v51  ;;  %v5131_v31 = vadd.f32 %v5095_v55, %v5052_v23  ;;  %v5133_v59 = vadd.f32 %v5097_v50, %v5054_v22  ;;  %v7074_v23 = vld [vmem:[%s12397_s1 + $0x13] ss:$0 sm:$0xff]  ;;  %v5178_v47 = vld [vmem:[#allocation2 + $0x103] sm:$0xff] }
 0x3be   : > { %v5135_v24 = vadd.f32 %v5099_v60, %v5056_v5  ;;  %v5137_v17 = vadd.f32 %v5101_v42, %v5058_v40  ;;  %v5139_v56 = vadd.f32 %v5103_v49, %v5060_v15  ;;  %v5141_v7 = vadd.f32 %v5105_v30, %v5062_v39  ;;  %v5180_v8 = vld [vmem:[#allocation2 + $0x113] sm:$0xff]  ;;  %v5182_v5 = vld [vmem:[#allocation2 + $0x123] sm:$0xff] }
 0x3bf   : > { %v5143_v1 = vadd.f32 %v5107_v58, %v5064_v44  ;;  %v5145_v46 = vadd.f32 %v5109_v52, %v5066_v19  ;;  %v5190_v22 = vmul.f32 %v7074_v23, %v5150_v25  ;;  %v5192_v16 = vmul.f32 %v7074_v23, %v5152_v4  ;;  %v12066_v62 = vld [vmem:[#allocation2 + $0x24] sm:$0xff]  ;;  %v12068_v42 = vld [vmem:[#allocation2 + $0x34] sm:$0xff] }
 0x3c0   : > { %v5194_v40 = vmul.f32 %v7074_v23, %v5154_v33  ;;  %v5196_v15 = vmul.f32 %v7074_v23, %v5156_v11  ;;  %v5198_v39 = vmul.f32 %v7074_v23, %v5158_v27  ;;  %v5200_v57 = vmul.f32 %v7074_v23, %v5160_v54  ;;  %13569 = vst [vmem:[#allocation144_spill] sm:$0xff] %v12066_v62  ;;  %v12070_v49 = vld [vmem:[#allocation2 + $0x44] sm:$0xff]  ;;  %v12072_v30 = vld [vmem:[#allocation2 + $0x54] sm:$0xff] }
 0x3c1   : > { %v5202_v51 = vmul.f32 %v7074_v23, %v5162_v21  ;;  %v5204_v26 = vmul.f32 %v7074_v23, %v5164_v48  ;;  %v5206_v44 = vmul.f32 %v7074_v23, %v5166_v37  ;;  %v5208_v19 = vmul.f32 %v7074_v23, %v5168_v63  ;;  %13570 = vst [vmem:[#allocation135_spill] sm:$0xff] %v12068_v42  ;;  %v5271_v4 = vld [vmem:[#allocation2 + $0x64] sm:$0xff]  ;;  %v5273_v33 = vld [vmem:[#allocation2 + $0x74] sm:$0xff] }
 0x3c2   : > { %v5210_v38 = vmul.f32 %v7074_v23, %v5170_v32  ;;  %v5212_v36 = vmul.f32 %v7074_v23, %v5172_v10  ;;  %v5214_v35 = vmul.f32 %v7074_v23, %v5174_v28  ;;  %v5216_v43 = vmul.f32 %v7074_v23, %v5176_v53  ;;  %13571 = vst [vmem:[#allocation99_spill] sm:$0xff] %v12070_v49  ;;  %v5275_v11 = vld [vmem:[#allocation2 + $0x84] sm:$0xff]  ;;  %v5285_v10 = vld [vmem:[#allocation2 + $0xd4] sm:$0xff] }
 0x3c3   : > { %v5218_v12 = vmul.f32 %v7074_v23, %v5178_v47  ;;  %v5220_v13 = vmul.f32 %v7074_v23, %v5180_v8  ;;  %v5222_v45 = vmul.f32 %v7074_v23, %v5182_v5  ;;  %v5226_v41 = vadd.f32 %v5190_v22, %v5113_v3  ;;  %13572 = vst [vmem:[#allocation56_spill] sm:$0xff] %v12072_v30  ;;  %v5283_v32 = vld [vmem:[#allocation2 + $0xc4] sm:$0xff] }
 0x3c4   : > { %v5228_v34 = vadd.f32 %v5192_v16, %v5115_v9  ;;  %v5230_v55 = vadd.f32 %v5194_v40, %v5117_v20  ;;  %v5232_v50 = vadd.f32 %v5196_v15, %v5119_v2  ;;  %v5234_v60 = vadd.f32 %v5198_v39, %v5121_v6  ;;  %v5277_v20 = vld [vmem:[#allocation2 + $0x94] sm:$0xff]  ;;  %v5279_v2 = vld [vmem:[#allocation2 + $0xa4] sm:$0xff] }
 0x3c5   : > { %v5236_v58 = vadd.f32 %v5200_v57, %v5123_v18  ;;  %v5238_v52 = vadd.f32 %v5202_v51, %v5125_v29  ;;  %v5240_v0 = vadd.f32 %v5204_v26, %v5127_v61  ;;  %v5242_v25 = vadd.f32 %v5206_v44, %v5129_v14  ;;  %v5281_v6 = vld [vmem:[#allocation2 + $0xb4] sm:$0xff]  ;;  %v5287_v18 = vld [vmem:[#allocation2 + $0xe4] sm:$0xff] }
 0x3c6   : > { %v5244_v3 = vadd.f32 %v5208_v19, %v5131_v31  ;;  %v5246_v27 = vadd.f32 %v5210_v38, %v5133_v59  ;;  %v5248_v54 = vadd.f32 %v5212_v36, %v5135_v24  ;;  %v5250_v9 = vadd.f32 %v5214_v35, %v5137_v17  ;;  %v5289_v29 = vld [vmem:[#allocation2 + $0xf4] sm:$0xff]  ;;  %v5291_v61 = vld [vmem:[#allocation2 + $0x104] sm:$0xff] }
 0x3c7   : > { %v5252_v21 = vadd.f32 %v5216_v43, %v5139_v56  ;;  %v5254_v48 = vadd.f32 %v5218_v12, %v5141_v7  ;;  %v5256_v37 = vadd.f32 %v5220_v13, %v5143_v1  ;;  %v5258_v63 = vadd.f32 %v5222_v45, %v5145_v46  ;;  %v5293_v14 = vld [vmem:[#allocation2 + $0x114] sm:$0xff]  ;;  %v5295_v7 = vld [vmem:[#allocation2 + $0x124] sm:$0xff] }
 0x3c8   : > { %v7075_v31 = vld [vmem:[%s12397_s1 + $0x17] ss:$0 sm:$0xff]  ;;  %v5940_v35 = vld [vmem:[%s12397_s1 + $0x1b] ss:$0 sm:$0xff] }
 0x3c9   : > { %v5303_v59 = vmul.f32 %v7075_v31, %v12066_v62  ;;  %v5305_v24 = vmul.f32 %v7075_v31, %v12068_v42  ;;  %v5307_v17 = vmul.f32 %v7075_v31, %v12070_v49  ;;  %v5309_v56 = vmul.f32 %v7075_v31, %v12072_v30 }
 0x3ca   : > { %v5311_v1 = vmul.f32 %v7075_v31, %v5271_v4  ;;  %v5313_v46 = vmul.f32 %v7075_v31, %v5273_v33  ;;  %v5315_v28 = vmul.f32 %v7075_v31, %v5275_v11  ;;  %v5317_v53 = vmul.f32 %v7075_v31, %v5277_v20 }
 0x3cb   : > { %v5319_v23 = vmul.f32 %v7075_v31, %v5279_v2  ;;  %v5321_v22 = vmul.f32 %v7075_v31, %v5281_v6  ;;  %v5323_v16 = vmul.f32 %v7075_v31, %v5283_v32  ;;  %v5325_v47 = vmul.f32 %v7075_v31, %v5285_v10 }
 0x3cc   : > { %v5327_v8 = vmul.f32 %v7075_v31, %v5287_v18  ;;  %v5329_v5 = vmul.f32 %v7075_v31, %v5289_v29  ;;  %v5331_v40 = vmul.f32 %v7075_v31, %v5291_v61  ;;  %v5333_v15 = vmul.f32 %v7075_v31, %v5293_v14 }
 0x3cd   : > { %v5335_v39 = vmul.f32 %v7075_v31, %v5295_v7  ;;  %v5339_v57 = vadd.f32 %v5303_v59, %v5226_v41  ;;  %v5341_v51 = vadd.f32 %v5305_v24, %v5228_v34  ;;  %v5343_v26 = vadd.f32 %v5307_v17, %v5230_v55  ;;  %v13573_v34 = vld [vmem:[#allocation144_spill] sm:$0xff] }
 0x3ce   : > { %v5345_v44 = vadd.f32 %v5309_v56, %v5232_v50  ;;  %v5347_v19 = vadd.f32 %v5311_v1, %v5234_v60  ;;  %v5349_v38 = vadd.f32 %v5313_v46, %v5236_v58  ;;  %v5351_v36 = vadd.f32 %v5315_v28, %v5238_v52  ;;  %v13574_v50 = vld [vmem:[#allocation135_spill] sm:$0xff]  ;;  %v13576_v24 = vld [vmem:[#allocation56_spill] sm:$0xff] }
 0x3cf   : > { %v5353_v43 = vadd.f32 %v5317_v53, %v5240_v0  ;;  %v5355_v12 = vadd.f32 %v5319_v23, %v5242_v25  ;;  %v5357_v13 = vadd.f32 %v5321_v22, %v5244_v3  ;;  %v5359_v45 = vadd.f32 %v5323_v16, %v5246_v27  ;;  %v5374_v58 = vld [vmem:[#allocation2 + $0x134] sm:$0xff]  ;;  %v5941_v53 = vld [vmem:[%s12397_s1 + $0x1f] ss:$0 sm:$0xff]  ;;  %v13577_v23 = vld [vmem:[#allocation120_spill] sm:$0xff] }
 0x3d0   : > { %v5361_v30 = vadd.f32 %v5325_v47, %v5248_v54  ;;  %v5363_v49 = vadd.f32 %v5327_v8, %v5250_v9  ;;  %v5365_v42 = vadd.f32 %v5329_v5, %v5252_v21  ;;  %v5367_v62 = vadd.f32 %v5331_v40, %v5254_v48  ;;  %v13575_v52 = vld [vmem:[#allocation99_spill] sm:$0xff]  ;;  %v5465_v40 = vld [vmem:[#allocation2 + $0x85] sm:$0xff] }
 0x3d1   : > { %v5369_v31 = vadd.f32 %v5333_v15, %v5256_v37  ;;  %v5371_v41 = vadd.f32 %v5335_v39, %v5258_v63  ;;  %v5380_v55 = vmul.f32 %v5940_v35, %v13573_v34  ;;  %v5382_v60 = vmul.f32 %v5940_v35, %v13574_v50  ;;  %v5467_v15 = vld [vmem:[#allocation2 + $0x95] sm:$0xff]  ;;  %v5469_v39 = vld [vmem:[#allocation2 + $0xa5] sm:$0xff] }
 0x3d2   : > { %v5384_v59 = vmul.f32 %v5940_v35, %v13575_v52  ;;  %v5386_v17 = vmul.f32 %v5940_v35, %v13576_v24  ;;  %v5388_v56 = vmul.f32 %v5940_v35, %v5271_v4  ;;  %v5390_v0 = vmul.f32 %v5940_v35, %v5273_v33  ;;  %v5471_v34 = vld [vmem:[#allocation2 + $0xb5] sm:$0xff] }
 0x3d3   : > { %v5392_v25 = vmul.f32 %v5940_v35, %v5275_v11  ;;  %v5394_v3 = vmul.f32 %v5940_v35, %v5277_v20  ;;  %v5396_v27 = vmul.f32 %v5940_v35, %v5279_v2  ;;  %v5398_v54 = vmul.f32 %v5940_v35, %v5281_v6  ;;  %v5453_v20 = vld [vmem:[#allocation2 + $0x25] sm:$0xff]  ;;  %v5455_v2 = vld [vmem:[#allocation2 + $0x35] sm:$0xff] }
 0x3d4   : > { %v5400_v9 = vmul.f32 %v5940_v35, %v5283_v32  ;;  %v5402_v21 = vmul.f32 %v5940_v35, %v5285_v10  ;;  %v5404_v48 = vmul.f32 %v5940_v35, %v5287_v18  ;;  %v5406_v37 = vmul.f32 %v5940_v35, %v5289_v29  ;;  %v5457_v6 = vld [vmem:[#allocation2 + $0x45] sm:$0xff]  ;;  %v5479_v50 = vld [vmem:[#allocation2 + $0xf5] sm:$0xff] }
 0x3d5   : > { %v5408_v63 = vmul.f32 %v5940_v35, %v5291_v61  ;;  %v5410_v1 = vmul.f32 %v5940_v35, %v5293_v14  ;;  %v5412_v46 = vmul.f32 %v5940_v35, %v5295_v7  ;;  %v5414_v28 = vmul.f32 %v5940_v35, %v5374_v58  ;;  %v5459_v61 = vld [vmem:[#allocation2 + $0x55] sm:$0xff]  ;;  %v5461_v14 = vld [vmem:[#allocation2 + $0x65] sm:$0xff] }
 0x3d6   : > { %v5416_v22 = vadd.f32 %v5380_v55, %v13577_v23  ;;  %v5418_v4 = vadd.f32 %v5382_v60, %v5339_v57  ;;  %v5420_v33 = vadd.f32 %v5384_v59, %v5341_v51  ;;  %v5422_v11 = vadd.f32 %v5386_v17, %v5343_v26  ;;  %v5463_v7 = vld [vmem:[#allocation2 + $0x75] sm:$0xff]  ;;  %v5473_v55 = vld [vmem:[#allocation2 + $0xc5] sm:$0xff] }
 0x3d7   : > { %v5424_v32 = vadd.f32 %v5388_v56, %v5345_v44  ;;  %v5426_v10 = vadd.f32 %v5390_v0, %v5347_v19  ;;  %v5428_v18 = vadd.f32 %v5392_v25, %v5349_v38  ;;  %v5430_v29 = vadd.f32 %v5394_v3, %v5351_v36  ;;  %v5475_v44 = vld [vmem:[#allocation2 + $0xd5] sm:$0xff]  ;;  %v5477_v36 = vld [vmem:[#allocation2 + $0xe5] sm:$0xff] }
 0x3d8   : > { %v5432_v16 = vadd.f32 %v5396_v27, %v5353_v43  ;;  %v5434_v47 = vadd.f32 %v5398_v54, %v5355_v12  ;;  %v5436_v8 = vadd.f32 %v5400_v9, %v5357_v13  ;;  %v5438_v5 = vadd.f32 %v5402_v21, %v5359_v45  ;;  %v5481_v60 = vld [vmem:[#allocation2 + $0x105] sm:$0xff]  ;;  %v5483_v12 = vld [vmem:[#allocation2 + $0x115] sm:$0xff]  ;;  %v5942_v9 = vld [vmem:[%s12397_s1 + $0x23] ss:$0 sm:$0xff] }
 0x3d9   : > { %v5440_v57 = vadd.f32 %v5404_v48, %v5361_v30  ;;  %v5442_v51 = vadd.f32 %v5406_v37, %v5363_v49  ;;  %v5444_v26 = vadd.f32 %v5408_v63, %v5365_v42  ;;  %v5446_v35 = vadd.f32 %v5410_v1, %v5367_v62  ;;  %v5485_v13 = vld [vmem:[#allocation2 + $0x125] sm:$0xff]  ;;  %v5487_v45 = vld [vmem:[#allocation2 + $0x135] sm:$0xff] }
 0x3da   : > { %v5448_v19 = vadd.f32 %v5412_v46, %v5369_v31  ;;  %v5450_v38 = vadd.f32 %v5414_v28, %v5371_v41  ;;  %v5493_v58 = vmul.f32 %v5941_v53, %v5453_v20  ;;  %v5495_v43 = vmul.f32 %v5941_v53, %v5455_v2  ;;  %v5566_v1 = vld [vmem:[#allocation2 + $0x26] sm:$0xff]  ;;  %v5568_v46 = vld [vmem:[#allocation2 + $0x36] sm:$0xff] }
 0x3db   : > { %v5497_v52 = vmul.f32 %v5941_v53, %v5457_v6  ;;  %v5499_v59 = vmul.f32 %v5941_v53, %v5459_v61  ;;  %v5501_v24 = vmul.f32 %v5941_v53, %v5461_v14  ;;  %v5503_v30 = vmul.f32 %v5941_v53, %v5463_v7  ;;  %v5570_v28 = vld [vmem:[#allocation2 + $0x46] sm:$0xff]  ;;  %v5572_v61 = vld [vmem:[#allocation2 + $0x56] sm:$0xff] }
 0x3dc   : > { %v5505_v49 = vmul.f32 %v5941_v53, %v5465_v40  ;;  %v5507_v42 = vmul.f32 %v5941_v53, %v5467_v15  ;;  %v5509_v62 = vmul.f32 %v5941_v53, %v5469_v39  ;;  %v5511_v17 = vmul.f32 %v5941_v53, %v5471_v34  ;;  %v5574_v14 = vld [vmem:[#allocation2 + $0x66] sm:$0xff]  ;;  %v5576_v7 = vld [vmem:[#allocation2 + $0x76] sm:$0xff] }
 0x3dd   : > { %v5513_v56 = vmul.f32 %v5941_v53, %v5473_v55  ;;  %v5515_v0 = vmul.f32 %v5941_v53, %v5475_v44  ;;  %v5517_v31 = vmul.f32 %v5941_v53, %v5477_v36  ;;  %v5519_v41 = vmul.f32 %v5941_v53, %v5479_v50  ;;  %v5578_v34 = vld [vmem:[#allocation2 + $0x86] sm:$0xff]  ;;  %v5580_v55 = vld [vmem:[#allocation2 + $0x96] sm:$0xff] }
 0x3de   : > { %v5521_v25 = vmul.f32 %v5941_v53, %v5481_v60  ;;  %v5523_v3 = vmul.f32 %v5941_v53, %v5483_v12  ;;  %v5525_v27 = vmul.f32 %v5941_v53, %v5485_v13  ;;  %v5527_v54 = vmul.f32 %v5941_v53, %v5487_v45  ;;  %v5584_v36 = vld [vmem:[#allocation2 + $0xb6] sm:$0xff]  ;;  %v5586_v50 = vld [vmem:[#allocation2 + $0xc6] sm:$0xff] }
 0x3df   : > { %v5529_v21 = vadd.f32 %v5493_v58, %v5416_v22  ;;  %v5531_v48 = vadd.f32 %v5495_v43, %v5418_v4  ;;  %v5533_v37 = vadd.f32 %v5497_v52, %v5420_v33  ;;  %v5535_v63 = vadd.f32 %v5499_v59, %v5422_v11  ;;  %v5582_v22 = vld [vmem:[#allocation2 + $0xa6] sm:$0xff]  ;;  %v5592_v60 = vld [vmem:[#allocation2 + $0xf6] sm:$0xff] }
 0x3e0   : > { %v5537_v23 = vadd.f32 %v5501_v24, %v5424_v32  ;;  %v5539_v20 = vadd.f32 %v5503_v30, %v5426_v10  ;;  %v5541_v2 = vadd.f32 %v5505_v49, %v5428_v18  ;;  %v5543_v6 = vadd.f32 %v5507_v42, %v5430_v29  ;;  %v5588_v32 = vld [vmem:[#allocation2 + $0xd6] sm:$0xff]  ;;  %v5590_v29 = vld [vmem:[#allocation2 + $0xe6] sm:$0xff] }
 0x3e1   : > { %v5545_v40 = vadd.f32 %v5509_v62, %v5432_v16  ;;  %v5547_v53 = vadd.f32 %v5511_v17, %v5434_v47  ;;  %v5549_v15 = vadd.f32 %v5513_v56, %v5436_v8  ;;  %v5551_v39 = vadd.f32 %v5515_v0, %v5438_v5  ;;  %v5594_v58 = vld [vmem:[#allocation2 + $0x106] sm:$0xff]  ;;  %v5596_v47 = vld [vmem:[#allocation2 + $0x116] sm:$0xff] }
 0x3e2   : > { %v5553_v4 = vadd.f32 %v5517_v31, %v5440_v57  ;;  %v5555_v33 = vadd.f32 %v5519_v41, %v5442_v51  ;;  %v5557_v11 = vadd.f32 %v5521_v25, %v5444_v26  ;;  %v5559_v44 = vadd.f32 %v5523_v3, %v5446_v35  ;;  %v5598_v8 = vld [vmem:[#allocation2 + $0x126] sm:$0xff]  ;;  %v5600_v5 = vld [vmem:[#allocation2 + $0x136] sm:$0xff] }
 0x3e3   : > { %v5561_v10 = vadd.f32 %v5525_v27, %v5448_v19  ;;  %v5563_v18 = vadd.f32 %v5527_v54, %v5450_v38  ;;  %v5606_v43 = vmul.f32 %v5942_v9, %v5566_v1  ;;  %v5608_v16 = vmul.f32 %v5942_v9, %v5568_v46 }
 0x3e4   : > { %v5610_v12 = vmul.f32 %v5942_v9, %v5570_v28  ;;  %v5612_v13 = vmul.f32 %v5942_v9, %v5572_v61  ;;  %v5614_v45 = vmul.f32 %v5942_v9, %v5574_v14  ;;  %v5616_v57 = vmul.f32 %v5942_v9, %v5576_v7  ;;  %v4713_v61 = vpop.f32.mrb[168].mxu1  ;;  %v5688_v14 = vld [vmem:[%s7646_s25 + $0x50] sm:$0xff]  ;;  %v5690_v7 = vld [vmem:[%s7646_s25 + $0x60] sm:$0xff] }
 0x3e5   : > { %v5618_v51 = vmul.f32 %v5942_v9, %v5578_v34  ;;  %v5620_v26 = vmul.f32 %v5942_v9, %v5580_v55  ;;  %v5622_v35 = vmul.f32 %v5942_v9, %v5582_v22  ;;  %v5624_v52 = vmul.f32 %v5942_v9, %v5584_v36  ;;  %v5692_v55 = vld [vmem:[%s7646_s25 + $0x70] sm:$0xff]  ;;  %v5694_v22 = vld [vmem:[%s7646_s25 + $0x80] sm:$0xff] }
 0x3e6   : > { %v5626_v59 = vmul.f32 %v5942_v9, %v5586_v50  ;;  %v5628_v24 = vmul.f32 %v5942_v9, %v5588_v32  ;;  %v5630_v19 = vmul.f32 %v5942_v9, %v5590_v29  ;;  %v5632_v38 = vmul.f32 %v5942_v9, %v5592_v60  ;;  %v13592_v61 = vld [vmem:[#allocation126_spill] sm:$0xff] }
 0x3e7   : > { %v5634_v30 = vmul.f32 %v5942_v9, %v5594_v58  ;;  %v5636_v49 = vmul.f32 %v5942_v9, %v5596_v47  ;;  %v5638_v42 = vmul.f32 %v5942_v9, %v5598_v8  ;;  %v5640_v62 = vmul.f32 %v5942_v9, %v5600_v5  ;;  %v5708_v47 = vld [vmem:[%s7646_s25 + $0xf0] sm:$0xff]  ;;  %v5710_v8 = vld [vmem:[%s7646_s25 + $0x100] sm:$0xff]  ;;  %v13581_v5 = vld [vmem:[#allocation143_spill] sm:$0xff] }
 0x3e8   : > { %v5642_v17 = vadd.f32 %v5606_v43, %v5529_v21  ;;  %v5644_v56 = vadd.f32 %v5608_v16, %v5531_v48  ;;  %v5646_v0 = vadd.f32 %v5610_v12, %v5533_v37  ;;  %v5648_v31 = vadd.f32 %v5612_v13, %v5535_v63  ;;  %v5684_v63 = vld [vmem:[%s7646_s25 + $0x30] sm:$0xff]  ;;  %v5706_v16 = vld [vmem:[%s7646_s25 + $0xe0] sm:$0xff] }
 0x3e9   : > { %v5650_v41 = vadd.f32 %v5614_v45, %v5537_v23  ;;  %v5652_v25 = vadd.f32 %v5616_v57, %v5539_v20  ;;  %v5654_v3 = vadd.f32 %v5618_v51, %v5541_v2  ;;  %v5656_v27 = vadd.f32 %v5620_v26, %v5543_v6  ;;  %v6821_v23 = vpop.f32.mrb[169].mxu1  ;;  %v5686_v6 = vld [vmem:[%s7646_s25 + $0x40] sm:$0xff]  ;;  %v13582_v13 = vld [vmem:[#allocation98_spill] sm:$0xff] }
 0x3ea   : > { %v5658_v54 = vadd.f32 %v5622_v35, %v5545_v40  ;;  %v5660_v1 = vadd.f32 %v5624_v52, %v5547_v53  ;;  %v5662_v46 = vadd.f32 %v5626_v59, %v5549_v15  ;;  %v5664_v28 = vadd.f32 %v5628_v24, %v5551_v39  ;;  %v13578_v40 = vld [vmem:[#allocation125_spill] sm:$0xff]  ;;  %v13579_v15 = vld [vmem:[#allocation7_spill] sm:$0xff]  ;;  %v4718_v34 = vpop.f32.mrb[170].mxu1  ;;  %v13583_v59 = vld [vmem:[#allocation142_spill] sm:$0xff] }
 0x3eb   : > { %v5666_v9 = vadd.f32 %v5630_v19, %v5553_v4  ;;  %v5668_v21 = vadd.f32 %v5632_v38, %v5555_v33  ;;  %v5670_v48 = vadd.f32 %v5634_v30, %v5557_v11  ;;  %v5672_v37 = vadd.f32 %v5636_v49, %v5559_v44  ;;  %v5696_v4 = vld [vmem:[%s7646_s25 + $0x90] sm:$0xff]  ;;  %v13580_v33 = vld [vmem:[#allocation21_spill] sm:$0xff]  ;;  %v6824_v32 = vpop.f32.mrb[171].mxu1  ;;  %v7076_v19 = vld [vmem:[%s12397_s1 + $0x2] ss:$0 sm:$0xff] }
 0x3ec   : > { %v5674_v20 = vadd.f32 %v5638_v42, %v5561_v10  ;;  %v5676_v2 = vadd.f32 %v5640_v62, %v5563_v18  ;;  %v5714_v53 = vadd.f32 %v5642_v17, %v13578_v40  ;;  %v5716_v39 = vadd.f32 %v5644_v56, %v13579_v15  ;;  %v5702_v10 = vld [vmem:[%s7646_s25 + $0xc0] sm:$0xff]  ;;  %v5704_v18 = vld [vmem:[%s7646_s25 + $0xd0] sm:$0xff]  ;;  %v13584_v38 = vld [vmem:[#allocation123_spill] sm:$0xff] }
 0x3ed   : > { %v5718_v11 = vadd.f32 %v5646_v0, %v13580_v33  ;;  %v5720_v44 = vadd.f32 %v5684_v63, %v5648_v31  ;;  %v5722_v36 = vadd.f32 %v5686_v6, %v5650_v41  ;;  %v5724_v50 = vadd.f32 %v5688_v14, %v5652_v25  ;;  %v13585_v49 = vld [vmem:[#allocation239_spill] sm:$0xff]  ;;  %v13586_v62 = vld [vmem:[#allocation240_spill] sm:$0xff]  ;;  %v13587_v56 = vld [vmem:[#allocation241_spill] sm:$0xff] }
 0x3ee   : > { %v5726_v29 = vadd.f32 %v5690_v7, %v5654_v3  ;;  %v5728_v60 = vadd.f32 %v5692_v55, %v5656_v27  ;;  %v5730_v58 = vadd.f32 %v5694_v22, %v5658_v54  ;;  %v5732_v43 = vadd.f32 %v5696_v4, %v5660_v1  ;;  %5750 = vst [vmem:[%s7646_s25] sm:$0xff] %v5714_v53  ;;  %v13588_v31 = vld [vmem:[#allocation247_spill] sm:$0xff]  ;;  %v13589_v25 = vld [vmem:[#allocation248_spill] sm:$0xff]  ;;  %v13590_v27 = vld [vmem:[#allocation249_spill] sm:$0xff] }
 0x3ef   : > { %5752 = vst [vmem:[%s7646_s25 + $0x10] sm:$0xff] %v5716_v39  ;;  %v5734_v12 = vadd.f32 %v5662_v46, %v13581_v5  ;;  %v5736_v45 = vadd.f32 %v5664_v28, %v13582_v13  ;;  %v5738_v57 = vadd.f32 %v5702_v10, %v5666_v9  ;;  %v5740_v51 = vadd.f32 %v5704_v18, %v5668_v21  ;;  %v7077_v1 = vld [vmem:[%s12397_s1 + $0x6] ss:$0 sm:$0xff]  ;;  %v13591_v46 = vld [vmem:[#allocation93_spill] sm:$0xff]  ;;  %v13595_v23 = vld [vmem:[#allocation206_spill] sm:$0xff] }
 0x3f0   : > { %5754 = vst [vmem:[%s7646_s25 + $0x20] sm:$0xff] %v5718_v11  ;;  %5756 = vst [vmem:[%s7646_s25 + $0x30] sm:$0xff] %v5720_v44  ;;  %v5742_v26 = vadd.f32 %v5706_v16, %v5670_v48  ;;  %v5744_v35 = vadd.f32 %v5708_v47, %v5672_v37  ;;  %v5746_v52 = vadd.f32 %v5710_v8, %v5674_v20  ;;  %v13593_v21 = vld [vmem:[#allocation53_spill] sm:$0xff]  ;;  %v13594_v37 = vld [vmem:[#allocation128_spill] sm:$0xff] }
 0x3f1   : > { %5758 = vst [vmem:[%s7646_s25 + $0x40] sm:$0xff] %v5722_v36  ;;  %5760 = vst [vmem:[%s7646_s25 + $0x50] sm:$0xff] %v5724_v50  ;;  %v5748_v24 = vadd.f32 %v5676_v2, %v13583_v59  ;;  %v3455_v30 = vmul.f32 %v7076_v19, %v13584_v38  ;;  %v3457_v42 = vmul.f32 %v7076_v19, %v13585_v49  ;;  %v13596_v2 = vld [vmem:[#allocation207_spill] sm:$0xff]  ;;  %v13597_v14 = vld [vmem:[#allocation208_spill] sm:$0xff] }
 0x3f2   : > { %5762 = vst [vmem:[%s7646_s25 + $0x60] sm:$0xff] %v5726_v29  ;;  %5764 = vst [vmem:[%s7646_s25 + $0x70] sm:$0xff] %v5728_v60  ;;  %v3459_v17 = vmul.f32 %v7076_v19, %v13586_v62  ;;  %v3461_v0 = vmul.f32 %v7076_v19, %v13587_v56  ;;  %v3463_v41 = vmul.f32 %v7076_v19, %v13588_v31  ;;  %v13598_v40 = vld [vmem:[#allocation127_spill] sm:$0xff]  ;;  %v13599_v53 = vld [vmem:[#allocation136_spill] sm:$0xff] }
 0x3f3   : > { %5766 = vst [vmem:[%s7646_s25 + $0x80] sm:$0xff] %v5730_v58  ;;  %5768 = vst [vmem:[%s7646_s25 + $0x90] sm:$0xff] %v5732_v43  ;;  %v3465_v3 = vmul.f32 %v7076_v19, %v13589_v25  ;;  %v3467_v54 = vmul.f32 %v7076_v19, %v13590_v27  ;;  %v3532_v28 = vmul.f32 %v7077_v1, %v13591_v46  ;;  %v7078_v44 = vld [vmem:[%s12397_s1 + $0xa] ss:$0 sm:$0xff]  ;;  %v13601_v32 = vld [vmem:[#allocation52_spill] sm:$0xff] }
 0x3f4   : > { %5770 = vst [vmem:[%s7646_s25 + $0xa0] sm:$0xff] %v5734_v12  ;;  %5772 = vst [vmem:[%s7646_s25 + $0xb0] sm:$0xff] %v5736_v45  ;;  %v3534_v9 = vmul.f32 %v7077_v1, %v13592_v61  ;;  %v3536_v48 = vmul.f32 %v7077_v1, %v13593_v21  ;;  %v3538_v63 = vmul.f32 %v7077_v1, %v13594_v37  ;;  %v13600_v36 = vld [vmem:[#allocation137_spill] sm:$0xff]  ;;  %v13603_v60 = vld [vmem:[#allocation15_spill] sm:$0xff] }
 0x3f5   : > { %5774 = vst [vmem:[%s7646_s25 + $0xc0] sm:$0xff] %v5738_v57  ;;  %5776 = vst [vmem:[%s7646_s25 + $0xd0] sm:$0xff] %v5740_v51  ;;  %v3540_v20 = vmul.f32 %v7077_v1, %v13595_v23  ;;  %v3542_v6 = vmul.f32 %v7077_v1, %v13596_v2  ;;  %v3544_v7 = vmul.f32 %v7077_v1, %v13597_v14  ;;  %v13602_v18 = vld [vmem:[#allocation129_spill] sm:$0xff]  ;;  %v13604_v43 = vld [vmem:[#allocation14_spill] sm:$0xff] }
 0x3f6   : > { %5778 = vst [vmem:[%s7646_s25 + $0xe0] sm:$0xff] %v5742_v26  ;;  %5780 = vst [vmem:[%s7646_s25 + $0xf0] sm:$0xff] %v5744_v35  ;;  %v3566_v15 = vadd.f32 %v13599_v53, %v13598_v40  ;;  %v3568_v39 = vadd.f32 %v3532_v28, %v3455_v30  ;;  %v3570_v34 = vadd.f32 %v3534_v9, %v3457_v42  ;;  %v13605_v47 = vld [vmem:[#allocation209_spill] sm:$0xff]  ;;  %v13606_v5 = vld [vmem:[#allocation210_spill] sm:$0xff] }
 0x3f7   : > { %5782 = vst [vmem:[%s7646_s25 + $0x100] sm:$0xff] %v5746_v52  ;;  %5784 = vst [vmem:[%s7646_s25 + $0x110] sm:$0xff] %v5748_v24  ;;  %v3572_v55 = vadd.f32 %v3536_v48, %v3459_v17  ;;  %v3574_v22 = vadd.f32 %v3538_v63, %v3461_v0  ;;  %v3576_v4 = vadd.f32 %v3540_v20, %v3463_v41  ;;  %v13607_v13 = vld [vmem:[#allocation211_spill] sm:$0xff]  ;;  %v7079_v38 = vld [vmem:[%s12397_s1 + $0xe] ss:$0 sm:$0xff] }
 0x3f8   : > { %v3578_v33 = vadd.f32 %v3542_v6, %v3465_v3  ;;  %v3580_v11 = vadd.f32 %v3544_v7, %v3467_v54  ;;  %v3643_v50 = vmul.f32 %v7078_v44, %v13600_v36  ;;  %v3645_v10 = vmul.f32 %v7078_v44, %v13601_v32  ;;  %v13608_v31 = vld [vmem:[#allocation90_spill] sm:$0xff]  ;;  %v13609_v41 = vld [vmem:[#allocation27_spill] sm:$0xff]  ;;  %v13611_v37 = vld [vmem:[#allocation117_spill] sm:$0xff] }
 0x3f9   : > { %v3647_v29 = vmul.f32 %v7078_v44, %v13602_v18  ;;  %v3649_v58 = vmul.f32 %v7078_v44, %v13603_v60  ;;  %v3651_v16 = vmul.f32 %v7078_v44, %v13604_v43  ;;  %v3653_v8 = vmul.f32 %v7078_v44, %v13605_v47  ;;  %v13610_v9 = vld [vmem:[#allocation6_spill] sm:$0xff]  ;;  %v13612_v23 = vld [vmem:[#allocation184_spill] sm:$0xff]  ;;  %v13613_v2 = vld [vmem:[#allocation185_spill] sm:$0xff] }
 0x3fa   : > { %v3655_v12 = vmul.f32 %v7078_v44, %v13606_v5  ;;  %v3657_v45 = vmul.f32 %v7078_v44, %v13607_v13  ;;  %v3679_v57 = vadd.f32 %v3643_v50, %v3566_v15  ;;  %v3681_v51 = vadd.f32 %v3645_v10, %v3568_v39  ;;  %v7080_v48 = vld [vmem:[%s12397_s1 + $0x12] ss:$0 sm:$0xff]  ;;  %v13615_v40 = vld [vmem:[#allocation212_spill] sm:$0xff]  ;;  %v13616_v15 = vld [vmem:[#allocation213_spill] sm:$0xff] }
 0x3fb   : > { %v3683_v26 = vadd.f32 %v3647_v29, %v3570_v34  ;;  %v3685_v35 = vadd.f32 %v3649_v58, %v3572_v55  ;;  %v3687_v52 = vadd.f32 %v3651_v16, %v3574_v22  ;;  %v3689_v59 = vadd.f32 %v3653_v8, %v3576_v4  ;;  %v13614_v14 = vld [vmem:[#allocation186_spill] sm:$0xff] }
 0x3fc   : > { %v3691_v24 = vadd.f32 %v3655_v12, %v3578_v33  ;;  %v3693_v19 = vadd.f32 %v3657_v45, %v3580_v11  ;;  %v3722_v30 = vmul.f32 %v7079_v38, %v13601_v32  ;;  %v3724_v49 = vmul.f32 %v7079_v38, %v13602_v18  ;;  %v13617_v34 = vld [vmem:[#allocation214_spill] sm:$0xff] }
 0x3fd   : > { %v3726_v42 = vmul.f32 %v7079_v38, %v13603_v60  ;;  %v3728_v62 = vmul.f32 %v7079_v38, %v13604_v43  ;;  %v3730_v17 = vmul.f32 %v7079_v38, %v13605_v47  ;;  %v3732_v56 = vmul.f32 %v7079_v38, %v13606_v5  ;;  %v13618_v22 = vld [vmem:[#allocation242_spill] sm:$0xff]  ;;  %v13620_v43 = vld [vmem:[#allocation97_spill] sm:$0xff]  ;;  %v13621_v47 = vld [vmem:[#allocation124_spill] sm:$0xff] }
 0x3fe   : > { %v3734_v0 = vmul.f32 %v7079_v38, %v13607_v13  ;;  %v3756_v25 = vadd.f32 %v13609_v41, %v13608_v31  ;;  %v3758_v3 = vadd.f32 %v3722_v30, %v3679_v57  ;;  %v3760_v27 = vadd.f32 %v3724_v49, %v3681_v51  ;;  %v13619_v33 = vld [vmem:[#allocation30_spill] sm:$0xff]  ;;  %v13622_v5 = vld [vmem:[#allocation187_spill] sm:$0xff]  ;;  %v13623_v13 = vld [vmem:[#allocation188_spill] sm:$0xff] }
 0x3ff   : > { %v3762_v54 = vadd.f32 %v3726_v42, %v3683_v26  ;;  %v3764_v1 = vadd.f32 %v3728_v62, %v3685_v35  ;;  %v3766_v46 = vadd.f32 %v3730_v17, %v3687_v52  ;;  %v3768_v28 = vadd.f32 %v3732_v56, %v3689_v59  ;;  %v7081_v58 = vld [vmem:[%s12397_s1 + $0x16] ss:$0 sm:$0xff]  ;;  %v13624_v57 = vld [vmem:[#allocation189_spill] sm:$0xff]  ;;  %v13625_v26 = vld [vmem:[#allocation215_spill] sm:$0xff] }
 0x400   : > { %v3770_v61 = vadd.f32 %v3734_v0, %v3691_v24  ;;  %v3772_v21 = vadd.f32 %v13610_v9, %v3693_v19  ;;  %v3835_v63 = vmul.f32 %v7080_v48, %v13611_v37  ;;  %v3837_v20 = vmul.f32 %v7080_v48, %v13612_v23  ;;  %v13626_v52 = vld [vmem:[#allocation216_spill] sm:$0xff]  ;;  %v13627_v24 = vld [vmem:[#allocation217_spill] sm:$0xff]  ;;  %v13628_v38 = vld [vmem:[#allocation243_spill] sm:$0xff] }
 0x401   : > { %v3839_v6 = vmul.f32 %v7080_v48, %v13613_v2  ;;  %v3841_v7 = vmul.f32 %v7080_v48, %v13614_v14  ;;  %v3843_v53 = vmul.f32 %v7080_v48, %v13615_v40  ;;  %v3845_v39 = vmul.f32 %v7080_v48, %v13616_v15  ;;  %v13630_v15 = vld [vmem:[#allocation84_spill] sm:$0xff] }
 0x402   : > { %v3847_v55 = vmul.f32 %v7080_v48, %v13617_v34  ;;  %v3849_v4 = vmul.f32 %v7080_v48, %v13618_v22  ;;  %v3869_v11 = vadd.f32 %v13619_v33, %v3756_v25  ;;  %v3871_v44 = vadd.f32 %v3835_v63, %v3758_v3  ;;  %v7082_v3 = vld [vmem:[%s12397_s1 + $0x1a] ss:$0 sm:$0xff]  ;;  %v13631_v34 = vld [vmem:[#allocation218_spill] sm:$0xff]  ;;  %v13633_v33 = vld [vmem:[#allocation220_spill] sm:$0xff] }
 0x403   : > { %v3873_v36 = vadd.f32 %v3837_v20, %v3760_v27  ;;  %v3875_v50 = vadd.f32 %v3839_v6, %v3762_v54  ;;  %v3877_v32 = vadd.f32 %v3841_v7, %v3764_v1  ;;  %v3879_v10 = vadd.f32 %v3843_v53, %v3766_v46  ;;  %v13629_v7 = vld [vmem:[#allocation34_spill] sm:$0xff]  ;;  %v7083_v53 = vld [vmem:[%s12397_s1 + $0x1e] ss:$0 sm:$0xff] }
 0x404   : > { %v3881_v18 = vadd.f32 %v3845_v39, %v3768_v28  ;;  %v3883_v29 = vadd.f32 %v3847_v55, %v3770_v61  ;;  %v3885_v60 = vadd.f32 %v3849_v4, %v3772_v21  ;;  %v3946_v16 = vmul.f32 %v7081_v58, %v13620_v43  ;;  %v13632_v22 = vld [vmem:[#allocation219_spill] sm:$0xff] }
 0x405   : > { %v3948_v8 = vmul.f32 %v7081_v58, %v13621_v47  ;;  %v3950_v12 = vmul.f32 %v7081_v58, %v13622_v5  ;;  %v3952_v45 = vmul.f32 %v7081_v58, %v13623_v13  ;;  %v3954_v51 = vmul.f32 %v7081_v58, %v13624_v57 }
 0x406   : > { %v3956_v35 = vmul.f32 %v7081_v58, %v13625_v26  ;;  %v3958_v59 = vmul.f32 %v7081_v58, %v13626_v52  ;;  %v3960_v19 = vmul.f32 %v7081_v58, %v13627_v24  ;;  %v3962_v30 = vmul.f32 %v7081_v58, %v13628_v38  ;;  %v13638_v58 = vld [vmem:[#allocation251_spill] sm:$0xff] }
 0x407   : > { %v3982_v49 = vadd.f32 %v3946_v16, %v3869_v11  ;;  %v3984_v42 = vadd.f32 %v3948_v8, %v3871_v44  ;;  %v3986_v62 = vadd.f32 %v3950_v12, %v3873_v36  ;;  %v3988_v17 = vadd.f32 %v3952_v45, %v3875_v50  ;;  %v13634_v44 = vld [vmem:[#allocation244_spill] sm:$0xff]  ;;  %v13635_v50 = vld [vmem:[#allocation245_spill] sm:$0xff] }
 0x408   : > { %v3990_v56 = vadd.f32 %v3954_v51, %v3877_v32  ;;  %v3992_v0 = vadd.f32 %v3956_v35, %v3879_v10  ;;  %v3994_v31 = vadd.f32 %v3958_v59, %v3881_v18  ;;  %v3996_v41 = vadd.f32 %v3960_v19, %v3883_v29  ;;  %v13636_v10 = vld [vmem:[#allocation246_spill] sm:$0xff]  ;;  %v13639_v16 = vld [vmem:[#allocation252_spill] sm:$0xff]  ;;  %v13641_v19 = vld [vmem:[#allocation89_spill] sm:$0xff] }
 0x409   : > { %v3998_v25 = vadd.f32 %v3962_v30, %v3885_v60  ;;  %v4025_v27 = vmul.f32 %v7082_v3, %v13621_v47  ;;  %v4027_v54 = vmul.f32 %v7082_v3, %v13622_v5  ;;  %v4029_v1 = vmul.f32 %v7082_v3, %v13623_v13  ;;  %v13637_v29 = vld [vmem:[#allocation250_spill] sm:$0xff]  ;;  %v13642_v30 = vld [vmem:[#allocation133_spill] sm:$0xff] }
 0x40a   : > { %v4031_v46 = vmul.f32 %v7082_v3, %v13624_v57  ;;  %v4033_v28 = vmul.f32 %v7082_v3, %v13625_v26  ;;  %v4035_v61 = vmul.f32 %v7082_v3, %v13626_v52  ;;  %v4037_v9 = vmul.f32 %v7082_v3, %v13627_v24  ;;  %v13640_v52 = vld [vmem:[#allocation43_spill] sm:$0xff]  ;;  %v7084_v24 = vld [vmem:[%s12397_s1 + $0x22] ss:$0 sm:$0xff] }
 0x40b   : > { %v4039_v21 = vmul.f32 %v7082_v3, %v13628_v38  ;;  %v4061_v48 = vadd.f32 %v4025_v27, %v3982_v49  ;;  %v4063_v37 = vadd.f32 %v4027_v54, %v3984_v42  ;;  %v4065_v63 = vadd.f32 %v4029_v1, %v3986_v62  ;;  %v13643_v42 = vld [vmem:[#allocation134_spill] sm:$0xff]  ;;  %v13647_v3 = vld [vmem:[#allocation255_spill] sm:$0xff] }
 0x40c   : > { %v4067_v23 = vadd.f32 %v4031_v46, %v3988_v17  ;;  %v4069_v20 = vadd.f32 %v4033_v28, %v3990_v56  ;;  %v4071_v2 = vadd.f32 %v4035_v61, %v3992_v0  ;;  %v4073_v6 = vadd.f32 %v4037_v9, %v3994_v31  ;;  %v13644_v17 = vld [vmem:[#allocation54_spill] sm:$0xff]  ;;  %v13645_v0 = vld [vmem:[#allocation253_spill] sm:$0xff]  ;;  %v13648_v54 = vld [vmem:[#allocation95_spill] sm:$0xff] }
 0x40d   : > { %v4075_v14 = vadd.f32 %v4039_v21, %v3996_v41  ;;  %v4077_v40 = vadd.f32 %v13629_v7, %v3998_v25  ;;  %v4138_v39 = vmul.f32 %v7083_v53, %v13630_v15  ;;  %v4140_v55 = vmul.f32 %v7083_v53, %v13631_v34  ;;  %v13646_v41 = vld [vmem:[#allocation254_spill] sm:$0xff]  ;;  %v13650_v61 = vld [vmem:[#allocation256_spill] sm:$0xff]  ;;  %v4773_v15 = vld [vmem:[#allocation2 + $0x38] sm:$0xff] }
 0x40e   : > { %v4142_v4 = vmul.f32 %v7083_v53, %v13632_v22  ;;  %v4144_v11 = vmul.f32 %v7083_v53, %v13633_v33  ;;  %v4146_v36 = vmul.f32 %v7083_v53, %v13634_v44  ;;  %v4148_v32 = vmul.f32 %v7083_v53, %v13635_v50  ;;  %v13649_v46 = vld [vmem:[#allocation138_spill] sm:$0xff]  ;;  %v13651_v21 = vld [vmem:[#allocation104_spill] sm:$0xff]  ;;  %v4777_v34 = vld [vmem:[#allocation2 + $0x58] sm:$0xff] }
 0x40f   : > { %v4150_v18 = vmul.f32 %v7083_v53, %v13636_v10  ;;  %v4152_v60 = vmul.f32 %v7083_v53, %v13637_v29  ;;  %v4154_v43 = vmul.f32 %v7083_v53, %v13638_v58  ;;  %v4156_v47 = vmul.f32 %v7083_v53, %v13639_v16  ;;  %v4771_v53 = vld [vmem:[#allocation2 + $0x28] sm:$0xff]  ;;  %v4341_v33 = vld [vmem:[%s7646_s25 + $0xb8] sm:$0xff]  ;;  %v13653_v44 = vld [vmem:[#allocation16_spill] sm:$0xff] }
 0x410   : > { %v4174_v8 = vadd.f32 %v4138_v39, %v4061_v48  ;;  %v4176_v5 = vadd.f32 %v4140_v55, %v4063_v37  ;;  %v4178_v12 = vadd.f32 %v4142_v4, %v4065_v63  ;;  %v4180_v13 = vadd.f32 %v4144_v11, %v4067_v23  ;;  %v13652_v48 = vld [vmem:[#allocation102_spill] sm:$0xff]  ;;  %v4775_v39 = vld [vmem:[#allocation2 + $0x48] sm:$0xff] }
 0x411   : > { %v4182_v45 = vadd.f32 %v4146_v36, %v4069_v20  ;;  %v4184_v57 = vadd.f32 %v4148_v32, %v4071_v2  ;;  %v4186_v51 = vadd.f32 %v4150_v18, %v4073_v6  ;;  %v4188_v26 = vadd.f32 %v4152_v60, %v4075_v14  ;;  %v4769_v2 = vld [vmem:[#allocation2 + $0x18] sm:$0xff]  ;;  %v4343_v11 = vld [vmem:[%s7646_s25 + $0xc8] sm:$0xff]  ;;  %v13655_v29 = vld [vmem:[#allocation10_spill] sm:$0xff] }
 0x412   : > { %v4190_v35 = vadd.f32 %v4154_v43, %v4077_v40  ;;  %v4192_v59 = vadd.f32 %v4156_v47, %v13640_v52  ;;  %v4251_v38 = vmul.f32 %v7084_v24, %v13641_v19  ;;  %v4253_v49 = vmul.f32 %v7084_v24, %v13642_v30  ;;  %v4779_v50 = vld [vmem:[#allocation2 + $0x68] sm:$0xff]  ;;  %v4781_v32 = vld [vmem:[#allocation2 + $0x78] sm:$0xff]  ;;  %v13657_v58 = vld [vmem:[#allocation74_spill] sm:$0xff] }
 0x413   : > { %v4255_v62 = vmul.f32 %v7084_v24, %v13643_v42  ;;  %v4257_v56 = vmul.f32 %v7084_v24, %v13644_v17  ;;  %v4259_v31 = vmul.f32 %v7084_v24, %v13645_v0  ;;  %v4261_v25 = vmul.f32 %v7084_v24, %v13646_v41  ;;  %v4783_v10 = vld [vmem:[#allocation2 + $0x88] sm:$0xff]  ;;  %v4785_v18 = vld [vmem:[#allocation2 + $0x98] sm:$0xff]  ;;  %v13659_v16 = vld [vmem:[#allocation50_spill] sm:$0xff] }
 0x414   : > { %v4263_v27 = vmul.f32 %v7084_v24, %v13647_v3  ;;  %v4265_v1 = vmul.f32 %v7084_v24, %v13648_v54  ;;  %v4267_v28 = vmul.f32 %v7084_v24, %v13649_v46  ;;  %v4269_v9 = vmul.f32 %v7084_v24, %v13650_v61  ;;  %v13667_v52 = vld [vmem:[#allocation78_spill] sm:$0xff]  ;;  %v13669_v24 = vld [vmem:[#allocation20_spill] sm:$0xff]  ;;  %v4795_v30 = vld [vmem:[#allocation2 + $0xe8] sm:$0xff] }
 0x415   : > { %v4285_v37 = vadd.f32 %v13652_v48, %v13651_v21  ;;  %v4287_v63 = vadd.f32 %v4251_v38, %v4174_v8  ;;  %v4289_v23 = vadd.f32 %v4253_v49, %v4176_v5  ;;  %v4291_v20 = vadd.f32 %v4255_v62, %v4178_v12  ;;  %v13661_v8 = vld [vmem:[#allocation40_spill] sm:$0xff]  ;;  %v4787_v12 = vld [vmem:[#allocation2 + $0xa8] sm:$0xff]  ;;  %v4793_v38 = vld [vmem:[#allocation2 + $0xd8] sm:$0xff] }
 0x416   : > { %v4293_v6 = vadd.f32 %v4257_v56, %v4180_v13  ;;  %v4295_v14 = vadd.f32 %v4259_v31, %v4182_v45  ;;  %v4297_v7 = vadd.f32 %v4261_v25, %v4184_v57  ;;  %v4299_v40 = vadd.f32 %v4263_v27, %v4186_v51  ;;  %v4789_v13 = vld [vmem:[#allocation2 + $0xb8] sm:$0xff]  ;;  %v4791_v45 = vld [vmem:[#allocation2 + $0xc8] sm:$0xff]  ;;  %v13671_v42 = vld [vmem:[#allocation122_spill] sm:$0xff] }
 0x417   : > { %v4301_v55 = vadd.f32 %v4265_v1, %v4188_v26  ;;  %v4303_v22 = vadd.f32 %v4267_v28, %v4190_v35  ;;  %v4305_v4 = vadd.f32 %v4269_v9, %v4192_v59  ;;  %v12245_v36 = vadd.f32 %v4285_v37, %v13653_v44  ;;  %v13663_v57 = vld [vmem:[#allocation109_spill] sm:$0xff]  ;;  %v13665_v26 = vld [vmem:[#allocation19_spill] sm:$0xff]  ;;  %v7085_v25 = vld [vmem:[%s12397_s1 + $0x3] ss:$0 sm:$0xff] }
 0x418   : > { %v12248_v60 = vadd.f32 %v4287_v63, %v13655_v29  ;;  %v12251_v43 = vadd.f32 %v4289_v23, %v13657_v58  ;;  %v12254_v47 = vadd.f32 %v4291_v20, %v13659_v16  ;;  %v12257_v5 = vadd.f32 %v4293_v6, %v13661_v8  ;;  %v4797_v49 = vld [vmem:[#allocation2 + $0xf8] sm:$0xff]  ;;  %v13674_v56 = vld [vmem:[#allocation141_spill] sm:$0xff]  ;;  %v7086_v29 = vld [vmem:[%s12397_s1 + $0x7] ss:$0 sm:$0xff] }
 0x419   : > { %13654 = vst [vmem:[#allocation67_spill] sm:$0xff] %v12245_v36  ;;  %v12260_v51 = vadd.f32 %v4295_v14, %v13663_v57  ;;  %v12263_v35 = vadd.f32 %v4297_v7, %v13665_v26  ;;  %v12266_v59 = vadd.f32 %v4299_v40, %v13667_v52  ;;  %v12269_v19 = vadd.f32 %v4301_v55, %v13669_v24  ;;  %v4799_v31 = vld [vmem:[#allocation2 + $0x108] sm:$0xff]  ;;  %v4801_v41 = vld [vmem:[#allocation2 + $0x118] sm:$0xff] }
 0x41a   : > { %13656 = vst [vmem:[#allocation57_spill] sm:$0xff] %v12248_v60  ;;  %13658 = vst [vmem:[#allocation85_spill] sm:$0xff] %v12251_v43  ;;  %v12272_v62 = vadd.f32 %v4303_v22, %v13671_v42  ;;  %v12274_v17 = vadd.f32 %v4341_v33, %v4305_v4  ;;  %v12277_v0 = vadd.f32 %v4343_v11, %v13674_v56  ;;  %v4846_v27 = vld [vmem:[#allocation2 + $0x19] sm:$0xff]  ;;  %v4848_v61 = vld [vmem:[#allocation2 + $0x29] sm:$0xff] }
 0x41b   : > { %13660 = vst [vmem:[#allocation47_spill] sm:$0xff] %v12254_v47  ;;  %13662 = vst [vmem:[#allocation55_spill] sm:$0xff] %v12257_v5  ;;  %v4809_v3 = vmul.f32 %v7085_v25, %v4769_v2  ;;  %v4811_v54 = vmul.f32 %v7085_v25, %v4771_v53  ;;  %v4813_v1 = vmul.f32 %v7085_v25, %v4773_v15  ;;  %v4850_v9 = vld [vmem:[#allocation2 + $0x39] sm:$0xff]  ;;  %v4852_v21 = vld [vmem:[#allocation2 + $0x49] sm:$0xff] }
 0x41c   : > { %13664 = vst [vmem:[#allocation96_spill] sm:$0xff] %v12260_v51  ;;  %13666 = vst [vmem:[#allocation190_spill] sm:$0xff] %v12263_v35  ;;  %v4815_v46 = vmul.f32 %v7085_v25, %v4775_v39  ;;  %v4817_v28 = vmul.f32 %v7085_v25, %v4777_v34  ;;  %v4819_v48 = vmul.f32 %v7085_v25, %v4779_v50  ;;  %v4854_v20 = vld [vmem:[#allocation2 + $0x59] sm:$0xff]  ;;  %v4856_v6 = vld [vmem:[#allocation2 + $0x69] sm:$0xff] }
 0x41d   : > { %13668 = vst [vmem:[#allocation191_spill] sm:$0xff] %v12266_v59  ;;  %13670 = vst [vmem:[#allocation192_spill] sm:$0xff] %v12269_v19  ;;  %v4821_v37 = vmul.f32 %v7085_v25, %v4781_v32  ;;  %v4823_v63 = vmul.f32 %v7085_v25, %v4783_v10  ;;  %v4825_v23 = vmul.f32 %v7085_v25, %v4785_v18  ;;  %v4858_v14 = vld [vmem:[#allocation2 + $0x79] sm:$0xff]  ;;  %v4860_v2 = vld [vmem:[#allocation2 + $0x89] sm:$0xff] }
 0x41e   : > { %13672 = vst [vmem:[#allocation193_spill] sm:$0xff] %v12272_v62  ;;  %13673 = vst [vmem:[#allocation103_spill] sm:$0xff] %v12274_v17  ;;  %v4827_v7 = vmul.f32 %v7085_v25, %v4787_v12  ;;  %v4829_v40 = vmul.f32 %v7085_v25, %v4789_v13  ;;  %v4831_v55 = vmul.f32 %v7085_v25, %v4791_v45  ;;  %v4862_v4 = vld [vmem:[#allocation2 + $0x99] sm:$0xff]  ;;  %v4864_v53 = vld [vmem:[#allocation2 + $0xa9] sm:$0xff] }
 0x41f   : > { %13675 = vst [vmem:[#allocation194_spill] sm:$0xff] %v12277_v0  ;;  %v4833_v22 = vmul.f32 %v7085_v25, %v4793_v38  ;;  %v4835_v15 = vmul.f32 %v7085_v25, %v4795_v30  ;;  %v4837_v39 = vmul.f32 %v7085_v25, %v4797_v49  ;;  %v4839_v34 = vmul.f32 %v7085_v25, %v4799_v31  ;;  %v4866_v11 = vld [vmem:[#allocation2 + $0xb9] sm:$0xff]  ;;  %v4868_v44 = vld [vmem:[#allocation2 + $0xc9] sm:$0xff] }
 0x420   : > { %v4841_v33 = vmul.f32 %v7085_v25, %v4801_v41  ;;  %v4870_v50 = vld [vmem:[#allocation2 + $0xd9] sm:$0xff]  ;;  %v4872_v32 = vld [vmem:[#allocation2 + $0xe9] sm:$0xff]  ;;  %v4886_v58 = vmul.f32 %v7086_v29, %v4846_v27  ;;  %v4888_v16 = vmul.f32 %v7086_v29, %v4848_v61  ;;  %v4890_v8 = vmul.f32 %v7086_v29, %v4850_v9 }
 0x421   : > { %v4874_v10 = vld [vmem:[#allocation2 + $0xf9] sm:$0xff]  ;;  %v4876_v18 = vld [vmem:[#allocation2 + $0x109] sm:$0xff]  ;;  %v4892_v12 = vmul.f32 %v7086_v29, %v4852_v21  ;;  %v4894_v45 = vmul.f32 %v7086_v29, %v4854_v20  ;;  %v4896_v57 = vmul.f32 %v7086_v29, %v4856_v6  ;;  %v4898_v26 = vmul.f32 %v7086_v29, %v4858_v14 }
 0x422   : > { %v4878_v13 = vld [vmem:[#allocation2 + $0x119] sm:$0xff]  ;;  %v4900_v52 = vmul.f32 %v7086_v29, %v4860_v2  ;;  %v4902_v24 = vmul.f32 %v7086_v29, %v4862_v4  ;;  %v4904_v38 = vmul.f32 %v7086_v29, %v4864_v53  ;;  %v4906_v30 = vmul.f32 %v7086_v29, %v4866_v11  ;;  %v12287_v9 = vld [vmem:[#allocation2 + $0x2a] sm:$0xff] }
 0x423   : > { %v4908_v49 = vmul.f32 %v7086_v29, %v4868_v44  ;;  %v4910_v42 = vmul.f32 %v7086_v29, %v4870_v50  ;;  %v4912_v56 = vmul.f32 %v7086_v29, %v4872_v32  ;;  %v4914_v31 = vmul.f32 %v7086_v29, %v4874_v10  ;;  %v12285_v61 = vld [vmem:[#allocation2 + $0x1a] sm:$0xff]  ;;  %13677 = vst [vmem:[#allocation196_spill] sm:$0xff] %v12287_v9  ;;  %v12291_v4 = vld [vmem:[#allocation2 + $0x4a] sm:$0xff] }
 0x424   : > { %v4916_v41 = vmul.f32 %v7086_v29, %v4876_v18  ;;  %v4918_v25 = vmul.f32 %v7086_v29, %v4878_v13  ;;  %v4922_v0 = vadd.f32 %v4886_v58, %v4809_v3  ;;  %v4924_v17 = vadd.f32 %v4888_v16, %v4811_v54  ;;  %13676 = vst [vmem:[#allocation195_spill] sm:$0xff] %v12285_v61  ;;  %v12289_v2 = vld [vmem:[#allocation2 + $0x3a] sm:$0xff]  ;;  %v4969_v54 = vld [vmem:[#allocation2 + $0x6a] sm:$0xff] }
 0x425   : > { %v4926_v27 = vadd.f32 %v4890_v8, %v4813_v1  ;;  %v4928_v21 = vadd.f32 %v4892_v12, %v4815_v46  ;;  %v4930_v20 = vadd.f32 %v4894_v45, %v4817_v28  ;;  %v4932_v6 = vadd.f32 %v4896_v57, %v4819_v48  ;;  %13678 = vst [vmem:[#allocation105_spill] sm:$0xff] %v12289_v2  ;;  %v12293_v53 = vld [vmem:[#allocation2 + $0x5a] sm:$0xff]  ;;  %v4973_v32 = vld [vmem:[#allocation2 + $0x8a] sm:$0xff] }
 0x426   : > { %v4934_v14 = vadd.f32 %v4898_v26, %v4821_v37  ;;  %13679 = vst [vmem:[#allocation197_spill] sm:$0xff] %v12291_v4  ;;  %13680 = vst [vmem:[#allocation198_spill] sm:$0xff] %v12293_v53  ;;  %v4936_v11 = vadd.f32 %v4900_v52, %v4823_v63  ;;  %v4938_v44 = vadd.f32 %v4902_v24, %v4825_v23  ;;  %v4971_v1 = vld [vmem:[#allocation2 + $0x7a] sm:$0xff]  ;;  %v4977_v48 = vld [vmem:[#allocation2 + $0xaa] sm:$0xff] }
 0x427   : > { %v4940_v50 = vadd.f32 %v4904_v38, %v4827_v7  ;;  %v4942_v3 = vadd.f32 %v4906_v30, %v4829_v40  ;;  %v4944_v10 = vadd.f32 %v4908_v49, %v4831_v55  ;;  %v4946_v18 = vadd.f32 %v4910_v42, %v4833_v22  ;;  %v4975_v28 = vld [vmem:[#allocation2 + $0x9a] sm:$0xff]  ;;  %v4981_v8 = vld [vmem:[#allocation2 + $0xca] sm:$0xff] }
 0x428   : > { %v4948_v29 = vadd.f32 %v4912_v56, %v4835_v15  ;;  %v4950_v46 = vadd.f32 %v4914_v31, %v4837_v39  ;;  %v4979_v37 = vld [vmem:[#allocation2 + $0xba] sm:$0xff]  ;;  %v4952_v58 = vadd.f32 %v4916_v41, %v4839_v34  ;;  %v4954_v16 = vadd.f32 %v4918_v25, %v4841_v33  ;;  %v4985_v13 = vld [vmem:[#allocation2 + $0xea] sm:$0xff] }
 0x429   : > { %v4983_v12 = vld [vmem:[#allocation2 + $0xda] sm:$0xff]  ;;  %v7087_v63 = vld [vmem:[%s12397_s1 + $0xb] ss:$0 sm:$0xff] }
 0x42a   : > { %v4999_v23 = vmul.f32 %v7087_v63, %v12285_v61  ;;  %v5001_v7 = vmul.f32 %v7087_v63, %v12287_v9  ;;  %v4987_v40 = vld [vmem:[#allocation2 + $0xfa] sm:$0xff]  ;;  %v4989_v55 = vld [vmem:[#allocation2 + $0x10a] sm:$0xff]  ;;  %v5003_v15 = vmul.f32 %v7087_v63, %v12289_v2  ;;  %v5005_v39 = vmul.f32 %v7087_v63, %v12291_v4 }
 0x42b   : > { %v4991_v22 = vld [vmem:[#allocation2 + $0x11a] sm:$0xff]  ;;  %v5007_v34 = vmul.f32 %v7087_v63, %v12293_v53  ;;  %v5009_v33 = vmul.f32 %v7087_v63, %v4969_v54  ;;  %v5011_v45 = vmul.f32 %v7087_v63, %v4971_v1  ;;  %v5013_v57 = vmul.f32 %v7087_v63, %v4973_v32 }
 0x42c   : > { %v5015_v26 = vmul.f32 %v7087_v63, %v4975_v28  ;;  %v5017_v52 = vmul.f32 %v7087_v63, %v4977_v48  ;;  %v5019_v24 = vmul.f32 %v7087_v63, %v4979_v37  ;;  %v5021_v38 = vmul.f32 %v7087_v63, %v4981_v8 }
 0x42d   : > { %v5023_v30 = vmul.f32 %v7087_v63, %v4983_v12  ;;  %v5025_v49 = vmul.f32 %v7087_v63, %v4985_v13  ;;  %v5027_v42 = vmul.f32 %v7087_v63, %v4987_v40  ;;  %v5029_v56 = vmul.f32 %v7087_v63, %v4989_v55 }
 0x42e   : > { %v5031_v31 = vmul.f32 %v7087_v63, %v4991_v22  ;;  %v5035_v41 = vadd.f32 %v4999_v23, %v4922_v0  ;;  %v5037_v25 = vadd.f32 %v5001_v7, %v4924_v17  ;;  %v5039_v62 = vadd.f32 %v5003_v15, %v4926_v27  ;;  %v7088_v0 = vld [vmem:[%s12397_s1 + $0xf] ss:$0 sm:$0xff]  ;;  %v13681_v17 = vld [vmem:[#allocation195_spill] sm:$0xff] }
 0x42f   : > { %v5041_v19 = vadd.f32 %v5005_v39, %v4928_v21  ;;  %v5043_v59 = vadd.f32 %v5007_v34, %v4930_v20  ;;  %v5045_v35 = vadd.f32 %v5009_v33, %v4932_v6  ;;  %v5047_v51 = vadd.f32 %v5011_v45, %v4934_v14  ;;  %v13682_v21 = vld [vmem:[#allocation196_spill] sm:$0xff]  ;;  %v13683_v6 = vld [vmem:[#allocation105_spill] sm:$0xff] }
 0x430   : > { %v5049_v5 = vadd.f32 %v5013_v57, %v4936_v11  ;;  %v5051_v47 = vadd.f32 %v5015_v26, %v4938_v44  ;;  %v5053_v43 = vadd.f32 %v5017_v52, %v4940_v50  ;;  %v5055_v60 = vadd.f32 %v5019_v24, %v4942_v3  ;;  %v13684_v11 = vld [vmem:[#allocation197_spill] sm:$0xff]  ;;  %v13685_v3 = vld [vmem:[#allocation198_spill] sm:$0xff]  ;;  %v13686_v57 = vld [vmem:[#allocation116_spill] sm:$0xff] }
 0x431   : > { %v5057_v36 = vadd.f32 %v5021_v38, %v4944_v10  ;;  %v5059_v53 = vadd.f32 %v5023_v30, %v4946_v18  ;;  %v5061_v4 = vadd.f32 %v5025_v49, %v4948_v29  ;;  %v5063_v2 = vadd.f32 %v5027_v42, %v4950_v46  ;;  %v5070_v50 = vld [vmem:[#allocation2 + $0x12a] sm:$0xff]  ;;  %v5149_v24 = vld [vmem:[#allocation2 + $0x1b] sm:$0xff] }
 0x432   : > { %v5065_v9 = vadd.f32 %v5029_v56, %v4952_v58  ;;  %v5067_v61 = vadd.f32 %v5031_v31, %v4954_v16  ;;  %v5076_v27 = vmul.f32 %v7088_v0, %v13681_v17  ;;  %v5078_v20 = vmul.f32 %v7088_v0, %v13682_v21  ;;  %v5171_v21 = vld [vmem:[#allocation2 + $0xcb] sm:$0xff] }
 0x433   : > { %v5080_v14 = vmul.f32 %v7088_v0, %v13683_v6  ;;  %v5082_v44 = vmul.f32 %v7088_v0, %v13684_v11  ;;  %v5084_v10 = vmul.f32 %v7088_v0, %v13685_v3  ;;  %v5086_v18 = vmul.f32 %v7088_v0, %v4969_v54  ;;  %v5181_v6 = vld [vmem:[#allocation2 + $0x11b] sm:$0xff] }
 0x434   : > { %v5088_v29 = vmul.f32 %v7088_v0, %v4971_v1  ;;  %v5090_v46 = vmul.f32 %v7088_v0, %v4973_v32  ;;  %v5092_v58 = vmul.f32 %v7088_v0, %v4975_v28  ;;  %v5094_v16 = vmul.f32 %v7088_v0, %v4977_v48  ;;  %v5151_v1 = vld [vmem:[#allocation2 + $0x2b] sm:$0xff]  ;;  %v5153_v32 = vld [vmem:[#allocation2 + $0x3b] sm:$0xff] }
 0x435   : > { %v5096_v63 = vmul.f32 %v7088_v0, %v4979_v37  ;;  %v5098_v23 = vmul.f32 %v7088_v0, %v4981_v8  ;;  %v5100_v7 = vmul.f32 %v7088_v0, %v4983_v12  ;;  %v5102_v15 = vmul.f32 %v7088_v0, %v4985_v13  ;;  %v5155_v28 = vld [vmem:[#allocation2 + $0x4b] sm:$0xff]  ;;  %v5157_v13 = vld [vmem:[#allocation2 + $0x5b] sm:$0xff] }
 0x436   : > { %v5104_v39 = vmul.f32 %v7088_v0, %v4987_v40  ;;  %v5106_v34 = vmul.f32 %v7088_v0, %v4989_v55  ;;  %v5108_v33 = vmul.f32 %v7088_v0, %v4991_v22  ;;  %v5110_v45 = vmul.f32 %v7088_v0, %v5070_v50  ;;  %v5159_v40 = vld [vmem:[#allocation2 + $0x6b] sm:$0xff]  ;;  %v5161_v55 = vld [vmem:[#allocation2 + $0x7b] sm:$0xff] }
 0x437   : > { %v5112_v26 = vadd.f32 %v5076_v27, %v13686_v57  ;;  %v5114_v52 = vadd.f32 %v5078_v20, %v5035_v41  ;;  %v5116_v38 = vadd.f32 %v5080_v14, %v5037_v25  ;;  %v5118_v30 = vadd.f32 %v5082_v44, %v5039_v62  ;;  %v5163_v41 = vld [vmem:[#allocation2 + $0x8b] sm:$0xff]  ;;  %v5165_v0 = vld [vmem:[#allocation2 + $0x9b] sm:$0xff] }
 0x438   : > { %v5120_v49 = vadd.f32 %v5084_v10, %v5041_v19  ;;  %v5122_v54 = vadd.f32 %v5086_v18, %v5043_v59  ;;  %v5124_v48 = vadd.f32 %v5088_v29, %v5045_v35  ;;  %v5126_v37 = vadd.f32 %v5090_v46, %v5047_v51  ;;  %v5167_v25 = vld [vmem:[#allocation2 + $0xab] sm:$0xff]  ;;  %v5169_v27 = vld [vmem:[#allocation2 + $0xbb] sm:$0xff] }
 0x439   : > { %v5128_v8 = vadd.f32 %v5092_v58, %v5049_v5  ;;  %v5130_v12 = vadd.f32 %v5094_v16, %v5051_v47  ;;  %v5132_v22 = vadd.f32 %v5096_v63, %v5053_v43  ;;  %v5134_v42 = vadd.f32 %v5098_v23, %v5055_v60  ;;  %v5173_v35 = vld [vmem:[#allocation2 + $0xdb] sm:$0xff]  ;;  %v5175_v51 = vld [vmem:[#allocation2 + $0xeb] sm:$0xff]  ;;  %v7089_v43 = vld [vmem:[%s12397_s1 + $0x13] ss:$0 sm:$0xff] }
 0x43a   : > { %v5136_v56 = vadd.f32 %v5100_v7, %v5057_v36  ;;  %v5138_v31 = vadd.f32 %v5102_v15, %v5059_v53  ;;  %v5140_v62 = vadd.f32 %v5104_v39, %v5061_v4  ;;  %v5142_v19 = vadd.f32 %v5106_v34, %v5063_v2  ;;  %v5177_v5 = vld [vmem:[#allocation2 + $0xfb] sm:$0xff]  ;;  %v5179_v47 = vld [vmem:[#allocation2 + $0x10b] sm:$0xff] }
 0x43b   : > { %v5144_v59 = vadd.f32 %v5108_v33, %v5065_v9  ;;  %v5146_v17 = vadd.f32 %v5110_v45, %v5067_v61  ;;  %v5189_v60 = vmul.f32 %v7089_v43, %v5149_v24  ;;  %v5191_v36 = vmul.f32 %v7089_v43, %v5151_v1  ;;  %v5183_v14 = vld [vmem:[#allocation2 + $0x12b] sm:$0xff]  ;;  %v5262_v7 = vld [vmem:[#allocation2 + $0x1c] sm:$0xff] }
 0x43c   : > { %v5193_v53 = vmul.f32 %v7089_v43, %v5153_v32  ;;  %v5195_v20 = vmul.f32 %v7089_v43, %v5155_v28  ;;  %v5197_v4 = vmul.f32 %v7089_v43, %v5157_v13  ;;  %v5199_v2 = vmul.f32 %v7089_v43, %v5159_v40  ;;  %v12315_v45 = vld [vmem:[#allocation2 + $0x2c] sm:$0xff]  ;;  %v12317_v57 = vld [vmem:[#allocation2 + $0x3c] sm:$0xff] }
 0x43d   : > { %v5201_v9 = vmul.f32 %v7089_v43, %v5161_v55  ;;  %v5203_v61 = vmul.f32 %v7089_v43, %v5163_v41  ;;  %v5205_v11 = vmul.f32 %v7089_v43, %v5165_v0  ;;  %v5207_v44 = vmul.f32 %v7089_v43, %v5167_v25  ;;  %13687 = vst [vmem:[#allocation199_spill] sm:$0xff] %v12315_v45  ;;  %v12319_v24 = vld [vmem:[#allocation2 + $0x4c] sm:$0xff]  ;;  %v12321_v40 = vld [vmem:[#allocation2 + $0x5c] sm:$0xff] }
 0x43e   : > { %v5209_v50 = vmul.f32 %v7089_v43, %v5169_v27  ;;  %v5211_v3 = vmul.f32 %v7089_v43, %v5171_v21  ;;  %v5213_v10 = vmul.f32 %v7089_v43, %v5173_v35  ;;  %v5215_v18 = vmul.f32 %v7089_v43, %v5175_v51  ;;  %13688 = vst [vmem:[#allocation201_spill] sm:$0xff] %v12317_v57  ;;  %v12323_v55 = vld [vmem:[#allocation2 + $0x6c] sm:$0xff]  ;;  %v5278_v41 = vld [vmem:[#allocation2 + $0x9c] sm:$0xff] }
 0x43f   : > { %v5217_v29 = vmul.f32 %v7089_v43, %v5177_v5  ;;  %v5219_v46 = vmul.f32 %v7089_v43, %v5179_v47  ;;  %v5221_v58 = vmul.f32 %v7089_v43, %v5181_v6  ;;  %v5223_v16 = vmul.f32 %v7089_v43, %v5183_v14  ;;  %13689 = vst [vmem:[#allocation202_spill] sm:$0xff] %v12319_v24  ;;  %v5280_v0 = vld [vmem:[#allocation2 + $0xac] sm:$0xff]  ;;  %v5290_v51 = vld [vmem:[#allocation2 + $0xfc] sm:$0xff] }
 0x440   : > { %v5225_v63 = vadd.f32 %v5189_v60, %v5112_v26  ;;  %v5227_v23 = vadd.f32 %v5191_v36, %v5114_v52  ;;  %v5229_v15 = vadd.f32 %v5193_v53, %v5116_v38  ;;  %v5231_v39 = vadd.f32 %v5195_v20, %v5118_v30  ;;  %13690 = vst [vmem:[#allocation203_spill] sm:$0xff] %v12321_v40  ;;  %v12325_v26 = vld [vmem:[#allocation2 + $0x7c] sm:$0xff]  ;;  %v5288_v35 = vld [vmem:[#allocation2 + $0xec] sm:$0xff] }
 0x441   : > { %v5233_v34 = vadd.f32 %v5197_v4, %v5120_v49  ;;  %v5235_v33 = vadd.f32 %v5199_v2, %v5122_v54  ;;  %v5237_v1 = vadd.f32 %v5201_v9, %v5124_v48  ;;  %v5239_v32 = vadd.f32 %v5203_v61, %v5126_v37  ;;  %13691 = vst [vmem:[#allocation68_spill] sm:$0xff] %v12323_v55  ;;  %v5276_v54 = vld [vmem:[#allocation2 + $0x8c] sm:$0xff]  ;;  %v5282_v37 = vld [vmem:[#allocation2 + $0xbc] sm:$0xff] }
 0x442   : > { %v5241_v28 = vadd.f32 %v5205_v11, %v5128_v8  ;;  %v5243_v13 = vadd.f32 %v5207_v44, %v5130_v12  ;;  %13692 = vst [vmem:[#allocation204_spill] sm:$0xff] %v12325_v26  ;;  %v5245_v52 = vadd.f32 %v5209_v50, %v5132_v22  ;;  %v5247_v38 = vadd.f32 %v5211_v3, %v5134_v42  ;;  %v5284_v8 = vld [vmem:[#allocation2 + $0xcc] sm:$0xff]  ;;  %v5286_v12 = vld [vmem:[#allocation2 + $0xdc] sm:$0xff]  ;;  %v7090_v22 = vld [vmem:[%s12397_s1 + $0x17] ss:$0 sm:$0xff] }
 0x443   : > { %v5249_v30 = vadd.f32 %v5213_v10, %v5136_v56  ;;  %v5251_v49 = vadd.f32 %v5215_v18, %v5138_v31  ;;  %v5253_v25 = vadd.f32 %v5217_v29, %v5140_v62  ;;  %v5255_v27 = vadd.f32 %v5219_v46, %v5142_v19  ;;  %v5292_v5 = vld [vmem:[#allocation2 + $0x10c] sm:$0xff]  ;;  %v5294_v19 = vld [vmem:[#allocation2 + $0x11c] sm:$0xff] }
 0x444   : > { %v5257_v21 = vadd.f32 %v5221_v58, %v5144_v59  ;;  %v5259_v48 = vadd.f32 %v5223_v16, %v5146_v17  ;;  %v5302_v42 = vmul.f32 %v7090_v22, %v5262_v7  ;;  %v5304_v56 = vmul.f32 %v7090_v22, %v12315_v45  ;;  %v5296_v59 = vld [vmem:[#allocation2 + $0x12c] sm:$0xff] }
 0x445   : > { %v5306_v31 = vmul.f32 %v7090_v22, %v12317_v57  ;;  %v5308_v62 = vmul.f32 %v7090_v22, %v12319_v24  ;;  %v5310_v17 = vmul.f32 %v7090_v22, %v12321_v40  ;;  %v5312_v47 = vmul.f32 %v7090_v22, %v12323_v55 }
 0x446   : > { %v5314_v43 = vmul.f32 %v7090_v22, %v12325_v26  ;;  %v5316_v60 = vmul.f32 %v7090_v22, %v5276_v54  ;;  %v5318_v36 = vmul.f32 %v7090_v22, %v5278_v41  ;;  %v5320_v53 = vmul.f32 %v7090_v22, %v5280_v0 }
 0x447   : > { %v5322_v20 = vmul.f32 %v7090_v22, %v5282_v37  ;;  %v5324_v6 = vmul.f32 %v7090_v22, %v5284_v8  ;;  %v5326_v14 = vmul.f32 %v7090_v22, %v5286_v12  ;;  %v5328_v4 = vmul.f32 %v7090_v22, %v5288_v35 }
 0x448   : > { %v5330_v2 = vmul.f32 %v7090_v22, %v5290_v51  ;;  %v5332_v9 = vmul.f32 %v7090_v22, %v5292_v5  ;;  %v5334_v61 = vmul.f32 %v7090_v22, %v5294_v19  ;;  %v5336_v11 = vmul.f32 %v7090_v22, %v5296_v59 }
 0x449   : > { %v5338_v44 = vadd.f32 %v5302_v42, %v5225_v63  ;;  %v5340_v50 = vadd.f32 %v5304_v56, %v5227_v23  ;;  %v5342_v3 = vadd.f32 %v5306_v31, %v5229_v15  ;;  %v5344_v10 = vadd.f32 %v5308_v62, %v5231_v39  ;;  %v7091_v63 = vld [vmem:[%s12397_s1 + $0x1b] ss:$0 sm:$0xff]  ;;  %v13694_v39 = vld [vmem:[#allocation201_spill] sm:$0xff] }
 0x44a   : > { %v5346_v18 = vadd.f32 %v5310_v17, %v5233_v34  ;;  %v5348_v29 = vadd.f32 %v5312_v47, %v5235_v33  ;;  %v5350_v46 = vadd.f32 %v5314_v43, %v5237_v1  ;;  %v5352_v58 = vadd.f32 %v5316_v60, %v5239_v32  ;;  %v13693_v23 = vld [vmem:[#allocation199_spill] sm:$0xff]  ;;  %v13695_v33 = vld [vmem:[#allocation202_spill] sm:$0xff] }
 0x44b   : > { %v5354_v16 = vadd.f32 %v5318_v36, %v5241_v28  ;;  %v5356_v7 = vadd.f32 %v5320_v53, %v5243_v13  ;;  %v5358_v26 = vadd.f32 %v5322_v20, %v5245_v52  ;;  %v5360_v55 = vadd.f32 %v5324_v6, %v5247_v38  ;;  %v13696_v32 = vld [vmem:[#allocation203_spill] sm:$0xff]  ;;  %v13697_v52 = vld [vmem:[#allocation68_spill] sm:$0xff]  ;;  %v5454_v6 = vld [vmem:[#allocation2 + $0x2d] sm:$0xff] }
 0x44c   : > { %v5362_v40 = vadd.f32 %v5326_v14, %v5249_v30  ;;  %v5364_v24 = vadd.f32 %v5328_v4, %v5251_v49  ;;  %v5366_v57 = vadd.f32 %v5330_v2, %v5253_v25  ;;  %v5368_v45 = vadd.f32 %v5332_v9, %v5255_v27  ;;  %v5375_v13 = vld [vmem:[#allocation2 + $0x13c] sm:$0xff] }
 0x44d   : > { %v5370_v22 = vadd.f32 %v5334_v61, %v5257_v21  ;;  %v5372_v42 = vadd.f32 %v5336_v11, %v5259_v48  ;;  %v5381_v15 = vmul.f32 %v7091_v63, %v13693_v23  ;;  %v5383_v34 = vmul.f32 %v7091_v63, %v13694_v39  ;;  %v13698_v30 = vld [vmem:[#allocation204_spill] sm:$0xff] }
 0x44e   : > { %v5385_v1 = vmul.f32 %v7091_v63, %v13695_v33  ;;  %v5387_v28 = vmul.f32 %v7091_v63, %v13696_v32  ;;  %v5389_v38 = vmul.f32 %v7091_v63, %v13697_v52  ;;  %v5391_v49 = vmul.f32 %v7091_v63, %v13698_v30  ;;  %v5456_v61 = vld [vmem:[#allocation2 + $0x3d] sm:$0xff]  ;;  %v5486_v33 = vld [vmem:[#allocation2 + $0x12d] sm:$0xff] }
 0x44f   : > { %v5393_v25 = vmul.f32 %v7091_v63, %v5276_v54  ;;  %v5395_v27 = vmul.f32 %v7091_v63, %v5278_v41  ;;  %v5397_v21 = vmul.f32 %v7091_v63, %v5280_v0  ;;  %v5399_v48 = vmul.f32 %v7091_v63, %v5282_v37  ;;  %v5458_v54 = vld [vmem:[#allocation2 + $0x4d] sm:$0xff]  ;;  %v5460_v41 = vld [vmem:[#allocation2 + $0x5d] sm:$0xff] }
 0x450   : > { %v5401_v56 = vmul.f32 %v7091_v63, %v5284_v8  ;;  %v5403_v31 = vmul.f32 %v7091_v63, %v5286_v12  ;;  %v5405_v62 = vmul.f32 %v7091_v63, %v5288_v35  ;;  %v5407_v17 = vmul.f32 %v7091_v63, %v5290_v51  ;;  %v5462_v35 = vld [vmem:[#allocation2 + $0x6d] sm:$0xff]  ;;  %v5464_v51 = vld [vmem:[#allocation2 + $0x7d] sm:$0xff] }
 0x451   : > { %v5409_v47 = vmul.f32 %v7091_v63, %v5292_v5  ;;  %v5411_v43 = vmul.f32 %v7091_v63, %v5294_v19  ;;  %v5413_v60 = vmul.f32 %v7091_v63, %v5296_v59  ;;  %v5415_v36 = vmul.f32 %v7091_v63, %v5375_v13  ;;  %v5466_v5 = vld [vmem:[#allocation2 + $0x8d] sm:$0xff]  ;;  %v5476_v39 = vld [vmem:[#allocation2 + $0xdd] sm:$0xff] }
 0x452   : > { %v5417_v53 = vadd.f32 %v5381_v15, %v5338_v44  ;;  %v5419_v20 = vadd.f32 %v5383_v34, %v5340_v50  ;;  %v5421_v14 = vadd.f32 %v5385_v1, %v5342_v3  ;;  %v5423_v4 = vadd.f32 %v5387_v28, %v5344_v10  ;;  %v5468_v50 = vld [vmem:[#allocation2 + $0x9d] sm:$0xff]  ;;  %v5470_v63 = vld [vmem:[#allocation2 + $0xad] sm:$0xff] }
 0x453   : > { %v5425_v2 = vadd.f32 %v5389_v38, %v5346_v18  ;;  %v5427_v9 = vadd.f32 %v5391_v49, %v5348_v29  ;;  %v5429_v0 = vadd.f32 %v5393_v25, %v5350_v46  ;;  %v5431_v37 = vadd.f32 %v5395_v27, %v5352_v58  ;;  %v5472_v3 = vld [vmem:[#allocation2 + $0xbd] sm:$0xff]  ;;  %v5474_v15 = vld [vmem:[#allocation2 + $0xcd] sm:$0xff] }
 0x454   : > { %v5433_v8 = vadd.f32 %v5397_v21, %v5354_v16  ;;  %v5435_v12 = vadd.f32 %v5399_v48, %v5356_v7  ;;  %v5437_v19 = vadd.f32 %v5401_v56, %v5358_v26  ;;  %v5439_v59 = vadd.f32 %v5403_v31, %v5360_v55  ;;  %v5478_v46 = vld [vmem:[#allocation2 + $0xed] sm:$0xff]  ;;  %v5480_v58 = vld [vmem:[#allocation2 + $0xfd] sm:$0xff] }
 0x455   : > { %v5441_v11 = vadd.f32 %v5405_v62, %v5362_v40  ;;  %v5443_v44 = vadd.f32 %v5407_v17, %v5364_v24  ;;  %v5445_v10 = vadd.f32 %v5409_v47, %v5366_v57  ;;  %v5447_v18 = vadd.f32 %v5411_v43, %v5368_v45  ;;  %v5482_v16 = vld [vmem:[#allocation2 + $0x10d] sm:$0xff]  ;;  %v5484_v7 = vld [vmem:[#allocation2 + $0x11d] sm:$0xff] }
 0x456   : > { %v5449_v29 = vadd.f32 %v5413_v60, %v5370_v22  ;;  %v5451_v23 = vadd.f32 %v5415_v36, %v5372_v42  ;;  %v7092_v26 = vld [vmem:[%s12397_s1 + $0x1f] ss:$0 sm:$0xff]  ;;  %v5567_v31 = vld [vmem:[#allocation2 + $0x2e] sm:$0xff] }
 0x457   : > { %v5494_v55 = vmul.f32 %v7092_v26, %v5454_v6  ;;  %v5496_v40 = vmul.f32 %v7092_v26, %v5456_v61  ;;  %v5498_v24 = vmul.f32 %v7092_v26, %v5458_v54  ;;  %v5500_v34 = vmul.f32 %v7092_v26, %v5460_v41  ;;  %v5488_v1 = vld [vmem:[#allocation2 + $0x13d] sm:$0xff]  ;;  %v5571_v36 = vld [vmem:[#allocation2 + $0x4e] sm:$0xff] }
 0x458   : > { %v5502_v57 = vmul.f32 %v7092_v26, %v5462_v35  ;;  %v5504_v45 = vmul.f32 %v7092_v26, %v5464_v51  ;;  %v5506_v22 = vmul.f32 %v7092_v26, %v5466_v5  ;;  %v5508_v42 = vmul.f32 %v7092_v26, %v5468_v50  ;;  %v5569_v60 = vld [vmem:[#allocation2 + $0x3e] sm:$0xff]  ;;  %v5575_v51 = vld [vmem:[#allocation2 + $0x6e] sm:$0xff] }
 0x459   : > { %v5510_v32 = vmul.f32 %v7092_v26, %v5470_v63  ;;  %v5512_v28 = vmul.f32 %v7092_v26, %v5472_v3  ;;  %v5514_v13 = vmul.f32 %v7092_v26, %v5474_v15  ;;  %v5516_v52 = vmul.f32 %v7092_v26, %v5476_v39  ;;  %v5573_v6 = vld [vmem:[#allocation2 + $0x5e] sm:$0xff]  ;;  %v5579_v50 = vld [vmem:[#allocation2 + $0x8e] sm:$0xff] }
 0x45a   : > { %v5518_v38 = vmul.f32 %v7092_v26, %v5478_v46  ;;  %v5520_v30 = vmul.f32 %v7092_v26, %v5480_v58  ;;  %v5522_v49 = vmul.f32 %v7092_v26, %v5482_v16  ;;  %v5524_v25 = vmul.f32 %v7092_v26, %v5484_v7  ;;  %v5577_v5 = vld [vmem:[#allocation2 + $0x7e] sm:$0xff]  ;;  %v5583_v39 = vld [vmem:[#allocation2 + $0xae] sm:$0xff] }
 0x45b   : > { %v5526_v27 = vmul.f32 %v7092_v26, %v5486_v33  ;;  %v5528_v21 = vmul.f32 %v7092_v26, %v5488_v1  ;;  %v5530_v48 = vadd.f32 %v5494_v55, %v5417_v53  ;;  %v5532_v56 = vadd.f32 %v5496_v40, %v5419_v20  ;;  %v5581_v20 = vld [vmem:[#allocation2 + $0x9e] sm:$0xff]  ;;  %v5587_v58 = vld [vmem:[#allocation2 + $0xce] sm:$0xff] }
 0x45c   : > { %v5534_v62 = vadd.f32 %v5498_v24, %v5421_v14  ;;  %v5536_v17 = vadd.f32 %v5500_v34, %v5423_v4  ;;  %v5538_v47 = vadd.f32 %v5502_v57, %v5425_v2  ;;  %v5540_v43 = vadd.f32 %v5504_v45, %v5427_v9  ;;  %v5585_v14 = vld [vmem:[#allocation2 + $0xbe] sm:$0xff]  ;;  %v5599_v26 = vld [vmem:[#allocation2 + $0x12e] sm:$0xff] }
 0x45d   : > { %v5542_v61 = vadd.f32 %v5506_v22, %v5429_v0  ;;  %v5544_v54 = vadd.f32 %v5508_v42, %v5431_v37  ;;  %v5546_v41 = vadd.f32 %v5510_v32, %v5433_v8  ;;  %v5548_v35 = vadd.f32 %v5512_v28, %v5435_v12  ;;  %v5589_v16 = vld [vmem:[#allocation2 + $0xde] sm:$0xff]  ;;  %v5591_v0 = vld [vmem:[#allocation2 + $0xee] sm:$0xff] }
 0x45e   : > { %v5550_v63 = vadd.f32 %v5514_v13, %v5437_v19  ;;  %v5552_v3 = vadd.f32 %v5516_v52, %v5439_v59  ;;  %v5554_v15 = vadd.f32 %v5518_v38, %v5441_v11  ;;  %v5556_v53 = vadd.f32 %v5520_v30, %v5443_v44  ;;  %v5593_v37 = vld [vmem:[#allocation2 + $0xfe] sm:$0xff]  ;;  %v5595_v8 = vld [vmem:[#allocation2 + $0x10e] sm:$0xff] }
 0x45f   : > { %v5558_v4 = vadd.f32 %v5522_v49, %v5445_v10  ;;  %v5560_v2 = vadd.f32 %v5524_v25, %v5447_v18  ;;  %v5562_v9 = vadd.f32 %v5526_v27, %v5449_v29  ;;  %v5564_v46 = vadd.f32 %v5528_v21, %v5451_v23  ;;  %v5597_v12 = vld [vmem:[#allocation2 + $0x11e] sm:$0xff] }
 0x460   : > { %v7093_v19 = vld [vmem:[%s12397_s1 + $0x23] ss:$0 sm:$0xff] }
 0x461   : > { %v5607_v59 = vmul.f32 %v7093_v19, %v5567_v31  ;;  %v5609_v11 = vmul.f32 %v7093_v19, %v5569_v60  ;;  %v5611_v44 = vmul.f32 %v7093_v19, %v5571_v36  ;;  %v5613_v7 = vmul.f32 %v7093_v19, %v5573_v6  ;;  %v5601_v55 = vld [vmem:[#allocation2 + $0x13e] sm:$0xff] }
 0x462   : > { %v5615_v10 = vmul.f32 %v7093_v19, %v5575_v51  ;;  %v5617_v18 = vmul.f32 %v7093_v19, %v5577_v5  ;;  %v5619_v29 = vmul.f32 %v7093_v19, %v5579_v50  ;;  %v5621_v23 = vmul.f32 %v7093_v19, %v5581_v20  ;;  %v5679_v50 = vld [vmem:[%s7646_s25 + $0x8] sm:$0xff] }
 0x463   : > { %v5623_v40 = vmul.f32 %v7093_v19, %v5583_v39  ;;  %v5625_v24 = vmul.f32 %v7093_v19, %v5585_v14  ;;  %v5627_v34 = vmul.f32 %v7093_v19, %v5587_v58  ;;  %v5629_v33 = vmul.f32 %v7093_v19, %v5589_v16  ;;  %v13704_v39 = vld [vmem:[#allocation96_spill] sm:$0xff]  ;;  %v5709_v58 = vld [vmem:[%s7646_s25 + $0xf8] sm:$0xff] }
 0x464   : > { %v5631_v1 = vmul.f32 %v7093_v19, %v5591_v0  ;;  %v5633_v57 = vmul.f32 %v7093_v19, %v5593_v37  ;;  %v5635_v45 = vmul.f32 %v7093_v19, %v5595_v8  ;;  %v5637_v22 = vmul.f32 %v7093_v19, %v5597_v12  ;;  %v13706_v16 = vld [vmem:[#allocation191_spill] sm:$0xff]  ;;  %v13707_v37 = vld [vmem:[#allocation192_spill] sm:$0xff]  ;;  %v13708_v12 = vld [vmem:[#allocation193_spill] sm:$0xff] }
 0x465   : > { %v5639_v42 = vmul.f32 %v7093_v19, %v5599_v26  ;;  %v5641_v32 = vmul.f32 %v7093_v19, %v5601_v55  ;;  %v5643_v28 = vadd.f32 %v5607_v59, %v5530_v48  ;;  %v5645_v13 = vadd.f32 %v5609_v11, %v5532_v56  ;;  %v13709_v59 = vld [vmem:[#allocation103_spill] sm:$0xff] }
 0x466   : > { %v5647_v52 = vadd.f32 %v5611_v44, %v5534_v62  ;;  %v5649_v38 = vadd.f32 %v5613_v7, %v5536_v17  ;;  %v5651_v30 = vadd.f32 %v5615_v10, %v5538_v47  ;;  %v5653_v49 = vadd.f32 %v5617_v18, %v5540_v43  ;;  %v13699_v47 = vld [vmem:[#allocation67_spill] sm:$0xff]  ;;  %v5711_v44 = vld [vmem:[%s7646_s25 + $0x108] sm:$0xff]  ;;  %v13710_v7 = vld [vmem:[#allocation194_spill] sm:$0xff] }
 0x467   : > { %v5655_v25 = vadd.f32 %v5619_v29, %v5542_v61  ;;  %v5657_v27 = vadd.f32 %v5621_v23, %v5544_v54  ;;  %v5659_v21 = vadd.f32 %v5623_v40, %v5546_v41  ;;  %v5661_v31 = vadd.f32 %v5625_v24, %v5548_v35  ;;  %v13700_v61 = vld [vmem:[#allocation57_spill] sm:$0xff] }
 0x468   : > { %v5663_v60 = vadd.f32 %v5627_v34, %v5550_v63  ;;  %v5665_v36 = vadd.f32 %v5629_v33, %v5552_v3  ;;  %v5667_v6 = vadd.f32 %v5631_v1, %v5554_v15  ;;  %v5669_v51 = vadd.f32 %v5633_v57, %v5556_v53  ;;  %v13701_v41 = vld [vmem:[#allocation85_spill] sm:$0xff]  ;;  %v5713_v63 = vld [vmem:[%s7646_s25 + $0x118] sm:$0xff] }
 0x469   : > { %v5671_v5 = vadd.f32 %v5635_v45, %v5558_v4  ;;  %v5673_v48 = vadd.f32 %v5637_v22, %v5560_v2  ;;  %v5675_v56 = vadd.f32 %v5639_v42, %v5562_v9  ;;  %v5677_v62 = vadd.f32 %v5641_v32, %v5564_v46  ;;  %v13702_v3 = vld [vmem:[#allocation47_spill] sm:$0xff]  ;;  %v13705_v4 = vld [vmem:[#allocation190_spill] sm:$0xff]  ;;  %v5707_v46 = vld [vmem:[%s7646_s25 + $0xe8] sm:$0xff] }
 0x46a   : > { %v5715_v17 = vadd.f32 %v5679_v50, %v5643_v28  ;;  %v5717_v43 = vadd.f32 %v5645_v13, %v13699_v47  ;;  %v5719_v54 = vadd.f32 %v5647_v52, %v13700_v61  ;;  %v5721_v35 = vadd.f32 %v5649_v38, %v13701_v41  ;;  %v13703_v53 = vld [vmem:[#allocation55_spill] sm:$0xff] }
 0x46b   : > { %v5723_v15 = vadd.f32 %v5651_v30, %v13702_v3  ;;  %v5725_v20 = vadd.f32 %v5653_v49, %v13703_v53  ;;  %v5727_v14 = vadd.f32 %v5655_v25, %v13704_v39  ;;  %v5729_v2 = vadd.f32 %v5657_v27, %v13705_v4  ;;  %v5705_v9 = vld [vmem:[%s7646_s25 + $0xd8] sm:$0xff] }
 0x46c   : > { %v5731_v0 = vadd.f32 %v5659_v21, %v13706_v16  ;;  %v5733_v8 = vadd.f32 %v5661_v31, %v13707_v37  ;;  %v5735_v19 = vadd.f32 %v5663_v60, %v13708_v12  ;;  %v5737_v11 = vadd.f32 %v5665_v36, %v13709_v59  ;;  %5751 = vst [vmem:[%s7646_s25 + $0x8] sm:$0xff] %v5715_v17 }
 0x46d   : > { %5753 = vst [vmem:[%s7646_s25 + $0x18] sm:$0xff] %v5717_v43  ;;  %5755 = vst [vmem:[%s7646_s25 + $0x28] sm:$0xff] %v5719_v54  ;;  %v5739_v26 = vadd.f32 %v5667_v6, %v13710_v7  ;;  %v5741_v55 = vadd.f32 %v5705_v9, %v5669_v51  ;;  %v5743_v10 = vadd.f32 %v5707_v46, %v5671_v5 }
 0x46e   : > { %5757 = vst [vmem:[%s7646_s25 + $0x38] sm:$0xff] %v5721_v35  ;;  %v5745_v18 = vadd.f32 %v5709_v58, %v5673_v48  ;;  %5759 = vst [vmem:[%s7646_s25 + $0x48] sm:$0xff] %v5723_v15  ;;  %v5747_v29 = vadd.f32 %v5711_v44, %v5675_v56  ;;  %v5749_v23 = vadd.f32 %v5713_v63, %v5677_v62 }
 0x46f   : > { %5761 = vst [vmem:[%s7646_s25 + $0x58] sm:$0xff] %v5725_v20  ;;  %5763 = vst [vmem:[%s7646_s25 + $0x68] sm:$0xff] %v5727_v14 }
 0x470   : > { %5765 = vst [vmem:[%s7646_s25 + $0x78] sm:$0xff] %v5729_v2  ;;  %5767 = vst [vmem:[%s7646_s25 + $0x88] sm:$0xff] %v5731_v0 }
 0x471   : > { %5769 = vst [vmem:[%s7646_s25 + $0x98] sm:$0xff] %v5733_v8  ;;  %5771 = vst [vmem:[%s7646_s25 + $0xa8] sm:$0xff] %v5735_v19 }
 0x472   : > { %5773 = vst [vmem:[%s7646_s25 + $0xb8] sm:$0xff] %v5737_v11  ;;  %5775 = vst [vmem:[%s7646_s25 + $0xc8] sm:$0xff] %v5739_v26 }
 0x473   : > { %5777 = vst [vmem:[%s7646_s25 + $0xd8] sm:$0xff] %v5741_v55  ;;  %5779 = vst [vmem:[%s7646_s25 + $0xe8] sm:$0xff] %v5743_v10 }
 0x474   : > { %5781 = vst [vmem:[%s7646_s25 + $0xf8] sm:$0xff] %v5745_v18  ;;  %5783 = vst [vmem:[%s7646_s25 + $0x108] sm:$0xff] %v5747_v29 }
 0x475   : > { %5785 = vst [vmem:[%s7646_s25 + $0x118] sm:$0xff] %v5749_v23 }
 0x476 PF: > { %s14_s17 = sadd.s32 1, %s7116_s17   ;;  %s13711_s15 = smov %s7112_s16 }
 0x477   : > { %p11_p5 = scmp.ge.s32.totalorder %s14_s17, 4   ;;  %s13712_s16 = smov %s13714_s18 }
 0x479   :  { %13 = sbr.rel (!%p11_p5) target bundleno = 2 (0x2), region = 72 }

</bundles_post_ra>
